<compile_context>
chip_gen: v6e
topology: v6e:2x2x1
jax: 0.10.0
libtpu: 0.0.40
codegen_flags: <defaults>
</compile_context>

<pallas_src>
import functools
import math

import jax
import jax.numpy as jnp
from jax import lax
from jax.experimental import pallas as pl
from jax.experimental.pallas import tpu as pltpu


# --------------------- channel-major kernel (image path) ----------------------
# Block layouts: x/o (1, D, L); pe (D, L); weights in PyTorch-native (out, in)
# form so every projection is a plain W @ X matmul; biases/affines as (out, 1).

def _tu_kernel_cm(x_ref, pe_ref, w_in_ref, b_in_ref, w_out_ref, b_out_ref,
                  ln_g_ref, ln_b_ref, w1_ref, b1_ref, w2_ref, b2_ref, o_ref,
                  *, num_heads):
    f32, bf16 = jnp.float32, jnp.bfloat16
    D, L = pe_ref.shape
    hd = D // num_heads
    scale = 1.0 / math.sqrt(hd)

    # positional encoding, channel-major (no transpose of x)
    x = x_ref[0] + pe_ref[...]                                        # (D, L) f32

    # fused QKV projection: one (3D, D) @ (D, L) bf16 matmul, f32 accumulation
    qkv = jnp.dot(w_in_ref[...], x.astype(bf16),
                  preferred_element_type=f32) + b_in_ref[...]         # (3D, L)

    # Only Q is transposed to token-major (one (D,L) XLU transpose total).
    q_t = ((qkv[0:D, :] * scale).T).astype(bf16)                      # (L, D)

    head_outs = []
    for h in range(num_heads):            # static unroll (num_heads == 2)
        k_h = qkv[1 * D + h * hd:1 * D + (h + 1) * hd, :].astype(bf16)   # (hd, L)
        v_h = qkv[2 * D + h * hd:2 * D + (h + 1) * hd, :].astype(bf16)   # (hd, L)
        # scores: (L, hd) @ (hd, L) -> (Lq, Lk); K already channel-major, no .T
        s = jnp.dot(q_t[:, h * hd:(h + 1) * hd], k_h,
                    preferred_element_type=f32)
        s = s - jnp.max(s, axis=-1, keepdims=True)
        p = jnp.exp(s)
        p = p * pl.reciprocal(jnp.sum(p, axis=-1, keepdims=True), approx=True)
        # o_h[d, m] = sum_n v_h[d, n] * p[m, n]   -> channel-major head output
        head_outs.append(
            lax.dot_general(v_h, p.astype(bf16), (((1,), (1,)), ((), ())),
                            preferred_element_type=f32))              # (hd, L)
    o_cat = jnp.concatenate(head_outs, axis=0).astype(bf16)           # (D, L) sublane concat
    attn = jnp.dot(w_out_ref[...], o_cat,
                   preferred_element_type=f32) + b_out_ref[...]       # (D, L)

    x1 = x + attn                                                      # residual 1 (f32)

    # LayerNorm over d_model (= sublane axis), eps 1e-5, f32 stats
    mu = jnp.mean(x1, axis=0, keepdims=True)
    xc = x1 - mu
    var = jnp.mean(xc * xc, axis=0, keepdims=True)
    ln = xc * lax.rsqrt(var + 1e-5) * ln_g_ref[...] + ln_b_ref[...]

    # FFN: (4D, D) @ (D, L) -> ReLU -> (D, 4D) @ (4D, L)
    h1 = jnp.maximum(jnp.dot(w1_ref[...], ln.astype(bf16),
                             preferred_element_type=f32) + b1_ref[...], 0.0)
    f = jnp.dot(w2_ref[...], h1.astype(bf16),
                preferred_element_type=f32) + b2_ref[...]

    o_ref[0] = (x1 + f).astype(o_ref.dtype)        # lane-dense (D, L) store, no y.T


# --------------------- token-major kernel (sequence path) ---------------------
# Block layouts: x/o (Bt*L, D); pe pre-tiled to (Bt*L, D); weights transposed to
# (in, out) so projections are X @ W; biases/affines as (1, out).

def _tu_kernel_tm(x_ref, pe_ref, w_in_ref, b_in_ref, w_out_ref, b_out_ref,
                  ln_g_ref, ln_b_ref, w1_ref, b1_ref, w2_ref, b2_ref, o_ref,
                  *, num_heads, seq_len):
    f32, bf16 = jnp.float32, jnp.bfloat16
    M, D = x_ref.shape
    L = seq_len
    Bt = M // L
    hd = D // num_heads
    scale = 1.0 / math.sqrt(hd)

    x = x_ref[...] + pe_ref[...]                                      # (M, D) f32

    # QKV projection for ALL Bt*L tokens at once (fills the MXU M-dimension)
    qkv = jnp.dot(x.astype(bf16), w_in_ref[...],
                  preferred_element_type=f32) + b_in_ref[...]         # (M, 3D)

    batch_outs = []
    for b in range(Bt):                   # static unroll over folded batches
        rows = slice(b * L, (b + 1) * L)
        q_b = qkv[rows, 0 * D:1 * D]
        k_b = qkv[rows, 1 * D:2 * D]
        v_b = qkv[rows, 2 * D:3 * D]
        head_outs = []
        for h in range(num_heads):
            cs = slice(h * hd, (h + 1) * hd)
            q_h = (q_b[:, cs] * scale).astype(bf16)
            k_h = k_b[:, cs].astype(bf16)
            v_h = v_b[:, cs].astype(bf16)
            s = lax.dot_general(q_h, k_h, (((1,), (1,)), ((), ())),
                                preferred_element_type=f32)           # (L, L)
            s = s - jnp.max(s, axis=-1, keepdims=True)
            p = jnp.exp(s)
            p = p * pl.reciprocal(jnp.sum(p, axis=-1, keepdims=True), approx=True)
            head_outs.append(jnp.dot(p.astype(bf16), v_h,
                                     preferred_element_type=f32))     # (L, hd)
        batch_outs.append(jnp.concatenate(head_outs, axis=-1))        # (L, D)
    o_all = jnp.concatenate(batch_outs, axis=0).astype(bf16)          # (M, D)

    attn = jnp.dot(o_all, w_out_ref[...],
                   preferred_element_type=f32) + b_out_ref[...]       # (M, D)
    x1 = x + attn                                                     # residual 1

    mu = jnp.mean(x1, axis=-1, keepdims=True)
    xc = x1 - mu
    var = jnp.mean(xc * xc, axis=-1, keepdims=True)
    ln = xc * lax.rsqrt(var + 1e-5) * ln_g_ref[...] + ln_b_ref[...]

    h1 = jnp.maximum(jnp.dot(ln.astype(bf16), w1_ref[...],
                             preferred_element_type=f32) + b1_ref[...], 0.0)
    f = jnp.dot(h1.astype(bf16), w2_ref[...],
                preferred_element_type=f32) + b2_ref[...]

    o_ref[...] = (x1 + f).astype(o_ref.dtype)                         # lane-dense (M, 128)


# ----------------------------------- wrapper ----------------------------------

def _positional_encoding(L, D):
    # PyTorch: pe[:, 0::2] = sin(pos * div), pe[:, 1::2] = cos(pos * div)
    pos = jnp.arange(L, dtype=jnp.float32)[:, None]
    div = jnp.exp(jnp.arange(0, D, 2, dtype=jnp.float32) * (-math.log(10000.0) / D))
    pe = jnp.zeros((L, D), jnp.float32)
    pe = pe.at[:, 0::2].set(jnp.sin(pos * div))
    pe = pe.at[:, 1::2].set(jnp.cos(pos * div))
    return pe


def _rep_spec(arr):
    """Whole-array block, constant index map (weights resident across the grid)."""
    zeros = (0,) * arr.ndim
    return pl.BlockSpec(arr.shape, lambda i, z=zeros: z)


def _prep_weights_cm(p):
    """Channel-major views: weights as (out, in) bf16, biases/affines as (out, 1) f32."""
    bf = jnp.bfloat16
    return (p["w_in"].astype(bf), p["b_in"].reshape(-1, 1),
            p["w_out"].astype(bf), p["b_out"].reshape(-1, 1),
            p["ln_g"].reshape(-1, 1), p["ln_b"].reshape(-1, 1),
            p["w1"].astype(bf), p["b1"].reshape(-1, 1),
            p["w2"].astype(bf), p["b2"].reshape(-1, 1))


def _prep_weights_tm(p):
    """Token-major views: weights as (in, out) bf16, biases/affines as (1, out) f32."""
    bf = jnp.bfloat16
    return (p["w_in"].T.astype(bf), p["b_in"].reshape(1, -1),
            p["w_out"].T.astype(bf), p["b_out"].reshape(1, -1),
            p["ln_g"].reshape(1, -1), p["ln_b"].reshape(1, -1),
            p["w1"].T.astype(bf), p["b1"].reshape(1, -1),
            p["w2"].T.astype(bf), p["b2"].reshape(1, -1))


def _pick_bt(B, L):
    """Largest divisor of B whose folded block keeps a reasonable row count."""
    best = 1
    for c in range(1, B + 1):
        if B % c == 0 and c * L <= 1024 and (c == B or (c * L) % 8 == 0):
            best = c
    return best


@functools.partial(jax.jit, static_argnames=("num_heads",))
def transformer_unit_forward(x, params, *, num_heads=2):
    """Forward of TransformerUnit. x: (B, C, H, W) with C == d_model, or (B, L, D)."""
    x = x.astype(jnp.float32)
    if x.ndim == 4:
        # ---------------- image path: channel-major end-to-end ----------------
        B, C, H, W = x.shape
        D, L = C, H * W
        assert D % num_heads == 0
        xs = x.reshape(B, D, L)                      # free reshape, stays (D, L)
        pe_cm = _positional_encoding(L, D).T         # (D, L)
        weights = (pe_cm,) + _prep_weights_cm(params)
        kernel = functools.partial(_tu_kernel_cm, num_heads=num_heads)
        out = pl.pallas_call(
            kernel,
            out_shape=jax.ShapeDtypeStruct((B, D, L), jnp.float32),
            grid=(B,),                               # keep B even on v7x (2 TCs)
            in_specs=[pl.BlockSpec((1, D, L), lambda b: (b, 0, 0))]
                     + [_rep_spec(w) for w in weights],
            out_specs=pl.BlockSpec((1, D, L), lambda b: (b, 0, 0)),
            compiler_params=pltpu.CompilerParams(dimension_semantics=("parallel",)),
        )(xs, *weights)
        return out.reshape(B, C, H, W)               # free reshape (channels-first already)
    else:
        # -------------- sequence path: fold Bt batches per grid step ----------
        B, L, D = x.shape
        assert D % num_heads == 0
        Bt = _pick_bt(B, L)
        xs = x.reshape(B * L, D)                     # free reshape
        pe_rep = jnp.tile(_positional_encoding(L, D), (Bt, 1))   # (Bt*L, D)
        weights = (pe_rep,) + _prep_weights_tm(params)
        kernel = functools.partial(_tu_kernel_tm, num_heads=num_heads, seq_len=L)
        out = pl.pallas_call(
            kernel,
            out_shape=jax.ShapeDtypeStruct((B * L, D), jnp.float32),
            grid=(B // Bt,),
            in_specs=[pl.BlockSpec((Bt * L, D), lambda i: (i, 0))]
                     + [_rep_spec(w) for w in weights],
            out_specs=pl.BlockSpec((Bt * L, D), lambda i: (i, 0)),
            compiler_params=pltpu.CompilerParams(dimension_semantics=("parallel",)),
        )(xs, *weights)
        return out.reshape(B, L, D)


# ----------------------------- pure-JAX reference ------------------------------

def _reference(xs, pe, p, num_heads):
    B, L, D = xs.shape
    hd = D // num_heads
    x = xs + pe[None]
    qkv = x @ p["w_in"].T + p["b_in"]
    q, k, v = jnp.split(qkv, 3, axis=-1)

    def heads(t):
        return t.reshape(B, L, num_heads, hd).transpose(0, 2, 1, 3)

    q, k, v = heads(q), heads(k), heads(v)
    s = jnp.einsum("bhqd,bhkd->bhqk", q, k) / math.sqrt(hd)
    a = jax.nn.softmax(s, axis=-1)
    o = jnp.einsum("bhqk,bhkd->bhqd", a, v).transpose(0, 2, 1, 3).reshape(B, L, D)
    attn = o @ p["w_out"].T + p["b_out"]
    x1 = x + attn
    mu = x1.mean(-1, keepdims=True)
    var = ((x1 - mu) ** 2).mean(-1, keepdims=True)
    ln = (x1 - mu) / jnp.sqrt(var + 1e-5) * p["ln_g"] + p["ln_b"]
    h = jnp.maximum(ln @ p["w1"].T + p["b1"], 0.0)
    return x1 + h @ p["w2"].T + p["b2"]


# ----------------------------------- params ------------------------------------
# Stored in PyTorch-native layouts: in_proj_weight (3D, D), out_proj.weight (D, D),
# linear1.weight (4D, D), linear2.weight (D, 4D); 1-D biases.

def _init_params(key, d_model):
    D = d_model
    ks = jax.random.split(key, 8)

    def unif(k, shape, bound):
        return jax.random.uniform(k, shape, jnp.float32, -bound, bound)

    xav = math.sqrt(6.0 / (D + 3 * D))               # xavier_uniform_ on (3D, D)
    return {
        "w_in": unif(ks[0], (3 * D, D), xav),
        "b_in": jnp.zeros((3 * D,), jnp.float32),    # MHA zero-inits in_proj bias
        "w_out": unif(ks[1], (D, D), 1.0 / math.sqrt(D)),
        "b_out": jnp.zeros((D,), jnp.float32),       # MHA zero-inits out_proj bias
        "ln_g": 1.0 + 0.1 * jax.random.normal(ks[2], (D,), jnp.float32),
        "ln_b": 0.1 * jax.random.normal(ks[3], (D,), jnp.float32),
        "w1": unif(ks[4], (4 * D, D), 1.0 / math.sqrt(D)),
        "b1": unif(ks[5], (4 * D,), 1.0 / math.sqrt(D)),
        "w2": unif(ks[6], (D, 4 * D), 1.0 / math.sqrt(4 * D)),
        "b2": unif(ks[7], (D,), 1.0 / math.sqrt(4 * D)),
    }


# ------------------------------------ main --------------------------------------

if __name__ == "__main__":
    key = jax.random.PRNGKey(0)
    k_img, k_seq, k_p = jax.random.split(key, 3)

    d_model, num_heads = 128, 2
    params = _init_params(k_p, d_model)

    # --- image-form input: (B, C, H, W) with C == d_model (is_image branch) ----
    B, H, W = 2, 16, 16                               # even B -> both v7x TCs busy
    x_img = jax.random.normal(k_img, (B, d_model, H, W), jnp.float32)
    out_img = jax.block_until_ready(
        transformer_unit_forward(x_img, params, num_heads=num_heads))
    assert out_img.shape == x_img.shape
    assert bool(jnp.all(jnp.isfinite(out_img)))

    xs = x_img.reshape(B, d_model, H * W).transpose(0, 2, 1)   # (B, L, D) like PyTorch
    ref_img = _reference(xs, _positional_encoding(H * W, d_model), params, num_heads)
    ref_img = ref_img.transpose(0, 2, 1).reshape(B, d_model, H, W)
    assert bool(jnp.allclose(out_img, ref_img, rtol=2e-2, atol=2e-2)), \
        float(jnp.max(jnp.abs(out_img - ref_img)))

    # --- sequence-form input: (B, L, D) -----------------------------------------
    x_seq = jax.random.normal(k_seq, (2, 8, d_model), jnp.float32)
    out_seq = jax.block_until_ready(
        transformer_unit_forward(x_seq, params, num_heads=num_heads))
    assert out_seq.shape == x_seq.shape
    ref_seq = _reference(x_seq, _positional_encoding(8, d_model), params, num_heads)
    assert bool(jnp.allclose(out_seq, ref_seq, rtol=2e-2, atol=2e-2)), \
        float(jnp.max(jnp.abs(out_seq - ref_seq)))

    print("KERNEL_OK")
</pallas_src>

<mosaic_0001>
module attributes {stable_mosaic.version = 11 : i64} {
  func.func @_tu_kernel_cm(%arg0: i32, %arg1: memref<1x128x256xf32, #tpu.memory_space<vmem>>, %arg2: memref<128x256xf32, #tpu.memory_space<vmem>>, %arg3: memref<384x128xbf16, #tpu.memory_space<vmem>>, %arg4: memref<384x1xf32, #tpu.memory_space<vmem>>, %arg5: memref<128x128xbf16, #tpu.memory_space<vmem>>, %arg6: memref<128x1xf32, #tpu.memory_space<vmem>>, %arg7: memref<128x1xf32, #tpu.memory_space<vmem>>, %arg8: memref<128x1xf32, #tpu.memory_space<vmem>>, %arg9: memref<512x128xbf16, #tpu.memory_space<vmem>>, %arg10: memref<512x1xf32, #tpu.memory_space<vmem>>, %arg11: memref<128x512xbf16, #tpu.memory_space<vmem>>, %arg12: memref<128x1xf32, #tpu.memory_space<vmem>>, %arg13: memref<1x128x256xf32, #tpu.memory_space<vmem>>) attributes {dimension_semantics = [#tpu.dimension_semantics<parallel>], iteration_bounds = array<i64: 2>, scalar_prefetch = 0 : i64, scratch_operands = 0 : i64, tpu.core_type = #tpu.core_type<tc>, window_params = [{transform_indices = @transform_0, window_bounds = array<i64: 1, 128, 256>}, {pipeline_mode = #tpu.pipeline_mode<synchronous>, transform_indices = @transform_1, window_bounds = array<i64: 128, 256>}, {pipeline_mode = #tpu.pipeline_mode<synchronous>, transform_indices = @transform_2, window_bounds = array<i64: 384, 128>}, {pipeline_mode = #tpu.pipeline_mode<synchronous>, transform_indices = @transform_3, window_bounds = array<i64: 384, 1>}, {pipeline_mode = #tpu.pipeline_mode<synchronous>, transform_indices = @transform_4, window_bounds = array<i64: 128, 128>}, {pipeline_mode = #tpu.pipeline_mode<synchronous>, transform_indices = @transform_5, window_bounds = array<i64: 128, 1>}, {pipeline_mode = #tpu.pipeline_mode<synchronous>, transform_indices = @transform_6, window_bounds = array<i64: 128, 1>}, {pipeline_mode = #tpu.pipeline_mode<synchronous>, transform_indices = @transform_7, window_bounds = array<i64: 128, 1>}, {pipeline_mode = #tpu.pipeline_mode<synchronous>, transform_indices = @transform_8, window_bounds = array<i64: 512, 128>}, {pipeline_mode = #tpu.pipeline_mode<synchronous>, transform_indices = @transform_9, window_bounds = array<i64: 512, 1>}, {pipeline_mode = #tpu.pipeline_mode<synchronous>, transform_indices = @transform_10, window_bounds = array<i64: 128, 512>}, {pipeline_mode = #tpu.pipeline_mode<synchronous>, transform_indices = @transform_11, window_bounds = array<i64: 128, 1>}, {transform_indices = @transform_12, window_bounds = array<i64: 1, 128, 256>}]} {
    %c0 = arith.constant 0 : index
    %c0_0 = arith.constant 0 : index
    %c0_1 = arith.constant 0 : index
    %0 = vector.load %arg1[%c0, %c0_0, %c0_1] : memref<1x128x256xf32, #tpu.memory_space<vmem>>, vector<1x128x256xf32>
    %1 = vector.shape_cast %0 : vector<1x128x256xf32> to vector<128x256xf32>
    %c0_2 = arith.constant 0 : index
    %c0_3 = arith.constant 0 : index
    %2 = vector.load %arg2[%c0_2, %c0_3] : memref<128x256xf32, #tpu.memory_space<vmem>>, vector<128x256xf32>
    %3 = arith.addf %1, %2 : vector<128x256xf32>
    %c0_4 = arith.constant 0 : index
    %c0_5 = arith.constant 0 : index
    %4 = vector.load %arg3[%c0_4, %c0_5] : memref<384x128xbf16, #tpu.memory_space<vmem>>, vector<384x128xbf16>
    %5 = arith.truncf %3 : vector<128x256xf32> to vector<128x256xbf16>
    %cst = arith.constant dense<0.000000e+00> : vector<384x256xf32>
    %6 = tpu.matmul %4, %5, %cst {dimension_numbers = #tpu.dot_dimension_numbers<[1], [0], [0], [1], [0, 0, 1, 1], [], []>} : vector<384x128xbf16>, vector<128x256xbf16>, vector<384x256xf32> -> vector<384x256xf32>
    %c0_6 = arith.constant 0 : index
    %c0_7 = arith.constant 0 : index
    %7 = vector.load %arg4[%c0_6, %c0_7] : memref<384x1xf32, #tpu.memory_space<vmem>>, vector<384x1xf32>
    %8 = vector.broadcast %7 : vector<384x1xf32> to vector<384x256xf32>
    %9 = arith.addf %6, %8 : vector<384x256xf32>
    %10 = vector.extract_strided_slice %9 {offsets = [0, 0], sizes = [128, 256], strides = [1, 1]} : vector<384x256xf32> to vector<128x256xf32>
    %cst_8 = arith.constant 1.250000e-01 : f32
    %11 = vector.broadcast %cst_8 : f32 to vector<128x256xf32>
    %12 = arith.mulf %10, %11 : vector<128x256xf32>
    %13 = tpu.transpose %12, [1, 0] : vector<128x256xf32> -> vector<256x128xf32>
    %14 = arith.truncf %13 : vector<256x128xf32> to vector<256x128xbf16>
    %15 = vector.extract_strided_slice %9 {offsets = [128, 0], sizes = [64, 256], strides = [1, 1]} : vector<384x256xf32> to vector<64x256xf32>
    %16 = arith.truncf %15 : vector<64x256xf32> to vector<64x256xbf16>
    %17 = vector.extract_strided_slice %9 {offsets = [256, 0], sizes = [64, 256], strides = [1, 1]} : vector<384x256xf32> to vector<64x256xf32>
    %18 = arith.truncf %17 : vector<64x256xf32> to vector<64x256xbf16>
    %19 = vector.extract_strided_slice %14 {offsets = [0, 0], sizes = [256, 64], strides = [1, 1]} : vector<256x128xbf16> to vector<256x64xbf16>
    %cst_9 = arith.constant dense<0.000000e+00> : vector<256x256xf32>
    %20 = tpu.matmul %19, %16, %cst_9 {dimension_numbers = #tpu.dot_dimension_numbers<[1], [0], [0], [1], [0, 0, 1, 1], [], []>} : vector<256x64xbf16>, vector<64x256xbf16>, vector<256x256xf32> -> vector<256x256xf32>
    %cst_10 = arith.constant dense<0xFF800000> : vector<256xf32>
    %21 = vector.multi_reduction <maximumf>, %20, %cst_10 [1] : vector<256x256xf32> to vector<256xf32>
    %22 = vector.shape_cast %21 : vector<256xf32> to vector<256x1xf32>
    %23 = vector.broadcast %22 : vector<256x1xf32> to vector<256x256xf32>
    %24 = arith.subf %20, %23 : vector<256x256xf32>
    %25 = math.exp %24 : vector<256x256xf32>
    %cst_11 = arith.constant dense<0.000000e+00> : vector<256xf32>
    %26 = vector.multi_reduction <add>, %25, %cst_11 [1] : vector<256x256xf32> to vector<256xf32>
    %27 = vector.shape_cast %26 : vector<256xf32> to vector<256x1xf32>
    %28 = tpu.reciprocal %27 {approx = true} : vector<256x1xf32> -> vector<256x1xf32>
    %29 = vector.broadcast %28 : vector<256x1xf32> to vector<256x256xf32>
    %30 = arith.mulf %25, %29 : vector<256x256xf32>
    %31 = arith.truncf %30 : vector<256x256xf32> to vector<256x256xbf16>
    %cst_12 = arith.constant dense<0.000000e+00> : vector<64x256xf32>
    %32 = tpu.matmul %18, %31, %cst_12 {dimension_numbers = #tpu.dot_dimension_numbers<[1], [1], [0], [0], [0, 0, 1, 0], [], []>} : vector<64x256xbf16>, vector<256x256xbf16>, vector<64x256xf32> -> vector<64x256xf32>
    %33 = vector.extract_strided_slice %9 {offsets = [192, 0], sizes = [64, 256], strides = [1, 1]} : vector<384x256xf32> to vector<64x256xf32>
    %34 = arith.truncf %33 : vector<64x256xf32> to vector<64x256xbf16>
    %35 = vector.extract_strided_slice %9 {offsets = [320, 0], sizes = [64, 256], strides = [1, 1]} : vector<384x256xf32> to vector<64x256xf32>
    %36 = arith.truncf %35 : vector<64x256xf32> to vector<64x256xbf16>
    %37 = vector.extract_strided_slice %14 {offsets = [0, 64], sizes = [256, 64], strides = [1, 1]} : vector<256x128xbf16> to vector<256x64xbf16>
    %cst_13 = arith.constant dense<0.000000e+00> : vector<256x256xf32>
    %38 = tpu.matmul %37, %34, %cst_13 {dimension_numbers = #tpu.dot_dimension_numbers<[1], [0], [0], [1], [0, 0, 1, 1], [], []>} : vector<256x64xbf16>, vector<64x256xbf16>, vector<256x256xf32> -> vector<256x256xf32>
    %cst_14 = arith.constant dense<0xFF800000> : vector<256xf32>
    %39 = vector.multi_reduction <maximumf>, %38, %cst_14 [1] : vector<256x256xf32> to vector<256xf32>
    %40 = vector.shape_cast %39 : vector<256xf32> to vector<256x1xf32>
    %41 = vector.broadcast %40 : vector<256x1xf32> to vector<256x256xf32>
    %42 = arith.subf %38, %41 : vector<256x256xf32>
    %43 = math.exp %42 : vector<256x256xf32>
    %cst_15 = arith.constant dense<0.000000e+00> : vector<256xf32>
    %44 = vector.multi_reduction <add>, %43, %cst_15 [1] : vector<256x256xf32> to vector<256xf32>
    %45 = vector.shape_cast %44 : vector<256xf32> to vector<256x1xf32>
    %46 = tpu.reciprocal %45 {approx = true} : vector<256x1xf32> -> vector<256x1xf32>
    %47 = vector.broadcast %46 : vector<256x1xf32> to vector<256x256xf32>
    %48 = arith.mulf %43, %47 : vector<256x256xf32>
    %49 = arith.truncf %48 : vector<256x256xf32> to vector<256x256xbf16>
    %cst_16 = arith.constant dense<0.000000e+00> : vector<64x256xf32>
    %50 = tpu.matmul %36, %49, %cst_16 {dimension_numbers = #tpu.dot_dimension_numbers<[1], [1], [0], [0], [0, 0, 1, 0], [], []>} : vector<64x256xbf16>, vector<256x256xbf16>, vector<64x256xf32> -> vector<64x256xf32>
    %51 = tpu.concatenate %32, %50 in 0 : vector<64x256xf32>, vector<64x256xf32> -> vector<128x256xf32>
    %52 = arith.truncf %51 : vector<128x256xf32> to vector<128x256xbf16>
    %c0_17 = arith.constant 0 : index
    %c0_18 = arith.constant 0 : index
    %53 = vector.load %arg5[%c0_17, %c0_18] : memref<128x128xbf16, #tpu.memory_space<vmem>>, vector<128x128xbf16>
    %cst_19 = arith.constant dense<0.000000e+00> : vector<128x256xf32>
    %54 = tpu.matmul %53, %52, %cst_19 {dimension_numbers = #tpu.dot_dimension_numbers<[1], [0], [0], [1], [0, 0, 1, 1], [], []>} : vector<128x128xbf16>, vector<128x256xbf16>, vector<128x256xf32> -> vector<128x256xf32>
    %c0_20 = arith.constant 0 : index
    %c0_21 = arith.constant 0 : index
    %55 = vector.load %arg6[%c0_20, %c0_21] : memref<128x1xf32, #tpu.memory_space<vmem>>, vector<128x1xf32>
    %56 = vector.broadcast %55 : vector<128x1xf32> to vector<128x256xf32>
    %57 = arith.addf %54, %56 : vector<128x256xf32>
    %58 = arith.addf %3, %57 : vector<128x256xf32>
    %cst_22 = arith.constant dense<0.000000e+00> : vector<256xf32>
    %59 = vector.multi_reduction <add>, %58, %cst_22 [0] : vector<128x256xf32> to vector<256xf32>
    %60 = vector.shape_cast %59 : vector<256xf32> to vector<1x256xf32>
    %cst_23 = arith.constant 1.280000e+02 : f32
    %61 = vector.broadcast %cst_23 : f32 to vector<1x256xf32>
    %62 = arith.divf %60, %61 : vector<1x256xf32>
    %63 = vector.broadcast %62 : vector<1x256xf32> to vector<128x256xf32>
    %64 = arith.subf %58, %63 : vector<128x256xf32>
    %65 = arith.mulf %64, %64 : vector<128x256xf32>
    %cst_24 = arith.constant dense<0.000000e+00> : vector<256xf32>
    %66 = vector.multi_reduction <add>, %65, %cst_24 [0] : vector<128x256xf32> to vector<256xf32>
    %67 = vector.shape_cast %66 : vector<256xf32> to vector<1x256xf32>
    %cst_25 = arith.constant 1.280000e+02 : f32
    %68 = vector.broadcast %cst_25 : f32 to vector<1x256xf32>
    %69 = arith.divf %67, %68 : vector<1x256xf32>
    %cst_26 = arith.constant 9.99999974E-6 : f32
    %70 = vector.broadcast %cst_26 : f32 to vector<1x256xf32>
    %71 = arith.addf %69, %70 : vector<1x256xf32>
    %72 = math.rsqrt %71 : vector<1x256xf32>
    %73 = vector.broadcast %72 : vector<1x256xf32> to vector<128x256xf32>
    %74 = arith.mulf %64, %73 : vector<128x256xf32>
    %c0_27 = arith.constant 0 : index
    %c0_28 = arith.constant 0 : index
    %75 = vector.load %arg7[%c0_27, %c0_28] : memref<128x1xf32, #tpu.memory_space<vmem>>, vector<128x1xf32>
    %76 = vector.broadcast %75 : vector<128x1xf32> to vector<128x256xf32>
    %77 = arith.mulf %74, %76 : vector<128x256xf32>
    %c0_29 = arith.constant 0 : index
    %c0_30 = arith.constant 0 : index
    %78 = vector.load %arg8[%c0_29, %c0_30] : memref<128x1xf32, #tpu.memory_space<vmem>>, vector<128x1xf32>
    %79 = vector.broadcast %78 : vector<128x1xf32> to vector<128x256xf32>
    %80 = arith.addf %77, %79 : vector<128x256xf32>
    %c0_31 = arith.constant 0 : index
    %c0_32 = arith.constant 0 : index
    %81 = vector.load %arg9[%c0_31, %c0_32] : memref<512x128xbf16, #tpu.memory_space<vmem>>, vector<512x128xbf16>
    %82 = arith.truncf %80 : vector<128x256xf32> to vector<128x256xbf16>
    %cst_33 = arith.constant dense<0.000000e+00> : vector<512x256xf32>
    %83 = tpu.matmul %81, %82, %cst_33 {dimension_numbers = #tpu.dot_dimension_numbers<[1], [0], [0], [1], [0, 0, 1, 1], [], []>} : vector<512x128xbf16>, vector<128x256xbf16>, vector<512x256xf32> -> vector<512x256xf32>
    %c0_34 = arith.constant 0 : index
    %c0_35 = arith.constant 0 : index
    %84 = vector.load %arg10[%c0_34, %c0_35] : memref<512x1xf32, #tpu.memory_space<vmem>>, vector<512x1xf32>
    %85 = vector.broadcast %84 : vector<512x1xf32> to vector<512x256xf32>
    %86 = arith.addf %83, %85 : vector<512x256xf32>
    %cst_36 = arith.constant 0.000000e+00 : f32
    %87 = vector.broadcast %cst_36 : f32 to vector<512x256xf32>
    %88 = arith.maximumf %86, %87 : vector<512x256xf32>
    %c0_37 = arith.constant 0 : index
    %c0_38 = arith.constant 0 : index
    %89 = vector.load %arg11[%c0_37, %c0_38] : memref<128x512xbf16, #tpu.memory_space<vmem>>, vector<128x512xbf16>
    %90 = arith.truncf %88 : vector<512x256xf32> to vector<512x256xbf16>
    %cst_39 = arith.constant dense<0.000000e+00> : vector<128x256xf32>
    %91 = tpu.matmul %89, %90, %cst_39 {dimension_numbers = #tpu.dot_dimension_numbers<[1], [0], [0], [1], [0, 0, 1, 1], [], []>} : vector<128x512xbf16>, vector<512x256xbf16>, vector<128x256xf32> -> vector<128x256xf32>
    %c0_40 = arith.constant 0 : index
    %c0_41 = arith.constant 0 : index
    %92 = vector.load %arg12[%c0_40, %c0_41] : memref<128x1xf32, #tpu.memory_space<vmem>>, vector<128x1xf32>
    %93 = vector.broadcast %92 : vector<128x1xf32> to vector<128x256xf32>
    %94 = arith.addf %91, %93 : vector<128x256xf32>
    %95 = arith.addf %58, %94 : vector<128x256xf32>
    %c0_42 = arith.constant 0 : index
    %c0_43 = arith.constant 0 : index
    %c0_44 = arith.constant 0 : index
    %96 = vector.load %arg13[%c0_42, %c0_43, %c0_44] : memref<1x128x256xf32, #tpu.memory_space<vmem>>, vector<1x128x256xf32>
    %97 = vector.shape_cast %96 : vector<1x128x256xf32> to vector<128x256xf32>
    %98 = vector.shape_cast %95 : vector<128x256xf32> to vector<1x128x256xf32>
    tpu.vector_store %arg13[%c0_42, %c0_43, %c0_44], %98 {strides = array<i32>} : memref<1x128x256xf32, #tpu.memory_space<vmem>>, vector<1x128x256xf32>,
    return
  }
  func.func @transform_0(%arg0: i32) -> (i32, i32, i32) {
    %c0_i32 = arith.constant 0 : i32
    %c0_i32_0 = arith.constant 0 : i32
    %c0_i32_1 = arith.constant 0 : i32
    return %arg0, %c0_i32, %c0_i32_0 : i32, i32, i32
  }
  func.func @transform_1(%arg0: i32) -> (i32, i32) {
    %c0_i32 = arith.constant 0 : i32
    %c0_i32_0 = arith.constant 0 : i32
    %c0_i32_1 = arith.constant 0 : i32
    return %c0_i32, %c0_i32_0 : i32, i32
  }
  func.func @transform_2(%arg0: i32) -> (i32, i32) {
    %c0_i32 = arith.constant 0 : i32
    %c0_i32_0 = arith.constant 0 : i32
    %c0_i32_1 = arith.constant 0 : i32
    return %c0_i32, %c0_i32_0 : i32, i32
  }
  func.func @transform_3(%arg0: i32) -> (i32, i32) {
    %c0_i32 = arith.constant 0 : i32
    %c0_i32_0 = arith.constant 0 : i32
    %c0_i32_1 = arith.constant 0 : i32
    return %c0_i32, %c0_i32_0 : i32, i32
  }
  func.func @transform_4(%arg0: i32) -> (i32, i32) {
    %c0_i32 = arith.constant 0 : i32
    %c0_i32_0 = arith.constant 0 : i32
    %c0_i32_1 = arith.constant 0 : i32
    return %c0_i32, %c0_i32_0 : i32, i32
  }
  func.func @transform_5(%arg0: i32) -> (i32, i32) {
    %c0_i32 = arith.constant 0 : i32
    %c0_i32_0 = arith.constant 0 : i32
    %c0_i32_1 = arith.constant 0 : i32
    return %c0_i32, %c0_i32_0 : i32, i32
  }
  func.func @transform_6(%arg0: i32) -> (i32, i32) {
    %c0_i32 = arith.constant 0 : i32
    %c0_i32_0 = arith.constant 0 : i32
    %c0_i32_1 = arith.constant 0 : i32
    return %c0_i32, %c0_i32_0 : i32, i32
  }
  func.func @transform_7(%arg0: i32) -> (i32, i32) {
    %c0_i32 = arith.constant 0 : i32
    %c0_i32_0 = arith.constant 0 : i32
    %c0_i32_1 = arith.constant 0 : i32
    return %c0_i32, %c0_i32_0 : i32, i32
  }
  func.func @transform_8(%arg0: i32) -> (i32, i32) {
    %c0_i32 = arith.constant 0 : i32
    %c0_i32_0 = arith.constant 0 : i32
    %c0_i32_1 = arith.constant 0 : i32
    return %c0_i32, %c0_i32_0 : i32, i32
  }
  func.func @transform_9(%arg0: i32) -> (i32, i32) {
    %c0_i32 = arith.constant 0 : i32
    %c0_i32_0 = arith.constant 0 : i32
    %c0_i32_1 = arith.constant 0 : i32
    return %c0_i32, %c0_i32_0 : i32, i32
  }
  func.func @transform_10(%arg0: i32) -> (i32, i32) {
    %c0_i32 = arith.constant 0 : i32
    %c0_i32_0 = arith.constant 0 : i32
    %c0_i32_1 = arith.constant 0 : i32
    return %c0_i32, %c0_i32_0 : i32, i32
  }
  func.func @transform_11(%arg0: i32) -> (i32, i32) {
    %c0_i32 = arith.constant 0 : i32
    %c0_i32_0 = arith.constant 0 : i32
    %c0_i32_1 = arith.constant 0 : i32
    return %c0_i32, %c0_i32_0 : i32, i32
  }
  func.func @transform_12(%arg0: i32) -> (i32, i32, i32) {
    %c0_i32 = arith.constant 0 : i32
    %c0_i32_0 = arith.constant 0 : i32
    %c0_i32_1 = arith.constant 0 : i32
    return %arg0, %c0_i32, %c0_i32_0 : i32, i32, i32
  }
}

</mosaic_0001>

<bundles_post_ra>
// kernel: transformer_unit_forward.1
= control target key start
LH: loop header
LB: loop body
LE: loop exit
PB: predicated region body
PF: predicated region fallthrough
CT: control target
= control target key end

     0   :  { %s6453_s21 = smov 0   ;;  %s9967_s0 = inlined_call_operand.vmem [shape: f32[2,128,256], index: 0, kind: input, shape index: {}]   ;;  %s9968_s1 = inlined_call_operand.vmem [shape: f32[128,256], index: 1, kind: input, shape index: {}]   ;;  %s9969_s2 = inlined_call_operand.vmem [shape: bf16[384,128], index: 2, kind: input, shape index: {}]   ;;  %s9970_s3 = inlined_call_operand.vmem [shape: f32[384,1], index: 3, kind: input, shape index: {}]   ;;  %s9971_s4 = inlined_call_operand.vmem [shape: bf16[128,128], index: 4, kind: input, shape index: {}]   ;;  %s9972_s5 = inlined_call_operand.vmem [shape: f32[128,1], index: 5, kind: input, shape index: {}]   ;;  %s9973_s6 = inlined_call_operand.vmem [shape: f32[128,1], index: 6, kind: input, shape index: {}]   ;;  %s9974_s7 = inlined_call_operand.vmem [shape: f32[128,1], index: 7, kind: input, shape index: {}]   ;;  %s9975_s8 = inlined_call_operand.vmem [shape: bf16[512,128], index: 8, kind: input, shape index: {}]   ;;  %s9976_s9 = inlined_call_operand.vmem [shape: f32[512,1], index: 9, kind: input, shape index: {}]   ;;  %s9977_s10 = inlined_call_operand.vmem [shape: bf16[128,512], index: 10, kind: input, shape index: {}]   ;;  %s9978_s11 = inlined_call_operand.vmem [shape: f32[128,1], index: 11, kind: input, shape index: {}]   ;;  %s9979_s12 = inlined_call_operand.vmem [shape: f32[2,128,256], index: 12, kind: output, shape index: {}]  }
   0x1 LB: > { %s5725_s22 = sadd.s32 4294967295, %s6384_s21   ;;  %p5729_p0 = scmp.ge.s32.totalorder %s6384_s21, 1  ;;  %s6384_s21 = sphi %s6453_s21, %s22_s21  }
   0x2   : > { %p362_p1 = scmp.lt.s32.totalorder %s6384_s21, 3 }
   0x4   : > { %p363_p2 = pnand %p5729_p0, %p362_p1 }
   0x6   : > { %366 = sbr.rel (%p363_p2) target bundleno = 3337 (0xd09), region = 68 }
   0xb   : > { %p404_p3 = scmp.lt.s32.totalorder %s5725_s22, 1  ;;  %v9980_v0 = vmov 0   ;;  %v476_v1 = vld [vmem:[%s9968_s1 + $0xe8] sm:$0xff]  ;;  %v478_v2 = vld [vmem:[%s9968_s1 + $0xf8] sm:$0xff]  ;;  %v475_v3 = vld [vmem:[%s9968_s1 + $0xe0] sm:$0xff]  ;;  %vm1408_vm0 = vcmask 523264  }
   0xc   : > { %1039 = vmatprep.mubr.bf16.mxu0 %v9980_v0  ;;  %5876 = vset.pattern.permute.xlu0 %v9980_v0  ;;  %v477_v4 = vld [vmem:[%s9968_s1 + $0xf0] sm:$0xff]  ;;  %v472_v5 = vld [vmem:[%s9968_s1 + $0xc8] sm:$0xff]  ;;  %v474_v6 = vld [vmem:[%s9968_s1 + $0xd8] sm:$0xff]  ;;  %s6387_s16 = smov 64  }
   0xd   : > { %s10496_s22 = smov (!%p404_p3, %s5725_s22), 1  ;;  %5877 = vset.pattern.permute.xlu1 %v9980_v0  ;;  %1489 = vmatprep.mubr.bf16.mxu1 %v9980_v0  ;;  %v471_v7 = vld [vmem:[%s9968_s1 + $0xc0] sm:$0xff]  ;;  %v473_v8 = vld [vmem:[%s9968_s1 + $0xd0] sm:$0xff]  ;;  %v468_v9 = vld [vmem:[%s9968_s1 + $0xa8] sm:$0xff] }
   0xe   : > { %s5864_s13 = sshll.u32 %s10496_s22, 8  ;;  %v470_v10 = vld [vmem:[%s9968_s1 + $0xb8] sm:$0xff]  ;;  %v467_v20 = vld [vmem:[%s9968_s1 + $0xa0] sm:$0xff]  ;;  %v469_v21 = vld [vmem:[%s9968_s1 + $0xb0] sm:$0xff] }
   0xf   : > { %s6494_s24 = scalar_lea.vmem %s9967_s0, %s5864_s13  ;;  %v464_v28 = vld [vmem:[%s9968_s1 + $0x88] sm:$0xff]  ;;  %v466_v41 = vld [vmem:[%s9968_s1 + $0x98] sm:$0xff]  ;;  %v463_v45 = vld [vmem:[%s9968_s1 + $0x80] sm:$0xff]  ;;  %s9874_s26 = scalar_lea.vmem %s9979_s12, %s5864_s13 }
  0x10   : > { %v444_v11 = vld [vmem:[%s6494_s24 + $0xe8] sm:$0xff]  ;;  %v446_v12 = vld [vmem:[%s6494_s24 + $0xf8] sm:$0xff]  ;;  %v443_v13 = vld [vmem:[%s6494_s24 + $0xe0] sm:$0xff] }
  0x11   : > { %v6508_v14 = vadd.f32 %v476_v1, %v444_v11  ;;  %v6510_v15 = vadd.f32 %v478_v2, %v446_v12  ;;  %v445_v16 = vld [vmem:[%s6494_s24 + $0xf0] sm:$0xff]  ;;  %v6513_v17 = vadd.f32 %v475_v3, %v443_v13  ;;  %v440_v18 = vld [vmem:[%s6494_s24 + $0xc8] sm:$0xff]  ;;  %v442_v19 = vld [vmem:[%s6494_s24 + $0xd8] sm:$0xff] }
  0x12   : > { %v6523_v22 = vadd.f32 %v477_v4, %v445_v16  ;;  %v6525_v23 = vadd.f32 %v472_v5, %v440_v18  ;;  %v6527_v24 = vadd.f32 %v474_v6, %v442_v19  ;;  %v439_v25 = vld [vmem:[%s6494_s24 + $0xc0] sm:$0xff]  ;;  %v441_v26 = vld [vmem:[%s6494_s24 + $0xd0] sm:$0xff]  ;;  %v436_v27 = vld [vmem:[%s6494_s24 + $0xa8] sm:$0xff] }
  0x13   : > { %10147 = vst [vmem:[#allocation2_spill] sm:$0xff] %v6508_v14  ;;  %10148 = vst [vmem:[#allocation3_spill] sm:$0xff] %v6510_v15  ;;  %v574_v29 = vpack.c.bf16 %v6510_v15, %v6508_v14  ;;  %v6537_v30 = vadd.f32 %v471_v7, %v439_v25  ;;  %v6539_v31 = vadd.f32 %v473_v8, %v441_v26  ;;  %v438_v32 = vld [vmem:[%s6494_s24 + $0xb8] sm:$0xff]  ;;  %v435_v34 = vld [vmem:[%s6494_s24 + $0xa0] sm:$0xff] }
  0x14   : > { %10149 = vst [vmem:[#allocation4_spill] sm:$0xff] %v6513_v17  ;;  %10150 = vst [vmem:[#allocation5_spill] sm:$0xff] %v6523_v22  ;;  %v6542_v33 = vadd.f32 %v468_v9, %v436_v27  ;;  %v437_v35 = vld [vmem:[%s6494_s24 + $0xb0] sm:$0xff]  ;;  %v573_v36 = vpack.c.bf16 %v6523_v22, %v6513_v17  ;;  %v572_v37 = vpack.c.bf16 %v6527_v24, %v6525_v23  ;;  %v432_v39 = vld [vmem:[%s6494_s24 + $0x88] sm:$0xff] }
  0x15   : > { %10151 = vst [vmem:[#allocation6_spill] sm:$0xff] %v6525_v23  ;;  %10152 = vst [vmem:[#allocation7_spill] sm:$0xff] %v6527_v24  ;;  %v6550_v38 = vadd.f32 %v470_v10, %v438_v32  ;;  %v434_v40 = vld [vmem:[%s6494_s24 + $0x98] sm:$0xff]  ;;  %1007 = vmatprep.subr.bf16.mxu0 %v574_v29  ;;  %v571_v42 = vpack.c.bf16 %v6539_v31, %v6537_v30  ;;  %v6559_v43 = vadd.f32 %v467_v20, %v435_v34  ;;  %v465_v46 = vld [vmem:[%s9968_s1 + $0x90] sm:$0xff] }
  0x16   : > { %10153 = vst [vmem:[#allocation8_spill] sm:$0xff] %v6537_v30  ;;  %10154 = vst [vmem:[#allocation9_spill] sm:$0xff] %v6539_v31  ;;  %1008 = vmatpush1.bf16.msra.mxu0 %v573_v36  ;;  %v6561_v44 = vadd.f32 %v469_v21, %v437_v35  ;;  %v6571_v48 = vadd.f32 %v464_v28, %v432_v39  ;;  %v6573_v49 = vadd.f32 %v466_v41, %v434_v40  ;;  %v431_v50 = vld [vmem:[%s6494_s24 + $0x80] sm:$0xff]  ;;  %v433_v51 = vld [vmem:[%s6494_s24 + $0x90] sm:$0xff] }
  0x17   : > { %10155 = vst [vmem:[#allocation10_spill] sm:$0xff] %v6542_v33  ;;  %10156 = vst [vmem:[#allocation11_spill] sm:$0xff] %v6550_v38  ;;  %1009 = vmatprep.subr.bf16.mxu0 %v572_v37  ;;  %v570_v47 = vpack.c.bf16 %v6550_v38, %v6542_v33  ;;  %v460_v52 = vld [vmem:[%s9968_s1 + $0x68] sm:$0xff]  ;;  %v430_v54 = vld [vmem:[%s6494_s24 + $0x78] sm:$0xff]  ;;  %v6587_v57 = vadd.f32 %v463_v45, %v431_v50  ;;  %v6589_v58 = vadd.f32 %v465_v46, %v433_v51 }
  0x18   : > { %10157 = vst [vmem:[#allocation12_spill] sm:$0xff] %v6559_v43  ;;  %10158 = vst [vmem:[#allocation13_spill] sm:$0xff] %v6561_v44  ;;  %v428_v53 = vld [vmem:[%s6494_s24 + $0x68] sm:$0xff]  ;;  %v462_v55 = vld [vmem:[%s9968_s1 + $0x78] sm:$0xff]  ;;  %v569_v56 = vpack.c.bf16 %v6561_v44, %v6559_v43  ;;  %v568_v61 = vpack.c.bf16 %v6573_v49, %v6571_v48 }
  0x19   : > { %10159 = vst [vmem:[#allocation14_spill] sm:$0xff] %v6571_v48  ;;  %10160 = vst [vmem:[#allocation15_spill] sm:$0xff] %v6573_v49  ;;  %v427_v59 = vld [vmem:[%s6494_s24 + $0x60] sm:$0xff]  ;;  %v429_v60 = vld [vmem:[%s6494_s24 + $0x70] sm:$0xff]  ;;  %v6595_v62 = vadd.f32 %v460_v52, %v428_v53  ;;  %v6597_v63 = vadd.f32 %v462_v55, %v430_v54  ;;  %v567_v10 = vpack.c.bf16 %v6589_v58, %v6587_v57 }
  0x1a   : > { %1010 = vmatpush1.bf16.msra.mxu0 %v571_v42  ;;  %10161 = vst [vmem:[#allocation16_spill] sm:$0xff] %v6587_v57  ;;  %10162 = vst [vmem:[#allocation17_spill] sm:$0xff] %v6589_v58  ;;  %v459_v1 = vld [vmem:[%s9968_s1 + $0x60] sm:$0xff]  ;;  %v461_v2 = vld [vmem:[%s9968_s1 + $0x70] sm:$0xff] }
  0x1b   : > { %1011 = vmatprep.subr.bf16.mxu0 %v570_v47  ;;  %10163 = vst [vmem:[#allocation18_spill] sm:$0xff] %v6595_v62  ;;  %10164 = vst [vmem:[#allocation19_spill] sm:$0xff] %v6597_v63  ;;  %v424_v3 = vld [vmem:[%s6494_s24 + $0x48] sm:$0xff]  ;;  %v426_v4 = vld [vmem:[%s6494_s24 + $0x58] sm:$0xff]  ;;  %v6620_v11 = vadd.f32 %v459_v1, %v427_v59  ;;  %v6622_v12 = vadd.f32 %v461_v2, %v429_v60  ;;  %v566_v19 = vpack.c.bf16 %v6597_v63, %v6595_v62 }
  0x1c   : > { %v456_v5 = vld [vmem:[%s9968_s1 + $0x48] sm:$0xff]  ;;  %v458_v6 = vld [vmem:[%s9968_s1 + $0x58] sm:$0xff]  ;;  %v423_v7 = vld [vmem:[%s6494_s24 + $0x40] sm:$0xff] }
  0x1d   : > { %v425_v8 = vld [vmem:[%s6494_s24 + $0x50] sm:$0xff]  ;;  %v455_v9 = vld [vmem:[%s9968_s1 + $0x40] sm:$0xff]  ;;  %10165 = vst [vmem:[#allocation20_spill] sm:$0xff] %v6620_v11  ;;  %10166 = vst [vmem:[#allocation21_spill] sm:$0xff] %v6622_v12  ;;  %v6631_v20 = vadd.f32 %v456_v5, %v424_v3  ;;  %v6633_v21 = vadd.f32 %v458_v6, %v426_v4  ;;  %v565_v34 = vpack.c.bf16 %v6622_v12, %v6620_v11 }
  0x1e   : > { %1012 = vmatpush1.bf16.msra.mxu0 %v569_v56  ;;  %v457_v13 = vld [vmem:[%s9968_s1 + $0x50] sm:$0xff]  ;;  %v420_v16 = vld [vmem:[%s6494_s24 + $0x28] sm:$0xff]  ;;  %v422_v18 = vld [vmem:[%s6494_s24 + $0x38] sm:$0xff]  ;;  %v6651_v35 = vadd.f32 %v455_v9, %v423_v7 }
  0x1f   : > { %1013 = vmatprep.subr.bf16.mxu0 %v568_v61  ;;  %10167 = vst [vmem:[#allocation22_spill] sm:$0xff] %v6631_v20  ;;  %10168 = vst [vmem:[#allocation23_spill] sm:$0xff] %v6633_v21  ;;  %v452_v25 = vld [vmem:[%s9968_s1 + $0x28] sm:$0xff]  ;;  %v454_v26 = vld [vmem:[%s9968_s1 + $0x38] sm:$0xff]  ;;  %v6653_v36 = vadd.f32 %v457_v13, %v425_v8  ;;  %v564_v39 = vpack.c.bf16 %v6633_v21, %v6631_v20 }
  0x20   : > { %v419_v27 = vld [vmem:[%s6494_s24 + $0x20] sm:$0xff]  ;;  %v421_v28 = vld [vmem:[%s6494_s24 + $0x30] sm:$0xff]  ;;  %10169 = vst [vmem:[#allocation24_spill] sm:$0xff] %v6651_v35  ;;  %v416_v37 = vld [vmem:[%s6494_s24 + $0x8] sm:$0xff]  ;;  %v6658_v40 = vadd.f32 %v452_v25, %v420_v16  ;;  %v6660_v41 = vadd.f32 %v454_v26, %v422_v18 }
  0x21   : > { %v451_v29 = vld [vmem:[%s9968_s1 + $0x20] sm:$0xff]  ;;  %v453_v32 = vld [vmem:[%s9968_s1 + $0x30] sm:$0xff]  ;;  %10170 = vst [vmem:[#allocation25_spill] sm:$0xff] %v6653_v36  ;;  %v418_v42 = vld [vmem:[%s6494_s24 + $0x18] sm:$0xff]  ;;  %v563_v53 = vpack.c.bf16 %v6653_v36, %v6651_v35 }
  0x22   : > { %1014 = vmatpush1.bf16.msra.mxu0 %v567_v10  ;;  %10171 = vst [vmem:[#allocation26_spill] sm:$0xff] %v6658_v40  ;;  %10172 = vst [vmem:[#allocation27_spill] sm:$0xff] %v6660_v41  ;;  %v448_v45 = vld [vmem:[%s9968_s1 + $0x8] sm:$0xff]  ;;  %v575_v46 = vld [vmem:[%s9970_s3] sm:$0xff]  ;;  %v6681_v54 = vadd.f32 %v451_v29, %v419_v27  ;;  %v6683_v55 = vadd.f32 %v453_v32, %v421_v28  ;;  %v562_v59 = vpack.c.bf16 %v6660_v41, %v6658_v40 }
  0x23   : > { %1015 = vmatprep.subr.bf16.mxu0 %v566_v19  ;;  %v450_v47 = vld [vmem:[%s9968_s1 + $0x18] sm:$0xff]  ;;  %625 = vperm.xlu0 %5876, %v575_v46   ;;  %v415_v50 = vld [vmem:[%s6494_s24] sm:$0xff]  ;;  %v576_v51 = vld [vmem:[%s9970_s3 + $0x8] sm:$0xff]  ;;  %v6688_v60 = vadd.f32 %v448_v45, %v416_v37 }
  0x24   : > { %v577_v52 = vld [vmem:[%s9970_s3 + $0x10] sm:$0xff]  ;;  %10173 = vst [vmem:[#allocation28_spill] sm:$0xff] %v6681_v54  ;;  %10174 = vst [vmem:[#allocation29_spill] sm:$0xff] %v6683_v55  ;;  %v6690_v61 = vadd.f32 %v450_v47, %v418_v42  ;;  %v447_v1 = vld [vmem:[%s9968_s1] sm:$0xff]  ;;  %v561_v5 = vpack.c.bf16 %v6683_v55, %v6681_v54 }
  0x25   : > { %v417_v56 = vld [vmem:[%s6494_s24 + $0x10] sm:$0xff]  ;;  %635 = vperm.xlu1 %5877, %v577_v52   ;;  %10175 = vst [vmem:[#allocation30_spill] sm:$0xff] %v6688_v60  ;;  %v578_v3 = vld [vmem:[%s9970_s3 + $0x18] sm:$0xff]  ;;  %v579_v4 = vld [vmem:[%s9970_s3 + $0x20] sm:$0xff]  ;;  %v6706_v6 = vadd.f32 %v447_v1, %v415_v50 }
  0x26   : > { %1016 = vmatpush1.bf16.msra.mxu0 %v565_v34  ;;  %10176 = vst [vmem:[#allocation31_spill] sm:$0xff] %v6690_v61  ;;  %v449_v2 = vld [vmem:[%s9968_s1 + $0x10] sm:$0xff]  ;;  %v560_v8 = vpack.c.bf16 %v6690_v61, %v6688_v60  ;;  %v580_v9 = vld [vmem:[%s9970_s3 + $0x28] sm:$0xff]  ;;  %v582_v16 = vld [vmem:[%s9970_s3 + $0x38] sm:$0xff] }
  0x27   : > { %1017 = vmatprep.subr.bf16.mxu0 %v564_v39  ;;  %630 = vperm.xlu0 %5876, %v576_v51   ;;  %10177 = vst [vmem:[#allocation32_spill] sm:$0xff] %v6706_v6  ;;  %v6708_v7 = vadd.f32 %v449_v2, %v417_v56  ;;  %v581_v10 = vld [vmem:[%s9970_s3 + $0x30] sm:$0xff]  ;;  %v5878_v18 = vld [vmem:[%s9969_s2] sm:$0xff]   ;;  %v584_v26 = vld [vmem:[%s9970_s3 + $0x48] sm:$0xff] }
  0x28   : > { %v583_v19 = vld [vmem:[%s9970_s3 + $0x40] sm:$0xff]  ;;  %v585_v25 = vld [vmem:[%s9970_s3 + $0x50] sm:$0xff]  ;;  %v586_v27 = vld [vmem:[%s9970_s3 + $0x58] sm:$0xff] }
  0x29   : > { %10178 = vst [vmem:[#allocation33_spill] sm:$0xff] %v6708_v7  ;;  %640 = vperm.xlu1 %5877, %v578_v3   ;;  %v559_v13 = vpack.c.bf16 %v6708_v7, %v6706_v6  ;;  %v5879_v28 = vld [vmem:[%s9969_s2 + $0x8] sm:$0xff]   ;;  %v587_v29 = vld [vmem:[%s9970_s3 + $0x60] sm:$0xff]  ;;  %v589_v34 = vld [vmem:[%s9970_s3 + $0x70] sm:$0xff] }
  0x2a   : > { %1018 = vmatpush1.bf16.msra.mxu0 %v563_v53  ;;  %v588_v32 = vld [vmem:[%s9970_s3 + $0x68] sm:$0xff]  ;;  %v590_v37 = vld [vmem:[%s9970_s3 + $0x78] sm:$0xff]  ;;  %v5880_v39 = vld [vmem:[%s9969_s2 + $0x10] sm:$0xff]  }
  0x2b   : > { %1019 = vmatprep.subr.bf16.mxu0 %v562_v59  ;;  %645 = vperm.xlu0 %5876, %v579_v4   ;;  %v597_v42 = vld [vmem:[%s9970_s3 + $0xb0] sm:$0xff]  ;;  %v598_v45 = vld [vmem:[%s9970_s3 + $0xb8] sm:$0xff]  ;;  %v595_v46 = vld [vmem:[%s9970_s3 + $0xa0] sm:$0xff] }
  0x2c   : > { %v596_v47 = vld [vmem:[%s9970_s3 + $0xa8] sm:$0xff]  ;;  %v5881_v50 = vld [vmem:[%s9969_s2 + $0x18] sm:$0xff]   ;;  %v593_v51 = vld [vmem:[%s9970_s3 + $0x90] sm:$0xff] }
  0x2d   : > { %650 = vperm.xlu1 %5877, %v580_v9   ;;  %v594_v52 = vld [vmem:[%s9970_s3 + $0x98] sm:$0xff]  ;;  %v591_v53 = vld [vmem:[%s9970_s3 + $0x80] sm:$0xff]  ;;  %v592_v56 = vld [vmem:[%s9970_s3 + $0x88] sm:$0xff] }
  0x2e   : > { %1020 = vmatpush1.bf16.msra.mxu0 %v561_v5  ;;  %v5882_v59 = vld [vmem:[%s9969_s2 + $0x20] sm:$0xff]   ;;  %v5883_v1 = vld [vmem:[%s9969_s2 + $0x28] sm:$0xff]   ;;  %v5884_v2 = vld [vmem:[%s9969_s2 + $0x30] sm:$0xff]  }
  0x2f   : > { %1021 = vmatprep.subr.bf16.mxu0 %v560_v8  ;;  %655 = vperm.xlu0 %5876, %v581_v10   ;;  %v5885_v3 = vld [vmem:[%s9969_s2 + $0x38] sm:$0xff]   ;;  %v5886_v4 = vld [vmem:[%s9969_s2 + $0x40] sm:$0xff]   ;;  %v5887_v5 = vld [vmem:[%s9969_s2 + $0x48] sm:$0xff]  }
  0x30   : > { %v5888_v8 = vld [vmem:[%s9969_s2 + $0x50] sm:$0xff]   ;;  %v5889_v9 = vld [vmem:[%s9969_s2 + $0x58] sm:$0xff]  }
  0x31   : > { %660 = vperm.xlu1 %5877, %v582_v16  }
  0x32   : > { %1022 = vmatpush1.bf16.msra.mxu0 %v559_v13 }
  0x33   : > { %665 = vperm.xlu0 %5876, %v583_v19  }
  0x35   : > { %1040 = vmatmul.mubr.bf16.vlgmr.msra.gmra.mxu0 %v5878_v18  ;;  %670 = vperm.xlu1 %5877, %v584_v26  }
  0x36   : > { %1049 = vmatprep.mubr.bf16.mxu0 %v9980_v0 }
  0x37   : > { %675 = vperm.xlu0 %5876, %v585_v25  }
  0x39   : > { %680 = vperm.xlu1 %5877, %v586_v27  }
  0x3b   : > { %685 = vperm.xlu0 %5876, %v587_v29  }
  0x3d   : > { %1050 = vmatmul.mubr.bf16.gmra.mxu0 %v5879_v28  ;;  %690 = vperm.xlu1 %5877, %v588_v32  }
  0x3e   : > { %1059 = vmatprep.mubr.bf16.mxu0 %v9980_v0 }
  0x3f   : > { %695 = vperm.xlu0 %5876, %v589_v34  }
  0x41   : > { %700 = vperm.xlu1 %5877, %v590_v37  }
  0x43   : > { %735 = vperm.xlu0 %5876, %v597_v42  }
  0x45   : > { %1060 = vmatmul.mubr.bf16.gmra.mxu0 %v5880_v39  ;;  %740 = vperm.xlu1 %5877, %v598_v45  }
  0x46   : > { %1069 = vmatprep.mubr.bf16.mxu0 %v9980_v0 }
  0x47   : > { %725 = vperm.xlu0 %5876, %v595_v46  }
  0x49   : > { %730 = vperm.xlu1 %5877, %v596_v47  }
  0x4b   : > { %715 = vperm.xlu0 %5876, %v593_v51  }
  0x4d   : > { %1070 = vmatmul.mubr.bf16.gmra.mxu0 %v5881_v50  ;;  %720 = vperm.xlu1 %5877, %v594_v52  }
  0x4e   : > { %1079 = vmatprep.mubr.bf16.mxu0 %v9980_v0 }
  0x4f   : > { %705 = vperm.xlu0 %5876, %v591_v53  }
  0x51   : > { %710 = vperm.xlu1 %5877, %v592_v56  }
  0x55   : > { %1080 = vmatmul.mubr.bf16.gmra.mxu0 %v5882_v59 }
  0x56   : > { %1089 = vmatprep.mubr.bf16.mxu0 %v9980_v0 }
  0x5d   : > { %1090 = vmatmul.mubr.bf16.gmra.mxu0 %v5883_v1 }
  0x5e   : > { %1099 = vmatprep.mubr.bf16.mxu0 %v9980_v0 }
  0x65   : > { %1100 = vmatmul.mubr.bf16.gmra.mxu0 %v5884_v2 }
  0x66   : > { %1109 = vmatprep.mubr.bf16.mxu0 %v9980_v0 }
  0x6d   : > { %1110 = vmatmul.mubr.bf16.gmra.mxu0 %v5885_v3 }
  0x6e   : > { %1119 = vmatprep.mubr.bf16.mxu0 %v9980_v0 }
  0x75   : > { %1120 = vmatmul.mubr.bf16.gmra.mxu0 %v5886_v4 }
  0x76   : > { %1129 = vmatprep.mubr.bf16.mxu0 %v9980_v0 }
  0x7d   : > { %1130 = vmatmul.mubr.bf16.gmra.mxu0 %v5887_v5 }
  0x7e   : > { %1139 = vmatprep.mubr.bf16.mxu0 %v9980_v0 }
  0x85   : > { %1140 = vmatmul.mubr.bf16.gmra.mxu0 %v5888_v8 }
  0x86   : > { %1149 = vmatprep.mubr.bf16.mxu0 %v9980_v0 }
  0x8d   : > { %1150 = vmatmul.mubr.bf16.gmra.mxu0 %v5889_v9 }
  0x8e   : > { %1159 = vmatprep.mubr.bf16.mxu0 %v9980_v0 }
  0x9e   : > { %v626_v10 = vpop.permute.xlu0 %625 }
  0xa0   : > { %v636_v32 = vpop.permute.xlu1 %635 }
  0xa2   : > { %v631_v26 = vpop.permute.xlu0 %630 }
  0xa4   : > { %v641_v52 = vpop.permute.xlu1 %640 }
  0xa6   : > { %v646_v4 = vpop.permute.xlu0 %645 }
  0xf5   : > { %v1041_v13 = vpop.f32.mrf.mxu0 }
  0xf6   : > { %v1042_v16 = vadd.f32 %v1041_v13, %v626_v10 }
  0xf7   : > { %v1043_v18 = vpop.f32.mrf.mxu0 }
  0xf8   : > { %v1280_v19 = vmul.f32 0.125, %v1042_v16  ;;  %v1044_v25 = vadd.f32 %v1043_v18, %v626_v10  ;;  %v651_v18 = vpop.permute.xlu1 %650 }
  0xf9   : > { %v1045_v27 = vpop.f32.mrf.mxu0 }
  0xfa   : > { %v1281_v28 = vmul.f32 0.125, %v1044_v25  ;;  %v1046_v29 = vadd.f32 %v1045_v27, %v631_v26  ;;  %1312 = vxpose.xlu0.b32.start [1/16] %v1280_v19, 128 }
  0xfb   : > { %v1047_v34 = vpop.f32.mrf.mxu0 }
  0xfc   : > { %v1282_v37 = vmul.f32 0.125, %v1046_v29  ;;  %v1048_v39 = vadd.f32 %v1047_v34, %v631_v26  ;;  %1344 = vxpose.xlu1.b32.start [1/16] %v1281_v28, 128 }
  0xfd   : > { %v1051_v42 = vpop.f32.mrf.mxu0 }
  0xfe   : > { %v1283_v45 = vmul.f32 0.125, %v1048_v39  ;;  %v1052_v46 = vadd.f32 %v1051_v42, %v636_v32  ;;  %1313 = vxpose.xlu0.b32.cont [2/16] %v1282_v37, 128 }
  0xff   : > { %v1053_v47 = vpop.f32.mrf.mxu0 }
 0x100   : > { %v1284_v50 = vmul.f32 0.125, %v1052_v46  ;;  %v1054_v51 = vadd.f32 %v1053_v47, %v636_v32  ;;  %1345 = vxpose.xlu1.b32.cont [2/16] %v1283_v45, 128  ;;  %v656_v32 = vpop.permute.xlu0 %655  ;;  %v661_v47 = vpop.permute.xlu1 %660 }
 0x101   : > { %v1055_v53 = vpop.f32.mrf.mxu0 }
 0x102   : > { %v1285_v56 = vmul.f32 0.125, %v1054_v51  ;;  %v1056_v59 = vadd.f32 %v1055_v53, %v641_v52  ;;  %1314 = vxpose.xlu0.b32.cont [3/16] %v1284_v50, 128 }
 0x103   : > { %v1057_v1 = vpop.f32.mrf.mxu0 }
 0x104   : > { %v1286_v2 = vmul.f32 0.125, %v1056_v59  ;;  %v1058_v3 = vadd.f32 %v1057_v1, %v641_v52  ;;  %1346 = vxpose.xlu1.b32.cont [3/16] %v1285_v56, 128  ;;  %v666_v1 = vpop.permute.xlu0 %665 }
 0x105   : > { %v1061_v5 = vpop.f32.mrf.mxu0 }
 0x106   : > { %v1287_v8 = vmul.f32 0.125, %v1058_v3  ;;  %v1062_v9 = vadd.f32 %v1061_v5, %v646_v4  ;;  %1315 = vxpose.xlu0.b32.cont [4/16] %v1286_v2, 128 }
 0x107   : > { %v1063_v10 = vpop.f32.mrf.mxu0 }
 0x108   : > { %v1288_v13 = vmul.f32 0.125, %v1062_v9  ;;  %v1064_v16 = vadd.f32 %v1063_v10, %v646_v4  ;;  %1347 = vxpose.xlu1.b32.cont [4/16] %v1287_v8, 128  ;;  %v671_v10 = vpop.permute.xlu1 %670 }
 0x109   : > { %v1065_v19 = vpop.f32.mrf.mxu0 }
 0x10a   : > { %v1289_v25 = vmul.f32 0.125, %v1064_v16  ;;  %v1066_v26 = vadd.f32 %v1065_v19, %v651_v18  ;;  %1316 = vxpose.xlu0.b32.cont [5/16] %v1288_v13, 128 }
 0x10b   : > { %v1067_v27 = vpop.f32.mrf.mxu0 }
 0x10c   : > { %v1290_v28 = vmul.f32 0.125, %v1066_v26  ;;  %v1068_v29 = vadd.f32 %v1067_v27, %v651_v18  ;;  %1348 = vxpose.xlu1.b32.cont [5/16] %v1289_v25, 128  ;;  %v676_v27 = vpop.permute.xlu0 %675 }
 0x10d   : > { %v1071_v34 = vpop.f32.mrf.mxu0 }
 0x10e   : > { %v1291_v37 = vmul.f32 0.125, %v1068_v29  ;;  %v1072_v39 = vadd.f32 %v1071_v34, %v656_v32  ;;  %1317 = vxpose.xlu0.b32.cont [6/16] %v1290_v28, 128 }
 0x10f   : > { %v1073_v42 = vpop.f32.mrf.mxu0 }
 0x110   : > { %v1292_v45 = vmul.f32 0.125, %v1072_v39  ;;  %v1074_v46 = vadd.f32 %v1073_v42, %v656_v32  ;;  %1349 = vxpose.xlu1.b32.cont [6/16] %v1291_v37, 128  ;;  %v681_v42 = vpop.permute.xlu1 %680 }
 0x111   : > { %v1075_v50 = vpop.f32.mrf.mxu0 }
 0x112   : > { %v1293_v51 = vmul.f32 0.125, %v1074_v46  ;;  %v1076_v52 = vadd.f32 %v1075_v50, %v661_v47  ;;  %1318 = vxpose.xlu0.b32.cont [7/16] %v1292_v45, 128 }
 0x113   : > { %v1077_v53 = vpop.f32.mrf.mxu0 }
 0x114   : > { %v1294_v56 = vmul.f32 0.125, %v1076_v52  ;;  %v1078_v59 = vadd.f32 %v1077_v53, %v661_v47  ;;  %1350 = vxpose.xlu1.b32.cont [7/16] %v1293_v51, 128  ;;  %v686_v53 = vpop.permute.xlu0 %685 }
 0x115   : > { %v1081_v2 = vpop.f32.mrf.mxu0 }
 0x116   : > { %v1295_v3 = vmul.f32 0.125, %v1078_v59  ;;  %v1082_v4 = vadd.f32 %v1081_v2, %v666_v1  ;;  %1319 = vxpose.xlu0.b32.cont [8/16] %v1294_v56, 128 }
 0x117   : > { %v1083_v5 = vpop.f32.mrf.mxu0 }
 0x118   : > { %v1296_v8 = vmul.f32 0.125, %v1082_v4  ;;  %v1084_v9 = vadd.f32 %v1083_v5, %v666_v1  ;;  %1351 = vxpose.xlu1.b32.cont [8/16] %v1295_v3, 128  ;;  %v691_v5 = vpop.permute.xlu1 %690 }
 0x119   : > { %v1085_v13 = vpop.f32.mrf.mxu0 }
 0x11a   : > { %v1297_v16 = vmul.f32 0.125, %v1084_v9  ;;  %v1086_v18 = vadd.f32 %v1085_v13, %v671_v10  ;;  %1320 = vxpose.xlu0.b32.cont [9/16] %v1296_v8, 128 }
 0x11b   : > { %v1087_v19 = vpop.f32.mrf.mxu0 }
 0x11c   : > { %v1298_v25 = vmul.f32 0.125, %v1086_v18  ;;  %v1088_v26 = vadd.f32 %v1087_v19, %v671_v10  ;;  %1352 = vxpose.xlu1.b32.cont [9/16] %v1297_v16, 128  ;;  %v696_v19 = vpop.permute.xlu0 %695 }
 0x11d   : > { %v1091_v28 = vpop.f32.mrf.mxu0 }
 0x11e   : > { %v1299_v29 = vmul.f32 0.125, %v1088_v26  ;;  %v1092_v32 = vadd.f32 %v1091_v28, %v676_v27  ;;  %1321 = vxpose.xlu0.b32.cont [10/16] %v1298_v25, 128 }
 0x11f   : > { %v1093_v34 = vpop.f32.mrf.mxu0 }
 0x120   : > { %v1300_v37 = vmul.f32 0.125, %v1092_v32  ;;  %v1094_v39 = vadd.f32 %v1093_v34, %v676_v27  ;;  %1353 = vxpose.xlu1.b32.cont [10/16] %v1299_v29, 128  ;;  %v701_v34 = vpop.permute.xlu1 %700 }
 0x121   : > { %v1095_v45 = vpop.f32.mrf.mxu0 }
 0x122   : > { %v1301_v46 = vmul.f32 0.125, %v1094_v39  ;;  %v1096_v47 = vadd.f32 %v1095_v45, %v681_v42  ;;  %1322 = vxpose.xlu0.b32.cont [11/16] %v1300_v37, 128 }
 0x123   : > { %v1097_v50 = vpop.f32.mrf.mxu0 }
 0x124   : > { %v1302_v51 = vmul.f32 0.125, %v1096_v47  ;;  %v1098_v52 = vadd.f32 %v1097_v50, %v681_v42  ;;  %1354 = vxpose.xlu1.b32.cont [11/16] %v1301_v46, 128 }
 0x125   : > { %v1101_v56 = vpop.f32.mrf.mxu0 }
 0x126   : > { %v1303_v59 = vmul.f32 0.125, %v1098_v52  ;;  %v1102_v1 = vadd.f32 %v1101_v56, %v686_v53  ;;  %1323 = vxpose.xlu0.b32.cont [12/16] %v1302_v51, 128 }
 0x127   : > { %v1103_v2 = vpop.f32.mrf.mxu0 }
 0x128   : > { %v1304_v3 = vmul.f32 0.125, %v1102_v1  ;;  %v1104_v4 = vadd.f32 %v1103_v2, %v686_v53  ;;  %1355 = vxpose.xlu1.b32.cont [12/16] %v1303_v59, 128 }
 0x129   : > { %v1105_v8 = vpop.f32.mrf.mxu0 }
 0x12a   : > { %v1305_v9 = vmul.f32 0.125, %v1104_v4  ;;  %v1106_v10 = vadd.f32 %v1105_v8, %v691_v5  ;;  %1324 = vxpose.xlu0.b32.cont [13/16] %v1304_v3, 128  ;;  %v741_v8 = vpop.permute.xlu1 %740 }
 0x12b   : > { %v1107_v13 = vpop.f32.mrf.mxu0 }
 0x12c   : > { %v1306_v16 = vmul.f32 0.125, %v1106_v10  ;;  %v1108_v18 = vadd.f32 %v1107_v13, %v691_v5  ;;  %1356 = vxpose.xlu1.b32.cont [13/16] %v1305_v9, 128  ;;  %v736_v10 = vpop.permute.xlu0 %735 }
 0x12d   : > { %v1111_v25 = vpop.f32.mrf.mxu0 }
 0x12e   : > { %v1307_v26 = vmul.f32 0.125, %v1108_v18  ;;  %v1112_v27 = vadd.f32 %v1111_v25, %v696_v19  ;;  %1325 = vxpose.xlu0.b32.cont [14/16] %v1306_v16, 128  ;;  %v731_v18 = vpop.permute.xlu1 %730 }
 0x12f   : > { %v1113_v28 = vpop.f32.mrf.mxu0 }
 0x130   : > { %v1308_v29 = vmul.f32 0.125, %v1112_v27  ;;  %v1114_v32 = vadd.f32 %v1113_v28, %v696_v19  ;;  %1357 = vxpose.xlu1.b32.cont [14/16] %v1307_v26, 128  ;;  %v726_v25 = vpop.permute.xlu0 %725 }
 0x131   : > { %v1115_v37 = vpop.f32.mrf.mxu0 }
 0x132   : > { %v1309_v39 = vmul.f32 0.125, %v1114_v32  ;;  %v1116_v42 = vadd.f32 %v1115_v37, %v701_v34  ;;  %1326 = vxpose.xlu0.b32.cont [15/16] %v1308_v29, 128  ;;  %v721_v37 = vpop.permute.xlu1 %720 }
 0x133   : > { %v1117_v45 = vpop.f32.mrf.mxu0 }
 0x134   : > { %v1310_v46 = vmul.f32 0.125, %v1116_v42  ;;  %v1118_v47 = vadd.f32 %v1117_v45, %v701_v34  ;;  %1358 = vxpose.xlu1.b32.cont [15/16] %v1309_v39, 128 }
 0x135   : > { %v1121_v50 = vpop.f32.mrf.mxu0 }
 0x136   : > { %v1311_v51 = vmul.f32 0.125, %v1118_v47  ;;  %1327 = vxpose.xlu0.b32.end [16/16] %v1310_v46, 128  ;;  %v716_v46 = vpop.permute.xlu0 %715  ;;  %v711_v17 = vpop.permute.xlu1 %710 }
 0x137   : > { %v1123_v52 = vpop.f32.mrf.mxu0 }
 0x138   : > { %1359 = vxpose.xlu1.b32.end [16/16] %v1311_v51, 128 }
 0x139   : > { %v1125_v53 = vpop.f32.mrf.mxu0 }
 0x13b   : > { %v1127_v56 = vpop.f32.mrf.mxu0 }
 0x13d   : > { %v1131_v59 = vpop.f32.mrf.mxu0 }
 0x13f   : > { %v1133_v1 = vpop.f32.mrf.mxu0 }
 0x140   : > { %v1134_v14 = vadd.f32 %v1133_v1, %v716_v46 }
 0x141   : > { %v1135_v2 = vpop.f32.mrf.mxu0 }
 0x143   : > { %v1137_v3 = vpop.f32.mrf.mxu0 }
 0x144   : > { %v1138_v0 = vadd.f32 %v1137_v3, %v721_v37 }
 0x145   : > { %v1141_v4 = vpop.f32.mrf.mxu0 }
 0x146   : > { %v1142_v22 = vadd.f32 %v1141_v4, %v726_v25 }
 0x147   : > { %v1143_v5 = vpop.f32.mrf.mxu0 }
 0x148   : > { %v1144_v42 = vadd.f32 %v1143_v5, %v726_v25 }
 0x149   : > { %v1145_v9 = vpop.f32.mrf.mxu0 }
 0x14a   : > { %v1146_v47 = vadd.f32 %v1145_v9, %v731_v18 }
 0x14b   : > { %v1147_v13 = vpop.f32.mrf.mxu0 }
 0x14c   : > { %v1148_v29 = vadd.f32 %v1147_v13, %v731_v18  ;;  %v1396_v24 = vpack.c.bf16 %v1146_v47, %v1142_v22  ;;  %v1128_v13 = vadd.f32 %v1127_v56, %v711_v17 }
 0x14d   : > { %v1151_v16 = vpop.f32.mrf.mxu0 }
 0x14e   : > { %v1152_v39 = vadd.f32 %v1151_v16, %v736_v10  ;;  %v1397_v15 = vpack.c.bf16 %v1148_v29, %v1144_v42 }
 0x14f   : > { %v1153_v19 = vpop.f32.mrf.mxu0 }
 0x150   : > { %v1154_v32 = vadd.f32 %v1153_v19, %v736_v10  ;;  %v1395_v19 = vpack.c.bf16 %v1138_v0, %v1134_v14  ;;  %v1126_v10 = vadd.f32 %v1125_v53, %v711_v17  ;;  %v10180_v14 = vmov 0  }
 0x151   : > { %v1155_v26 = vpop.f32.mrf.mxu0 }
 0x152   : > { %v1156_v27 = vadd.f32 %v1155_v26, %v741_v8  ;;  %v1136_v26 = vadd.f32 %v1135_v2, %v721_v37 }
 0x153   : > { %v1157_v28 = vpop.f32.mrf.mxu0 }
 0x154   : > { %v1158_v34 = vadd.f32 %v1157_v28, %v741_v8  ;;  %v1398_v51 = vpack.c.bf16 %v1156_v27, %v1152_v39  ;;  %v706_v8 = vpop.permute.xlu0 %705  ;;  %v1132_v28 = vadd.f32 %v1131_v59, %v716_v46 }
 0x155   : > { %v1124_v5 = vadd.f32 %v1123_v52, %v706_v8  ;;  %v1122_v3 = vadd.f32 %v1121_v50, %v706_v8 }
 0x156   : > { %v1399_v45 = vpack.c.bf16 %v1158_v34, %v1154_v32  ;;  %v1394_v9 = vpack.c.bf16 %v1136_v26, %v1132_v28 }
 0x157   : > { %v1393_v16 = vpack.c.bf16 %v1128_v13, %v1124_v5  ;;  %v1392_v4 = vpack.c.bf16 %v1126_v10, %v1122_v3 }
 0x158   : > { %1465 = vmatprep.subr.bf16.mxu1 %v1399_v45 }
 0x159   : > { %1466 = vmatpush1.bf16.msra.mxu1 %v1398_v51 }
 0x15a   : > { %1467 = vmatprep.subr.bf16.mxu1 %v1397_v15 }
 0x15d   : > { %1468 = vmatpush1.bf16.msra.mxu1 %v1396_v24 }
 0x15e   : > { %1469 = vmatprep.subr.bf16.mxu1 %v1395_v19 }
 0x161   : > { %1470 = vmatpush1.bf16.msra.mxu1 %v1394_v9 }
 0x162   : > { %1471 = vmatprep.subr.bf16.mxu1 %v1393_v16 }
 0x165   : > { %1472 = vmatpush1.bf16.msra.mxu1 %v1392_v4 }
 0x176   : > { %v1328_v1 = vpop.trf.xlu0 }
 0x178   : > { %v1360_v18 = vpop.trf.xlu1 }
 0x17a   : > { %v1329_v15 = vpop.trf.xlu0 }
 0x17b   : > { %v6819_v2 = vpack.c.bf16 %v1329_v15, %v1328_v1 }
 0x17c   : > { %v1361_v29 = vpop.trf.xlu1 }
 0x17d   : > { %10179 = vst [vmem:[#allocation34_spill] sm:$0xff] %v6819_v2  ;;  %5758 = vmatmul.mubr.msk.bf16.vlgmr.msra.gmra.mxu1 %vm1408_vm0, %v6819_v2  ;;  %v6859_v10 = vpack.c.bf16 %v1361_v29, %v1360_v18 }
 0x17e   : > { %v1330_v0 = vpop.trf.xlu0  ;;  %1499 = vmatprep.mubr.bf16.mxu1 %v10180_v14 }
 0x17f   : > { %10188 = vst [vmem:[#allocation42_spill] sm:$0xff] %v6859_v10 }
 0x180   : > { %v1362_v37 = vpop.trf.xlu1 }
 0x182   : > { %v1331_v22 = vpop.trf.xlu0 }
 0x183   : > { %v6824_v17 = vpack.c.bf16 %v1331_v22, %v1330_v0 }
 0x184   : > { %v1363_v46 = vpop.trf.xlu1 }
 0x185   : > { %10181 = vst [vmem:[#allocation35_spill] sm:$0xff] %v6824_v17  ;;  %5759 = vmatmul.mubr.msk.bf16.gmra.mxu1 %vm1408_vm0, %v6824_v17  ;;  %v6864_v16 = vpack.c.bf16 %v1363_v46, %v1362_v37 }
 0x186   : > { %v1332_v24 = vpop.trf.xlu0  ;;  %1509 = vmatprep.mubr.bf16.mxu1 %v10180_v14 }
 0x187   : > { %10189 = vst [vmem:[#allocation43_spill] sm:$0xff] %v6864_v16 }
 0x188   : > { %v1364_v26 = vpop.trf.xlu1 }
 0x18a   : > { %v1333_v50 = vpop.trf.xlu0 }
 0x18b   : > { %v6829_v52 = vpack.c.bf16 %v1333_v50, %v1332_v24 }
 0x18c   : > { %v1365_v8 = vpop.trf.xlu1 }
 0x18d   : > { %10182 = vst [vmem:[#allocation36_spill] sm:$0xff] %v6829_v52  ;;  %5760 = vmatmul.mubr.msk.bf16.gmra.mxu1 %vm1408_vm0, %v6829_v52  ;;  %v6869_v4 = vpack.c.bf16 %v1365_v8, %v1364_v26 }
 0x18e   : > { %v1334_v53 = vpop.trf.xlu0  ;;  %1519 = vmatprep.mubr.bf16.mxu1 %v10180_v14 }
 0x18f   : > { %10190 = vst [vmem:[#allocation44_spill] sm:$0xff] %v6869_v4 }
 0x190   : > { %v1366_v5 = vpop.trf.xlu1 }
 0x192   : > { %v1335_v56 = vpop.trf.xlu0 }
 0x193   : > { %v6834_v59 = vpack.c.bf16 %v1335_v56, %v1334_v53 }
 0x194   : > { %v1367_v9 = vpop.trf.xlu1 }
 0x195   : > { %10183 = vst [vmem:[#allocation37_spill] sm:$0xff] %v6834_v59  ;;  %5761 = vmatmul.mubr.msk.bf16.gmra.mxu1 %vm1408_vm0, %v6834_v59  ;;  %v6874_v0 = vpack.c.bf16 %v1367_v9, %v1366_v5 }
 0x196   : > { %v1336_v25 = vpop.trf.xlu0  ;;  %1529 = vmatprep.mubr.bf16.mxu1 %v10180_v14 }
 0x197   : > { %10191 = vst [vmem:[#allocation45_spill] sm:$0xff] %v6874_v0 }
 0x198   : > { %v1368_v3 = vpop.trf.xlu1 }
 0x19a   : > { %v1337_v27 = vpop.trf.xlu0 }
 0x19b   : > { %v6839_v32 = vpack.c.bf16 %v1337_v27, %v1336_v25 }
 0x19c   : > { %v1369_v1 = vpop.trf.xlu1 }
 0x19d   : > { %10184 = vst [vmem:[#allocation38_spill] sm:$0xff] %v6839_v32  ;;  %5762 = vmatmul.mubr.msk.bf16.gmra.mxu1 %vm1408_vm0, %v6839_v32  ;;  %v6879_v24 = vpack.c.bf16 %v1369_v1, %v1368_v3 }
 0x19e   : > { %v1338_v34 = vpop.trf.xlu0  ;;  %1539 = vmatprep.mubr.bf16.mxu1 %v10180_v14 }
 0x19f   : > { %10192 = vst [vmem:[#allocation46_spill] sm:$0xff] %v6879_v24 }
 0x1a0   : > { %v1370_v15 = vpop.trf.xlu1 }
 0x1a2   : > { %v1339_v39 = vpop.trf.xlu0 }
 0x1a3   : > { %v6844_v42 = vpack.c.bf16 %v1339_v39, %v1338_v34 }
 0x1a4   : > { %v1371_v22 = vpop.trf.xlu1 }
 0x1a5   : > { %10185 = vst [vmem:[#allocation39_spill] sm:$0xff] %v6844_v42  ;;  %5763 = vmatmul.mubr.msk.bf16.gmra.mxu1 %vm1408_vm0, %v6844_v42  ;;  %v6884_v53 = vpack.c.bf16 %v1371_v22, %v1370_v15 }
 0x1a6   : > { %v1340_v45 = vpop.trf.xlu0  ;;  %1549 = vmatprep.mubr.bf16.mxu1 %v10180_v14 }
 0x1a7   : > { %10193 = vst [vmem:[#allocation47_spill] sm:$0xff] %v6884_v53 }
 0x1a8   : > { %v1372_v50 = vpop.trf.xlu1 }
 0x1aa   : > { %v1341_v47 = vpop.trf.xlu0 }
 0x1ab   : > { %v6849_v51 = vpack.c.bf16 %v1341_v47, %v1340_v45 }
 0x1ac   : > { %v1373_v56 = vpop.trf.xlu1 }
 0x1ad   : > { %10186 = vst [vmem:[#allocation40_spill] sm:$0xff] %v6849_v51  ;;  %5764 = vmatmul.mubr.msk.bf16.gmra.mxu1 %vm1408_vm0, %v6849_v51  ;;  %v6889_v25 = vpack.c.bf16 %v1373_v56, %v1372_v50 }
 0x1ae   : > { %v1342_v13 = vpop.trf.xlu0  ;;  %1559 = vmatprep.mubr.bf16.mxu1 %v10180_v14 }
 0x1af   : > { %10194 = vst [vmem:[#allocation48_spill] sm:$0xff] %v6889_v25 }
 0x1b0   : > { %v1374_v18 = vpop.trf.xlu1 }
 0x1b2   : > { %v1343_v19 = vpop.trf.xlu0 }
 0x1b3   : > { %v6854_v28 = vpack.c.bf16 %v1343_v19, %v1342_v13 }
 0x1b4   : > { %v1375_v27 = vpop.trf.xlu1 }
 0x1b5   : > { %10187 = vst [vmem:[#allocation41_spill] sm:$0xff] %v6854_v28  ;;  %5765 = vmatmul.mubr.msk.bf16.gmra.mxu1 %vm1408_vm0, %v6854_v28  ;;  %v6894_v29 = vpack.c.bf16 %v1375_v27, %v1374_v18 }
 0x1b6   : > { %1569 = vmatprep.mubr.bf16.mxu1 %v10180_v14 }
 0x1b7   : > { %10195 = vst [vmem:[#allocation49_spill] sm:$0xff] %v6894_v29 }
 0x1bd   : > { %5766 = vmatmul.mubr.msk.bf16.gmra.mxu1 %vm1408_vm0, %v6859_v10 }
 0x1be   : > { %1579 = vmatprep.mubr.bf16.mxu1 %v10180_v14 }
 0x1c5   : > { %5767 = vmatmul.mubr.msk.bf16.gmra.mxu1 %vm1408_vm0, %v6864_v16 }
 0x1c6   : > { %1589 = vmatprep.mubr.bf16.mxu1 %v10180_v14 }
 0x1cd   : > { %5768 = vmatmul.mubr.msk.bf16.gmra.mxu1 %vm1408_vm0, %v6869_v4 }
 0x1ce   : > { %1599 = vmatprep.mubr.bf16.mxu1 %v10180_v14 }
 0x1d5   : > { %5769 = vmatmul.mubr.msk.bf16.gmra.mxu1 %vm1408_vm0, %v6874_v0 }
 0x1d6   : > { %1609 = vmatprep.mubr.bf16.mxu1 %v10180_v14 }
 0x1dd   : > { %5770 = vmatmul.mubr.msk.bf16.gmra.mxu1 %vm1408_vm0, %v6879_v24 }
 0x1de   : > { %1619 = vmatprep.mubr.bf16.mxu1 %v10180_v14 }
 0x1e5   : > { %5771 = vmatmul.mubr.msk.bf16.gmra.mxu1 %vm1408_vm0, %v6884_v53 }
 0x1e6   : > { %1629 = vmatprep.mubr.bf16.mxu1 %v10180_v14 }
 0x1ed   : > { %5772 = vmatmul.mubr.msk.bf16.gmra.mxu1 %vm1408_vm0, %v6889_v25 }
 0x1ee   : > { %1639 = vmatprep.mubr.bf16.mxu1 %v10180_v14 }
 0x1f5   : > { %5773 = vmatmul.mubr.msk.bf16.gmra.mxu1 %vm1408_vm0, %v6894_v29 }
 0x23d   : > { %v6898_v34 = vpop.f32.mrf.mxu1 }
 0x23f   : > { %v6900_v37 = vpop.f32.mrf.mxu1 }
 0x241   : > { %v6902_v39 = vpop.f32.mrf.mxu1 }
 0x243   : > { %v6904_v45 = vpop.f32.mrf.mxu1 }
 0x244   : > { %v1653_v53 = vmax.f32 %v6902_v39, %v6904_v45 }
 0x245   : > { %v6906_v46 = vpop.f32.mrf.mxu1 }
 0x247   : > { %v6908_v47 = vpop.f32.mrf.mxu1 }
 0x249   : > { %v6910_v26 = vpop.f32.mrf.mxu1 }
 0x24b   : > { %v6912_v13 = vpop.f32.mrf.mxu1 }
 0x24c   : > { %v1659_v29 = vmax.f32 %v6910_v26, %v6912_v13 }
 0x24d   : > { %v6914_v19 = vpop.f32.mrf.mxu1 }
 0x24f   : > { %v6916_v8 = vpop.f32.mrf.mxu1 }
 0x251   : > { %v6918_v5 = vpop.f32.mrf.mxu1 }
 0x253   : > { %v6920_v9 = vpop.f32.mrf.mxu1 }
 0x254   : > { %v1665_v7 = vmax.f32 %v6918_v5, %v6920_v9 }
 0x255   : > { %v6922_v3 = vpop.f32.mrf.mxu1 }
 0x257   : > { %v6924_v1 = vpop.f32.mrf.mxu1 }
 0x259   : > { %v6926_v15 = vpop.f32.mrf.mxu1 }
 0x25b   : > { %v6928_v22 = vpop.f32.mrf.mxu1 }
 0x25c   : > { %v1671_v6 = vmax.f32 %v6926_v15, %v6928_v22 }
 0x25d   : > { %v6930_v50 = vpop.f32.mrf.mxu1 }
 0x25f   : > { %v6932_v56 = vpop.f32.mrf.mxu1 }
 0x261   : > { %v6934_v18 = vpop.f32.mrf.mxu1 }
 0x263   : > { %v6936_v27 = vpop.f32.mrf.mxu1 }
 0x264   : > { %v1677_v60 = vmax.f32 %v6934_v18, %v6936_v27 }
 0x265   : > { %v6938_v31 = vpop.f32.mrf.mxu1 }
 0x267   : > { %v6940_v23 = vpop.f32.mrf.mxu1 }
 0x269   : > { %v6942_v30 = vpop.f32.mrf.mxu1 }
 0x26b   : > { %v6944_v38 = vpop.f32.mrf.mxu1 }
 0x26c   : > { %v1683_v55 = vmax.f32 %v6942_v30, %v6944_v38 }
 0x26d   : > { %v6946_v44 = vpop.f32.mrf.mxu1 }
 0x26f   : > { %v6948_v33 = vpop.f32.mrf.mxu1 }
 0x270   : > { %v1686_v62 = vmax.f32 %v6946_v44, %v6948_v33 }
 0x271   : > { %v6950_v43 = vpop.f32.mrf.mxu1 }
 0x273   : > { %v6952_v49 = vpop.f32.mrf.mxu1 }
 0x274   : > { %v1689_v20 = vmax.f32 %v6950_v43, %v6952_v49 }
 0x275   : > { %v6954_v58 = vpop.f32.mrf.mxu1 }
 0x277   : > { %v6956_v48 = vpop.f32.mrf.mxu1 }
 0x278   : > { %v1692_v57 = vmax.f32 %v6954_v58, %v6956_v48 }
 0x279   : > { %v6960_v63 = vpop.f32.mrf.mxu1 }
 0x27a   : > { %1693 = vmax.xlane.f32.xlu0 %v1692_v57  ;;  %v1680_v57 = vmax.f32 %v6938_v31, %v6940_v23 }
 0x27b   : > { %v6962_v12 = vpop.f32.mrf.mxu1 }
 0x27c   : > { %v1695_v11 = vmax.f32 %v6960_v63, %v6962_v12 }
 0x27d   : > { %v6968_v21 = vpop.f32.mrf.mxu1 }
 0x27e   : > { %10196 = vst [vmem:[#allocation50_spill] sm:$0xff] %v6968_v21  ;;  %1687 = vmax.xlane.f32.xlu0 %v1686_v62  ;;  %1696 = vmax.xlane.f32.xlu1 %v1695_v11  ;;  %v1674_v62 = vmax.f32 %v6930_v50, %v6932_v56 }
 0x27f   : > { %v6970_v36 = vpop.f32.mrf.mxu1 }
 0x280   : > { %10197 = vst [vmem:[#allocation51_spill] sm:$0xff] %v6970_v36 }
 0x281   : > { %v6976_v35 = vpop.f32.mrf.mxu1 }
 0x282   : > { %10198 = vst [vmem:[#allocation52_spill] sm:$0xff] %v6976_v35  ;;  %1690 = vmax.xlane.f32.xlu0 %v1689_v20  ;;  %1681 = vmax.xlane.f32.xlu1 %v1680_v57  ;;  %v1668_v20 = vmax.f32 %v6922_v3, %v6924_v1 }
 0x283   : > { %v6978_v41 = vpop.f32.mrf.mxu1 }
 0x284   : > { %10199 = vst [vmem:[#allocation53_spill] sm:$0xff] %v6978_v41 }
 0x285   : > { %v6984_v11 = vpop.f32.mrf.mxu1 }
 0x286   : > { %1684 = vmax.xlane.f32.xlu0 %v1683_v55  ;;  %1675 = vmax.xlane.f32.xlu1 %v1674_v62  ;;  %v1662_v55 = vmax.f32 %v6914_v19, %v6916_v8 }
 0x287   : > { %v6986_v40 = vpop.f32.mrf.mxu1 }
 0x289   : > { %v6992_v57 = vpop.f32.mrf.mxu1 }
 0x28a   : > { %10200 = vst [vmem:[#allocation54_spill] sm:$0xff] %v6992_v57  ;;  %1678 = vmax.xlane.f32.xlu0 %v1677_v60  ;;  %1669 = vmax.xlane.f32.xlu1 %v1668_v20  ;;  %v1656_v60 = vmax.f32 %v6906_v46, %v6908_v47 }
 0x28b   : > { %v6994_v54 = vpop.f32.mrf.mxu1 }
 0x28c   : > { %10201 = vst [vmem:[#allocation55_spill] sm:$0xff] %v6994_v54 }
 0x28d   : > { %v7000_v62 = vpop.f32.mrf.mxu1 }
 0x28e   : > { %1672 = vmax.xlane.f32.xlu0 %v1671_v6  ;;  %1663 = vmax.xlane.f32.xlu1 %v1662_v55  ;;  %v1650_v6 = vmax.f32 %v6898_v34, %v6900_v37 }
 0x28f   : > { %v7002_v61 = vpop.f32.mrf.mxu1 }
 0x291   : > { %v7008_v20 = vpop.f32.mrf.mxu1 }
 0x292   : > { %1666 = vmax.xlane.f32.xlu0 %v1665_v7  ;;  %1657 = vmax.xlane.f32.xlu1 %v1656_v60 }
 0x293   : > { %v7010_v25 = vpop.f32.mrf.mxu1 }
 0x295   : > { %v7016_v55 = vpop.f32.mrf.mxu1 }
 0x296   : > { %1660 = vmax.xlane.f32.xlu0 %v1659_v29  ;;  %1651 = vmax.xlane.f32.xlu1 %v1650_v6 }
 0x297   : > { %v7018_v24 = vpop.f32.mrf.mxu1 }
 0x299   : > { %v7022_v4 = vpop.f32.mrf.mxu1 }
 0x29a   : > { %1654 = vmax.xlane.f32.xlu0 %v1653_v53 }
 0x29b   : > { %v7024_v7 = vpop.f32.mrf.mxu1 }
 0x29d   : > { %v7026_v60 = vpop.f32.mrf.mxu1 }
 0x29e   : > { %10202 = vst [vmem:[#allocation56_spill] sm:$0xff] %v7026_v60 }
 0x29f   : > { %v7028_v0 = vpop.f32.mrf.mxu1 }
 0x2a0   : > { %10203 = vst [vmem:[#allocation57_spill] sm:$0xff] %v7028_v0 }
 0x2a1   : > { %v7030_v10 = vpop.f32.mrf.mxu1 }
 0x2a2   : > { %10204 = vst [vmem:[#allocation58_spill] sm:$0xff] %v7030_v10 }
 0x2a3   : > { %v7032_v16 = vpop.f32.mrf.mxu1 }
 0x2a4   : > { %10205 = vst [vmem:[#allocation59_spill] sm:$0xff] %v7032_v16 }
 0x2a5   : > { %v7034_v29 = vpop.f32.mrf.mxu1 }
 0x2a7   : > { %v7036_v6 = vpop.f32.mrf.mxu1 }
 0x2a8   : > { %v1728_v57 = vmax.f32 %v7034_v29, %v7036_v6 }
 0x2a9   : > { %v7038_v51 = vpop.f32.mrf.mxu1 }
 0x2aa   : > { %10206 = vst [vmem:[#allocation60_spill] sm:$0xff] %v7038_v51 }
 0x2ab   : > { %v7040_v28 = vpop.f32.mrf.mxu1 }
 0x2ac   : > { %10207 = vst [vmem:[#allocation61_spill] sm:$0xff] %v7040_v28 }
 0x2ad   : > { %v7042_v32 = vpop.f32.mrf.mxu1 }
 0x2af   : > { %v7044_v53 = vpop.f32.mrf.mxu1 }
 0x2b0   : > { %10208 = vst [vmem:[#allocation62_spill] sm:$0xff] %v7044_v53  ;;  %v1734_v41 = vmax.f32 %v7042_v32, %v7044_v53  ;;  %v1731_v53 = vmax.f32 %v7038_v51, %v7040_v28 }
 0x2b1   : > { %v7046_v42 = vpop.f32.mrf.mxu1 }
 0x2b3   : > { %v7048_v52 = vpop.f32.mrf.mxu1 }
 0x2b4   : > { %10209 = vst [vmem:[#allocation63_spill] sm:$0xff] %v7048_v52  ;;  %v1737_v54 = vmax.f32 %v7046_v42, %v7048_v52 }
 0x2b5   : > { %v7050_v59 = vpop.f32.mrf.mxu1 }
 0x2b7   : > { %v7052_v2 = vpop.f32.mrf.mxu1 }
 0x2b8   : > { %v1740_v17 = vmax.f32 %v7050_v59, %v7052_v2 }
 0x2b9   : > { %v7056_v35 = vpop.f32.mrf.mxu1 }
 0x2ba   : > { %1741 = vmax.xlane.f32.xlu1 %v1740_v17  ;;  %v1722_v17 = vmax.f32 %v7026_v60, %v7028_v0 }
 0x2bb   : > { %v7060_v21 = vpop.f32.mrf.mxu1 }
 0x2bc   : > { %v1743_v36 = vmax.f32 %v7056_v35, %v7060_v21 }
 0x2be   : > { %1735 = vmax.xlane.f32.xlu1 %v1734_v41  ;;  %1744 = vmax.xlane.f32.xlu0 %v1743_v36  ;;  %v1725_v41 = vmax.f32 %v7030_v10, %v7032_v16  ;;  %v5890_v36 = vld [vmem:[%s9969_s2 + $0x60] sm:$0xff]  }
 0x2bf   : > { %1160 = vmatmul.mubr.bf16.gmra.mxu0 %v5890_v36 }
 0x2c0   : > { %1169 = vmatprep.mubr.bf16.mxu0 %v10180_v14 }
 0x2c2   : > { %1729 = vmax.xlane.f32.xlu1 %v1728_v57  ;;  %1738 = vmax.xlane.f32.xlu0 %v1737_v54  ;;  %v5891_v54 = vld [vmem:[%s9969_s2 + $0x68] sm:$0xff]   ;;  %v5892_v57 = vld [vmem:[%s9969_s2 + $0x70] sm:$0xff]  }
 0x2c6   : > { %1723 = vmax.xlane.f32.xlu1 %v1722_v17  ;;  %1732 = vmax.xlane.f32.xlu0 %v1731_v53  ;;  %v5893_v53 = vld [vmem:[%s9969_s2 + $0x78] sm:$0xff]  }
 0x2c7   : > { %1170 = vmatmul.mubr.bf16.gmra.mxu0 %v5891_v54 }
 0x2c8   : > { %1179 = vmatprep.mubr.bf16.mxu0 %v10180_v14 }
 0x2ca   : > { %1726 = vmax.xlane.f32.xlu0 %v1725_v41 }
 0x2cf   : > { %1180 = vmatmul.mubr.bf16.gmra.mxu0 %v5892_v57 }
 0x2d0   : > { %1189 = vmatprep.mubr.bf16.mxu0 %v10180_v14 }
 0x2d7   : > { %1190 = vmatmul.mubr.bf16.gmra.mxu0 %v5893_v53 }
 0x2d8   : > { %1199 = vmatprep.mubr.bf16.mxu0 %v10180_v14 }
 0x303   : > { %v1694_v17 = vpop.xlane.xlu0 %1693 }
 0x304   : > { %v1774_v41 = vsub.f32 %v6954_v58, %v1694_v17  ;;  %v1775_v36 = vsub.f32 %v6956_v48, %v1694_v17  ;;  %v5894_v48 = vld [vmem:[%s9969_s2 + $0x80] sm:$0xff]  }
 0x305   : > { %1200 = vmatmul.mubr.bf16.gmra.mxu0 %v5894_v48 }
 0x306   : > { %v1866_v54 = vmul.f32 1.442695, %v1774_v41  ;;  %v1868_v16 = vmul.f32 1.442695, %v1775_v36  ;;  %1209 = vmatprep.mubr.bf16.mxu0 %v10180_v14 }
 0x307   : > { %v1688_v10 = vpop.xlane.xlu0 %1687  ;;  %v1697_v28 = vpop.xlane.xlu1 %1696 }
 0x308   : > { %5990 = vpow2.f32 %v1866_v54  ;;  %v1770_v57 = vsub.f32 %v6946_v44, %v1688_v10  ;;  %v1771_v51 = vsub.f32 %v6948_v33, %v1688_v10  ;;  %v1776_v0 = vsub.f32 %v6960_v63, %v1697_v28 }
 0x309   : > { %5992 = vpow2.f32 %v1868_v16  ;;  %v1777_v60 = vsub.f32 %v6962_v12, %v1697_v28 }
 0x30a   : > { %v1858_v58 = vmul.f32 1.442695, %v1770_v57  ;;  %v1860_v53 = vmul.f32 1.442695, %v1771_v51  ;;  %v1870_v17 = vmul.f32 1.442695, %v1776_v0 }
 0x30b   : > { %v1872_v41 = vmul.f32 1.442695, %v1777_v60  ;;  %v1691_v36 = vpop.xlane.xlu0 %1690  ;;  %v1682_v52 = vpop.xlane.xlu1 %1681 }
 0x30c   : > { %5994 = vpow2.f32 %v1858_v58  ;;  %v1772_v44 = vsub.f32 %v6950_v43, %v1691_v36  ;;  %v1773_v33 = vsub.f32 %v6952_v49, %v1691_v36  ;;  %v1766_v63 = vsub.f32 %v6938_v31, %v1682_v52  ;;  %v5895_v43 = vld [vmem:[%s9969_s2 + $0x88] sm:$0xff]  }
 0x30d   : > { %5996 = vpow2.f32 %v1860_v53  ;;  %v1767_v12 = vsub.f32 %v6940_v23, %v1682_v52  ;;  %1210 = vmatmul.mubr.bf16.gmra.mxu0 %v5895_v43 }
 0x30e   : > { %5998 = vpow2.f32 %v1870_v17  ;;  %v1862_v10 = vmul.f32 1.442695, %v1772_v44  ;;  %v1864_v16 = vmul.f32 1.442695, %v1773_v33  ;;  %v1850_v0 = vmul.f32 1.442695, %v1766_v63  ;;  %1219 = vmatprep.mubr.bf16.mxu0 %v10180_v14 }
 0x30f   : > { %6000 = vpow2.f32 %v1872_v41  ;;  %v1685_v51 = vpop.xlane.xlu0 %1684  ;;  %v1676_v28 = vpop.xlane.xlu1 %1675  ;;  %v1852_v60 = vmul.f32 1.442695, %v1767_v12  ;;  %v1716_v12 = vmax.f32 %v7016_v55, %v7018_v24 }
 0x310   : > { %6002 = vpow2.f32 %v1862_v10  ;;  %v1768_v49 = vsub.f32 %v6942_v30, %v1685_v51  ;;  %v1769_v31 = vsub.f32 %v6944_v38, %v1685_v51  ;;  %v1762_v48 = vsub.f32 %v6930_v50, %v1676_v28 }
 0x311   : > { %6004 = vpow2.f32 %v1864_v16  ;;  %v1763_v58 = vsub.f32 %v6932_v56, %v1676_v28 }
 0x312   : > { %6006 = vpow2.f32 %v1850_v0  ;;  %v1854_v53 = vmul.f32 1.442695, %v1768_v49  ;;  %v1856_v38 = vmul.f32 1.442695, %v1769_v31  ;;  %v1842_v36 = vmul.f32 1.442695, %v1762_v48 }
 0x313   : > { %v1679_v57 = vpop.xlane.xlu0 %1678  ;;  %v1670_v23 = vpop.xlane.xlu1 %1669  ;;  %6008 = vpow2.f32 %v1852_v60  ;;  %v1844_v33 = vmul.f32 1.442695, %v1763_v58 }
 0x314   : > { %6010 = vpow2.f32 %v1854_v53  ;;  %v1764_v51 = vsub.f32 %v6934_v18, %v1679_v57  ;;  %v1765_v28 = vsub.f32 %v6936_v27, %v1679_v57  ;;  %v1758_v16 = vsub.f32 %v6922_v3, %v1670_v23 }
 0x315   : > { %v7108_v54 = vpop.eup %5990  ;;  %6012 = vpow2.f32 %v1856_v38  ;;  %v1759_v43 = vsub.f32 %v6924_v1, %v1670_v23  ;;  %v1719_v57 = vmax.f32 %v7022_v4, %v7024_v7  ;;  %v1710_v53 = vmax.f32 %v7000_v62, %v7002_v61  ;;  %v5896_v38 = vld [vmem:[%s9969_s2 + $0x90] sm:$0xff]  }
 0x316   : > { %v7111_v52 = vpop.eup %5992  ;;  %6014 = vpow2.f32 %v1842_v36  ;;  %v1846_v60 = vmul.f32 1.442695, %v1764_v51  ;;  %v1848_v18 = vmul.f32 1.442695, %v1765_v28  ;;  %v1834_v3 = vmul.f32 1.442695, %v1758_v16  ;;  %1220 = vmatmul.mubr.bf16.gmra.mxu0 %v5896_v38 }
 0x317   : > { %v1980_v30 = vadd.f32 %v7111_v52, %v7108_v54  ;;  %v1673_v50 = vpop.xlane.xlu0 %1672  ;;  %v1664_v63 = vpop.xlane.xlu1 %1663  ;;  %6016 = vpow2.f32 %v1844_v33  ;;  %v1836_v23 = vmul.f32 1.442695, %v1759_v43  ;;  %1229 = vmatprep.mubr.bf16.mxu0 %v10180_v14 }
 0x318   : > { %v1754_v58 = vsub.f32 %v6914_v19, %v1664_v63  ;;  %6018 = vpow2.f32 %v1846_v60  ;;  %v1760_v33 = vsub.f32 %v6926_v15, %v1673_v50  ;;  %v1761_v19 = vsub.f32 %v6928_v22, %v1673_v50 }
 0x319   : > { %v7118_v17 = vpop.eup %5994  ;;  %1981 = vadd.xlane.f32.xlu1 %v1980_v30  ;;  %v1755_v30 = vsub.f32 %v6916_v8, %v1664_v63  ;;  %6020 = vpow2.f32 %v1848_v18  ;;  %v1713_v60 = vmax.f32 %v7008_v20, %v7010_v25 }
 0x31a   : > { %v7120_v41 = vpop.eup %5996  ;;  %6022 = vpow2.f32 %v1834_v3  ;;  %v1826_v63 = vmul.f32 1.442695, %v1754_v58  ;;  %v1838_v50 = vmul.f32 1.442695, %v1760_v33 }
 0x31b   : > { %v7122_v44 = vpop.eup %5998  ;;  %v1974_v0 = vadd.f32 %v7120_v41, %v7118_v17  ;;  %v1667_v31 = vpop.xlane.xlu0 %1666  ;;  %6024 = vpow2.f32 %v1836_v23  ;;  %v1828_v51 = vmul.f32 1.442695, %v1755_v30 }
 0x31c   : > { %v7126_v56 = vpop.eup %6000  ;;  %v1658_v27 = vpop.xlane.xlu1 %1657  ;;  %v1756_v16 = vsub.f32 %v6918_v5, %v1667_v31  ;;  %6026 = vpow2.f32 %v1826_v63 }
 0x31d   : > { %1717 = vmax.xlane.f32.xlu1 %v1716_v12  ;;  %v1983_v10 = vadd.f32 %v7126_v56, %v7122_v44  ;;  %v7136_v49 = vpop.eup %6002  ;;  %v1750_v12 = vsub.f32 %v6906_v46, %v1658_v27  ;;  %v1751_v28 = vsub.f32 %v6908_v47, %v1658_v27  ;;  %v1757_v46 = vsub.f32 %v6920_v9, %v1667_v31 }
 0x31e   : > { %v7140_v48 = vpop.eup %6004  ;;  %6028 = vpow2.f32 %v1828_v51  ;;  %v1704_v9 = vmax.f32 %v6984_v11, %v6986_v40  ;;  %v1830_v58 = vmul.f32 1.442695, %v1756_v16  ;;  %v10210_v51 = vld [vmem:[#allocation55_spill] sm:$0xff]  ;;  %v10213_v16 = vld [vmem:[#allocation50_spill] sm:$0xff] }
 0x31f   : > { %1984 = vadd.xlane.f32.xlu0 %v1983_v10  ;;  %v7143_v1 = vpop.eup %6006  ;;  %v1977_v8 = vadd.f32 %v7140_v48, %v7136_v49  ;;  %v1661_v10 = vpop.xlane.xlu0 %1660  ;;  %v1818_v47 = vmul.f32 1.442695, %v1750_v12  ;;  %v1820_v3 = vmul.f32 1.442695, %v1751_v28  ;;  %6030 = vpow2.f32 %v1838_v50  ;;  %v10211_v28 = vld [vmem:[#allocation54_spill] sm:$0xff]  ;;  %v10212_v50 = vld [vmem:[#allocation51_spill] sm:$0xff] }
 0x320   : > { %v7151_v36 = vpop.eup %6008  ;;  %v1652_v15 = vpop.xlane.xlu1 %1651  ;;  %v1752_v23 = vsub.f32 %v6910_v26, %v1661_v10  ;;  %v1832_v30 = vmul.f32 1.442695, %v1757_v46 }
 0x321   : > { %1975 = vadd.xlane.f32.xlu1 %v1974_v0  ;;  %v1968_v22 = vadd.f32 %v7151_v36, %v7143_v1  ;;  %v7163_v43 = vpop.eup %6010  ;;  %v1840_v0 = vmul.f32 1.442695, %v1761_v19  ;;  %v1746_v27 = vsub.f32 %v6898_v34, %v1652_v15  ;;  %v1747_v5 = vsub.f32 %v6900_v37, %v1652_v15 }
 0x322   : > { %v7168_v18 = vpop.eup %6012  ;;  %v1753_v34 = vsub.f32 %v6912_v13, %v1661_v10  ;;  %v1707_v10 = vmax.f32 %v10211_v28, %v10210_v51 }
 0x323   : > { %1720 = vmax.xlane.f32.xlu0 %v1719_v57  ;;  %v7171_v57 = vpop.eup %6014  ;;  %6032 = vpow2.f32 %v1840_v0  ;;  %v1971_v38 = vadd.f32 %v7168_v18, %v7163_v43  ;;  %v1810_v37 = vmul.f32 1.442695, %v1746_v27  ;;  %v1812_v33 = vmul.f32 1.442695, %v1747_v5 }
 0x324   : > { %v7176_v31 = vpop.eup %6016  ;;  %6034 = vpow2.f32 %v1818_v47  ;;  %v1824_v13 = vmul.f32 1.442695, %v1753_v34  ;;  %v5897_v47 = vld [vmem:[%s9969_s2 + $0x98] sm:$0xff]  }
 0x325   : > { %1711 = vmax.xlane.f32.xlu1 %v1710_v53  ;;  %v1655_v53 = vpop.xlane.xlu0 %1654  ;;  %6036 = vpow2.f32 %v1820_v3  ;;  %v1962_v19 = vadd.f32 %v7176_v31, %v7171_v57  ;;  %v7185_v63 = vpop.eup %6018  ;;  %1230 = vmatmul.mubr.bf16.gmra.mxu0 %v5897_v47 }
 0x326   : > { %6038 = vpow2.f32 %v1830_v58  ;;  %v1748_v26 = vsub.f32 %v6902_v39, %v1655_v53  ;;  %v1749_v12 = vsub.f32 %v6904_v45, %v1655_v53  ;;  %v7190_v15 = vpop.eup %6020  ;;  %v1698_v39 = vmax.f32 %v10213_v16, %v10212_v50  ;;  %1239 = vmatprep.mubr.bf16.mxu0 %v10180_v14  ;;  %v10215_v58 = vld [vmem:[#allocation53_spill] sm:$0xff] }
 0x327   : > { %1978 = vadd.xlane.f32.xlu0 %v1977_v8  ;;  %v1822_v8 = vmul.f32 1.442695, %v1752_v23  ;;  %6040 = vpow2.f32 %v1832_v30  ;;  %v10216_v23 = vld [vmem:[#allocation52_spill] sm:$0xff] }
 0x328   : > { %6042 = vpow2.f32 %v1810_v37  ;;  %v1814_v46 = vmul.f32 1.442695, %v1748_v26  ;;  %v1816_v45 = vmul.f32 1.442695, %v1749_v12  ;;  %v1701_v30 = vmax.f32 %v10216_v23, %v10215_v58 }
 0x329   : > { %1969 = vadd.xlane.f32.xlu1 %v1968_v22  ;;  %v7192_v22 = vpop.eup %6022  ;;  %6044 = vpow2.f32 %v1812_v33 }
 0x32a   : > { %v7196_v0 = vpop.eup %6024  ;;  %6046 = vpow2.f32 %v1822_v8 }
 0x32b   : > { %1714 = vmax.xlane.f32.xlu0 %v1713_v60  ;;  %6048 = vpow2.f32 %v1824_v13  ;;  %v1965_v60 = vadd.f32 %v7190_v15, %v7185_v63  ;;  %v7203_v27 = vpop.eup %6026  ;;  %v1956_v3 = vadd.f32 %v7196_v0, %v7192_v22 }
 0x32c   : > { %10214 = vst [vmem:[#allocation55_spill] sm:$0xff] %v7203_v27  ;;  %v7207_v5 = vpop.eup %6028  ;;  %6050 = vpow2.f32 %v1814_v46 }
 0x32d   : > { %1705 = vmax.xlane.f32.xlu1 %v1704_v9  ;;  %v7210_v9 = vpop.eup %6030  ;;  %6052 = vpow2.f32 %v1816_v45 }
 0x32f   : > { %1972 = vadd.xlane.f32.xlu0 %v1971_v38  ;;  %v1950_v38 = vadd.f32 %v7207_v5, %v7203_v27 }
 0x330   : > { %v7214_v34 = vpop.eup %6032 }
 0x331   : > { %1963 = vadd.xlane.f32.xlu1 %v1962_v19  ;;  %v7216_v53 = vpop.eup %6034  ;;  %v1959_v19 = vadd.f32 %v7214_v34, %v7210_v9 }
 0x332   : > { %10217 = vst [vmem:[#allocation54_spill] sm:$0xff] %v7216_v53  ;;  %v7220_v37 = vpop.eup %6036 }
 0x333   : > { %1708 = vmax.xlane.f32.xlu0 %v1707_v10  ;;  %10218 = vst [vmem:[#allocation51_spill] sm:$0xff] %v7220_v37  ;;  %v7222_v33 = vpop.eup %6038  ;;  %v1944_v13 = vadd.f32 %v7220_v37, %v7216_v53 }
 0x334   : > { %v7226_v8 = vpop.eup %6040 }
 0x335   : > { %1699 = vmax.xlane.f32.xlu1 %v1698_v39  ;;  %v7228_v26 = vpop.eup %6042  ;;  %v1953_v39 = vadd.f32 %v7226_v8, %v7222_v33 }
 0x336   : > { %10219 = vst [vmem:[#allocation50_spill] sm:$0xff] %v7228_v26  ;;  %v7232_v12 = vpop.eup %6044 }
 0x337   : > { %1966 = vadd.xlane.f32.xlu0 %v1965_v60  ;;  %10220 = vst [vmem:[#allocation53_spill] sm:$0xff] %v7232_v12  ;;  %v7234_v10 = vpop.eup %6046  ;;  %v1938_v60 = vadd.f32 %v7232_v12, %v7228_v26  ;;  %v10223_v12 = vld [vmem:[#allocation62_spill] sm:$0xff] }
 0x338   : > { %10221 = vst [vmem:[#allocation52_spill] sm:$0xff] %v7234_v10  ;;  %v7238_v46 = vpop.eup %6048 }
 0x339   : > { %1957 = vadd.xlane.f32.xlu1 %v1956_v3 }
 0x33b   : > { %1702 = vmax.xlane.f32.xlu0 %v1701_v30  ;;  %v7244_v30 = vpop.eup %6050 }
 0x33c   : > { %10222 = vst [vmem:[#allocation64_spill] sm:$0xff] %v7244_v30 }
 0x33d   : > { %1951 = vadd.xlane.f32.xlu1 %v1950_v38  ;;  %v1947_v38 = vadd.f32 %v7238_v46, %v7234_v10 }
 0x33f   : > { %1960 = vadd.xlane.f32.xlu0 %v1959_v19  ;;  %v7248_v19 = vpop.eup %6052 }
 0x341   : > { %1945 = vadd.xlane.f32.xlu1 %v1944_v13 }
 0x343   : > { %1954 = vadd.xlane.f32.xlu0 %v1953_v39  ;;  %v1742_v45 = vpop.xlane.xlu1 %1741 }
 0x344   : > { %v1806_v47 = vsub.f32 %v7050_v59, %v1742_v45  ;;  %v1807_v3 = vsub.f32 %v7052_v2, %v1742_v45 }
 0x345   : > { %1939 = vadd.xlane.f32.xlu1 %v1938_v60  ;;  %v1941_v60 = vadd.f32 %v7248_v19, %v7244_v30  ;;  %v10227_v30 = vld [vmem:[#allocation60_spill] sm:$0xff] }
 0x346   : > { %v1930_v13 = vmul.f32 1.442695, %v1806_v47  ;;  %v1932_v14 = vmul.f32 1.442695, %v1807_v3 }
 0x347   : > { %1948 = vadd.xlane.f32.xlu0 %v1947_v38  ;;  %v1736_v39 = vpop.xlane.xlu1 %1735  ;;  %v1745_v53 = vpop.xlane.xlu0 %1744 }
 0x348   : > { %6054 = vpow2.f32 %v1930_v13  ;;  %v1802_v26 = vsub.f32 %v7042_v32, %v1736_v39  ;;  %v1803_v59 = vsub.f32 %v10223_v12, %v1736_v39  ;;  %v1808_v2 = vsub.f32 %v7056_v35, %v1745_v53 }
 0x349   : > { %6056 = vpow2.f32 %v1932_v14  ;;  %v1809_v45 = vsub.f32 %v7060_v21, %v1745_v53  ;;  %v10224_v14 = vld [vmem:[#allocation63_spill] sm:$0xff] }
 0x34a   : > { %v1922_v10 = vmul.f32 1.442695, %v1802_v26  ;;  %v1924_v37 = vmul.f32 1.442695, %v1803_v59  ;;  %v1934_v47 = vmul.f32 1.442695, %v1808_v2 }
 0x34b   : > { %v1936_v3 = vmul.f32 1.442695, %v1809_v45  ;;  %1942 = vadd.xlane.f32.xlu0 %v1941_v60  ;;  %v1730_v38 = vpop.xlane.xlu1 %1729  ;;  %v1739_v27 = vpop.xlane.xlu0 %1738  ;;  %v10225_v45 = vld [vmem:[#allocation56_spill] sm:$0xff]  ;;  %v10226_v60 = vld [vmem:[#allocation57_spill] sm:$0xff] }
 0x34c   : > { %6058 = vpow2.f32 %v1922_v10  ;;  %v1798_v32 = vsub.f32 %v7034_v29, %v1730_v38  ;;  %v1799_v12 = vsub.f32 %v7036_v6, %v1730_v38  ;;  %v1804_v35 = vsub.f32 %v7046_v42, %v1739_v27  ;;  %v10228_v42 = vld [vmem:[#allocation61_spill] sm:$0xff] }
 0x34d   : > { %6060 = vpow2.f32 %v1924_v37  ;;  %v1805_v21 = vsub.f32 %v10224_v14, %v1739_v27  ;;  %v10230_v14 = vld [vmem:[#allocation59_spill] sm:$0xff] }
 0x34e   : > { %6062 = vpow2.f32 %v1934_v47  ;;  %v1914_v53 = vmul.f32 1.442695, %v1798_v32  ;;  %v1916_v13 = vmul.f32 1.442695, %v1799_v12  ;;  %v1926_v26 = vmul.f32 1.442695, %v1804_v35 }
 0x34f   : > { %6064 = vpow2.f32 %v1936_v3  ;;  %v1928_v39 = vmul.f32 1.442695, %v1805_v21  ;;  %v1724_v59 = vpop.xlane.xlu1 %1723  ;;  %v1733_v2 = vpop.xlane.xlu0 %1732  ;;  %v10229_v12 = vld [vmem:[#allocation58_spill] sm:$0xff] }
 0x350   : > { %6066 = vpow2.f32 %v1914_v53  ;;  %v1794_v10 = vsub.f32 %v10225_v45, %v1724_v59  ;;  %v1795_v29 = vsub.f32 %v10226_v60, %v1724_v59  ;;  %v1800_v6 = vsub.f32 %v10227_v30, %v1733_v2 }
 0x351   : > { %6068 = vpow2.f32 %v1916_v13  ;;  %v1801_v37 = vsub.f32 %v10228_v42, %v1733_v2 }
 0x352   : > { %6070 = vpow2.f32 %v1926_v26  ;;  %v1906_v27 = vmul.f32 1.442695, %v1794_v10  ;;  %v1908_v47 = vmul.f32 1.442695, %v1795_v29  ;;  %v1918_v38 = vmul.f32 1.442695, %v1800_v6 }
 0x353   : > { %6072 = vpow2.f32 %v1928_v39  ;;  %v1920_v32 = vmul.f32 1.442695, %v1801_v37  ;;  %v1727_v3 = vpop.xlane.xlu0 %1726 }
 0x354   : > { %6074 = vpow2.f32 %v1906_v27  ;;  %v1796_v35 = vsub.f32 %v10229_v12, %v1727_v3  ;;  %v1797_v21 = vsub.f32 %v10230_v14, %v1727_v3 }
 0x355   : > { %v7266_v53 = vpop.eup %6054  ;;  %6076 = vpow2.f32 %v1908_v47 }
 0x356   : > { %v7268_v59 = vpop.eup %6056  ;;  %6078 = vpow2.f32 %v1918_v38  ;;  %v1910_v30 = vmul.f32 1.442695, %v1796_v35  ;;  %v1912_v13 = vmul.f32 1.442695, %v1797_v21 }
 0x357   : > { %6080 = vpow2.f32 %v1920_v32  ;;  %v2028_v26 = vadd.f32 %v7268_v59, %v7266_v53 }
 0x358   : > { %6082 = vpow2.f32 %v1910_v30 }
 0x359   : > { %v7272_v39 = vpop.eup %6058  ;;  %6084 = vpow2.f32 %v1912_v13  ;;  %2029 = vadd.xlane.f32.xlu1 %v2028_v26 }
 0x35a   : > { %v7274_v2 = vpop.eup %6060 }
 0x35b   : > { %v7276_v45 = vpop.eup %6062  ;;  %v2022_v10 = vadd.f32 %v7274_v2, %v7272_v39 }
 0x35c   : > { %v7280_v60 = vpop.eup %6064 }
 0x35d   : > { %v7282_v29 = vpop.eup %6066  ;;  %2023 = vadd.xlane.f32.xlu1 %v2022_v10  ;;  %v2031_v6 = vadd.f32 %v7280_v60, %v7276_v45 }
 0x35e   : > { %10231 = vst [vmem:[#allocation62_spill] sm:$0xff] %v7282_v29  ;;  %v7286_v42 = vpop.eup %6068 }
 0x35f   : > { %10232 = vst [vmem:[#allocation63_spill] sm:$0xff] %v7286_v42  ;;  %v7288_v37 = vpop.eup %6070  ;;  %2032 = vadd.xlane.f32.xlu0 %v2031_v6  ;;  %v2016_v27 = vadd.f32 %v7286_v42, %v7282_v29 }
 0x360   : > { %v7292_v47 = vpop.eup %6072 }
 0x361   : > { %v7294_v38 = vpop.eup %6074  ;;  %2017 = vadd.xlane.f32.xlu1 %v2016_v27  ;;  %v2025_v32 = vadd.f32 %v7292_v47, %v7288_v37 }
 0x362   : > { %10233 = vst [vmem:[#allocation56_spill] sm:$0xff] %v7294_v38  ;;  %v7298_v3 = vpop.eup %6076 }
 0x363   : > { %10234 = vst [vmem:[#allocation57_spill] sm:$0xff] %v7298_v3  ;;  %v7300_v12 = vpop.eup %6078  ;;  %2026 = vadd.xlane.f32.xlu0 %v2025_v32  ;;  %v2010_v35 = vadd.f32 %v7298_v3, %v7294_v38 }
 0x364   : > { %10235 = vst [vmem:[#allocation60_spill] sm:$0xff] %v7300_v12  ;;  %v7304_v14 = vpop.eup %6080 }
 0x365   : > { %v7306_v21 = vpop.eup %6082  ;;  %2011 = vadd.xlane.f32.xlu1 %v2010_v35  ;;  %v2019_v30 = vadd.f32 %v7304_v14, %v7300_v12 }
 0x366   : > { %10236 = vst [vmem:[#allocation61_spill] sm:$0xff] %v7306_v21  ;;  %v7310_v13 = vpop.eup %6084 }
 0x367   : > { %10237 = vst [vmem:[#allocation58_spill] sm:$0xff] %v7310_v13  ;;  %2020 = vadd.xlane.f32.xlu0 %v2019_v30  ;;  %v2013_v26 = vadd.f32 %v7310_v13, %v7306_v21 }
 0x36b   : > { %2014 = vadd.xlane.f32.xlu0 %v2013_v26 }
 0x3a2   : > { %v1982_v10 = vpop.xlane.xlu1 %1981 }
 0x3a3   : > { %6086 = vrcp.f32 %v1982_v10 }
 0x3a6   : > { %v1718_v6 = vpop.xlane.xlu1 %1717 }
 0x3a7   : > { %v1790_v27 = vsub.f32 %v7016_v55, %v1718_v6  ;;  %v1791_v32 = vsub.f32 %v7018_v24, %v1718_v6 }
 0x3a8   : > { %v1985_v38 = vpop.xlane.xlu0 %1984 }
 0x3a9   : > { %v1898_v3 = vmul.f32 1.442695, %v1790_v27  ;;  %v1900_v35 = vmul.f32 1.442695, %v1791_v32  ;;  %6088 = vrcp.f32 %v1985_v38 }
 0x3aa   : > { %v1976_v29 = vpop.xlane.xlu1 %1975 }
 0x3ab   : > { %6090 = vpow2.f32 %v1898_v3 }
 0x3ac   : > { %6092 = vpow2.f32 %v1900_v35  ;;  %v1721_v12 = vpop.xlane.xlu0 %1720 }
 0x3ad   : > { %v1792_v30 = vsub.f32 %v7022_v4, %v1721_v12  ;;  %v1793_v21 = vsub.f32 %v7024_v7, %v1721_v12  ;;  %6094 = vrcp.f32 %v1976_v29 }
 0x3ae   : > { %v1712_v26 = vpop.xlane.xlu1 %1711 }
 0x3af   : > { %v1902_v13 = vmul.f32 1.442695, %v1792_v30  ;;  %v1904_v10 = vmul.f32 1.442695, %v1793_v21  ;;  %v1786_v42 = vsub.f32 %v7000_v62, %v1712_v26  ;;  %v1787_v55 = vsub.f32 %v7002_v61, %v1712_v26 }
 0x3b0   : > { %v1979_v24 = vpop.xlane.xlu0 %1978  ;;  %v6087_v27 = vpop.eup %6086 }
 0x3b1   : > { %6096 = vpow2.f32 %v1902_v13  ;;  %v1890_v6 = vmul.f32 1.442695, %v1786_v42  ;;  %v1892_v38 = vmul.f32 1.442695, %v1787_v55  ;;  %v2095_v61 = vmul.f32 %v6087_v27, %v7111_v52 }
 0x3b2   : > { %6098 = vpow2.f32 %v1904_v10  ;;  %v1970_v3 = vpop.xlane.xlu1 %1969 }
 0x3b3   : > { %6100 = vpow2.f32 %v1890_v6 }
 0x3b4   : > { %6102 = vpow2.f32 %v1892_v38  ;;  %v1715_v4 = vpop.xlane.xlu0 %1714 }
 0x3b5   : > { %6104 = vrcp.f32 %v1979_v24  ;;  %v1788_v7 = vsub.f32 %v7008_v20, %v1715_v4  ;;  %v1789_v12 = vsub.f32 %v7010_v25, %v1715_v4  ;;  %v2094_v20 = vmul.f32 %v6087_v27, %v7108_v54 }
 0x3b6   : > { %v6089_v21 = vpop.eup %6088  ;;  %v1706_v62 = vpop.xlane.xlu1 %1705  ;;  %6106 = vrcp.f32 %v1970_v3 }
 0x3b7   : > { %v1894_v29 = vmul.f32 1.442695, %v1788_v7  ;;  %v1896_v32 = vmul.f32 1.442695, %v1789_v12  ;;  %v1782_v42 = vsub.f32 %v6984_v11, %v1706_v62  ;;  %v1783_v13 = vsub.f32 %v6986_v40, %v1706_v62 }
 0x3b8   : > { %v7325_v35 = vpop.eup %6090  ;;  %v1973_v30 = vpop.xlane.xlu0 %1972  ;;  %v2097_v26 = vmul.f32 %v6089_v21, %v7126_v56  ;;  %v2096_v25 = vmul.f32 %v6089_v21, %v7122_v44 }
 0x3b9   : > { %v7330_v10 = vpop.eup %6092  ;;  %6108 = vpow2.f32 %v1894_v29  ;;  %v1882_v52 = vmul.f32 1.442695, %v1782_v42  ;;  %v1884_v55 = vmul.f32 1.442695, %v1783_v13 }
 0x3ba   : > { %6110 = vpow2.f32 %v1896_v32  ;;  %v2145_v24 = vpack.c.bf16 %v2097_v26, %v2095_v61  ;;  %v1964_v11 = vpop.xlane.xlu1 %1963  ;;  %v2144_v6 = vpack.c.bf16 %v2096_v25, %v2094_v20  ;;  %v2004_v40 = vadd.f32 %v7330_v10, %v7325_v35  ;;  %v6095_v54 = vpop.eup %6094 }
 0x3bb   : > { %6112 = vpow2.f32 %v1882_v52  ;;  %v2090_v20 = vmul.f32 %v6095_v54, %v7118_v17 }
 0x3bc   : > { %6114 = vpow2.f32 %v1884_v55  ;;  %2162 = vmatprep.subr.bf16.mxu1 %v2145_v24  ;;  %v1709_v56 = vpop.xlane.xlu0 %1708  ;;  %2005 = vadd.xlane.f32.xlu1 %v2004_v40 }
 0x3bd   : > { %6116 = vrcp.f32 %v1973_v30  ;;  %2163 = vmatpush1.bf16.xpose.msra.mxu1 %v2144_v6  ;;  %v1784_v44 = vsub.f32 %v10211_v28, %v1709_v56  ;;  %v1785_v38 = vsub.f32 %v10210_v51, %v1709_v56  ;;  %v2091_v30 = vmul.f32 %v6095_v54, %v7120_v41 }
 0x3be   : > { %v7336_v3 = vpop.eup %6096  ;;  %v1700_v27 = vpop.xlane.xlu1 %1699  ;;  %6118 = vrcp.f32 %v1964_v11 }
 0x3bf   : > { %v7338_v4 = vpop.eup %6098  ;;  %v1886_v7 = vmul.f32 1.442695, %v1784_v44  ;;  %v1888_v12 = vmul.f32 1.442695, %v1785_v38  ;;  %v1778_v21 = vsub.f32 %v10213_v16, %v1700_v27  ;;  %v1779_v62 = vsub.f32 %v10212_v50, %v1700_v27 }
 0x3c0   : > { %v7342_v61 = vpop.eup %6100  ;;  %v1967_v29 = vpop.xlane.xlu0 %1966  ;;  %v2007_v28 = vadd.f32 %v7338_v4, %v7336_v3 }
 0x3c1   : > { %v7346_v32 = vpop.eup %6102  ;;  %6120 = vpow2.f32 %v1886_v7  ;;  %v1874_v51 = vmul.f32 1.442695, %v1778_v21  ;;  %v1876_v42 = vmul.f32 1.442695, %v1779_v62 }
 0x3c2   : > { %v6105_v13 = vpop.eup %6104  ;;  %6122 = vpow2.f32 %v1888_v12  ;;  %2008 = vadd.xlane.f32.xlu0 %v2007_v28  ;;  %v1958_v16 = vpop.xlane.xlu1 %1957  ;;  %v1998_v50 = vadd.f32 %v7346_v32, %v7342_v61 }
 0x3c3   : > { %6124 = vpow2.f32 %v1874_v51  ;;  %v2093_v26 = vmul.f32 %v6105_v13, %v7140_v48  ;;  %v2092_v25 = vmul.f32 %v6105_v13, %v7136_v49  ;;  %v6107_v55 = vpop.eup %6106 }
 0x3c4   : > { %6126 = vpow2.f32 %v1876_v42  ;;  %v1703_v52 = vpop.xlane.xlu0 %1702  ;;  %1999 = vadd.xlane.f32.xlu1 %v1998_v50  ;;  %v2086_v21 = vmul.f32 %v6107_v55, %v7143_v1 }
 0x3c5   : > { %6128 = vrcp.f32 %v1967_v29  ;;  %v2143_v24 = vpack.c.bf16 %v2093_v26, %v2091_v30  ;;  %v2142_v11 = vpack.c.bf16 %v2092_v25, %v2090_v20  ;;  %v1780_v41 = vsub.f32 %v10216_v23, %v1703_v52 }
 0x3c6   : > { %v7355_v6 = vpop.eup %6108  ;;  %v1781_v40 = vsub.f32 %v10215_v58, %v1703_v52  ;;  %v1952_v56 = vpop.xlane.xlu1 %1951  ;;  %6130 = vrcp.f32 %v1958_v16  ;;  %v2087_v58 = vmul.f32 %v6107_v55, %v7151_v36 }
 0x3c7   : > { %v7358_v44 = vpop.eup %6110  ;;  %2164 = vmatprep.subr.bf16.mxu1 %v2143_v24  ;;  %v1878_v17 = vmul.f32 1.442695, %v1780_v41  ;;  %6132 = vrcp.f32 %v1952_v56 }
 0x3c8   : > { %v7360_v49 = vpop.eup %6112  ;;  %2165 = vmatpush1.bf16.xpose.msra.mxu1 %v2142_v11  ;;  %v1880_v48 = vmul.f32 1.442695, %v1781_v40  ;;  %v1961_v54 = vpop.xlane.xlu0 %1960  ;;  %v2001_v38 = vadd.f32 %v7358_v44, %v7355_v6 }
 0x3c9   : > { %v7364_v23 = vpop.eup %6114  ;;  %6134 = vpow2.f32 %v1878_v17 }
 0x3ca   : > { %v6117_v27 = vpop.eup %6116  ;;  %6136 = vpow2.f32 %v1880_v48  ;;  %2002 = vadd.xlane.f32.xlu0 %v2001_v38  ;;  %v1992_v7 = vadd.f32 %v7364_v23, %v7360_v49  ;;  %v1946_v50 = vpop.xlane.xlu1 %1945 }
 0x3cb   : > { %6138 = vrcp.f32 %v1961_v54  ;;  %v2089_v12 = vmul.f32 %v6117_v27, %v7168_v18  ;;  %v2088_v62 = vmul.f32 %v6117_v27, %v7163_v43  ;;  %v6119_v28 = vpop.eup %6118 }
 0x3cc   : > { %v1955_v29 = vpop.xlane.xlu0 %1954  ;;  %1993 = vadd.xlane.f32.xlu1 %v1992_v7  ;;  %v2083_v26 = vmul.f32 %v6119_v28, %v7176_v31  ;;  %v2082_v52 = vmul.f32 %v6119_v28, %v7171_v57 }
 0x3cd   : > { %v2141_v51 = vpack.c.bf16 %v2089_v12, %v2087_v58  ;;  %v2140_v42 = vpack.c.bf16 %v2088_v62, %v2086_v21  ;;  %6140 = vrcp.f32 %v1955_v29 }
 0x3ce   : > { %v7372_v13 = vpop.eup %6120  ;;  %v1940_v27 = vpop.xlane.xlu1 %1939 }
 0x3cf   : > { %v7374_v30 = vpop.eup %6122  ;;  %2166 = vmatprep.subr.bf16.mxu1 %v2141_v51 }
 0x3d0   : > { %v7376_v36 = vpop.eup %6124  ;;  %2167 = vmatpush1.bf16.xpose.msra.mxu1 %v2140_v42  ;;  %v1949_v16 = vpop.xlane.xlu0 %1948  ;;  %v1995_v1 = vadd.f32 %v7374_v30, %v7372_v13 }
 0x3d1   : > { %v7380_v18 = vpop.eup %6126  ;;  %6142 = vrcp.f32 %v1949_v16 }
 0x3d2   : > { %v6129_v43 = vpop.eup %6128  ;;  %1996 = vadd.xlane.f32.xlu0 %v1995_v1  ;;  %v1986_v20 = vadd.f32 %v7380_v18, %v7376_v36  ;;  %6144 = vrcp.f32 %v1946_v50 }
 0x3d3   : > { %v2085_v25 = vmul.f32 %v6129_v43, %v7190_v15  ;;  %v2084_v55 = vmul.f32 %v6129_v43, %v7185_v63  ;;  %v6131_v24 = vpop.eup %6130  ;;  %v609_v43 = vld [vmem:[%s9970_s3 + $0x110] sm:$0xff] }
 0x3d4   : > { %1987 = vadd.xlane.f32.xlu1 %v1986_v20  ;;  %v6133_v11 = vpop.eup %6132  ;;  %v1943_v48 = vpop.xlane.xlu0 %1942  ;;  %v2079_v57 = vmul.f32 %v6131_v24, %v7196_v0  ;;  %v2078_v58 = vmul.f32 %v6131_v24, %v7192_v22  ;;  %v607_v22 = vld [vmem:[%s9970_s3 + $0x100] sm:$0xff] }
 0x3d5   : > { %v2139_v41 = vpack.c.bf16 %v2085_v25, %v2083_v26  ;;  %v2138_v40 = vpack.c.bf16 %v2084_v55, %v2082_v52  ;;  %6146 = vrcp.f32 %v1943_v48  ;;  %v2075_v12 = vmul.f32 %v6133_v11, %v7207_v5  ;;  %v10238_v5 = vld [vmem:[#allocation55_spill] sm:$0xff]  ;;  %v10240_v25 = vld [vmem:[#allocation52_spill] sm:$0xff]  ;;  %v610_v55 = vld [vmem:[%s9970_s3 + $0x118] sm:$0xff] }
 0x3d6   : > { %v7388_v56 = vpop.eup %6134  ;;  %6148 = vrcp.f32 %v1940_v27  ;;  %v2074_v42 = vmul.f32 %v6133_v11, %v10238_v5  ;;  %v10241_v11 = vld [vmem:[#allocation54_spill] sm:$0xff] }
 0x3d7   : > { %v7390_v17 = vpop.eup %6136  ;;  %2168 = vmatprep.subr.bf16.mxu1 %v2139_v41 }
 0x3d8   : > { %v6139_v31 = vpop.eup %6138  ;;  %2169 = vmatpush1.bf16.xpose.msra.mxu1 %v2138_v40  ;;  %v1989_v15 = vadd.f32 %v7390_v17, %v7388_v56 }
 0x3d9   : > { %v2081_v63 = vmul.f32 %v6139_v31, %v7214_v34  ;;  %v2080_v54 = vmul.f32 %v6139_v31, %v7210_v9  ;;  %v10242_v31 = vld [vmem:[#allocation53_spill] sm:$0xff] }
 0x3da   : > { %v6141_v38 = vpop.eup %6140  ;;  %1990 = vadd.xlane.f32.xlu0 %v1989_v15  ;;  %v608_v15 = vld [vmem:[%s9970_s3 + $0x108] sm:$0xff] }
 0x3db   : > { %v2137_v7 = vpack.c.bf16 %v2081_v63, %v2079_v57  ;;  %v2077_v21 = vmul.f32 %v6141_v38, %v7226_v8  ;;  %v2136_v62 = vpack.c.bf16 %v2080_v54, %v2078_v58  ;;  %v2076_v28 = vmul.f32 %v6141_v38, %v7222_v33  ;;  %v10239_v8 = vld [vmem:[#allocation51_spill] sm:$0xff]  ;;  %v611_v38 = vld [vmem:[%s9970_s3 + $0x120] sm:$0xff]  ;;  %v10243_v58 = vld [vmem:[#allocation64_spill] sm:$0xff] }
 0x3dc   : > { %v612_v63 = vld [vmem:[%s9970_s3 + $0x128] sm:$0xff] }
 0x3dd   : > { %2170 = vmatprep.subr.bf16.mxu1 %v2137_v7  ;;  %v2135_v29 = vpack.c.bf16 %v2077_v21, %v2075_v12  ;;  %v2134_v1 = vpack.c.bf16 %v2076_v28, %v2074_v42  ;;  %v606_v12 = vld [vmem:[%s9970_s3 + $0xf8] sm:$0xff]  ;;  %v604_v28 = vld [vmem:[%s9970_s3 + $0xe8] sm:$0xff] }
 0x3de   : > { %v6143_v0 = vpop.eup %6142 }
 0x3df   : > { %v6145_v34 = vpop.eup %6144  ;;  %v2073_v51 = vmul.f32 %v6143_v0, %v7238_v46  ;;  %v2072_v52 = vmul.f32 %v6143_v0, %v10240_v25  ;;  %v605_v0 = vld [vmem:[%s9970_s3 + $0xf0] sm:$0xff] }
 0x3e0   : > { %2171 = vmatpush1.bf16.xpose.msra.mxu1 %v2136_v62  ;;  %v2071_v16 = vmul.f32 %v6145_v34, %v10239_v8  ;;  %v2070_v41 = vmul.f32 %v6145_v34, %v10241_v11  ;;  %v10244_v62 = vld [vmem:[#allocation50_spill] sm:$0xff] }
 0x3e1   : > { %2172 = vmatprep.subr.bf16.mxu1 %v2135_v29 }
 0x3e2   : > { %v2030_v9 = vpop.xlane.xlu1 %2029  ;;  %v2133_v50 = vpack.c.bf16 %v2073_v51, %v2071_v16  ;;  %v6147_v26 = vpop.eup %6146  ;;  %v2132_v57 = vpack.c.bf16 %v2072_v52, %v2070_v41  ;;  %v603_v16 = vld [vmem:[%s9970_s3 + $0xe0] sm:$0xff]  ;;  %v10245_v41 = vld [vmem:[#allocation63_spill] sm:$0xff] }
 0x3e3   : > { %6150 = vrcp.f32 %v2030_v9  ;;  %v6149_v46 = vpop.eup %6148  ;;  %v2069_v24 = vmul.f32 %v6147_v26, %v7248_v19  ;;  %v2068_v7 = vmul.f32 %v6147_v26, %v10243_v58 }
 0x3e4   : > { %v2067_v48 = vmul.f32 %v6149_v46, %v10242_v31  ;;  %v2066_v29 = vmul.f32 %v6149_v46, %v10244_v62  ;;  %v599_v31 = vld [vmem:[%s9970_s3 + $0xc0] sm:$0xff]  ;;  %v10252_v62 = vld [vmem:[#allocation37_spill] sm:$0xff] }
 0x3e5   : > { %785 = vperm.xlu1 %5877, %v607_v22  }
 0x3e6   : > { %v2024_v33 = vpop.xlane.xlu1 %2023  ;;  %v2131_v54 = vpack.c.bf16 %v2069_v24, %v2067_v48  ;;  %v2130_v9 = vpack.c.bf16 %v2068_v7, %v2066_v29  ;;  %v7475_v7 = vpop.f32.mrf.mxu0 }
 0x3e8   : > { %2173 = vmatpush1.bf16.xpose.msra.mxu1 %v2134_v1  ;;  %v2033_v20 = vpop.xlane.xlu0 %2032 }
 0x3e9   : > { %2174 = vmatprep.subr.bf16.mxu1 %v2133_v50  ;;  %6152 = vrcp.f32 %v2033_v20  ;;  %795 = vperm.xlu1 %5877, %v609_v43   ;;  %v613_v20 = vld [vmem:[%s9970_s3 + $0x130] sm:$0xff] }
 0x3ea   : > { %6154 = vrcp.f32 %v2024_v33  ;;  %v2018_v27 = vpop.xlane.xlu1 %2017 }
 0x3ec   : > { %v2027_v40 = vpop.xlane.xlu0 %2026 }
 0x3ed   : > { %6156 = vrcp.f32 %v2027_v40  ;;  %800 = vperm.xlu1 %5877, %v610_v55   ;;  %v600_v55 = vld [vmem:[%s9970_s3 + $0xc8] sm:$0xff] }
 0x3ee   : > { %v2012_v50 = vpop.xlane.xlu1 %2011 }
 0x3f0   : > { %2175 = vmatpush1.bf16.xpose.msra.mxu1 %v2132_v57  ;;  %790 = vperm.xlu0 %5876, %v608_v15   ;;  %v2021_v19 = vpop.xlane.xlu0 %2020  ;;  %v6151_v21 = vpop.eup %6150 }
 0x3f1   : > { %2176 = vmatprep.subr.bf16.mxu1 %v2131_v54  ;;  %810 = vperm.xlu1 %5877, %v612_v63   ;;  %6158 = vrcp.f32 %v2021_v19  ;;  %v2127_v22 = vmul.f32 %v6151_v21, %v7268_v59  ;;  %v2126_v26 = vmul.f32 %v6151_v21, %v7266_v53  ;;  %v614_v59 = vld [vmem:[%s9970_s3 + $0x138] sm:$0xff]  ;;  %v10247_v63 = vld [vmem:[#allocation60_spill] sm:$0xff]  ;;  %v10248_v54 = vld [vmem:[#allocation58_spill] sm:$0xff] }
 0x3f2   : > { %6160 = vrcp.f32 %v2018_v27  ;;  %v602_v53 = vld [vmem:[%s9970_s3 + $0xd8] sm:$0xff]  ;;  %v10250_v27 = vld [vmem:[#allocation62_spill] sm:$0xff] }
 0x3f4   : > { %805 = vperm.xlu0 %5876, %v611_v38   ;;  %v2015_v42 = vpop.xlane.xlu0 %2014  ;;  %v10249_v38 = vld [vmem:[#allocation34_spill] sm:$0xff] }
 0x3f5   : > { %780 = vperm.xlu1 %5877, %v606_v12   ;;  %6162 = vrcp.f32 %v2015_v42  ;;  %v10251_v12 = vld [vmem:[#allocation57_spill] sm:$0xff]  ;;  %v10257_v42 = vld [vmem:[#allocation56_spill] sm:$0xff] }
 0x3f6   : > { %v6153_v34 = vpop.eup %6152  ;;  %6164 = vrcp.f32 %v2012_v50  ;;  %v10259_v50 = vld [vmem:[#allocation40_spill] sm:$0xff] }
 0x3f7   : > { %v2129_v51 = vmul.f32 %v6153_v34, %v7280_v60  ;;  %v6155_v5 = vpop.eup %6154  ;;  %v2128_v8 = vmul.f32 %v6153_v34, %v7276_v45  ;;  %v10253_v34 = vld [vmem:[#allocation36_spill] sm:$0xff] }
 0x3f8   : > { %2177 = vmatpush1.bf16.xpose.msra.mxu1 %v2130_v9  ;;  %775 = vperm.xlu0 %5876, %v605_v0   ;;  %v2123_v60 = vmul.f32 %v6155_v5, %v7274_v2  ;;  %v601_v2 = vld [vmem:[%s9970_s3 + $0xd0] sm:$0xff]  ;;  %v2122_v11 = vmul.f32 %v6155_v5, %v7272_v39  ;;  %v7482_v9 = vpop.f32.mrf.mxu0  ;;  %v10256_v5 = vld [vmem:[#allocation38_spill] sm:$0xff] }
 0x3f9   : > { %770 = vperm.xlu1 %5877, %v604_v28   ;;  %v2161_v1 = vpack.c.bf16 %v2129_v51, %v2127_v22  ;;  %v2160_v33 = vpack.c.bf16 %v2128_v8, %v2126_v26  ;;  %v10254_v28 = vld [vmem:[#allocation39_spill] sm:$0xff]  ;;  %v10255_v22 = vld [vmem:[#allocation61_spill] sm:$0xff] }
 0x3fa   : > { %v6157_v43 = vpop.eup %6156 }
 0x3fb   : > { %2178 = vmatprep.subr.bf16.mxu1 %v2161_v1  ;;  %v2125_v45 = vmul.f32 %v6157_v43, %v7292_v47  ;;  %v2124_v52 = vmul.f32 %v6157_v43, %v7288_v37  ;;  %v10246_v37 = vld [vmem:[#allocation35_spill] sm:$0xff]  ;;  %v10258_v1 = vld [vmem:[#allocation41_spill] sm:$0xff] }
 0x3fc   : > { %765 = vperm.xlu0 %5876, %v603_v16   ;;  %v7490_v16 = vpop.f32.mrf.mxu0 }
 0x3fd   : > { %820 = vperm.xlu1 %5877, %v614_v59   ;;  %v2159_v46 = vpack.c.bf16 %v2125_v45, %v2123_v60  ;;  %v2158_v48 = vpack.c.bf16 %v2124_v52, %v2122_v11  ;;  %v10260_v59 = vld [vmem:[#allocation43_spill] sm:$0xff]  ;;  %v10261_v60 = vld [vmem:[#allocation42_spill] sm:$0xff]  ;;  %v10267_v52 = vld [vmem:[#allocation48_spill] sm:$0xff] }
 0x3fe   : > { %v6159_v25 = vpop.eup %6158  ;;  %v7496_v26 = vpop.f32.mrf.mxu0 }
 0x3ff   : > { %v6161_v47 = vpop.eup %6160  ;;  %v2121_v24 = vmul.f32 %v6159_v25, %v7304_v14  ;;  %v2120_v39 = vmul.f32 %v6159_v25, %v10247_v63  ;;  %v10265_v25 = vld [vmem:[#allocation46_spill] sm:$0xff] }
 0x400   : > { %2179 = vmatpush2.bf16.xpose.msra.mxu1 %v2160_v33  ;;  %815 = vperm.xlu0 %5876, %v613_v20   ;;  %v2119_v40 = vmul.f32 %v6161_v47, %v10245_v41  ;;  %v2118_v58 = vmul.f32 %v6161_v47, %v10250_v27  ;;  %v7502_v45 = vpop.f32.mrf.mxu0  ;;  %v10262_v33 = vld [vmem:[#allocation45_spill] sm:$0xff]  ;;  %v10263_v20 = vld [vmem:[#allocation44_spill] sm:$0xff] }
 0x401   : > { %2180 = vmatprep.subr.bf16.mxu1 %v2159_v46  ;;  %760 = vperm.xlu1 %5877, %v602_v53   ;;  %v10264_v53 = vld [vmem:[#allocation47_spill] sm:$0xff]  ;;  %v10266_v47 = vld [vmem:[#allocation49_spill] sm:$0xff] }
 0x402   : > { %v2157_v15 = vpack.c.bf16 %v2121_v24, %v2119_v40  ;;  %v6163_v57 = vpop.eup %6162  ;;  %v2156_v29 = vpack.c.bf16 %v2120_v39, %v2118_v58  ;;  %v7508_v46 = vpop.f32.mrf.mxu0 }
 0x403   : > { %v6165_v14 = vpop.eup %6164  ;;  %v2117_v19 = vmul.f32 %v6163_v57, %v10248_v54  ;;  %v2116_v51 = vmul.f32 %v6163_v57, %v10255_v22 }
 0x404   : > { %755 = vperm.xlu0 %5876, %v601_v2   ;;  %v2115_v21 = vmul.f32 %v6165_v14, %v10251_v12  ;;  %v2114_v8 = vmul.f32 %v6165_v14, %v10257_v42  ;;  %v7514_v2 = vpop.f32.mrf.mxu0 }
 0x405   : > { %750 = vperm.xlu1 %5877, %v600_v55  }
 0x406   : > { %v2155_v0 = vpack.c.bf16 %v2117_v19, %v2115_v21  ;;  %v2154_v43 = vpack.c.bf16 %v2116_v51, %v2114_v8  ;;  %v7520_v55 = vpop.f32.mrf.mxu0 }
 0x408   : > { %2181 = vmatpush2.bf16.xpose.msra.mxu1 %v2158_v48  ;;  %745 = vperm.xlu0 %5876, %v599_v31   ;;  %v7522_v24 = vpop.f32.mrf.mxu0 }
 0x409   : > { %2182 = vmatprep.subr.bf16.mxu1 %v2157_v15  ;;  %2269 = vrot.lane.b32.xlu1 %v10246_v37, %s6387_s16 }
 0x40a   : > { %v7524_v11 = vpop.f32.mrf.mxu0 }
 0x40c   : > { %2267 = vrot.lane.b32.xlu0 %v10249_v38, %s6387_s16  ;;  %v7526_v41 = vpop.f32.mrf.mxu0 }
 0x40d   : > { %2273 = vrot.lane.b32.xlu1 %v10252_v62, %s6387_s16 }
 0x40e   : > { %v7528_v40 = vpop.f32.mrf.mxu0 }
 0x410   : > { %2183 = vmatpush2.bf16.xpose.msra.mxu1 %v2156_v29  ;;  %2271 = vrot.lane.b32.xlu0 %v10253_v34, %s6387_s16  ;;  %v7530_v31 = vpop.f32.mrf.mxu0 }
 0x411   : > { %2184 = vmatprep.subr.bf16.mxu1 %v2155_v0  ;;  %2277 = vrot.lane.b32.xlu1 %v10254_v28, %s6387_s16 }
 0x412   : > { %v7532_v48 = vpop.f32.mrf.mxu0 }
 0x414   : > { %2275 = vrot.lane.b32.xlu0 %v10256_v5, %s6387_s16  ;;  %v7534_v15 = vpop.f32.mrf.mxu0 }
 0x415   : > { %2281 = vrot.lane.b32.xlu1 %v10258_v1, %s6387_s16 }
 0x416   : > { %v7536_v37 = vpop.f32.mrf.mxu0 }
 0x418   : > { %2185 = vmatpush2.bf16.xpose.msra.mxu1 %v2154_v43  ;;  %2279 = vrot.lane.b32.xlu0 %v10259_v50, %s6387_s16  ;;  %v7538_v63 = vpop.f32.mrf.mxu0 }
 0x419   : > { %2285 = vrot.lane.b32.xlu1 %v10260_v59, %s6387_s16 }
 0x41a   : > { %v1203_v54 = vpop.f32.mrf.mxu0 }
 0x41c   : > { %2283 = vrot.lane.b32.xlu0 %v10261_v60, %s6387_s16  ;;  %v7540_v38 = vpop.f32.mrf.mxu0 }
 0x41d   : > { %2289 = vrot.lane.b32.xlu1 %v10262_v33, %s6387_s16 }
 0x41e   : > { %v1207_v12 = vpop.f32.mrf.mxu0 }
 0x420   : > { %2287 = vrot.lane.b32.xlu0 %v10263_v20, %s6387_s16  ;;  %v7546_v5 = vpop.f32.mrf.mxu0 }
 0x421   : > { %2293 = vrot.lane.b32.xlu1 %v10264_v53, %s6387_s16 }
 0x422   : > { %v7548_v1 = vpop.f32.mrf.mxu0 }
 0x424   : > { %2291 = vrot.lane.b32.xlu0 %v10265_v25, %s6387_s16  ;;  %v7554_v60 = vpop.f32.mrf.mxu0 }
 0x425   : > { %2297 = vrot.lane.b32.xlu1 %v10266_v47, %s6387_s16 }
 0x426   : > { %v1217_v47 = vpop.f32.mrf.mxu0 }
 0x428   : > { %2295 = vrot.lane.b32.xlu0 %v10267_v52, %s6387_s16 }
 0x445   : > { %v2006_v57 = vpop.xlane.xlu1 %2005 }
 0x446   : > { %6166 = vrcp.f32 %v2006_v57 }
 0x44b   : > { %v2009_v14 = vpop.xlane.xlu0 %2008 }
 0x44c   : > { %6168 = vrcp.f32 %v2009_v14 }
 0x44d   : > { %v2000_v39 = vpop.xlane.xlu1 %1999 }
 0x44e   : > { %6170 = vrcp.f32 %v2000_v39 }
 0x453   : > { %v2003_v19 = vpop.xlane.xlu0 %2002  ;;  %v6167_v27 = vpop.eup %6166 }
 0x454   : > { %6172 = vrcp.f32 %v2003_v19  ;;  %v2111_v62 = vmul.f32 %v6167_v27, %v7330_v10  ;;  %v2110_v0 = vmul.f32 %v6167_v27, %v7325_v35  ;;  %v7562_v19 = vpop.f32.mrf.mxu0 }
 0x455   : > { %v1994_v58 = vpop.xlane.xlu1 %1993 }
 0x456   : > { %6174 = vrcp.f32 %v1994_v58 }
 0x459   : > { %v6169_v21 = vpop.eup %6168 }
 0x45a   : > { %v2113_v29 = vmul.f32 %v6169_v21, %v7338_v4  ;;  %v2112_v34 = vmul.f32 %v6169_v21, %v7336_v3 }
 0x45b   : > { %v1997_v28 = vpop.xlane.xlu0 %1996  ;;  %v6171_v8 = vpop.eup %6170 }
 0x45c   : > { %6176 = vrcp.f32 %v1997_v28  ;;  %v2153_v22 = vpack.c.bf16 %v2113_v29, %v2111_v62  ;;  %v2152_v51 = vpack.c.bf16 %v2112_v34, %v2110_v0  ;;  %v2107_v4 = vmul.f32 %v6171_v8, %v7346_v32 }
 0x45d   : > { %v1988_v42 = vpop.xlane.xlu1 %1987  ;;  %v2106_v3 = vmul.f32 %v6171_v8, %v7342_v61 }
 0x45e   : > { %2186 = vmatprep.subr.bf16.mxu1 %v2153_v22  ;;  %6178 = vrcp.f32 %v1988_v42 }
 0x45f   : > { %2187 = vmatpush2.bf16.xpose.msra.mxu1 %v2152_v51 }
 0x461   : > { %v6173_v10 = vpop.eup %6172  ;;  %v786_v43 = vpop.permute.xlu1 %785 }
 0x462   : > { %v2109_v35 = vmul.f32 %v6173_v10, %v7358_v44  ;;  %v2108_v50 = vmul.f32 %v6173_v10, %v7355_v6  ;;  %v1204_v39 = vadd.f32 %v1203_v54, %v786_v43 }
 0x463   : > { %v1991_v59 = vpop.xlane.xlu0 %1990  ;;  %v6175_v25 = vpop.eup %6174 }
 0x464   : > { %6180 = vrcp.f32 %v1991_v59  ;;  %v2151_v33 = vpack.c.bf16 %v2109_v35, %v2107_v4  ;;  %v2150_v20 = vpack.c.bf16 %v2108_v50, %v2106_v3  ;;  %v2103_v44 = vmul.f32 %v6175_v25, %v7364_v23 }
 0x465   : > { %v7556_v53 = vpop.permute.xlu1 %795  ;;  %v2102_v6 = vmul.f32 %v6175_v25, %v7360_v49 }
 0x466   : > { %2188 = vmatprep.subr.bf16.mxu1 %v2151_v33  ;;  %v1202_v33 = vadd.f32 %v7538_v63, %v786_v43 }
 0x467   : > { %2189 = vmatpush2.bf16.xpose.msra.mxu1 %v2150_v20 }
 0x469   : > { %v6177_v52 = vpop.eup %6176  ;;  %v801_v32 = vpop.permute.xlu1 %800 }
 0x46a   : > { %v2105_v61 = vmul.f32 %v6177_v52, %v7374_v30  ;;  %v2104_v57 = vmul.f32 %v6177_v52, %v7372_v13  ;;  %v1223_v30 = vpop.f32.mrf.mxu0  ;;  %v1214_v52 = vadd.f32 %v7548_v1, %v7556_v53 }
 0x46b   : > { %v791_v14 = vpop.permute.xlu0 %790  ;;  %v6179_v29 = vpop.eup %6178 }
 0x46c   : > { %v1208_v27 = vadd.f32 %v1207_v12, %v791_v14  ;;  %v2149_v58 = vpack.c.bf16 %v2105_v61, %v2103_v44  ;;  %v2148_v21 = vpack.c.bf16 %v2104_v57, %v2102_v6  ;;  %v2099_v13 = vmul.f32 %v6179_v29, %v7380_v18  ;;  %v1225_v42 = vpop.f32.mrf.mxu0 }
 0x46d   : > { %v7564_v62 = vpop.permute.xlu1 %810  ;;  %v2098_v28 = vmul.f32 %v6179_v29, %v7376_v36  ;;  %v1206_v18 = vadd.f32 %v7540_v38, %v791_v14 }
 0x46e   : > { %2190 = vmatprep.subr.bf16.mxu1 %v2149_v58  ;;  %v1401_v0 = vpack.c.bf16 %v1208_v27, %v1204_v39 }
 0x46f   : > { %2191 = vmatpush2.bf16.xpose.msra.mxu1 %v2148_v21  ;;  %v7566_v23 = vpop.permute.xlu0 %805  ;;  %v1400_v38 = vpack.c.bf16 %v1206_v18, %v1202_v33 }
 0x470   : > { %2194 = vmatprep.mubr.bf16.mxu1 %v1401_v0 }
 0x471   : > { %v6181_v49 = vpop.eup %6180  ;;  %v781_v34 = vpop.permute.xlu1 %780 }
 0x472   : > { %v1198_v54 = vadd.f32 %v7536_v37, %v781_v34  ;;  %v2101_v12 = vmul.f32 %v6181_v49, %v7390_v17  ;;  %v2100_v22 = vmul.f32 %v6181_v49, %v7388_v56  ;;  %v1227_v37 = vpop.f32.mrf.mxu0  ;;  %v1218_v17 = vadd.f32 %v1217_v47, %v801_v32 }
 0x473   : > { %v776_v51 = vpop.permute.xlu0 %775  ;;  %v1196_v36 = vadd.f32 %v7534_v15, %v781_v34  ;;  %v1228_v1 = vadd.f32 %v1227_v37, %v7564_v62 }
 0x474   : > { %v1194_v8 = vadd.f32 %v7532_v48, %v776_v51  ;;  %v2147_v10 = vpack.c.bf16 %v2101_v12, %v2099_v13  ;;  %v2146_v4 = vpack.c.bf16 %v2100_v22, %v2098_v28  ;;  %v1192_v56 = vadd.f32 %v7530_v31, %v776_v51  ;;  %v1231_v48 = vpop.f32.mrf.mxu0 }
 0x475   : > { %v771_v35 = vpop.permute.xlu1 %770  ;;  %v1403_v31 = vpack.c.bf16 %v1218_v17, %v1214_v52  ;;  %v10268_v51 = vmov 0  }
 0x476   : > { %2192 = vmatprep.subr.bf16.mxu1 %v2147_v10  ;;  %v2242_v3 = vpack.c.bf16 %v1198_v54, %v1194_v8  ;;  %v1188_v20 = vadd.f32 %v7528_v40, %v771_v35  ;;  %v2241_v61 = vpack.c.bf16 %v1196_v36, %v1192_v56  ;;  %v1186_v47 = vadd.f32 %v7526_v41, %v771_v35  ;;  %v1233_v57 = vpop.f32.mrf.mxu0 }
 0x477   : > { %2193 = vmatpush2.bf16.xpose.msra.mxu1 %v2146_v4  ;;  %v766_v50 = vpop.permute.xlu0 %765  ;;  %v1216_v40 = vadd.f32 %v7554_v60, %v801_v32  ;;  %v1224_v41 = vadd.f32 %v1223_v30, %v7566_v23 }
 0x478   : > { %2355 = vmatprep.subr.bf16.mxu1 %v2242_v3  ;;  %v1184_v25 = vadd.f32 %v7524_v11, %v766_v50  ;;  %v1182_v15 = vadd.f32 %v7522_v24, %v766_v50  ;;  %v1235_v21 = vpop.f32.mrf.mxu0 }
 0x479   : > { %v821_v59 = vpop.permute.xlu1 %820 }
 0x47a   : > { %v2240_v43 = vpack.c.bf16 %v1188_v20, %v1184_v25  ;;  %v2239_v24 = vpack.c.bf16 %v1186_v47, %v1182_v15  ;;  %v1237_v34 = vpop.f32.mrf.mxu0 }
 0x47b   : > { %v816_v44 = vpop.permute.xlu0 %815 }
 0x47c   : > { %v1232_v28 = vadd.f32 %v1231_v48, %v816_v44 }
 0x47d   : > { %v761_v6 = vpop.permute.xlu1 %760 }
 0x47e   : > { %2195 = vmatmul.mubr.bf16.vlgmr.msra.gmra.mxu1 %v1400_v38  ;;  %v1178_v63 = vadd.f32 %v7520_v55, %v761_v6  ;;  %v1176_v39 = vadd.f32 %v7514_v2, %v761_v6  ;;  %v1212_v55 = vadd.f32 %v7546_v5, %v7556_v53  ;;  %v1222_v5 = vadd.f32 %v7562_v19, %v7566_v23 }
 0x47f   : > { %2204 = vmatprep.mubr.bf16.mxu1 %v1403_v31  ;;  %2356 = vmatpush1.bf16.msra.mxu1 %v2241_v61  ;;  %v756_v11 = vpop.permute.xlu0 %755  ;;  %v1234_v53 = vadd.f32 %v1233_v57, %v816_v44 }
 0x480   : > { %v1174_v14 = vadd.f32 %v7508_v46, %v756_v11  ;;  %2357 = vmatprep.subr.bf16.mxu1 %v2240_v43  ;;  %v1172_v27 = vadd.f32 %v7502_v45, %v756_v11  ;;  %v1402_v0 = vpack.c.bf16 %v1216_v40, %v1212_v55  ;;  %v1405_v45 = vpack.c.bf16 %v1228_v1, %v1224_v41 }
 0x481   : > { %v751_v58 = vpop.permute.xlu1 %750 }
 0x482   : > { %v1168_v29 = vadd.f32 %v7496_v26, %v751_v58  ;;  %v2238_v60 = vpack.c.bf16 %v1178_v63, %v1174_v14  ;;  %v2237_v30 = vpack.c.bf16 %v1176_v39, %v1172_v27  ;;  %v1166_v49 = vadd.f32 %v7490_v16, %v751_v58 }
 0x483   : > { %2358 = vmatpush1.bf16.msra.mxu1 %v2239_v24  ;;  %v746_v32 = vpop.permute.xlu0 %745  ;;  %v1226_v26 = vadd.f32 %v1225_v42, %v7564_v62 }
 0x484   : > { %v1164_v46 = vadd.f32 %v7482_v9, %v746_v32  ;;  %2359 = vmatprep.subr.bf16.mxu1 %v2238_v60  ;;  %v1162_v2 = vadd.f32 %v7475_v7, %v746_v32  ;;  %v1238_v9 = vadd.f32 %v1237_v34, %v821_v59  ;;  %v1236_v7 = vadd.f32 %v1235_v21, %v821_v59 }
 0x485   : > { %v1404_v12 = vpack.c.bf16 %v1226_v26, %v1222_v5  ;;  %v2270_v19 = vpop.permute.xlu1 %2269 }
 0x486   : > { %2205 = vmatmul.mubr.bf16.gmra.mxu1 %v1402_v0  ;;  %v2236_v13 = vpack.c.bf16 %v1168_v29, %v1164_v46  ;;  %v2235_v54 = vpack.c.bf16 %v1166_v49, %v1162_v2  ;;  %v1407_v16 = vpack.c.bf16 %v1238_v9, %v1234_v53  ;;  %v1406_v22 = vpack.c.bf16 %v1236_v7, %v1232_v28 }
 0x487   : > { %2214 = vmatprep.mubr.bf16.mxu1 %v1405_v45  ;;  %2360 = vmatpush1.bf16.msra.mxu1 %v2237_v30  ;;  %v2268_v8 = vpop.permute.xlu0 %2267 }
 0x488   : > { %2361 = vmatprep.subr.bf16.mxu1 %v2236_v13 }
 0x489   : > { %v2274_v23 = vpop.permute.xlu1 %2273 }
 0x48b   : > { %2362 = vmatpush1.bf16.msra.mxu1 %v2235_v54  ;;  %v2272_v62 = vpop.permute.xlu0 %2271 }
 0x48d   : > { %v2278_v10 = vpop.permute.xlu1 %2277 }
 0x48e   : > { %2215 = vmatmul.mubr.bf16.gmra.mxu1 %v1404_v12 }
 0x48f   : > { %2224 = vmatprep.mubr.bf16.mxu1 %v1407_v16  ;;  %v2276_v42 = vpop.permute.xlu0 %2275 }
 0x491   : > { %v2282_v35 = vpop.permute.xlu1 %2281 }
 0x493   : > { %v2280_v4 = vpop.permute.xlu0 %2279 }
 0x495   : > { %v2286_v50 = vpop.permute.xlu1 %2285 }
 0x496   : > { %2225 = vmatmul.mubr.bf16.gmra.mxu1 %v1406_v22 }
 0x497   : > { %2379 = vmatprep.mubr.bf16.mxu1 %v10268_v51  ;;  %v2284_v3 = vpop.permute.xlu0 %2283 }
 0x499   : > { %v2290_v37 = vpop.permute.xlu1 %2289 }
 0x49b   : > { %v2288_v18 = vpop.permute.xlu0 %2287 }
 0x49d   : > { %v2294_v36 = vpop.permute.xlu1 %2293 }
 0x49e   : > { %5774 = vmatmul.mubr.msk.bf16.vlgmr.msra.gmra.mxu1 %vm1408_vm0, %v2268_v8 }
 0x49f   : > { %2389 = vmatprep.mubr.bf16.mxu1 %v10268_v51  ;;  %v2292_v17 = vpop.permute.xlu0 %2291 }
 0x4a1   : > { %v2298_v59 = vpop.permute.xlu1 %2297 }
 0x4a3   : > { %v2296_v56 = vpop.permute.xlu0 %2295 }
 0x4a6   : > { %5775 = vmatmul.mubr.msk.bf16.gmra.mxu1 %vm1408_vm0, %v2270_v19 }
 0x4a7   : > { %2399 = vmatprep.mubr.bf16.mxu1 %v10268_v51 }
 0x4ae   : > { %5776 = vmatmul.mubr.msk.bf16.gmra.mxu1 %vm1408_vm0, %v2272_v62 }
 0x4af   : > { %2409 = vmatprep.mubr.bf16.mxu1 %v10268_v51 }
 0x4b6   : > { %5777 = vmatmul.mubr.msk.bf16.gmra.mxu1 %vm1408_vm0, %v2274_v23 }
 0x4b7   : > { %2419 = vmatprep.mubr.bf16.mxu1 %v10268_v51 }
 0x4be   : > { %5778 = vmatmul.mubr.msk.bf16.gmra.mxu1 %vm1408_vm0, %v2276_v42 }
 0x4bf   : > { %2429 = vmatprep.mubr.bf16.mxu1 %v10268_v51 }
 0x4c6   : > { %5779 = vmatmul.mubr.msk.bf16.gmra.mxu1 %vm1408_vm0, %v2278_v10 }
 0x4c7   : > { %2439 = vmatprep.mubr.bf16.mxu1 %v10268_v51 }
 0x4ce   : > { %5780 = vmatmul.mubr.msk.bf16.gmra.mxu1 %vm1408_vm0, %v2280_v4 }
 0x4cf   : > { %2449 = vmatprep.mubr.bf16.mxu1 %v10268_v51 }
 0x4d6   : > { %5781 = vmatmul.mubr.msk.bf16.gmra.mxu1 %vm1408_vm0, %v2282_v35 }
 0x4d7   : > { %2459 = vmatprep.mubr.bf16.mxu1 %v10268_v51 }
 0x4de   : > { %5782 = vmatmul.mubr.msk.bf16.gmra.mxu1 %vm1408_vm0, %v2284_v3 }
 0x4df   : > { %2469 = vmatprep.mubr.bf16.mxu1 %v10268_v51 }
 0x4e6   : > { %5783 = vmatmul.mubr.msk.bf16.gmra.mxu1 %vm1408_vm0, %v2286_v50 }
 0x4e7   : > { %2479 = vmatprep.mubr.bf16.mxu1 %v10268_v51 }
 0x4ee   : > { %5784 = vmatmul.mubr.msk.bf16.gmra.mxu1 %vm1408_vm0, %v2288_v18 }
 0x4ef   : > { %2489 = vmatprep.mubr.bf16.mxu1 %v10268_v51 }
 0x4f6   : > { %5785 = vmatmul.mubr.msk.bf16.gmra.mxu1 %vm1408_vm0, %v2290_v37 }
 0x4f7   : > { %2499 = vmatprep.mubr.bf16.mxu1 %v10268_v51 }
 0x4fe   : > { %5786 = vmatmul.mubr.msk.bf16.gmra.mxu1 %vm1408_vm0, %v2292_v17 }
 0x4ff   : > { %2509 = vmatprep.mubr.bf16.mxu1 %v10268_v51 }
 0x506   : > { %5787 = vmatmul.mubr.msk.bf16.gmra.mxu1 %vm1408_vm0, %v2294_v36 }
 0x507   : > { %2519 = vmatprep.mubr.bf16.mxu1 %v10268_v51 }
 0x50e   : > { %5788 = vmatmul.mubr.msk.bf16.gmra.mxu1 %vm1408_vm0, %v2296_v56 }
 0x50f   : > { %2529 = vmatprep.mubr.bf16.mxu1 %v10268_v51 }
 0x516   : > { %5789 = vmatmul.mubr.msk.bf16.gmra.mxu1 %vm1408_vm0, %v2298_v59 }
 0x517   : > { %4579 = vmatprep.mubr.bf16.mxu1 %v10268_v51 }
 0x53e   : > { %v7633_v33 = vpop.f32.mrf.mxu1 }
 0x53f   : > { %10269 = vst [vmem:[#allocation59_spill] sm:$0xff] %v7633_v33 }
 0x540   : > { %v7635_v48 = vpop.f32.mrf.mxu1 }
 0x541   : > { %10270 = vst [vmem:[#allocation55_spill] sm:$0xff] %v7635_v48 }
 0x542   : > { %v7637_v20 = vpop.f32.mrf.mxu1 }
 0x543   : > { %10271 = vst [vmem:[#allocation51_spill] sm:$0xff] %v7637_v20 }
 0x544   : > { %v7641_v52 = vpop.f32.mrf.mxu1 }
 0x545   : > { %10272 = vst [vmem:[#allocation52_spill] sm:$0xff] %v7641_v52 }
 0x546   : > { %v7643_v44 = vpop.f32.mrf.mxu1 }
 0x547   : > { %10273 = vst [vmem:[#allocation54_spill] sm:$0xff] %v7643_v44 }
 0x548   : > { %v7645_v38 = vpop.f32.mrf.mxu1 }
 0x549   : > { %10274 = vst [vmem:[#allocation53_spill] sm:$0xff] %v7645_v38 }
 0x54a   : > { %v7647_v61 = vpop.f32.mrf.mxu1 }
 0x54b   : > { %10275 = vst [vmem:[#allocation64_spill] sm:$0xff] %v7647_v61 }
 0x54c   : > { %v7651_v15 = vpop.f32.mrf.mxu1 }
 0x54d   : > { %10276 = vst [vmem:[#allocation50_spill] sm:$0xff] %v7651_v15 }
 0x54e   : > { %v7653_v6 = vpop.f32.mrf.mxu1 }
 0x54f   : > { %10277 = vst [vmem:[#allocation63_spill] sm:$0xff] %v7653_v6 }
 0x550   : > { %v7655_v31 = vpop.f32.mrf.mxu1 }
 0x551   : > { %10278 = vst [vmem:[#allocation35_spill] sm:$0xff] %v7655_v31 }
 0x552   : > { %v7657_v57 = vpop.f32.mrf.mxu1 }
 0x553   : > { %10279 = vst [vmem:[#allocation60_spill] sm:$0xff] %v7657_v57 }
 0x554   : > { %v7661_v43 = vpop.f32.mrf.mxu1 }
 0x555   : > { %10280 = vst [vmem:[#allocation58_spill] sm:$0xff] %v7661_v43 }
 0x556   : > { %v7663_v11 = vpop.f32.mrf.mxu1 }
 0x557   : > { %10281 = vst [vmem:[#allocation34_spill] sm:$0xff] %v7663_v11 }
 0x558   : > { %v7665_v40 = vpop.f32.mrf.mxu1 }
 0x559   : > { %10282 = vst [vmem:[#allocation62_spill] sm:$0xff] %v7665_v40 }
 0x55a   : > { %v7667_v1 = vpop.f32.mrf.mxu1 }
 0x55b   : > { %10283 = vst [vmem:[#allocation57_spill] sm:$0xff] %v7667_v1 }
 0x55c   : > { %v7671_v41 = vpop.f32.mrf.mxu1 }
 0x55d   : > { %10284 = vst [vmem:[#allocation37_spill] sm:$0xff] %v7671_v41 }
 0x55e   : > { %v7673_v24 = vpop.f32.mrf.mxu1 }
 0x560   : > { %v7675_v39 = vpop.f32.mrf.mxu1 }
 0x561   : > { %v2540_v20 = vmax.f32 %v7673_v24, %v7675_v39 }
 0x562   : > { %v7677_v27 = vpop.f32.mrf.mxu1 }
 0x563   : > { %10285 = vst [vmem:[#allocation36_spill] sm:$0xff] %v7677_v27 }
 0x564   : > { %v7679_v58 = vpop.f32.mrf.mxu1 }
 0x565   : > { %10286 = vst [vmem:[#allocation39_spill] sm:$0xff] %v7679_v58  ;;  %v2543_v61 = vmax.f32 %v7677_v27, %v7679_v58 }
 0x566   : > { %v7681_v55 = vpop.f32.mrf.mxu1 }
 0x568   : > { %v7683_v21 = vpop.f32.mrf.mxu1 }
 0x569   : > { %v2546_v14 = vmax.f32 %v7681_v55, %v7683_v21 }
 0x56a   : > { %v7685_v29 = vpop.f32.mrf.mxu1 }
 0x56c   : > { %v7687_v60 = vpop.f32.mrf.mxu1 }
 0x56e   : > { %v7689_v32 = vpop.f32.mrf.mxu1 }
 0x570   : > { %v7691_v46 = vpop.f32.mrf.mxu1 }
 0x571   : > { %v2552_v47 = vmax.f32 %v7689_v32, %v7691_v46 }
 0x572   : > { %v7693_v0 = vpop.f32.mrf.mxu1 }
 0x574   : > { %v7695_v30 = vpop.f32.mrf.mxu1 }
 0x576   : > { %v7697_v49 = vpop.f32.mrf.mxu1 }
 0x578   : > { %v7699_v2 = vpop.f32.mrf.mxu1 }
 0x57a   : > { %v7701_v45 = vpop.f32.mrf.mxu1 }
 0x57c   : > { %v7703_v34 = vpop.f32.mrf.mxu1 }
 0x57e   : > { %v7705_v13 = vpop.f32.mrf.mxu1 }
 0x580   : > { %v7707_v26 = vpop.f32.mrf.mxu1 }
 0x581   : > { %v2564_v56 = vmax.f32 %v7705_v13, %v7707_v26 }
 0x582   : > { %v7709_v5 = vpop.f32.mrf.mxu1 }
 0x584   : > { %v7711_v9 = vpop.f32.mrf.mxu1 }
 0x586   : > { %v7713_v53 = vpop.f32.mrf.mxu1 }
 0x588   : > { %v7715_v54 = vpop.f32.mrf.mxu1 }
 0x589   : > { %v2570_v18 = vmax.f32 %v7713_v53, %v7715_v54 }
 0x58a   : > { %v7717_v12 = vpop.f32.mrf.mxu1 }
 0x58c   : > { %v7719_v16 = vpop.f32.mrf.mxu1 }
 0x58d   : > { %v2573_v59 = vmax.f32 %v7717_v12, %v7719_v16 }
 0x58e   : > { %v7721_v7 = vpop.f32.mrf.mxu1 }
 0x590   : > { %v7723_v28 = vpop.f32.mrf.mxu1 }
 0x591   : > { %v2576_v4 = vmax.f32 %v7721_v7, %v7723_v28 }
 0x592   : > { %v7725_v22 = vpop.f32.mrf.mxu1 }
 0x594   : > { %v7727_v8 = vpop.f32.mrf.mxu1 }
 0x595   : > { %v2579_v37 = vmax.f32 %v7725_v22, %v7727_v8 }
 0x596   : > { %v7729_v19 = vpop.f32.mrf.mxu1 }
 0x598   : > { %v7731_v62 = vpop.f32.mrf.mxu1 }
 0x599   : > { %v2582_v23 = vmax.f32 %v7729_v19, %v7731_v62 }
 0x59a   : > { %v7735_v42 = vpop.f32.mrf.mxu1 }
 0x59b   : > { %2583 = vmax.xlane.f32.xlu0 %v2582_v23 }
 0x59c   : > { %v7737_v10 = vpop.f32.mrf.mxu1 }
 0x59d   : > { %v2585_v35 = vmax.f32 %v7735_v42, %v7737_v10 }
 0x59e   : > { %v7743_v3 = vpop.f32.mrf.mxu1 }
 0x59f   : > { %10287 = vst [vmem:[#allocation61_spill] sm:$0xff] %v7743_v3  ;;  %2577 = vmax.xlane.f32.xlu0 %v2576_v4  ;;  %2586 = vmax.xlane.f32.xlu1 %v2585_v35  ;;  %v2558_v35 = vmax.f32 %v7697_v49, %v7699_v2 }
 0x5a0   : > { %v7745_v50 = vpop.f32.mrf.mxu1 }
 0x5a1   : > { %10288 = vst [vmem:[#allocation38_spill] sm:$0xff] %v7745_v50 }
 0x5a2   : > { %v7751_v17 = vpop.f32.mrf.mxu1 }
 0x5a3   : > { %10289 = vst [vmem:[#allocation56_spill] sm:$0xff] %v7751_v17  ;;  %2580 = vmax.xlane.f32.xlu0 %v2579_v37  ;;  %2571 = vmax.xlane.f32.xlu1 %v2570_v18  ;;  %v2567_v18 = vmax.f32 %v7709_v5, %v7711_v9 }
 0x5a4   : > { %v7753_v36 = vpop.f32.mrf.mxu1 }
 0x5a5   : > { %10290 = vst [vmem:[#allocation41_spill] sm:$0xff] %v7753_v36 }
 0x5a6   : > { %v7759_v23 = vpop.f32.mrf.mxu1 }
 0x5a7   : > { %2574 = vmax.xlane.f32.xlu0 %v2573_v59  ;;  %2565 = vmax.xlane.f32.xlu1 %v2564_v56  ;;  %v2561_v56 = vmax.f32 %v7701_v45, %v7703_v34 }
 0x5a8   : > { %v7761_v4 = vpop.f32.mrf.mxu1 }
 0x5aa   : > { %v7767_v37 = vpop.f32.mrf.mxu1 }
 0x5ab   : > { %2568 = vmax.xlane.f32.xlu0 %v2567_v18  ;;  %2559 = vmax.xlane.f32.xlu1 %v2558_v35  ;;  %v2555_v35 = vmax.f32 %v7693_v0, %v7695_v30 }
 0x5ac   : > { %v7769_v25 = vpop.f32.mrf.mxu1 }
 0x5ae   : > { %v7775_v59 = vpop.f32.mrf.mxu1 }
 0x5af   : > { %2562 = vmax.xlane.f32.xlu0 %v2561_v56  ;;  %2553 = vmax.xlane.f32.xlu1 %v2552_v47  ;;  %v2549_v47 = vmax.f32 %v7685_v29, %v7687_v60 }
 0x5b0   : > { %v7777_v63 = vpop.f32.mrf.mxu1 }
 0x5b2   : > { %v7783_v18 = vpop.f32.mrf.mxu1 }
 0x5b3   : > { %2556 = vmax.xlane.f32.xlu0 %v2555_v35  ;;  %2547 = vmax.xlane.f32.xlu1 %v2546_v14 }
 0x5b4   : > { %v7785_v33 = vpop.f32.mrf.mxu1 }
 0x5b6   : > { %v7791_v56 = vpop.f32.mrf.mxu1 }
 0x5b7   : > { %2550 = vmax.xlane.f32.xlu0 %v2549_v47  ;;  %2541 = vmax.xlane.f32.xlu1 %v2540_v20 }
 0x5b8   : > { %v7793_v44 = vpop.f32.mrf.mxu1 }
 0x5ba   : > { %v7797_v52 = vpop.f32.mrf.mxu1 }
 0x5bb   : > { %2544 = vmax.xlane.f32.xlu0 %v2543_v61 }
 0x5bc   : > { %v7799_v14 = vpop.f32.mrf.mxu1 }
 0x5be   : > { %v7801_v35 = vpop.f32.mrf.mxu1 }
 0x5bf   : > { %10291 = vst [vmem:[#allocation40_spill] sm:$0xff] %v7801_v35 }
 0x5c0   : > { %v7803_v48 = vpop.f32.mrf.mxu1 }
 0x5c1   : > { %10292 = vst [vmem:[#allocation43_spill] sm:$0xff] %v7803_v48 }
 0x5c2   : > { %v7805_v6 = vpop.f32.mrf.mxu1 }
 0x5c3   : > { %10293 = vst [vmem:[#allocation42_spill] sm:$0xff] %v7805_v6 }
 0x5c4   : > { %v7807_v57 = vpop.f32.mrf.mxu1 }
 0x5c5   : > { %10294 = vst [vmem:[#allocation45_spill] sm:$0xff] %v7807_v57 }
 0x5c6   : > { %v7809_v47 = vpop.f32.mrf.mxu1 }
 0x5c8   : > { %v7811_v20 = vpop.f32.mrf.mxu1 }
 0x5c9   : > { %v2618_v58 = vmax.f32 %v7809_v47, %v7811_v20 }
 0x5ca   : > { %v7813_v15 = vpop.f32.mrf.mxu1 }
 0x5cb   : > { %10295 = vst [vmem:[#allocation44_spill] sm:$0xff] %v7813_v15 }
 0x5cc   : > { %v7815_v38 = vpop.f32.mrf.mxu1 }
 0x5cd   : > { %10296 = vst [vmem:[#allocation47_spill] sm:$0xff] %v7815_v38 }
 0x5ce   : > { %v7817_v11 = vpop.f32.mrf.mxu1 }
 0x5d0   : > { %v7819_v61 = vpop.f32.mrf.mxu1 }
 0x5d1   : > { %v2624_v3 = vmax.f32 %v7817_v11, %v7819_v61 }
 0x5d2   : > { %v7821_v1 = vpop.f32.mrf.mxu1 }
 0x5d3   : > { %10297 = vst [vmem:[#allocation46_spill] sm:$0xff] %v7821_v1 }
 0x5d4   : > { %v7823_v43 = vpop.f32.mrf.mxu1 }
 0x5d5   : > { %10298 = vst [vmem:[#allocation49_spill] sm:$0xff] %v7823_v43  ;;  %v2627_v27 = vmax.f32 %v7821_v1, %v7823_v43 }
 0x5d6   : > { %v7825_v31 = vpop.f32.mrf.mxu1 }
 0x5d8   : > { %v7827_v41 = vpop.f32.mrf.mxu1 }
 0x5d9   : > { %10299 = vst [vmem:[#allocation48_spill] sm:$0xff] %v7827_v41  ;;  %v2630_v40 = vmax.f32 %v7825_v31, %v7827_v41  ;;  %v2621_v41 = vmax.f32 %v7813_v15, %v7815_v38 }
 0x5da   : > { %v7831_v17 = vpop.f32.mrf.mxu1 }
 0x5db   : > { %2631 = vmax.xlane.f32.xlu1 %v2630_v40  ;;  %v2612_v40 = vmax.f32 %v7801_v35, %v7803_v48 }
 0x5dc   : > { %v7833_v36 = vpop.f32.mrf.mxu1 }
 0x5dd   : > { %v2633_v50 = vmax.f32 %v7831_v17, %v7833_v36 }
 0x5df   : > { %2625 = vmax.xlane.f32.xlu1 %v2624_v3  ;;  %2634 = vmax.xlane.f32.xlu0 %v2633_v50  ;;  %v2615_v3 = vmax.f32 %v7805_v6, %v7807_v57  ;;  %v5898_v50 = vld [vmem:[%s9969_s2 + $0xa0] sm:$0xff]  }
 0x5e0   : > { %1240 = vmatmul.mubr.bf16.gmra.mxu0 %v5898_v50 }
 0x5e1   : > { %1249 = vmatprep.mubr.bf16.mxu0 %v10268_v51 }
 0x5e3   : > { %2619 = vmax.xlane.f32.xlu1 %v2618_v58  ;;  %2628 = vmax.xlane.f32.xlu0 %v2627_v27  ;;  %v5899_v27 = vld [vmem:[%s9969_s2 + $0xa8] sm:$0xff]  }
 0x5e7   : > { %2613 = vmax.xlane.f32.xlu1 %v2612_v40  ;;  %2622 = vmax.xlane.f32.xlu0 %v2621_v41  ;;  %v5900_v41 = vld [vmem:[%s9969_s2 + $0xb0] sm:$0xff]  }
 0x5e8   : > { %1250 = vmatmul.mubr.bf16.gmra.mxu0 %v5899_v27 }
 0x5e9   : > { %1259 = vmatprep.mubr.bf16.mxu0 %v10268_v51 }
 0x5eb   : > { %2616 = vmax.xlane.f32.xlu0 %v2615_v3 }
 0x5f0   : > { %1260 = vmatmul.mubr.bf16.gmra.mxu0 %v5900_v41 }
 0x5f1   : > { %1269 = vmatprep.mubr.bf16.mxu0 %v10268_v51 }
 0x624   : > { %v2584_v58 = vpop.xlane.xlu0 %2583 }
 0x625   : > { %v2664_v40 = vsub.f32 %v7729_v19, %v2584_v58  ;;  %v2665_v3 = vsub.f32 %v7731_v62, %v2584_v58 }
 0x627   : > { %v2756_v50 = vmul.f32 1.442695, %v2664_v40  ;;  %v2758_v57 = vmul.f32 1.442695, %v2665_v3 }
 0x628   : > { %v2587_v6 = vpop.xlane.xlu1 %2586  ;;  %v2578_v38 = vpop.xlane.xlu0 %2577 }
 0x629   : > { %6182 = vpow2.f32 %v2756_v50  ;;  %v2666_v27 = vsub.f32 %v7735_v42, %v2587_v6  ;;  %v2667_v15 = vsub.f32 %v7737_v10, %v2587_v6  ;;  %v2660_v48 = vsub.f32 %v7721_v7, %v2578_v38 }
 0x62a   : > { %6184 = vpow2.f32 %v2758_v57  ;;  %v2661_v41 = vsub.f32 %v7723_v28, %v2578_v38 }
 0x62b   : > { %v2760_v51 = vmul.f32 1.442695, %v2666_v27  ;;  %v2762_v35 = vmul.f32 1.442695, %v2667_v15  ;;  %v2748_v43 = vmul.f32 1.442695, %v2660_v48 }
 0x62c   : > { %v2750_v19 = vmul.f32 1.442695, %v2661_v41  ;;  %v2572_v1 = vpop.xlane.xlu1 %2571  ;;  %v2581_v62 = vpop.xlane.xlu0 %2580 }
 0x62d   : > { %6186 = vpow2.f32 %v2760_v51  ;;  %v2662_v58 = vsub.f32 %v7725_v22, %v2581_v62  ;;  %v2663_v40 = vsub.f32 %v7727_v8, %v2581_v62  ;;  %v2656_v6 = vsub.f32 %v7713_v53, %v2572_v1 }
 0x62e   : > { %6188 = vpow2.f32 %v2762_v35  ;;  %v2657_v57 = vsub.f32 %v7715_v54, %v2572_v1 }
 0x62f   : > { %6190 = vpow2.f32 %v2748_v43  ;;  %v2752_v42 = vmul.f32 1.442695, %v2662_v58  ;;  %v2754_v38 = vmul.f32 1.442695, %v2663_v40  ;;  %v2740_v48 = vmul.f32 1.442695, %v2656_v6 }
 0x630   : > { %6192 = vpow2.f32 %v2750_v19  ;;  %v2566_v7 = vpop.xlane.xlu1 %2565  ;;  %v2575_v15 = vpop.xlane.xlu0 %2574  ;;  %v2742_v51 = vmul.f32 1.442695, %v2657_v57  ;;  %v2606_v19 = vmax.f32 %v7791_v56, %v7793_v44  ;;  %v2609_v57 = vmax.f32 %v7797_v52, %v7799_v14 }
 0x631   : > { %6194 = vpow2.f32 %v2752_v42  ;;  %v2658_v28 = vsub.f32 %v7717_v12, %v2575_v15  ;;  %v2659_v22 = vsub.f32 %v7719_v16, %v2575_v15  ;;  %v2652_v1 = vsub.f32 %v7705_v13, %v2566_v7 }
 0x632   : > { %6196 = vpow2.f32 %v2754_v38  ;;  %v2653_v35 = vsub.f32 %v7707_v26, %v2566_v7 }
 0x633   : > { %6198 = vpow2.f32 %v2740_v48  ;;  %v2744_v54 = vmul.f32 1.442695, %v2658_v28  ;;  %v2746_v3 = vmul.f32 1.442695, %v2659_v22  ;;  %v2732_v62 = vmul.f32 1.442695, %v2652_v1 }
 0x634   : > { %v2560_v10 = vpop.xlane.xlu1 %2559  ;;  %v2569_v8 = vpop.xlane.xlu0 %2568  ;;  %6200 = vpow2.f32 %v2742_v51  ;;  %v2734_v26 = vmul.f32 1.442695, %v2653_v35 }
 0x635   : > { %6202 = vpow2.f32 %v2744_v54  ;;  %v2654_v13 = vsub.f32 %v7709_v5, %v2569_v8  ;;  %v2655_v40 = vsub.f32 %v7711_v9, %v2569_v8  ;;  %v2648_v38 = vsub.f32 %v7697_v49, %v2560_v10 }
 0x636   : > { %v7873_v43 = vpop.eup %6182  ;;  %6204 = vpow2.f32 %v2746_v3  ;;  %v2649_v15 = vsub.f32 %v7699_v2, %v2560_v10  ;;  %v2600_v49 = vmax.f32 %v7775_v59, %v7777_v63 }
 0x637   : > { %v7875_v53 = vpop.eup %6184  ;;  %6206 = vpow2.f32 %v2732_v62  ;;  %v2736_v5 = vmul.f32 1.442695, %v2654_v13  ;;  %v2738_v9 = vmul.f32 1.442695, %v2655_v40  ;;  %v2724_v54 = vmul.f32 1.442695, %v2648_v38 }
 0x638   : > { %v2870_v12 = vadd.f32 %v7875_v53, %v7873_v43  ;;  %v2554_v16 = vpop.xlane.xlu1 %2553  ;;  %v2563_v27 = vpop.xlane.xlu0 %2562  ;;  %6208 = vpow2.f32 %v2734_v26  ;;  %v2726_v35 = vmul.f32 1.442695, %v2649_v15 }
 0x639   : > { %v2644_v8 = vsub.f32 %v7689_v32, %v2554_v16  ;;  %v2645_v1 = vsub.f32 %v7691_v46, %v2554_v16  ;;  %6210 = vpow2.f32 %v2736_v5  ;;  %v2650_v2 = vsub.f32 %v7701_v45, %v2563_v27 }
 0x63a   : > { %v7881_v50 = vpop.eup %6186  ;;  %2871 = vadd.xlane.f32.xlu1 %v2870_v12  ;;  %6212 = vpow2.f32 %v2738_v9  ;;  %v2651_v3 = vsub.f32 %v7703_v34, %v2563_v27  ;;  %v2603_v45 = vmax.f32 %v7783_v18, %v7785_v33 }
 0x63b   : > { %v7883_v41 = vpop.eup %6188  ;;  %v2716_v46 = vmul.f32 1.442695, %v2644_v8  ;;  %6214 = vpow2.f32 %v2724_v54  ;;  %v2728_v34 = vmul.f32 1.442695, %v2650_v2  ;;  %v2597_v2 = vmax.f32 %v7767_v37, %v7769_v25 }
 0x63c   : > { %v7888_v58 = vpop.eup %6190  ;;  %v2873_v6 = vadd.f32 %v7883_v41, %v7881_v50  ;;  %v2548_v48 = vpop.xlane.xlu1 %2547  ;;  %6216 = vpow2.f32 %v2726_v35 }
 0x63d   : > { %v7893_v42 = vpop.eup %6192  ;;  %v2557_v28 = vpop.xlane.xlu0 %2556  ;;  %v2640_v16 = vsub.f32 %v7681_v55, %v2548_v48  ;;  %v2641_v62 = vsub.f32 %v7683_v21, %v2548_v48  ;;  %6218 = vpow2.f32 %v2716_v46 }
 0x63e   : > { %2874 = vadd.xlane.f32.xlu0 %v2873_v6  ;;  %2607 = vmax.xlane.f32.xlu1 %v2606_v19  ;;  %v7898_v7 = vpop.eup %6194  ;;  %v2864_v51 = vadd.f32 %v7893_v42, %v7888_v58  ;;  %v2718_v19 = vmul.f32 1.442695, %v2645_v1  ;;  %v2646_v27 = vsub.f32 %v7693_v0, %v2557_v28  ;;  %v2730_v6 = vmul.f32 1.442695, %v2651_v3  ;;  %v10300_v3 = vld [vmem:[#allocation36_spill] sm:$0xff] }
 0x63f   : > { %v7903_v22 = vpop.eup %6196  ;;  %v2647_v55 = vsub.f32 %v7695_v30, %v2557_v28  ;;  %v2708_v38 = vmul.f32 1.442695, %v2640_v16  ;;  %v2710_v15 = vmul.f32 1.442695, %v2641_v62  ;;  %v2594_v0 = vmax.f32 %v7759_v23, %v7761_v4  ;;  %v5901_v28 = vld [vmem:[%s9969_s2 + $0xb8] sm:$0xff]   ;;  %v10301_v16 = vld [vmem:[#allocation39_spill] sm:$0xff] }
 0x640   : > { %v7910_v10 = vpop.eup %6198  ;;  %v2867_v32 = vadd.f32 %v7903_v22, %v7898_v7  ;;  %v2542_v13 = vpop.xlane.xlu1 %2541  ;;  %6220 = vpow2.f32 %v2718_v19  ;;  %v2720_v30 = vmul.f32 1.442695, %v2646_v27  ;;  %1270 = vmatmul.mubr.bf16.gmra.mxu0 %v5901_v28  ;;  %v10303_v27 = vld [vmem:[#allocation61_spill] sm:$0xff] }
 0x641   : > { %v7915_v12 = vpop.eup %6200  ;;  %v2551_v26 = vpop.xlane.xlu0 %2550  ;;  %v2636_v5 = vsub.f32 %v7673_v24, %v2542_v13  ;;  %v2637_v9 = vsub.f32 %v7675_v39, %v2542_v13  ;;  %6222 = vpow2.f32 %v2728_v34  ;;  %v2722_v24 = vmul.f32 1.442695, %v2647_v55  ;;  %v10302_v34 = vld [vmem:[#allocation38_spill] sm:$0xff] }
 0x642   : > { %2610 = vmax.xlane.f32.xlu0 %v2609_v57  ;;  %2865 = vadd.xlane.f32.xlu1 %v2864_v51  ;;  %v7922_v40 = vpop.eup %6202  ;;  %v2858_v21 = vadd.f32 %v7915_v12, %v7910_v10  ;;  %v2642_v48 = vsub.f32 %v7685_v29, %v2551_v26  ;;  %6224 = vpow2.f32 %v2730_v6  ;;  %v2643_v8 = vsub.f32 %v7687_v60, %v2551_v26 }
 0x643   : > { %v7927_v57 = vpop.eup %6204  ;;  %6226 = vpow2.f32 %v2708_v38  ;;  %v2700_v54 = vmul.f32 1.442695, %v2636_v5  ;;  %v2702_v29 = vmul.f32 1.442695, %v2637_v9  ;;  %v2588_v6 = vmax.f32 %v10303_v27, %v10302_v34 }
 0x644   : > { %v7937_v51 = vpop.eup %6206  ;;  %v2861_v1 = vadd.f32 %v7927_v57, %v7922_v40  ;;  %6228 = vpow2.f32 %v2710_v15  ;;  %v2712_v35 = vmul.f32 1.442695, %v2642_v48  ;;  %v2714_v46 = vmul.f32 1.442695, %v2643_v8 }
 0x645   : > { %v2545_v39 = vpop.xlane.xlu0 %2544  ;;  %6230 = vpow2.f32 %v2720_v30  ;;  %v10305_v30 = vld [vmem:[#allocation56_spill] sm:$0xff] }
 0x646   : > { %2601 = vmax.xlane.f32.xlu1 %v2600_v49  ;;  %2868 = vadd.xlane.f32.xlu0 %v2867_v32  ;;  %v7942_v49 = vpop.eup %6208  ;;  %v2638_v60 = vsub.f32 %v10300_v3, %v2545_v39  ;;  %6232 = vpow2.f32 %v2722_v24  ;;  %v2639_v19 = vsub.f32 %v10301_v16, %v2545_v39 }
 0x647   : > { %v7947_v32 = vpop.eup %6210  ;;  %v2852_v62 = vadd.f32 %v7942_v49, %v7937_v51  ;;  %6234 = vpow2.f32 %v2700_v54 }
 0x648   : > { %v7952_v13 = vpop.eup %6212  ;;  %6236 = vpow2.f32 %v2702_v29  ;;  %v2704_v26 = vmul.f32 1.442695, %v2638_v60  ;;  %v2706_v55 = vmul.f32 1.442695, %v2639_v19 }
 0x649   : > { %6238 = vpow2.f32 %v2712_v35 }
 0x64a   : > { %2859 = vadd.xlane.f32.xlu1 %v2858_v21  ;;  %2604 = vmax.xlane.f32.xlu0 %v2603_v45  ;;  %v7954_v45 = vpop.eup %6214  ;;  %6240 = vpow2.f32 %v2714_v46  ;;  %v2855_v21 = vadd.f32 %v7952_v13, %v7947_v32 }
 0x64b   : > { %v7960_v38 = vpop.eup %6216  ;;  %6242 = vpow2.f32 %v2704_v26 }
 0x64c   : > { %v7962_v5 = vpop.eup %6218  ;;  %6244 = vpow2.f32 %v2706_v55  ;;  %v2846_v28 = vadd.f32 %v7960_v38, %v7954_v45 }
 0x64d   : > { %v7964_v15 = vpop.eup %6220 }
 0x64e   : > { %2595 = vmax.xlane.f32.xlu1 %v2594_v0  ;;  %2862 = vadd.xlane.f32.xlu0 %v2861_v1  ;;  %v7966_v9 = vpop.eup %6222  ;;  %v10304_v0 = vld [vmem:[#allocation41_spill] sm:$0xff]  ;;  %v2840_v54 = vadd.f32 %v7964_v15, %v7962_v5 }
 0x64f   : > { %v2591_v48 = vmax.f32 %v10305_v30, %v10304_v0  ;;  %v7972_v24 = vpop.eup %6224 }
 0x650   : > { %v7974_v8 = vpop.eup %6226  ;;  %v2849_v29 = vadd.f32 %v7972_v24, %v7966_v9 }
 0x651   : > { %10306 = vst [vmem:[#allocation36_spill] sm:$0xff] %v7974_v8  ;;  %v7976_v39 = vpop.eup %6228 }
 0x652   : > { %2853 = vadd.xlane.f32.xlu1 %v2852_v62  ;;  %2598 = vmax.xlane.f32.xlu0 %v2597_v2  ;;  %10307 = vst [vmem:[#allocation39_spill] sm:$0xff] %v7976_v39  ;;  %v7978_v1 = vpop.eup %6230  ;;  %v2834_v46 = vadd.f32 %v7976_v39, %v7974_v8 }
 0x653   : > { %v7984_v2 = vpop.eup %6232 }
 0x654   : > { %v7986_v35 = vpop.eup %6234  ;;  %v2843_v16 = vadd.f32 %v7984_v2, %v7978_v1 }
 0x655   : > { %10308 = vst [vmem:[#allocation38_spill] sm:$0xff] %v7986_v35  ;;  %v7988_v3 = vpop.eup %6236 }
 0x656   : > { %2589 = vmax.xlane.f32.xlu1 %v2588_v6  ;;  %2856 = vadd.xlane.f32.xlu0 %v2855_v21  ;;  %10309 = vst [vmem:[#allocation61_spill] sm:$0xff] %v7988_v3  ;;  %v7990_v60 = vpop.eup %6238  ;;  %v2828_v6 = vadd.f32 %v7988_v3, %v7986_v35 }
 0x657   : > { %10310 = vst [vmem:[#allocation41_spill] sm:$0xff] %v7990_v60  ;;  %v7996_v19 = vpop.eup %6240 }
 0x658   : > { %v7998_v62 = vpop.eup %6242  ;;  %v2837_v55 = vadd.f32 %v7996_v19, %v7990_v60 }
 0x659   : > { %10311 = vst [vmem:[#allocation56_spill] sm:$0xff] %v7998_v62  ;;  %v8004_v21 = vpop.eup %6244 }
 0x65a   : > { %2847 = vadd.xlane.f32.xlu1 %v2846_v28  ;;  %2592 = vmax.xlane.f32.xlu0 %v2591_v48  ;;  %10312 = vst [vmem:[#allocation65_spill] sm:$0xff] %v8004_v21  ;;  %v10313_v28 = vld [vmem:[#allocation48_spill] sm:$0xff]  ;;  %v2831_v39 = vadd.f32 %v8004_v21, %v7998_v62 }
 0x65e   : > { %2841 = vadd.xlane.f32.xlu1 %v2840_v54  ;;  %2850 = vadd.xlane.f32.xlu0 %v2849_v29 }
 0x662   : > { %2835 = vadd.xlane.f32.xlu1 %v2834_v46  ;;  %2844 = vadd.xlane.f32.xlu0 %v2843_v16 }
 0x664   : > { %v2632_v26 = vpop.xlane.xlu1 %2631 }
 0x665   : > { %v2696_v48 = vsub.f32 %v7825_v31, %v2632_v26  ;;  %v2697_v54 = vsub.f32 %v10313_v28, %v2632_v26 }
 0x666   : > { %2829 = vadd.xlane.f32.xlu1 %v2828_v6  ;;  %2838 = vadd.xlane.f32.xlu0 %v2837_v55 }
 0x667   : > { %v2820_v29 = vmul.f32 1.442695, %v2696_v48  ;;  %v2822_v46 = vmul.f32 1.442695, %v2697_v54 }
 0x668   : > { %v2626_v16 = vpop.xlane.xlu1 %2625  ;;  %v2635_v8 = vpop.xlane.xlu0 %2634 }
 0x669   : > { %6246 = vpow2.f32 %v2820_v29  ;;  %v2692_v35 = vsub.f32 %v7817_v11, %v2626_v16  ;;  %v2693_v3 = vsub.f32 %v7819_v61, %v2626_v16  ;;  %v2698_v60 = vsub.f32 %v7831_v17, %v2635_v8  ;;  %v10314_v11 = vld [vmem:[#allocation46_spill] sm:$0xff]  ;;  %v10315_v61 = vld [vmem:[#allocation49_spill] sm:$0xff] }
 0x66a   : > { %6248 = vpow2.f32 %v2822_v46  ;;  %v2699_v31 = vsub.f32 %v7833_v36, %v2635_v8  ;;  %2832 = vadd.xlane.f32.xlu0 %v2831_v39 }
 0x66b   : > { %v2812_v26 = vmul.f32 1.442695, %v2692_v35  ;;  %v2814_v6 = vmul.f32 1.442695, %v2693_v3  ;;  %v2824_v55 = vmul.f32 1.442695, %v2698_v60 }
 0x66c   : > { %v2826_v48 = vmul.f32 1.442695, %v2699_v31  ;;  %v2620_v28 = vpop.xlane.xlu1 %2619  ;;  %v2629_v54 = vpop.xlane.xlu0 %2628  ;;  %v10316_v60 = vld [vmem:[#allocation40_spill] sm:$0xff]  ;;  %v10317_v31 = vld [vmem:[#allocation43_spill] sm:$0xff] }
 0x66d   : > { %6250 = vpow2.f32 %v2812_v26  ;;  %v2688_v62 = vsub.f32 %v7809_v47, %v2620_v28  ;;  %v2689_v29 = vsub.f32 %v7811_v20, %v2620_v28  ;;  %v2694_v21 = vsub.f32 %v10314_v11, %v2629_v54  ;;  %v10318_v26 = vld [vmem:[#allocation44_spill] sm:$0xff]  ;;  %v10319_v28 = vld [vmem:[#allocation47_spill] sm:$0xff] }
 0x66e   : > { %6252 = vpow2.f32 %v2814_v6  ;;  %v2695_v17 = vsub.f32 %v10315_v61, %v2629_v54  ;;  %v10321_v61 = vld [vmem:[#allocation45_spill] sm:$0xff] }
 0x66f   : > { %6254 = vpow2.f32 %v2824_v55  ;;  %v2804_v46 = vmul.f32 1.442695, %v2688_v62  ;;  %v2806_v36 = vmul.f32 1.442695, %v2689_v29  ;;  %v2816_v8 = vmul.f32 1.442695, %v2694_v21 }
 0x670   : > { %6256 = vpow2.f32 %v2826_v48  ;;  %v2818_v39 = vmul.f32 1.442695, %v2695_v17  ;;  %v2614_v35 = vpop.xlane.xlu1 %2613  ;;  %v2623_v3 = vpop.xlane.xlu0 %2622  ;;  %v10320_v29 = vld [vmem:[#allocation42_spill] sm:$0xff] }
 0x671   : > { %6258 = vpow2.f32 %v2804_v46  ;;  %v2684_v16 = vsub.f32 %v10316_v60, %v2614_v35  ;;  %v2685_v47 = vsub.f32 %v10317_v31, %v2614_v35  ;;  %v2690_v20 = vsub.f32 %v10318_v26, %v2623_v3 }
 0x672   : > { %6260 = vpow2.f32 %v2806_v36  ;;  %v2691_v6 = vsub.f32 %v10319_v28, %v2623_v3 }
 0x673   : > { %6262 = vpow2.f32 %v2816_v8  ;;  %v2796_v54 = vmul.f32 1.442695, %v2684_v16  ;;  %v2798_v55 = vmul.f32 1.442695, %v2685_v47  ;;  %v2808_v62 = vmul.f32 1.442695, %v2690_v20 }
 0x674   : > { %6264 = vpow2.f32 %v2818_v39  ;;  %v2810_v21 = vmul.f32 1.442695, %v2691_v6  ;;  %v2617_v48 = vpop.xlane.xlu0 %2616 }
 0x675   : > { %6266 = vpow2.f32 %v2796_v54  ;;  %v2686_v11 = vsub.f32 %v10320_v29, %v2617_v48  ;;  %v2687_v17 = vsub.f32 %v10321_v61, %v2617_v48 }
 0x676   : > { %v8024_v46 = vpop.eup %6246  ;;  %6268 = vpow2.f32 %v2798_v55 }
 0x677   : > { %v8026_v35 = vpop.eup %6248  ;;  %6270 = vpow2.f32 %v2808_v62  ;;  %v2800_v36 = vmul.f32 1.442695, %v2686_v11  ;;  %v2802_v3 = vmul.f32 1.442695, %v2687_v17 }
 0x678   : > { %6272 = vpow2.f32 %v2810_v21  ;;  %v2918_v8 = vadd.f32 %v8026_v35, %v8024_v46 }
 0x679   : > { %6274 = vpow2.f32 %v2800_v36 }
 0x67a   : > { %v8030_v39 = vpop.eup %6250  ;;  %6276 = vpow2.f32 %v2802_v3  ;;  %2919 = vadd.xlane.f32.xlu1 %v2918_v8 }
 0x67b   : > { %v8032_v60 = vpop.eup %6252 }
 0x67c   : > { %v8034_v16 = vpop.eup %6254  ;;  %v2912_v31 = vadd.f32 %v8032_v60, %v8030_v39 }
 0x67d   : > { %v8038_v47 = vpop.eup %6256 }
 0x67e   : > { %v8040_v26 = vpop.eup %6258  ;;  %2913 = vadd.xlane.f32.xlu1 %v2912_v31  ;;  %v2921_v20 = vadd.f32 %v8038_v47, %v8034_v16 }
 0x67f   : > { %10322 = vst [vmem:[#allocation48_spill] sm:$0xff] %v8040_v26  ;;  %v8044_v28 = vpop.eup %6260 }
 0x680   : > { %10323 = vst [vmem:[#allocation46_spill] sm:$0xff] %v8044_v28  ;;  %v8046_v6 = vpop.eup %6262  ;;  %2922 = vadd.xlane.f32.xlu0 %v2921_v20  ;;  %v2906_v54 = vadd.f32 %v8044_v28, %v8040_v26 }
 0x681   : > { %v8050_v55 = vpop.eup %6264 }
 0x682   : > { %v8052_v62 = vpop.eup %6266  ;;  %2907 = vadd.xlane.f32.xlu1 %v2906_v54  ;;  %v2915_v21 = vadd.f32 %v8050_v55, %v8046_v6 }
 0x683   : > { %10324 = vst [vmem:[#allocation49_spill] sm:$0xff] %v8052_v62  ;;  %v8056_v48 = vpop.eup %6268 }
 0x684   : > { %10325 = vst [vmem:[#allocation40_spill] sm:$0xff] %v8056_v48  ;;  %v8058_v29 = vpop.eup %6270  ;;  %2916 = vadd.xlane.f32.xlu0 %v2915_v21  ;;  %v2900_v11 = vadd.f32 %v8056_v48, %v8052_v62 }
 0x685   : > { %10326 = vst [vmem:[#allocation43_spill] sm:$0xff] %v8058_v29  ;;  %v8062_v61 = vpop.eup %6272 }
 0x686   : > { %v8064_v17 = vpop.eup %6274  ;;  %2901 = vadd.xlane.f32.xlu1 %v2900_v11  ;;  %v2909_v36 = vadd.f32 %v8062_v61, %v8058_v29 }
 0x687   : > { %10327 = vst [vmem:[#allocation44_spill] sm:$0xff] %v8064_v17  ;;  %v8068_v3 = vpop.eup %6276 }
 0x688   : > { %10328 = vst [vmem:[#allocation47_spill] sm:$0xff] %v8068_v3  ;;  %2910 = vadd.xlane.f32.xlu0 %v2909_v36  ;;  %v2903_v8 = vadd.f32 %v8068_v3, %v8064_v17 }
 0x68c   : > { %2904 = vadd.xlane.f32.xlu0 %v2903_v8 }
 0x6c3   : > { %v2872_v31 = vpop.xlane.xlu1 %2871 }
 0x6c4   : > { %6278 = vrcp.f32 %v2872_v31 }
 0x6c7   : > { %v2608_v20 = vpop.xlane.xlu1 %2607  ;;  %v2875_v54 = vpop.xlane.xlu0 %2874 }
 0x6c8   : > { %v2680_v21 = vsub.f32 %v7791_v56, %v2608_v20  ;;  %v2681_v62 = vsub.f32 %v7793_v44, %v2608_v20  ;;  %6280 = vrcp.f32 %v2875_v54 }
 0x6ca   : > { %v2788_v11 = vmul.f32 1.442695, %v2680_v21  ;;  %v2790_v48 = vmul.f32 1.442695, %v2681_v62 }
 0x6cb   : > { %v2866_v26 = vpop.xlane.xlu1 %2865  ;;  %v2611_v29 = vpop.xlane.xlu0 %2610 }
 0x6cc   : > { %6282 = vpow2.f32 %v2788_v11  ;;  %v2682_v36 = vsub.f32 %v7797_v52, %v2611_v29  ;;  %v2683_v28 = vsub.f32 %v7799_v14, %v2611_v29 }
 0x6cd   : > { %6284 = vpow2.f32 %v2790_v48 }
 0x6ce   : > { %v2792_v8 = vmul.f32 1.442695, %v2682_v36  ;;  %v2794_v17 = vmul.f32 1.442695, %v2683_v28  ;;  %6286 = vrcp.f32 %v2866_v26 }
 0x6cf   : > { %v2602_v31 = vpop.xlane.xlu1 %2601  ;;  %v2869_v3 = vpop.xlane.xlu0 %2868 }
 0x6d0   : > { %6288 = vpow2.f32 %v2792_v8  ;;  %v2676_v56 = vsub.f32 %v7775_v59, %v2602_v31  ;;  %v2677_v44 = vsub.f32 %v7777_v63, %v2602_v31 }
 0x6d1   : > { %6290 = vpow2.f32 %v2794_v17  ;;  %v6279_v54 = vpop.eup %6278 }
 0x6d2   : > { %v2780_v62 = vmul.f32 1.442695, %v2676_v56  ;;  %v2782_v20 = vmul.f32 1.442695, %v2677_v44  ;;  %6292 = vrcp.f32 %v2869_v3  ;;  %v2985_v59 = vmul.f32 %v6279_v54, %v7875_v53 }
 0x6d3   : > { %v2860_v21 = vpop.xlane.xlu1 %2859  ;;  %v2605_v52 = vpop.xlane.xlu0 %2604  ;;  %v2984_v3 = vmul.f32 %v6279_v54, %v7873_v43 }
 0x6d4   : > { %6294 = vpow2.f32 %v2780_v62  ;;  %v2678_v14 = vsub.f32 %v7783_v18, %v2605_v52  ;;  %v2679_v28 = vsub.f32 %v7785_v33, %v2605_v52 }
 0x6d5   : > { %v6281_v26 = vpop.eup %6280  ;;  %6296 = vpow2.f32 %v2782_v20 }
 0x6d6   : > { %v2784_v48 = vmul.f32 1.442695, %v2678_v14  ;;  %v2786_v29 = vmul.f32 1.442695, %v2679_v28  ;;  %v2987_v63 = vmul.f32 %v6281_v26, %v7883_v41  ;;  %6298 = vrcp.f32 %v2860_v21 }
 0x6d7   : > { %v2596_v17 = vpop.xlane.xlu1 %2595  ;;  %v2863_v11 = vpop.xlane.xlu0 %2862  ;;  %v2986_v36 = vmul.f32 %v6281_v26, %v7881_v50 }
 0x6d8   : > { %6300 = vpow2.f32 %v2784_v48  ;;  %v2672_v18 = vsub.f32 %v7759_v23, %v2596_v17  ;;  %v2673_v33 = vsub.f32 %v7761_v4, %v2596_v17  ;;  %v3035_v8 = vpack.c.bf16 %v2987_v63, %v2985_v59 }
 0x6d9   : > { %v8086_v31 = vpop.eup %6282  ;;  %6302 = vpow2.f32 %v2786_v29  ;;  %v3034_v56 = vpack.c.bf16 %v2986_v36, %v2984_v3 }
 0x6da   : > { %v8088_v53 = vpop.eup %6284  ;;  %v2772_v41 = vmul.f32 1.442695, %v2672_v18  ;;  %v2774_v44 = vmul.f32 1.442695, %v2673_v33  ;;  %6304 = vrcp.f32 %v2863_v11  ;;  %3052 = vmatprep.subr.bf16.mxu0 %v3035_v8 }
 0x6db   : > { %v2854_v62 = vpop.xlane.xlu1 %2853  ;;  %3053 = vmatpush1.bf16.xpose.msra.mxu0 %v3034_v56  ;;  %v2599_v43 = vpop.xlane.xlu0 %2598  ;;  %v2894_v50 = vadd.f32 %v8088_v53, %v8086_v31 }
 0x6dc   : > { %v6287_v23 = vpop.eup %6286  ;;  %6306 = vpow2.f32 %v2772_v41  ;;  %v2674_v4 = vsub.f32 %v7767_v37, %v2599_v43  ;;  %v2675_v20 = vsub.f32 %v7769_v25, %v2599_v43 }
 0x6dd   : > { %v8094_v54 = vpop.eup %6288  ;;  %6308 = vpow2.f32 %v2774_v44  ;;  %2895 = vadd.xlane.f32.xlu1 %v2894_v50  ;;  %v2981_v59 = vmul.f32 %v6287_v23, %v7893_v42  ;;  %v2980_v11 = vmul.f32 %v6287_v23, %v7888_v58 }
 0x6de   : > { %v8096_v21 = vpop.eup %6290  ;;  %v2776_v52 = vmul.f32 1.442695, %v2674_v4  ;;  %v2778_v14 = vmul.f32 1.442695, %v2675_v20  ;;  %6310 = vrcp.f32 %v2854_v62 }
 0x6df   : > { %v6293_v28 = vpop.eup %6292  ;;  %v2590_v26 = vpop.xlane.xlu1 %2589  ;;  %v2897_v29 = vadd.f32 %v8096_v21, %v8094_v54 }
 0x6e0   : > { %v2857_v48 = vpop.xlane.xlu0 %2856  ;;  %6312 = vpow2.f32 %v2776_v52  ;;  %v2668_v25 = vsub.f32 %v10303_v27, %v2590_v26  ;;  %v2669_v37 = vsub.f32 %v10302_v34, %v2590_v26  ;;  %v2983_v63 = vmul.f32 %v6293_v28, %v7903_v22 }
 0x6e1   : > { %v8104_v17 = vpop.eup %6294  ;;  %6314 = vpow2.f32 %v2778_v14  ;;  %2898 = vadd.xlane.f32.xlu0 %v2897_v29  ;;  %v2982_v3 = vmul.f32 %v6293_v28, %v7898_v7 }
 0x6e2   : > { %v8108_v36 = vpop.eup %6296  ;;  %v2764_v18 = vmul.f32 1.442695, %v2668_v25  ;;  %v2766_v33 = vmul.f32 1.442695, %v2669_v37  ;;  %6316 = vrcp.f32 %v2857_v48  ;;  %v3033_v42 = vpack.c.bf16 %v2983_v63, %v2981_v59 }
 0x6e3   : > { %v2848_v8 = vpop.xlane.xlu1 %2847  ;;  %v3032_v27 = vpack.c.bf16 %v2982_v3, %v2980_v11  ;;  %v2888_v22 = vadd.f32 %v8108_v36, %v8104_v17  ;;  %v6299_v34 = vpop.eup %6298 }
 0x6e4   : > { %v2593_v56 = vpop.xlane.xlu0 %2592  ;;  %6318 = vpow2.f32 %v2764_v18  ;;  %3054 = vmatprep.subr.bf16.mxu0 %v3033_v42  ;;  %v2976_v52 = vmul.f32 %v6299_v34, %v7910_v10 }
 0x6e5   : > { %v2670_v41 = vsub.f32 %v10305_v30, %v2593_v56  ;;  %v2671_v58 = vsub.f32 %v10304_v0, %v2593_v56  ;;  %v8114_v7 = vpop.eup %6300  ;;  %6320 = vpow2.f32 %v2766_v33  ;;  %3055 = vmatpush1.bf16.xpose.msra.mxu0 %v3032_v27  ;;  %2889 = vadd.xlane.f32.xlu1 %v2888_v22  ;;  %v2977_v30 = vmul.f32 %v6299_v34, %v7915_v12 }
 0x6e6   : > { %v8116_v44 = vpop.eup %6302  ;;  %6322 = vrcp.f32 %v2848_v8 }
 0x6e7   : > { %v2768_v62 = vmul.f32 1.442695, %v2670_v41  ;;  %v2770_v43 = vmul.f32 1.442695, %v2671_v58  ;;  %v6305_v50 = vpop.eup %6304  ;;  %v2842_v23 = vpop.xlane.xlu1 %2841  ;;  %v2891_v20 = vadd.f32 %v8116_v44, %v8114_v7 }
 0x6e8   : > { %v2851_v4 = vpop.xlane.xlu0 %2850  ;;  %v2979_v0 = vmul.f32 %v6305_v50, %v7927_v57  ;;  %v2978_v14 = vmul.f32 %v6305_v50, %v7922_v40 }
 0x6e9   : > { %6324 = vpow2.f32 %v2768_v62  ;;  %v8124_v28 = vpop.eup %6306  ;;  %2892 = vadd.xlane.f32.xlu0 %v2891_v20 }
 0x6ea   : > { %6326 = vpow2.f32 %v2770_v43  ;;  %v8126_v26 = vpop.eup %6308  ;;  %v3031_v48 = vpack.c.bf16 %v2979_v0, %v2977_v30  ;;  %v3030_v29 = vpack.c.bf16 %v2978_v14, %v2976_v52 }
 0x6eb   : > { %6328 = vrcp.f32 %v2842_v23  ;;  %v2882_v12 = vadd.f32 %v8126_v26, %v8124_v28  ;;  %v6311_v25 = vpop.eup %6310  ;;  %v2836_v11 = vpop.xlane.xlu1 %2835 }
 0x6ec   : > { %6330 = vrcp.f32 %v2851_v4  ;;  %v2845_v59 = vpop.xlane.xlu0 %2844  ;;  %3056 = vmatprep.subr.bf16.mxu0 %v3031_v48  ;;  %v2973_v3 = vmul.f32 %v6311_v25, %v7942_v49  ;;  %v2972_v33 = vmul.f32 %v6311_v25, %v7937_v51  ;;  %v10329_v25 = vld [vmem:[#allocation39_spill] sm:$0xff] }
 0x6ed   : > { %v8130_v57 = vpop.eup %6312  ;;  %3057 = vmatpush1.bf16.xpose.msra.mxu0 %v3030_v29  ;;  %6332 = vrcp.f32 %v2845_v59  ;;  %2883 = vadd.xlane.f32.xlu1 %v2882_v12 }
 0x6ee   : > { %v8132_v10 = vpop.eup %6314 }
 0x6ef   : > { %v6317_v40 = vpop.eup %6316  ;;  %v2885_v63 = vadd.f32 %v8132_v10, %v8130_v57  ;;  %v2830_v58 = vpop.xlane.xlu1 %2829 }
 0x6f0   : > { %v2839_v37 = vpop.xlane.xlu0 %2838  ;;  %v2975_v18 = vmul.f32 %v6317_v40, %v7952_v13  ;;  %v2974_v42 = vmul.f32 %v6317_v40, %v7947_v32 }
 0x6f1   : > { %v8140_v8 = vpop.eup %6318  ;;  %6334 = vrcp.f32 %v2839_v37  ;;  %2886 = vadd.xlane.f32.xlu0 %v2885_v63 }
 0x6f2   : > { %v8142_v27 = vpop.eup %6320  ;;  %v3029_v56 = vpack.c.bf16 %v2975_v18, %v2973_v3  ;;  %v3028_v22 = vpack.c.bf16 %v2974_v42, %v2972_v33  ;;  %6336 = vrcp.f32 %v2836_v11  ;;  %v10331_v33 = vld [vmem:[#allocation65_spill] sm:$0xff] }
 0x6f3   : > { %v2876_v34 = vadd.f32 %v8142_v27, %v8140_v8  ;;  %v6323_v41 = vpop.eup %6322 }
 0x6f4   : > { %3058 = vmatprep.subr.bf16.mxu0 %v3029_v56  ;;  %v2833_v51 = vpop.xlane.xlu0 %2832  ;;  %v2969_v50 = vmul.f32 %v6323_v41, %v7960_v38  ;;  %v2968_v4 = vmul.f32 %v6323_v41, %v7954_v45  ;;  %v10332_v56 = vld [vmem:[#allocation36_spill] sm:$0xff] }
 0x6f5   : > { %3059 = vmatpush1.bf16.xpose.msra.mxu0 %v3028_v22  ;;  %2877 = vadd.xlane.f32.xlu1 %v2876_v34  ;;  %6338 = vrcp.f32 %v2833_v51  ;;  %v10333_v34 = vld [vmem:[#allocation61_spill] sm:$0xff] }
 0x6f6   : > { %v8146_v49 = vpop.eup %6324  ;;  %6340 = vrcp.f32 %v2830_v58  ;;  %v618_v51 = vld [vmem:[%s9970_s3 + $0x158] sm:$0xff]  ;;  %v616_v58 = vld [vmem:[%s9970_s3 + $0x148] sm:$0xff] }
 0x6f7   : > { %v8148_v32 = vpop.eup %6326 }
 0x6f8   : > { %v6329_v13 = vpop.eup %6328  ;;  %v2879_v62 = vadd.f32 %v8148_v32, %v8146_v49 }
 0x6f9   : > { %v6331_v43 = vpop.eup %6330  ;;  %v2965_v14 = vmul.f32 %v6329_v13, %v7964_v15  ;;  %v615_v15 = vld [vmem:[%s9970_s3 + $0x140] sm:$0xff] }
 0x6fa   : > { %2880 = vadd.xlane.f32.xlu0 %v2879_v62  ;;  %v2971_v23 = vmul.f32 %v6331_v43, %v7972_v24  ;;  %v2970_v20 = vmul.f32 %v6331_v43, %v7966_v9  ;;  %v6333_v30 = vpop.eup %6332  ;;  %v2964_v9 = vmul.f32 %v6329_v13, %v7962_v5  ;;  %v10330_v5 = vld [vmem:[#allocation41_spill] sm:$0xff] }
 0x6fb   : > { %v2967_v48 = vmul.f32 %v6333_v30, %v7984_v2  ;;  %v2966_v24 = vmul.f32 %v6333_v30, %v7978_v1  ;;  %v617_v1 = vld [vmem:[%s9970_s3 + $0x150] sm:$0xff] }
 0x6fc   : > { %v3027_v0 = vpack.c.bf16 %v2971_v23, %v2969_v50  ;;  %v3026_v52 = vpack.c.bf16 %v2970_v20, %v2968_v4  ;;  %v620_v50 = vld [vmem:[%s9970_s3 + $0x168] sm:$0xff]  ;;  %v619_v4 = vld [vmem:[%s9970_s3 + $0x160] sm:$0xff]  ;;  %v10334_v20 = vld [vmem:[#allocation56_spill] sm:$0xff] }
 0x6fd   : > { %v3025_v29 = vpack.c.bf16 %v2967_v48, %v2965_v14  ;;  %v3024_v2 = vpack.c.bf16 %v2966_v24, %v2964_v9  ;;  %v622_v48 = vld [vmem:[%s9970_s3 + $0x178] sm:$0xff]  ;;  %v3158_v9 = vld [vmem:[%s9972_s5 + $0x8] sm:$0xff] }
 0x6fe   : > { %3060 = vmatprep.subr.bf16.mxu0 %v3027_v0  ;;  %v6335_v59 = vpop.eup %6334 }
 0x6ff   : > { %3061 = vmatpush1.bf16.xpose.msra.mxu0 %v3026_v52  ;;  %v6337_v38 = vpop.eup %6336  ;;  %v2963_v45 = vmul.f32 %v6335_v59, %v7996_v19  ;;  %v2962_v19 = vmul.f32 %v6335_v59, %v10330_v5  ;;  %v10335_v52 = vld [vmem:[#allocation38_spill] sm:$0xff]  ;;  %v621_v59 = vld [vmem:[%s9970_s3 + $0x170] sm:$0xff] }
 0x700   : > { %3062 = vmatprep.subr.bf16.mxu0 %v3025_v29  ;;  %v2961_v40 = vmul.f32 %v6337_v38, %v10329_v25  ;;  %v2960_v22 = vmul.f32 %v6337_v38, %v10332_v56  ;;  %v3157_v25 = vld [vmem:[%s9972_s5] sm:$0xff] }
 0x702   : > { %v6339_v37 = vpop.eup %6338  ;;  %v3023_v63 = vpack.c.bf16 %v2963_v45, %v2961_v40  ;;  %v3022_v13 = vpack.c.bf16 %v2962_v19, %v2960_v22  ;;  %v3160_v19 = vld [vmem:[%s9972_s5 + $0x18] sm:$0xff]  ;;  %v10336_v22 = vld [vmem:[#allocation46_spill] sm:$0xff] }
 0x703   : > { %v2920_v12 = vpop.xlane.xlu1 %2919  ;;  %v6341_v11 = vpop.eup %6340  ;;  %v2959_v42 = vmul.f32 %v6339_v37, %v10331_v33  ;;  %v2958_v30 = vmul.f32 %v6339_v37, %v10334_v20  ;;  %v10339_v20 = vld [vmem:[#allocation48_spill] sm:$0xff] }
 0x704   : > { %6342 = vrcp.f32 %v2920_v12  ;;  %v2957_v41 = vmul.f32 %v6341_v11, %v10333_v34  ;;  %v2956_v14 = vmul.f32 %v6341_v11, %v10335_v52 }
 0x706   : > { %825 = vperm.xlu1 %5877, %v615_v15   ;;  %v3021_v43 = vpack.c.bf16 %v2959_v42, %v2957_v41  ;;  %v3020_v29 = vpack.c.bf16 %v2958_v30, %v2956_v14  ;;  %v3161_v42 = vld [vmem:[%s9972_s5 + $0x20] sm:$0xff]  ;;  %v3164_v41 = vld [vmem:[%s9972_s5 + $0x38] sm:$0xff] }
 0x707   : > { %3063 = vmatpush1.bf16.xpose.msra.mxu0 %v3024_v2  ;;  %v2914_v3 = vpop.xlane.xlu1 %2913  ;;  %v3168_v14 = vld [vmem:[%s9972_s5 + $0x58] sm:$0xff] }
 0x708   : > { %3064 = vmatprep.subr.bf16.mxu0 %v3023_v63 }
 0x709   : > { %v2923_v18 = vpop.xlane.xlu0 %2922 }
 0x70a   : > { %6344 = vrcp.f32 %v2923_v18  ;;  %835 = vperm.xlu1 %5877, %v617_v1   ;;  %v3162_v18 = vld [vmem:[%s9972_s5 + $0x28] sm:$0xff] }
 0x70b   : > { %6346 = vrcp.f32 %v2914_v3  ;;  %v2908_v23 = vpop.xlane.xlu1 %2907 }
 0x70d   : > { %v2917_v62 = vpop.xlane.xlu0 %2916 }
 0x70e   : > { %6348 = vrcp.f32 %v2917_v62  ;;  %840 = vperm.xlu1 %5877, %v618_v51  }
 0x70f   : > { %3065 = vmatpush1.bf16.xpose.msra.mxu0 %v3022_v13  ;;  %v2902_v12 = vpop.xlane.xlu1 %2901  ;;  %v3163_v13 = vld [vmem:[%s9972_s5 + $0x30] sm:$0xff] }
 0x710   : > { %3066 = vmatprep.subr.bf16.mxu0 %v3021_v43  ;;  %830 = vperm.xlu0 %5876, %v616_v58   ;;  %v10337_v43 = vld [vmem:[#allocation43_spill] sm:$0xff] }
 0x711   : > { %v2911_v0 = vpop.xlane.xlu0 %2910  ;;  %v6343_v38 = vpop.eup %6342 }
 0x712   : > { %6350 = vrcp.f32 %v2911_v0  ;;  %850 = vperm.xlu1 %5877, %v620_v50   ;;  %v3017_v40 = vmul.f32 %v6343_v38, %v8026_v35  ;;  %v3016_v2 = vmul.f32 %v6343_v38, %v8024_v46  ;;  %v3159_v35 = vld [vmem:[%s9972_s5 + $0x10] sm:$0xff]  ;;  %v3170_v38 = vld [vmem:[%s9972_s5 + $0x68] sm:$0xff] }
 0x713   : > { %6352 = vrcp.f32 %v2908_v23  ;;  %v10338_v23 = vld [vmem:[#allocation47_spill] sm:$0xff]  ;;  %v10340_v0 = vld [vmem:[#allocation40_spill] sm:$0xff] }
 0x714   : > { %845 = vperm.xlu0 %5876, %v619_v4  }
 0x715   : > { %v2905_v24 = vpop.xlane.xlu0 %2904 }
 0x716   : > { %860 = vperm.xlu1 %5877, %v622_v48   ;;  %6354 = vrcp.f32 %v2905_v24  ;;  %v3169_v24 = vld [vmem:[%s9972_s5 + $0x60] sm:$0xff] }
 0x717   : > { %3067 = vmatpush1.bf16.xpose.msra.mxu0 %v3020_v29  ;;  %v6345_v45 = vpop.eup %6344  ;;  %6356 = vrcp.f32 %v2902_v12  ;;  %v3167_v29 = vld [vmem:[%s9972_s5 + $0x50] sm:$0xff]  ;;  %v10342_v12 = vld [vmem:[#allocation49_spill] sm:$0xff] }
 0x718   : > { %855 = vperm.xlu0 %5876, %v621_v59   ;;  %v3019_v15 = vmul.f32 %v6345_v45, %v8038_v47  ;;  %v3018_v37 = vmul.f32 %v6345_v45, %v8034_v16  ;;  %v6347_v63 = vpop.eup %6346  ;;  %v10341_v45 = vld [vmem:[#allocation44_spill] sm:$0xff] }
 0x719   : > { %v3013_v46 = vmul.f32 %v6347_v63, %v8032_v60 }
 0x71a   : > { %3180 = vperm.xlu1 %5877, %v3158_v9   ;;  %v3051_v11 = vpack.c.bf16 %v3019_v15, %v3017_v40  ;;  %v3050_v1 = vpack.c.bf16 %v3018_v37, %v3016_v2  ;;  %v3172_v40 = vld [vmem:[%s9972_s5 + $0x78] sm:$0xff]  ;;  %v3171_v2 = vld [vmem:[%s9972_s5 + $0x70] sm:$0xff] }
 0x71b   : > { %v6349_v5 = vpop.eup %6348  ;;  %v3650_v37 = vld [vmem:[%s9973_s6 + $0x78] sm:$0xff] }
 0x71c   : > { %3175 = vperm.xlu0 %5876, %v3157_v25   ;;  %3068 = vmatprep.subr.bf16.mxu0 %v3051_v11  ;;  %v3015_v16 = vmul.f32 %v6349_v5, %v8050_v55  ;;  %v3014_v56 = vmul.f32 %v6349_v5, %v8046_v6  ;;  %v3012_v55 = vmul.f32 %v6347_v63, %v8030_v39  ;;  %v3166_v39 = vld [vmem:[%s9972_s5 + $0x48] sm:$0xff]  ;;  %v3649_v63 = vld [vmem:[%s9973_s6 + $0x70] sm:$0xff]  ;;  %v3778_v11 = vld [vmem:[%s9974_s7 + $0x78] sm:$0xff] }
 0x71d   : > { %v3648_v5 = vld [vmem:[%s9973_s6 + $0x68] sm:$0xff] }
 0x71e   : > { %3190 = vperm.xlu1 %5877, %v3160_v19   ;;  %v3049_v47 = vpack.c.bf16 %v3015_v16, %v3013_v46  ;;  %v3048_v51 = vpack.c.bf16 %v3014_v56, %v3012_v55  ;;  %v3647_v19 = vld [vmem:[%s9973_s6 + $0x60] sm:$0xff]  ;;  %v3646_v16 = vld [vmem:[%s9973_s6 + $0x58] sm:$0xff]  ;;  %v3772_v56 = vld [vmem:[%s9974_s7 + $0x48] sm:$0xff] }
 0x71f   : > { %3069 = vmatpush2.bf16.xpose.msra.mxu0 %v3050_v1  ;;  %v6351_v3 = vpop.eup %6350  ;;  %v3777_v1 = vld [vmem:[%s9974_s7 + $0x70] sm:$0xff]  ;;  %v3775_v46 = vld [vmem:[%s9974_s7 + $0x60] sm:$0xff]  ;;  %v3642_v55 = vld [vmem:[%s9973_s6 + $0x38] sm:$0xff] }
 0x720   : > { %3185 = vperm.xlu0 %5876, %v3159_v35   ;;  %v6353_v33 = vpop.eup %6352  ;;  %3070 = vmatprep.subr.bf16.mxu0 %v3049_v47  ;;  %v3011_v60 = vmul.f32 %v6351_v3, %v8062_v61  ;;  %v3165_v61 = vld [vmem:[%s9972_s5 + $0x40] sm:$0xff]  ;;  %v3010_v50 = vmul.f32 %v6351_v3, %v10337_v43  ;;  %v3776_v35 = vld [vmem:[%s9974_s7 + $0x68] sm:$0xff]  ;;  %v3645_v47 = vld [vmem:[%s9973_s6 + $0x50] sm:$0xff]  ;;  %v8334_v43 = vpop.f32.mrf.mxu0 }
 0x721   : > { %v3009_v34 = vmul.f32 %v6353_v33, %v10336_v22  ;;  %v3008_v30 = vmul.f32 %v6353_v33, %v10339_v20  ;;  %v3774_v3 = vld [vmem:[%s9974_s7 + $0x58] sm:$0xff]  ;;  %v3644_v33 = vld [vmem:[%s9973_s6 + $0x48] sm:$0xff]  ;;  %v3641_v22 = vld [vmem:[%s9973_s6 + $0x30] sm:$0xff] }
 0x722   : > { %3200 = vperm.xlu1 %5877, %v3162_v18   ;;  %v3773_v18 = vld [vmem:[%s9974_s7 + $0x50] sm:$0xff]  ;;  %v8342_v20 = vpop.f32.mrf.mxu0 }
 0x723   : > { %v3047_v58 = vpack.c.bf16 %v3011_v60, %v3009_v34  ;;  %v6355_v62 = vpop.eup %6354  ;;  %v3046_v48 = vpack.c.bf16 %v3010_v50, %v3008_v30  ;;  %v3771_v60 = vld [vmem:[%s9974_s7 + $0x40] sm:$0xff]  ;;  %v3770_v34 = vld [vmem:[%s9974_s7 + $0x38] sm:$0xff] }
 0x724   : > { %3195 = vperm.xlu0 %5876, %v3161_v42   ;;  %v6357_v6 = vpop.eup %6356  ;;  %v3007_v4 = vmul.f32 %v6355_v62, %v10338_v23  ;;  %v3006_v9 = vmul.f32 %v6355_v62, %v10341_v45  ;;  %v3643_v42 = vld [vmem:[%s9973_s6 + $0x40] sm:$0xff]  ;;  %v3766_v23 = vld [vmem:[%s9974_s7 + $0x18] sm:$0xff] }
 0x725   : > { %v3005_v52 = vmul.f32 %v6357_v6, %v10340_v0  ;;  %v3004_v25 = vmul.f32 %v6357_v6, %v10342_v12  ;;  %v3767_v62 = vld [vmem:[%s9974_s7 + $0x20] sm:$0xff]  ;;  %v3638_v6 = vld [vmem:[%s9973_s6 + $0x18] sm:$0xff]  ;;  %v3636_v0 = vld [vmem:[%s9973_s6 + $0x8] sm:$0xff] }
 0x726   : > { %3210 = vperm.xlu1 %5877, %v3164_v41   ;;  %v3769_v41 = vld [vmem:[%s9974_s7 + $0x30] sm:$0xff] }
 0x727   : > { %3071 = vmatpush2.bf16.xpose.msra.mxu0 %v3048_v51  ;;  %v3045_v59 = vpack.c.bf16 %v3007_v4, %v3005_v52  ;;  %v3044_v15 = vpack.c.bf16 %v3006_v9, %v3004_v25  ;;  %v3640_v51 = vld [vmem:[%s9973_s6 + $0x28] sm:$0xff]  ;;  %v3765_v4 = vld [vmem:[%s9974_s7 + $0x10] sm:$0xff]  ;;  %v3635_v52 = vld [vmem:[%s9973_s6] sm:$0xff] }
 0x728   : > { %3072 = vmatprep.subr.bf16.mxu0 %v3047_v58  ;;  %3205 = vperm.xlu0 %5876, %v3163_v13   ;;  %v3639_v13 = vld [vmem:[%s9973_s6 + $0x20] sm:$0xff]  ;;  %v3768_v58 = vld [vmem:[%s9974_s7 + $0x28] sm:$0xff]  ;;  %v3986_v9 = vld [vmem:[%s9976_s9 + $0x78] sm:$0xff] }
 0x729   : > { %v3985_v25 = vld [vmem:[%s9976_s9 + $0x70] sm:$0xff] }
 0x72a   : > { %3220 = vperm.xlu1 %5877, %v3166_v39  }
 0x72c   : > { %3215 = vperm.xlu0 %5876, %v3165_v61   ;;  %v3637_v61 = vld [vmem:[%s9973_s6 + $0x10] sm:$0xff] }
 0x72e   : > { %3230 = vperm.xlu1 %5877, %v3168_v14   ;;  %v8350_v14 = vpop.f32.mrf.mxu0 }
 0x72f   : > { %3073 = vmatpush2.bf16.xpose.msra.mxu0 %v3046_v48 }
 0x730   : > { %3074 = vmatprep.subr.bf16.mxu0 %v3045_v59  ;;  %3225 = vperm.xlu0 %5876, %v3167_v29   ;;  %v3764_v29 = vld [vmem:[%s9974_s7 + $0x8] sm:$0xff]  ;;  %v3763_v59 = vld [vmem:[%s9974_s7] sm:$0xff] }
 0x732   : > { %3240 = vperm.xlu1 %5877, %v3170_v38   ;;  %v8358_v38 = vpop.f32.mrf.mxu0 }
 0x734   : > { %3235 = vperm.xlu0 %5876, %v3169_v24  }
 0x736   : > { %3250 = vperm.xlu1 %5877, %v3172_v40   ;;  %v8366_v40 = vpop.f32.mrf.mxu0 }
 0x737   : > { %3075 = vmatpush2.bf16.xpose.msra.mxu0 %v3044_v15 }
 0x738   : > { %3245 = vperm.xlu0 %5876, %v3171_v2  }
 0x73a   : > { %3728 = vperm.xlu1 %5877, %v3650_v37  }
 0x73c   : > { %3723 = vperm.xlu0 %5876, %v3649_v63  }
 0x73e   : > { %3856 = vperm.xlu1 %5877, %v3778_v11  }
 0x740   : > { %3851 = vperm.xlu0 %5876, %v3777_v1  }
 0x742   : > { %3718 = vperm.xlu1 %5877, %v3648_v5   ;;  %v3984_v5 = vld [vmem:[%s9976_s9 + $0x68] sm:$0xff] }
 0x744   : > { %3713 = vperm.xlu0 %5876, %v3647_v19  }
 0x746   : > { %3846 = vperm.xlu1 %5877, %v3776_v35   ;;  %v3982_v35 = vld [vmem:[%s9976_s9 + $0x58] sm:$0xff] }
 0x748   : > { %3841 = vperm.xlu0 %5876, %v3775_v46  }
 0x74a   : > { %3708 = vperm.xlu1 %5877, %v3646_v16   ;;  %v3981_v16 = vld [vmem:[%s9976_s9 + $0x50] sm:$0xff] }
 0x74c   : > { %3703 = vperm.xlu0 %5876, %v3645_v47  }
 0x74e   : > { %3836 = vperm.xlu1 %5877, %v3774_v3  }
 0x750   : > { %3831 = vperm.xlu0 %5876, %v3773_v18  }
 0x752   : > { %3698 = vperm.xlu1 %5877, %v3644_v33  }
 0x754   : > { %3693 = vperm.xlu0 %5876, %v3643_v42  }
 0x756   : > { %3826 = vperm.xlu1 %5877, %v3772_v56  }
 0x758   : > { %3821 = vperm.xlu0 %5876, %v3771_v60  }
 0x75a   : > { %3688 = vperm.xlu1 %5877, %v3642_v55   ;;  %v3980_v55 = vld [vmem:[%s9976_s9 + $0x48] sm:$0xff] }
 0x75c   : > { %3683 = vperm.xlu0 %5876, %v3641_v22  }
 0x75e   : > { %3816 = vperm.xlu1 %5877, %v3770_v34  }
 0x760   : > { %3811 = vperm.xlu0 %5876, %v3769_v41  }
 0x762   : > { %3678 = vperm.xlu1 %5877, %v3640_v51   ;;  %v3977_v51 = vld [vmem:[%s9976_s9 + $0x30] sm:$0xff] }
 0x764   : > { %3673 = vperm.xlu0 %5876, %v3639_v13  }
 0x766   : > { %3806 = vperm.xlu1 %5877, %v3768_v58   ;;  %v2896_v39 = vpop.xlane.xlu1 %2895 }
 0x767   : > { %6358 = vrcp.f32 %v2896_v39 }
 0x768   : > { %3801 = vperm.xlu0 %5876, %v3767_v62  }
 0x76a   : > { %3668 = vperm.xlu1 %5877, %v3638_v6   ;;  %v2899_v50 = vpop.xlane.xlu0 %2898 }
 0x76b   : > { %6360 = vrcp.f32 %v2899_v50 }
 0x76c   : > { %3663 = vperm.xlu0 %5876, %v3637_v61  }
 0x76e   : > { %3796 = vperm.xlu1 %5877, %v3766_v23   ;;  %v2890_v30 = vpop.xlane.xlu1 %2889 }
 0x76f   : > { %6362 = vrcp.f32 %v2890_v30 }
 0x770   : > { %3791 = vperm.xlu0 %5876, %v3765_v4   ;;  %v3976_v4 = vld [vmem:[%s9976_s9 + $0x28] sm:$0xff] }
 0x772   : > { %3658 = vperm.xlu1 %5877, %v3636_v0   ;;  %v2893_v48 = vpop.xlane.xlu0 %2892 }
 0x773   : > { %6364 = vrcp.f32 %v2893_v48 }
 0x774   : > { %3653 = vperm.xlu0 %5876, %v3635_v52   ;;  %v6359_v24 = vpop.eup %6358 }
 0x775   : > { %v3001_v15 = vmul.f32 %v6359_v24, %v8088_v53  ;;  %v3000_v37 = vmul.f32 %v6359_v24, %v8086_v31  ;;  %v3983_v53 = vld [vmem:[%s9976_s9 + $0x60] sm:$0xff] }
 0x776   : > { %3786 = vperm.xlu1 %5877, %v3764_v29   ;;  %v2884_v45 = vpop.xlane.xlu1 %2883 }
 0x777   : > { %6366 = vrcp.f32 %v2884_v45 }
 0x778   : > { %3781 = vperm.xlu0 %5876, %v3763_v59   ;;  %v6361_v12 = vpop.eup %6360  ;;  %v3973_v59 = vld [vmem:[%s9976_s9 + $0x10] sm:$0xff] }
 0x779   : > { %v3003_v2 = vmul.f32 %v6361_v12, %v8096_v21  ;;  %v3002_v63 = vmul.f32 %v6361_v12, %v8094_v54  ;;  %v8378_v21 = vpop.f32.mrf.mxu0  ;;  %v3972_v12 = vld [vmem:[%s9976_s9 + $0x8] sm:$0xff] }
 0x77a   : > { %4112 = vperm.xlu1 %5877, %v3986_v9   ;;  %v2887_v11 = vpop.xlane.xlu0 %2886 }
 0x77b   : > { %6368 = vrcp.f32 %v2887_v11  ;;  %v3043_v1 = vpack.c.bf16 %v3003_v2, %v3001_v15  ;;  %v3042_v19 = vpack.c.bf16 %v3002_v63, %v3000_v37  ;;  %v8386_v47 = vpop.f32.mrf.mxu0  ;;  %v3971_v37 = vld [vmem:[%s9976_s9] sm:$0xff]  ;;  %v4001_v11 = vld [vmem:[%s9976_s9 + $0xf0] sm:$0xff] }
 0x77c   : > { %4107 = vperm.xlu0 %5876, %v3985_v25   ;;  %v6363_v31 = vpop.eup %6362 }
 0x77d   : > { %3076 = vmatprep.subr.bf16.mxu0 %v3043_v1  ;;  %v2997_v3 = vmul.f32 %v6363_v31, %v8108_v36  ;;  %v2996_v56 = vmul.f32 %v6363_v31, %v8104_v17  ;;  %v3979_v36 = vld [vmem:[%s9976_s9 + $0x40] sm:$0xff]  ;;  %v3978_v17 = vld [vmem:[%s9976_s9 + $0x38] sm:$0xff] }
 0x77e   : > { %4102 = vperm.xlu1 %5877, %v3984_v5   ;;  %3077 = vmatpush2.bf16.xpose.msra.mxu0 %v3042_v19  ;;  %v2878_v54 = vpop.xlane.xlu1 %2877  ;;  %v4000_v19 = vld [vmem:[%s9976_s9 + $0xe8] sm:$0xff] }
 0x77f   : > { %6370 = vrcp.f32 %v2878_v54  ;;  %v3999_v54 = vld [vmem:[%s9976_s9 + $0xe0] sm:$0xff] }
 0x780   : > { %4097 = vperm.xlu0 %5876, %v3983_v53   ;;  %v6365_v46 = vpop.eup %6364 }
 0x781   : > { %v2999_v18 = vmul.f32 %v6365_v46, %v8116_v44  ;;  %v2998_v33 = vmul.f32 %v6365_v46, %v8114_v7  ;;  %v1257_v44 = vpop.f32.mrf.mxu0 }
 0x782   : > { %4092 = vperm.xlu1 %5877, %v3982_v35   ;;  %v826_v41 = vpop.permute.xlu1 %825 }
 0x783   : > { %v2881_v42 = vpop.xlane.xlu0 %2880  ;;  %v3041_v60 = vpack.c.bf16 %v2999_v18, %v2997_v3  ;;  %v3040_v22 = vpack.c.bf16 %v2998_v33, %v2996_v56  ;;  %v8404_v13 = vpop.f32.mrf.mxu0  ;;  %v1244_v50 = vadd.f32 %v8342_v20, %v826_v41  ;;  %v1242_v1 = vadd.f32 %v8334_v43, %v826_v41  ;;  %v3998_v43 = vld [vmem:[%s9976_s9 + $0xd8] sm:$0xff]  ;;  %v3997_v33 = vld [vmem:[%s9976_s9 + $0xd0] sm:$0xff]  ;;  %v3996_v56 = vld [vmem:[%s9976_s9 + $0xc8] sm:$0xff] }
 0x784   : > { %6372 = vrcp.f32 %v2881_v42  ;;  %4087 = vperm.xlu0 %5876, %v3981_v16   ;;  %v6367_v7 = vpop.eup %6366 }
 0x785   : > { %3078 = vmatprep.subr.bf16.mxu0 %v3041_v60  ;;  %v2993_v6 = vmul.f32 %v6367_v7, %v8126_v26  ;;  %v2992_v61 = vmul.f32 %v6367_v7, %v8124_v28  ;;  %v3974_v26 = vld [vmem:[%s9976_s9 + $0x18] sm:$0xff] }
 0x786   : > { %4082 = vperm.xlu1 %5877, %v3980_v55   ;;  %3079 = vmatpush2.bf16.xpose.msra.mxu0 %v3040_v22  ;;  %v836_v48 = vpop.permute.xlu1 %835 }
 0x787   : > { %v1254_v5 = vadd.f32 %v8378_v21, %v836_v48  ;;  %v1252_v42 = vadd.f32 %v8366_v40, %v836_v48  ;;  %v3994_v40 = vld [vmem:[%s9976_s9 + $0xb8] sm:$0xff]  ;;  %v4013_v48 = vld [vmem:[%s9976_s9 + $0x150] sm:$0xff] }
 0x788   : > { %4077 = vperm.xlu0 %5876, %v3979_v36   ;;  %v6369_v34 = vpop.eup %6368 }
 0x789   : > { %v2995_v58 = vmul.f32 %v6369_v34, %v8132_v10  ;;  %v2994_v62 = vmul.f32 %v6369_v34, %v8130_v57  ;;  %v1263_v10 = vpop.f32.mrf.mxu0  ;;  %v3975_v57 = vld [vmem:[%s9976_s9 + $0x20] sm:$0xff] }
 0x78a   : > { %4072 = vperm.xlu1 %5877, %v3978_v17  }
 0x78b   : > { %v831_v39 = vpop.permute.xlu0 %830  ;;  %v3039_v30 = vpack.c.bf16 %v2995_v58, %v2993_v6  ;;  %v3038_v0 = vpack.c.bf16 %v2994_v62, %v2992_v61  ;;  %v1265_v29 = vpop.f32.mrf.mxu0  ;;  %v3992_v58 = vld [vmem:[%s9976_s9 + $0xa8] sm:$0xff]  ;;  %v3991_v6 = vld [vmem:[%s9976_s9 + $0xa0] sm:$0xff] }
 0x78c   : > { %v1248_v23 = vadd.f32 %v8358_v38, %v831_v39  ;;  %4067 = vperm.xlu0 %5876, %v3977_v51   ;;  %v6371_v28 = vpop.eup %6370  ;;  %v3993_v51 = vld [vmem:[%s9976_s9 + $0xb0] sm:$0xff] }
 0x78d   : > { %3080 = vmatprep.subr.bf16.mxu0 %v3039_v30  ;;  %v2989_v45 = vmul.f32 %v6371_v28, %v8142_v27  ;;  %v2988_v9 = vmul.f32 %v6371_v28, %v8140_v8  ;;  %v1267_v2 = vpop.f32.mrf.mxu0  ;;  %v4002_v8 = vld [vmem:[%s9976_s9 + $0xf8] sm:$0xff]  ;;  %v1246_v27 = vadd.f32 %v8350_v14, %v831_v39  ;;  %v4016_v28 = vld [vmem:[%s9976_s9 + $0x168] sm:$0xff] }
 0x78e   : > { %v2244_v52 = vpack.c.bf16 %v1248_v23, %v1244_v50  ;;  %4062 = vperm.xlu1 %5877, %v3976_v4   ;;  %3081 = vmatpush2.bf16.xpose.msra.mxu0 %v3038_v0  ;;  %v3989_v23 = vld [vmem:[%s9976_s9 + $0x90] sm:$0xff]  ;;  %v3988_v4 = vld [vmem:[%s9976_s9 + $0x88] sm:$0xff]  ;;  %v3987_v0 = vld [vmem:[%s9976_s9 + $0x80] sm:$0xff] }
 0x78f   : > { %v1271_v63 = vpop.f32.mrf.mxu0  ;;  %v2243_v53 = vpack.c.bf16 %v1246_v27, %v1242_v1  ;;  %v846_v46 = vpop.permute.xlu0 %845  ;;  %v4005_v27 = vld [vmem:[%s9976_s9 + $0x110] sm:$0xff] }
 0x790   : > { %4057 = vperm.xlu0 %5876, %v3975_v57   ;;  %3084 = vmatprep.mubr.bf16.mxu0 %v2244_v52  ;;  %v1264_v3 = vadd.f32 %v1263_v10, %v846_v46  ;;  %v1262_v17 = vadd.f32 %v8404_v13, %v846_v46  ;;  %v3990_v13 = vld [vmem:[%s9976_s9 + $0x98] sm:$0xff]  ;;  %v10343_v57 = vmov 0   ;;  %v4017_v52 = vld [vmem:[%s9976_s9 + $0x170] sm:$0xff] }
 0x791   : > { %v6373_v20 = vpop.eup %6372  ;;  %v1273_v31 = vpop.f32.mrf.mxu0  ;;  %v4018_v10 = vld [vmem:[%s9976_s9 + $0x178] sm:$0xff] }
 0x792   : > { %v2991_v38 = vmul.f32 %v6373_v20, %v8148_v32  ;;  %v2990_v24 = vmul.f32 %v6373_v20, %v8146_v49  ;;  %4052 = vperm.xlu1 %5877, %v3974_v26   ;;  %v841_v32 = vpop.permute.xlu1 %840  ;;  %v4015_v26 = vld [vmem:[%s9976_s9 + $0x160] sm:$0xff]  ;;  %v4014_v20 = vld [vmem:[%s9976_s9 + $0x158] sm:$0xff] }
 0x793   : > { %v1258_v49 = vadd.f32 %v1257_v44, %v841_v32  ;;  %v1256_v21 = vadd.f32 %v8386_v47, %v841_v32  ;;  %v1275_v18 = vpop.f32.mrf.mxu0  ;;  %v3995_v47 = vld [vmem:[%s9976_s9 + $0xc0] sm:$0xff]  ;;  %v856_v44 = vpop.permute.xlu0 %855  ;;  %v4006_v32 = vld [vmem:[%s9976_s9 + $0x118] sm:$0xff] }
 0x794   : > { %4047 = vperm.xlu0 %5876, %v3973_v59   ;;  %v3037_v25 = vpack.c.bf16 %v2991_v38, %v2989_v45  ;;  %v3036_v15 = vpack.c.bf16 %v2990_v24, %v2988_v9  ;;  %v1274_v41 = vadd.f32 %v1273_v31, %v856_v44  ;;  %v1272_v50 = vadd.f32 %v1271_v63, %v856_v44  ;;  %v4012_v59 = vld [vmem:[%s9976_s9 + $0x148] sm:$0xff]  ;;  %v4011_v24 = vld [vmem:[%s9976_s9 + $0x140] sm:$0xff]  ;;  %v4010_v45 = vld [vmem:[%s9976_s9 + $0x138] sm:$0xff] }
 0x795   : > { %v2246_v14 = vpack.c.bf16 %v1258_v49, %v1254_v5  ;;  %v2245_v60 = vpack.c.bf16 %v1256_v21, %v1252_v42  ;;  %v1277_v55 = vpop.f32.mrf.mxu0  ;;  %v4004_v49 = vld [vmem:[%s9976_s9 + $0x108] sm:$0xff]  ;;  %v4034_v5 = vld [vmem:[%s9976_s9 + $0x1f8] sm:$0xff]  ;;  %v4021_v44 = vld [vmem:[%s9976_s9 + $0x190] sm:$0xff] }
 0x796   : > { %3082 = vmatprep.subr.bf16.mxu0 %v3037_v25  ;;  %4042 = vperm.xlu1 %5877, %v3972_v12   ;;  %v851_v35 = vpop.permute.xlu1 %850  ;;  %v4009_v12 = vld [vmem:[%s9976_s9 + $0x130] sm:$0xff]  ;;  %v4032_v31 = vld [vmem:[%s9976_s9 + $0x1e8] sm:$0xff] }
 0x797   : > { %3083 = vmatpush2.bf16.xpose.msra.mxu0 %v3036_v15  ;;  %v1268_v16 = vadd.f32 %v1267_v2, %v851_v35  ;;  %v1266_v7 = vadd.f32 %v1265_v29, %v851_v35  ;;  %v8512_v38 = vpop.permute.xlu0 %3175  ;;  %v4008_v15 = vld [vmem:[%s9976_s9 + $0x128] sm:$0xff]  ;;  %v4007_v2 = vld [vmem:[%s9976_s9 + $0x120] sm:$0xff]  ;;  %v4030_v35 = vld [vmem:[%s9976_s9 + $0x1d8] sm:$0xff] }
 0x798   : > { %4037 = vperm.xlu0 %5876, %v3971_v37  }
 0x799   : > { %v2248_v22 = vpack.c.bf16 %v1268_v16, %v1264_v3  ;;  %v2247_v62 = vpack.c.bf16 %v1266_v7, %v1262_v17  ;;  %v4028_v16 = vld [vmem:[%s9976_s9 + $0x1c8] sm:$0xff]  ;;  %v4027_v3 = vld [vmem:[%s9976_s9 + $0x1c0] sm:$0xff] }
 0x79a   : > { %4192 = vperm.xlu1 %5877, %v4002_v8   ;;  %v861_v36 = vpop.permute.xlu1 %860  ;;  %v4020_v7 = vld [vmem:[%s9976_s9 + $0x188] sm:$0xff] }
 0x79b   : > { %v1278_v34 = vadd.f32 %v1277_v55, %v861_v36  ;;  %v1276_v61 = vadd.f32 %v1275_v18, %v861_v36  ;;  %v8525_v25 = vpop.permute.xlu0 %3185  ;;  %v4022_v36 = vld [vmem:[%s9976_s9 + $0x198] sm:$0xff] }
 0x79c   : > { %4187 = vperm.xlu0 %5876, %v4001_v11   ;;  %v4003_v11 = vld [vmem:[%s9976_s9 + $0x100] sm:$0xff] }
 0x79d   : > { %v2250_v39 = vpack.c.bf16 %v1278_v34, %v1274_v41  ;;  %v2249_v30 = vpack.c.bf16 %v1276_v61, %v1272_v50  ;;  %v4019_v34 = vld [vmem:[%s9976_s9 + $0x180] sm:$0xff]  ;;  %v5125_v41 = vld [vmem:[%s9978_s11 + $0x8] sm:$0xff] }
 0x79e   : > { %3085 = vmatmul.mubr.bf16.vlgmr.msra.gmra.mxu0 %v2243_v53  ;;  %4182 = vperm.xlu1 %5877, %v4000_v19   ;;  %v8507_v29 = vpop.permute.xlu1 %3180  ;;  %v4033_v19 = vld [vmem:[%s9976_s9 + $0x1f0] sm:$0xff]  ;;  %v5129_v61 = vld [vmem:[%s9978_s11 + $0x28] sm:$0xff] }
 0x79f   : > { %3094 = vmatprep.mubr.bf16.mxu0 %v2246_v14  ;;  %v8538_v8 = vpop.permute.xlu0 %3195 }
 0x7a0   : > { %4177 = vperm.xlu0 %5876, %v3999_v54   ;;  %v4031_v54 = vld [vmem:[%s9976_s9 + $0x1e0] sm:$0xff] }
 0x7a2   : > { %4172 = vperm.xlu1 %5877, %v3998_v43   ;;  %v8520_v9 = vpop.permute.xlu1 %3190  ;;  %v4029_v43 = vld [vmem:[%s9976_s9 + $0x1d0] sm:$0xff] }
 0x7a3   : > { %v8551_v1 = vpop.permute.xlu0 %3205 }
 0x7a4   : > { %4167 = vperm.xlu0 %5876, %v3997_v33   ;;  %v4026_v33 = vld [vmem:[%s9976_s9 + $0x1b8] sm:$0xff] }
 0x7a6   : > { %3095 = vmatmul.mubr.bf16.gmra.mxu0 %v2245_v60  ;;  %4162 = vperm.xlu1 %5877, %v3996_v56   ;;  %v8533_v37 = vpop.permute.xlu1 %3200  ;;  %v4025_v56 = vld [vmem:[%s9976_s9 + $0x1b0] sm:$0xff]  ;;  %v4024_v60 = vld [vmem:[%s9976_s9 + $0x1a8] sm:$0xff] }
 0x7a7   : > { %3104 = vmatprep.mubr.bf16.mxu0 %v2248_v22  ;;  %v8564_v14 = vpop.permute.xlu0 %3215  ;;  %v4023_v22 = vld [vmem:[%s9976_s9 + $0x1a0] sm:$0xff] }
 0x7a8   : > { %4157 = vperm.xlu0 %5876, %v3995_v47  }
 0x7aa   : > { %4152 = vperm.xlu1 %5877, %v3994_v40   ;;  %v8546_v63 = vpop.permute.xlu1 %3210 }
 0x7ab   : > { %v8577_v21 = vpop.permute.xlu0 %3225 }
 0x7ac   : > { %4147 = vperm.xlu0 %5876, %v3993_v51  }
 0x7ae   : > { %3105 = vmatmul.mubr.bf16.gmra.mxu0 %v2247_v62  ;;  %4142 = vperm.xlu1 %5877, %v3992_v58   ;;  %v8559_v53 = vpop.permute.xlu1 %3220  ;;  %v5124_v58 = vld [vmem:[%s9978_s11] sm:$0xff] }
 0x7af   : > { %3114 = vmatprep.mubr.bf16.mxu0 %v2250_v39  ;;  %v8590_v42 = vpop.permute.xlu0 %3235  ;;  %v5127_v39 = vld [vmem:[%s9978_s11 + $0x18] sm:$0xff] }
 0x7b0   : > { %4137 = vperm.xlu0 %5876, %v3991_v6   ;;  %v5126_v6 = vld [vmem:[%s9978_s11 + $0x10] sm:$0xff] }
 0x7b2   : > { %4132 = vperm.xlu1 %5877, %v3990_v13   ;;  %v8572_v46 = vpop.permute.xlu1 %3230 }
 0x7b3   : > { %v8603_v47 = vpop.permute.xlu0 %3245 }
 0x7b4   : > { %4127 = vperm.xlu0 %5876, %v3989_v23   ;;  %v5128_v23 = vld [vmem:[%s9978_s11 + $0x20] sm:$0xff] }
 0x7b6   : > { %3115 = vmatmul.mubr.bf16.gmra.mxu0 %v2249_v30  ;;  %4122 = vperm.xlu1 %5877, %v3988_v4   ;;  %v8585_v18 = vpop.permute.xlu1 %3240  ;;  %v5131_v4 = vld [vmem:[%s9978_s11 + $0x38] sm:$0xff] }
 0x7b7   : > { %3333 = vmatprep.mubr.bf16.mxu0 %v10343_v57  ;;  %v8616_v17 = vpop.permute.xlu0 %3723 }
 0x7b8   : > { %4117 = vperm.xlu0 %5876, %v3987_v0   ;;  %v5130_v0 = vld [vmem:[%s9978_s11 + $0x30] sm:$0xff] }
 0x7ba   : > { %4272 = vperm.xlu1 %5877, %v4018_v10   ;;  %v8598_v55 = vpop.permute.xlu1 %3250 }
 0x7bb   : > { %v8629_v62 = vpop.permute.xlu0 %3851 }
 0x7bc   : > { %4267 = vperm.xlu0 %5876, %v4017_v52   ;;  %v5133_v52 = vld [vmem:[%s9978_s11 + $0x48] sm:$0xff] }
 0x7be   : > { %4262 = vperm.xlu1 %5877, %v4016_v28   ;;  %v8611_v40 = vpop.permute.xlu1 %3728  ;;  %v5132_v28 = vld [vmem:[%s9978_s11 + $0x40] sm:$0xff] }
 0x7bf   : > { %v8642_v50 = vpop.permute.xlu0 %3713 }
 0x7c0   : > { %4257 = vperm.xlu0 %5876, %v4015_v26  }
 0x7c2   : > { %4252 = vperm.xlu1 %5877, %v4014_v20   ;;  %v8624_v51 = vpop.permute.xlu1 %3856  ;;  %v5135_v20 = vld [vmem:[%s9978_s11 + $0x58] sm:$0xff] }
 0x7c3   : > { %v8655_v10 = vpop.permute.xlu0 %3841 }
 0x7c4   : > { %4247 = vperm.xlu0 %5876, %v4013_v48  }
 0x7c6   : > { %4242 = vperm.xlu1 %5877, %v4012_v59   ;;  %v8637_v13 = vpop.permute.xlu1 %3718  ;;  %v5134_v59 = vld [vmem:[%s9978_s11 + $0x50] sm:$0xff] }
 0x7c7   : > { %v8668_v48 = vpop.permute.xlu0 %3703 }
 0x7c8   : > { %4237 = vperm.xlu0 %5876, %v4011_v24   ;;  %v5137_v24 = vld [vmem:[%s9978_s11 + $0x68] sm:$0xff] }
 0x7ca   : > { %4232 = vperm.xlu1 %5877, %v4010_v45   ;;  %v8650_v30 = vpop.permute.xlu1 %3846 }
 0x7cc   : > { %4227 = vperm.xlu0 %5876, %v4009_v12   ;;  %v5136_v12 = vld [vmem:[%s9978_s11 + $0x60] sm:$0xff] }
 0x7ce   : > { %4222 = vperm.xlu1 %5877, %v4008_v15   ;;  %v8663_v26 = vpop.permute.xlu1 %3708  ;;  %v8681_v15 = vpop.permute.xlu0 %3831 }
 0x7d0   : > { %4217 = vperm.xlu0 %5876, %v4007_v2   ;;  %v5139_v2 = vld [vmem:[%s9978_s11 + $0x78] sm:$0xff] }
 0x7d2   : > { %4212 = vperm.xlu1 %5877, %v4006_v32   ;;  %v8676_v45 = vpop.permute.xlu1 %3836  ;;  %v5138_v32 = vld [vmem:[%s9978_s11 + $0x70] sm:$0xff] }
 0x7d3   : > { %10344 = vst [vmem:[#allocation42_spill] sm:$0xff] %v8676_v45 }
 0x7d4   : > { %4207 = vperm.xlu0 %5876, %v4005_v27  }
 0x7d6   : > { %4202 = vperm.xlu1 %5877, %v4004_v49   ;;  %v8689_v27 = vpop.permute.xlu1 %3698  ;;  %v8691_v49 = vpop.permute.xlu0 %3693 }
 0x7d8   : > { %4197 = vperm.xlu0 %5876, %v4003_v11  }
 0x7da   : > { %4352 = vperm.xlu1 %5877, %v4034_v5  }
 0x7dc   : > { %4347 = vperm.xlu0 %5876, %v4033_v19  }
 0x7de   : > { %4342 = vperm.xlu1 %5877, %v4032_v31  }
 0x7e0   : > { %4337 = vperm.xlu0 %5876, %v4031_v54  }
 0x7e2   : > { %4332 = vperm.xlu1 %5877, %v4030_v35  }
 0x7e4   : > { %4327 = vperm.xlu0 %5876, %v4029_v43  }
 0x7e6   : > { %4322 = vperm.xlu1 %5877, %v4028_v16  }
 0x7e8   : > { %4317 = vperm.xlu0 %5876, %v4027_v3  }
 0x7ea   : > { %4312 = vperm.xlu1 %5877, %v4026_v33  }
 0x7ec   : > { %4307 = vperm.xlu0 %5876, %v4025_v56  }
 0x7ee   : > { %4302 = vperm.xlu1 %5877, %v4024_v60  }
 0x7f0   : > { %4297 = vperm.xlu0 %5876, %v4023_v22  }
 0x7f2   : > { %4292 = vperm.xlu1 %5877, %v4022_v36  }
 0x7f4   : > { %4287 = vperm.xlu0 %5876, %v4021_v44  }
 0x7f6   : > { %4282 = vperm.xlu1 %5877, %v4020_v7  }
 0x7f8   : > { %4277 = vperm.xlu0 %5876, %v4019_v34  }
 0x7fa   : > { %5147 = vperm.xlu1 %5877, %v5125_v41  }
 0x7fc   : > { %5142 = vperm.xlu0 %5876, %v5124_v58  }
 0x7fe   : > { %5157 = vperm.xlu1 %5877, %v5127_v39  }
 0x800   : > { %5152 = vperm.xlu0 %5876, %v5126_v6  }
 0x802   : > { %5167 = vperm.xlu1 %5877, %v5129_v61  }
 0x804   : > { %5162 = vperm.xlu0 %5876, %v5128_v23  }
 0x806   : > { %5177 = vperm.xlu1 %5877, %v5131_v4  }
 0x808   : > { %5172 = vperm.xlu0 %5876, %v5130_v0   ;;  %v10345_v0 = vld [vmem:[#allocation62_spill] sm:$0xff] }
 0x80a   : > { %5187 = vperm.xlu1 %5877, %v5133_v52   ;;  %v10346_v52 = vld [vmem:[#allocation37_spill] sm:$0xff] }
 0x80c   : > { %5182 = vperm.xlu0 %5876, %v5132_v28   ;;  %v3132_v28 = vpack.c.bf16 %v10346_v52, %v10345_v0 }
 0x80e   : > { %5197 = vperm.xlu1 %5877, %v5135_v20   ;;  %v10347_v20 = vld [vmem:[#allocation35_spill] sm:$0xff] }
 0x810   : > { %5192 = vperm.xlu0 %5876, %v5134_v59   ;;  %v10348_v59 = vld [vmem:[#allocation58_spill] sm:$0xff] }
 0x812   : > { %5207 = vperm.xlu1 %5877, %v5137_v24   ;;  %v3130_v24 = vpack.c.bf16 %v10348_v59, %v10347_v20 }
 0x814   : > { %5202 = vperm.xlu0 %5876, %v5136_v12   ;;  %v10349_v12 = vld [vmem:[#allocation57_spill] sm:$0xff] }
 0x816   : > { %5217 = vperm.xlu1 %5877, %v5139_v2   ;;  %v10350_v2 = vld [vmem:[#allocation34_spill] sm:$0xff] }
 0x818   : > { %5212 = vperm.xlu0 %5876, %v5138_v32   ;;  %v10351_v32 = vpack.c.bf16 %v10349_v12, %v10350_v2 }
 0x85e   : > { %v3086_v11 = vpop.f32.mrf.mxu0 }
 0x860   : > { %v3088_v5 = vpop.f32.mrf.mxu0 }
 0x862   : > { %v3090_v19 = vpop.f32.mrf.mxu0 }
 0x863   : > { %v3133_v4 = vpack.c.bf16 %v3090_v19, %v3086_v11  ;;  %v10357_v11 = vld [vmem:[#allocation55_spill] sm:$0xff]  ;;  %v10358_v19 = vld [vmem:[#allocation52_spill] sm:$0xff] }
 0x864   : > { %v3092_v31 = vpop.f32.mrf.mxu0 }
 0x865   : > { %v3134_v23 = vpack.c.bf16 %v3092_v31, %v3088_v5  ;;  %v10354_v5 = vld [vmem:[#allocation60_spill] sm:$0xff]  ;;  %v10355_v31 = vld [vmem:[#allocation63_spill] sm:$0xff] }
 0x866   : > { %v3096_v54 = vpop.f32.mrf.mxu0 }
 0x868   : > { %v3098_v35 = vpop.f32.mrf.mxu0 }
 0x86a   : > { %v3100_v43 = vpop.f32.mrf.mxu0 }
 0x86b   : > { %v3135_v61 = vpack.c.bf16 %v3100_v43, %v3096_v54  ;;  %v10356_v43 = vpack.c.bf16 %v10354_v5, %v10355_v31 }
 0x86c   : > { %v3102_v16 = vpop.f32.mrf.mxu0 }
 0x86d   : > { %v3136_v6 = vpack.c.bf16 %v3102_v16, %v3098_v35  ;;  %v10352_v35 = vld [vmem:[#allocation53_spill] sm:$0xff]  ;;  %v10353_v16 = vld [vmem:[#allocation50_spill] sm:$0xff] }
 0x86e   : > { %v3106_v3 = vpop.f32.mrf.mxu0  ;;  %v3128_v54 = vpack.c.bf16 %v10353_v16, %v10352_v35 }
 0x870   : > { %v3108_v33 = vpop.f32.mrf.mxu0 }
 0x872   : > { %v3110_v56 = vpop.f32.mrf.mxu0 }
 0x873   : > { %v3137_v39 = vpack.c.bf16 %v3110_v56, %v3106_v3  ;;  %v3126_v3 = vpack.c.bf16 %v10358_v19, %v10357_v11  ;;  %v10360_v56 = vld [vmem:[#allocation54_spill] sm:$0xff] }
 0x874   : > { %v3112_v60 = vpop.f32.mrf.mxu0 }
 0x875   : > { %v3138_v58 = vpack.c.bf16 %v3112_v60, %v3108_v33  ;;  %v10359_v33 = vld [vmem:[#allocation64_spill] sm:$0xff] }
 0x876   : > { %v3116_v22 = vpop.f32.mrf.mxu0  ;;  %v10361_v60 = vpack.c.bf16 %v10359_v33, %v10360_v56 }
 0x878   : > { %v3118_v36 = vpop.f32.mrf.mxu0 }
 0x87a   : > { %v3120_v44 = vpop.f32.mrf.mxu0 }
 0x87b   : > { %v3139_v41 = vpack.c.bf16 %v3120_v44, %v3116_v22  ;;  %v5902_v22 = vld [vmem:[%s9971_s4] sm:$0xff]   ;;  %v10363_v44 = vld [vmem:[#allocation59_spill] sm:$0xff] }
 0x87c   : > { %v3122_v7 = vpop.f32.mrf.mxu0 }
 0x87d   : > { %v3140_v34 = vpack.c.bf16 %v3122_v7, %v3118_v36  ;;  %v10362_v36 = vld [vmem:[#allocation51_spill] sm:$0xff] }
 0x87e   : > { %v10364_v7 = vpack.c.bf16 %v10362_v36, %v10363_v44  ;;  %v10365_v36 = vld [vmem:[#allocation33_spill] sm:$0xff] }
 0x87f   : > { %3301 = vmatprep.subr.bf16.mxu0 %v3140_v34  ;;  %v5903_v34 = vld [vmem:[%s9971_s4 + $0x8] sm:$0xff]  }
 0x880   : > { %3302 = vmatpush1.bf16.msra.mxu0 %v3139_v41  ;;  %v5904_v41 = vld [vmem:[%s9971_s4 + $0x10] sm:$0xff]  }
 0x881   : > { %3303 = vmatprep.subr.bf16.mxu0 %v3138_v58  ;;  %v5905_v58 = vld [vmem:[%s9971_s4 + $0x18] sm:$0xff]  }
 0x884   : > { %3304 = vmatpush1.bf16.msra.mxu0 %v3137_v39  ;;  %v5906_v39 = vld [vmem:[%s9971_s4 + $0x20] sm:$0xff]  }
 0x885   : > { %3305 = vmatprep.subr.bf16.mxu0 %v3136_v6  ;;  %v5907_v6 = vld [vmem:[%s9971_s4 + $0x28] sm:$0xff]  }
 0x888   : > { %3306 = vmatpush1.bf16.msra.mxu0 %v3135_v61  ;;  %v5908_v61 = vld [vmem:[%s9971_s4 + $0x30] sm:$0xff]  }
 0x889   : > { %3307 = vmatprep.subr.bf16.mxu0 %v3134_v23  ;;  %v5909_v23 = vld [vmem:[%s9971_s4 + $0x38] sm:$0xff]  }
 0x88c   : > { %3308 = vmatpush1.bf16.msra.mxu0 %v3133_v4 }
 0x88d   : > { %3309 = vmatprep.subr.bf16.mxu0 %v3132_v28 }
 0x890   : > { %3310 = vmatpush1.bf16.msra.mxu0 %v10351_v32 }
 0x891   : > { %3311 = vmatprep.subr.bf16.mxu0 %v3130_v24 }
 0x894   : > { %3312 = vmatpush1.bf16.msra.mxu0 %v10356_v43 }
 0x895   : > { %3313 = vmatprep.subr.bf16.mxu0 %v3128_v54 }
 0x898   : > { %3314 = vmatpush1.bf16.msra.mxu0 %v10361_v60 }
 0x899   : > { %3315 = vmatprep.subr.bf16.mxu0 %v3126_v3 }
 0x89c   : > { %3316 = vmatpush1.bf16.msra.mxu0 %v10364_v7 }
 0x89f   : > { %3334 = vmatmul.mubr.bf16.vlgmr.msra.gmra.mxu0 %v5902_v22 }
 0x8a0   : > { %3343 = vmatprep.mubr.bf16.mxu0 %v10343_v57 }
 0x8a7   : > { %3344 = vmatmul.mubr.bf16.gmra.mxu0 %v5903_v34  ;;  %v10367_v34 = vld [vmem:[#allocation31_spill] sm:$0xff] }
 0x8a8   : > { %3353 = vmatprep.mubr.bf16.mxu0 %v10343_v57 }
 0x8af   : > { %3354 = vmatmul.mubr.bf16.gmra.mxu0 %v5904_v41 }
 0x8b0   : > { %3363 = vmatprep.mubr.bf16.mxu0 %v10343_v57 }
 0x8b7   : > { %3364 = vmatmul.mubr.bf16.gmra.mxu0 %v5905_v58 }
 0x8b8   : > { %3373 = vmatprep.mubr.bf16.mxu0 %v10343_v57 }
 0x8bf   : > { %3374 = vmatmul.mubr.bf16.gmra.mxu0 %v5906_v39  ;;  %v10369_v39 = vld [vmem:[#allocation32_spill] sm:$0xff] }
 0x8c0   : > { %3383 = vmatprep.mubr.bf16.mxu0 %v10343_v57 }
 0x8c7   : > { %3384 = vmatmul.mubr.bf16.gmra.mxu0 %v5907_v6 }
 0x8c8   : > { %3393 = vmatprep.mubr.bf16.mxu0 %v10343_v57 }
 0x8cf   : > { %3394 = vmatmul.mubr.bf16.gmra.mxu0 %v5908_v61  ;;  %v10371_v61 = vld [vmem:[#allocation28_spill] sm:$0xff] }
 0x8d0   : > { %3403 = vmatprep.mubr.bf16.mxu0 %v10343_v57 }
 0x8d7   : > { %3404 = vmatmul.mubr.bf16.gmra.mxu0 %v5909_v23 }
 0x95f   : > { %v3335_v4 = vpop.f32.mrf.mxu0 }
 0x960   : > { %v3336_v3 = vadd.f32 %v3335_v4, %v8512_v38 }
 0x961   : > { %v3337_v0 = vpop.f32.mrf.mxu0 }
 0x962   : > { %v3338_v56 = vadd.f32 %v3337_v0, %v8512_v38  ;;  %v8759_v6 = vadd.f32 %v3336_v3, %v10369_v39  ;;  %v10375_v0 = vld [vmem:[#allocation26_spill] sm:$0xff] }
 0x963   : > { %v3339_v52 = vpop.f32.mrf.mxu0 }
 0x964   : > { %v3340_v43 = vadd.f32 %v3339_v52, %v8507_v29  ;;  %10370 = vst [vmem:[#allocation41_spill] sm:$0xff] %v8759_v6 }
 0x965   : > { %v3341_v28 = vpop.f32.mrf.mxu0 }
 0x966   : > { %v3342_v11 = vadd.f32 %v3341_v28, %v8507_v29  ;;  %v8751_v44 = vadd.f32 %v3340_v43, %v10365_v36  ;;  %v10379_v43 = vld [vmem:[#allocation27_spill] sm:$0xff] }
 0x967   : > { %v3345_v20 = vpop.f32.mrf.mxu0 }
 0x968   : > { %v3346_v33 = vadd.f32 %v3345_v20, %v8525_v25  ;;  %10366 = vst [vmem:[#allocation45_spill] sm:$0xff] %v8751_v44  ;;  %v8755_v41 = vadd.f32 %v3342_v11, %v10367_v34 }
 0x969   : > { %v3347_v59 = vpop.f32.mrf.mxu0 }
 0x96a   : > { %v3348_v60 = vadd.f32 %v3347_v59, %v8525_v25  ;;  %10368 = vst [vmem:[#allocation39_spill] sm:$0xff] %v8755_v41  ;;  %v8762_v23 = vadd.f32 %v3346_v33, %v10371_v61  ;;  %v10373_v25 = vld [vmem:[#allocation30_spill] sm:$0xff]  ;;  %v10377_v59 = vld [vmem:[#allocation29_spill] sm:$0xff] }
 0x96b   : > { %v3349_v24 = vpop.f32.mrf.mxu0  ;;  %v8766_v4 = vadd.f32 %v3338_v56, %v10373_v25  ;;  %v10385_v61 = vld [vmem:[#allocation25_spill] sm:$0xff]  ;;  %v10387_v25 = vld [vmem:[#allocation23_spill] sm:$0xff] }
 0x96c   : > { %v3350_v7 = vadd.f32 %v3349_v24, %v8520_v9  ;;  %10372 = vst [vmem:[#allocation65_spill] sm:$0xff] %v8762_v23  ;;  %v8769_v52 = vadd.f32 %v3348_v60, %v10375_v0 }
 0x96d   : > { %v3351_v12 = vpop.f32.mrf.mxu0  ;;  %10374 = vst [vmem:[#allocation36_spill] sm:$0xff] %v8766_v4 }
 0x96e   : > { %v3352_v29 = vadd.f32 %v3351_v12, %v8520_v9  ;;  %10376 = vst [vmem:[#allocation61_spill] sm:$0xff] %v8769_v52  ;;  %v3446_v9 = vadd.f32 %v8751_v44, %v8759_v6  ;;  %v8775_v24 = vadd.f32 %v3350_v7, %v10377_v59  ;;  %v10383_v7 = vld [vmem:[#allocation22_spill] sm:$0xff]  ;;  %v10389_v59 = vld [vmem:[#allocation20_spill] sm:$0xff] }
 0x96f   : > { %v3355_v2 = vpop.f32.mrf.mxu0 }
 0x970   : > { %v3356_v38 = vadd.f32 %v3355_v2, %v8538_v8  ;;  %10378 = vst [vmem:[#allocation56_spill] sm:$0xff] %v8775_v24  ;;  %v3467_v2 = vadd.f32 %v8755_v41, %v8766_v4  ;;  %v8781_v11 = vadd.f32 %v3352_v29, %v10379_v43 }
 0x971   : > { %v3357_v32 = vpop.f32.mrf.mxu0 }
 0x972   : > { %v3358_v28 = vadd.f32 %v3357_v32, %v8538_v8  ;;  %10380 = vst [vmem:[#allocation38_spill] sm:$0xff] %v8781_v11  ;;  %v3447_v8 = vadd.f32 %v3446_v9, %v8762_v23  ;;  %v10381_v32 = vld [vmem:[#allocation24_spill] sm:$0xff]  ;;  %v3468_v36 = vadd.f32 %v3467_v2, %v8769_v52  ;;  %v10391_v2 = vld [vmem:[#allocation18_spill] sm:$0xff] }
 0x973   : > { %v3359_v35 = vpop.f32.mrf.mxu0  ;;  %v8786_v56 = vadd.f32 %v3356_v38, %v10381_v32  ;;  %v10393_v32 = vld [vmem:[#allocation21_spill] sm:$0xff] }
 0x974   : > { %v3360_v12 = vadd.f32 %v3359_v35, %v8533_v37  ;;  %v8791_v35 = vadd.f32 %v3358_v28, %v10383_v7  ;;  %v3448_v29 = vadd.f32 %v3447_v8, %v8775_v24  ;;  %v3469_v38 = vadd.f32 %v3468_v36, %v8781_v11  ;;  %v10395_v36 = vld [vmem:[#allocation19_spill] sm:$0xff] }
 0x975   : > { %v3361_v16 = vpop.f32.mrf.mxu0  ;;  %10382 = vst [vmem:[#allocation46_spill] sm:$0xff] %v8786_v56 }
 0x976   : > { %v3362_v3 = vadd.f32 %v3361_v16, %v8533_v37  ;;  %10384 = vst [vmem:[#allocation43_spill] sm:$0xff] %v8791_v35  ;;  %v8796_v37 = vadd.f32 %v3360_v12, %v10385_v61  ;;  %v3449_v28 = vadd.f32 %v3448_v29, %v8786_v56  ;;  %v3470_v12 = vadd.f32 %v3469_v38, %v8791_v35  ;;  %v10397_v61 = vld [vmem:[#allocation16_spill] sm:$0xff]  ;;  %v10399_v38 = vld [vmem:[#allocation14_spill] sm:$0xff] }
 0x977   : > { %v3365_v54 = vpop.f32.mrf.mxu0 }
 0x978   : > { %v3366_v60 = vadd.f32 %v3365_v54, %v8551_v1  ;;  %10386 = vst [vmem:[#allocation47_spill] sm:$0xff] %v8796_v37  ;;  %v8801_v0 = vadd.f32 %v3362_v3, %v10387_v25  ;;  %v3450_v3 = vadd.f32 %v3449_v28, %v8796_v37 }
 0x979   : > { %v3367_v5 = vpop.f32.mrf.mxu0 }
 0x97a   : > { %v3368_v34 = vadd.f32 %v3367_v5, %v8551_v1  ;;  %10388 = vst [vmem:[#allocation48_spill] sm:$0xff] %v8801_v0  ;;  %v8806_v1 = vadd.f32 %v3366_v60, %v10389_v59  ;;  %v3471_v60 = vadd.f32 %v3470_v12, %v8801_v0  ;;  %v10401_v59 = vld [vmem:[#allocation17_spill] sm:$0xff]  ;;  %v10403_v12 = vld [vmem:[#allocation15_spill] sm:$0xff] }
 0x97b   : > { %v3369_v31 = vpop.f32.mrf.mxu0 }
 0x97c   : > { %v3370_v16 = vadd.f32 %v3369_v31, %v8546_v63  ;;  %10390 = vst [vmem:[#allocation40_spill] sm:$0xff] %v8806_v1  ;;  %v8811_v43 = vadd.f32 %v3368_v34, %v10391_v2  ;;  %v3451_v34 = vadd.f32 %v3450_v3, %v8806_v1 }
 0x97d   : > { %v3371_v19 = vpop.f32.mrf.mxu0 }
 0x97e   : > { %v3372_v54 = vadd.f32 %v3371_v19, %v8546_v63  ;;  %10392 = vst [vmem:[#allocation44_spill] sm:$0xff] %v8811_v43  ;;  %v8816_v63 = vadd.f32 %v3370_v16, %v10393_v32  ;;  %v3472_v16 = vadd.f32 %v3471_v60, %v8811_v43  ;;  %v10405_v32 = vld [vmem:[#allocation12_spill] sm:$0xff]  ;;  %v10407_v60 = vld [vmem:[#allocation10_spill] sm:$0xff] }
 0x97f   : > { %v3375_v22 = vpop.f32.mrf.mxu0 }
 0x980   : > { %v3376_v5 = vadd.f32 %v3375_v22, %v8564_v14  ;;  %10394 = vst [vmem:[#allocation49_spill] sm:$0xff] %v8816_v63  ;;  %v8821_v7 = vadd.f32 %v3372_v54, %v10395_v36  ;;  %v3452_v54 = vadd.f32 %v3451_v34, %v8816_v63 }
 0x981   : > { %v3377_v58 = vpop.f32.mrf.mxu0 }
 0x982   : > { %v3378_v31 = vadd.f32 %v3377_v58, %v8564_v14  ;;  %10396 = vst [vmem:[#allocation62_spill] sm:$0xff] %v8821_v7  ;;  %v8826_v14 = vadd.f32 %v3376_v5, %v10397_v61  ;;  %v3473_v5 = vadd.f32 %v3472_v16, %v8821_v7  ;;  %v10411_v16 = vld [vmem:[#allocation11_spill] sm:$0xff] }
 0x983   : > { %v3379_v20 = vpop.f32.mrf.mxu0 }
 0x984   : > { %v3380_v19 = vadd.f32 %v3379_v20, %v8559_v53  ;;  %10398 = vst [vmem:[#allocation37_spill] sm:$0xff] %v8826_v14  ;;  %v8831_v25 = vadd.f32 %v3378_v31, %v10399_v38  ;;  %v3453_v31 = vadd.f32 %v3452_v54, %v8826_v14 }
 0x985   : > { %v3381_v33 = vpop.f32.mrf.mxu0 }
 0x986   : > { %v3382_v22 = vadd.f32 %v3381_v33, %v8559_v53  ;;  %10400 = vst [vmem:[#allocation35_spill] sm:$0xff] %v8831_v25  ;;  %v8836_v53 = vadd.f32 %v3380_v19, %v10401_v59  ;;  %v3474_v19 = vadd.f32 %v3473_v5, %v8831_v25 }
 0x987   : > { %v3385_v39 = vpop.f32.mrf.mxu0 }
 0x988   : > { %v3386_v58 = vadd.f32 %v3385_v39, %v8577_v21  ;;  %10402 = vst [vmem:[#allocation58_spill] sm:$0xff] %v8836_v53  ;;  %v8841_v2 = vadd.f32 %v3382_v22, %v10403_v12  ;;  %v3454_v34 = vadd.f32 %v3453_v31, %v8836_v53  ;;  %v10409_v22 = vld [vmem:[#allocation13_spill] sm:$0xff] }
 0x989   : > { %v3387_v9 = vpop.f32.mrf.mxu0 }
 0x98a   : > { %v3388_v20 = vadd.f32 %v3387_v9, %v8577_v21  ;;  %10404 = vst [vmem:[#allocation57_spill] sm:$0xff] %v8841_v2  ;;  %v8846_v21 = vadd.f32 %v3386_v58, %v10405_v32  ;;  %v3475_v58 = vadd.f32 %v3474_v19, %v8841_v2  ;;  %v10417_v32 = vld [vmem:[#allocation9_spill] sm:$0xff] }
 0x98b   : > { %v3389_v8 = vpop.f32.mrf.mxu0 }
 0x98c   : > { %v3390_v33 = vadd.f32 %v3389_v8, %v8572_v46  ;;  %10406 = vst [vmem:[#allocation34_spill] sm:$0xff] %v8846_v21  ;;  %v8851_v36 = vadd.f32 %v3388_v20, %v10407_v60  ;;  %v3455_v54 = vadd.f32 %v3454_v34, %v8846_v21  ;;  %v10413_v20 = vld [vmem:[#allocation8_spill] sm:$0xff]  ;;  %v10419_v34 = vld [vmem:[#allocation7_spill] sm:$0xff] }
 0x98d   : > { %v3391_v29 = vpop.f32.mrf.mxu0 }
 0x98e   : > { %v3392_v39 = vadd.f32 %v3391_v29, %v8572_v46  ;;  %10408 = vst [vmem:[#allocation53_spill] sm:$0xff] %v8851_v36  ;;  %v8855_v61 = vadd.f32 %v3390_v33, %v10409_v22  ;;  %v3476_v33 = vadd.f32 %v3475_v58, %v8851_v36  ;;  %v10421_v22 = vld [vmem:[#allocation4_spill] sm:$0xff] }
 0x98f   : > { %v3395_v28 = vpop.f32.mrf.mxu0 }
 0x990   : > { %v3396_v9 = vadd.f32 %v3395_v28, %v8590_v42  ;;  %10410 = vst [vmem:[#allocation50_spill] sm:$0xff] %v8855_v61  ;;  %v8861_v38 = vadd.f32 %v3392_v39, %v10411_v16 }
 0x991   : > { %v3397_v3 = vpop.f32.mrf.mxu0 }
 0x992   : > { %v3398_v46 = vadd.f32 %v3397_v3, %v8590_v42  ;;  %10412 = vst [vmem:[#allocation60_spill] sm:$0xff] %v8861_v38  ;;  %v8865_v59 = vadd.f32 %v3396_v9, %v10413_v20  ;;  %v3456_v42 = vadd.f32 %v3455_v54, %v8855_v61  ;;  %v10415_v3 = vld [vmem:[#allocation6_spill] sm:$0xff]  ;;  %v3477_v60 = vadd.f32 %v3476_v33, %v8861_v38 }
 0x993   : > { %v3399_v8 = vpop.f32.mrf.mxu0  ;;  %v10423_v54 = vld [vmem:[#allocation2_spill] sm:$0xff] }
 0x994   : > { %v3400_v29 = vadd.f32 %v3399_v8, %v8585_v18  ;;  %10414 = vst [vmem:[#allocation63_spill] sm:$0xff] %v8865_v59  ;;  %v8871_v31 = vadd.f32 %v3398_v46, %v10415_v3  ;;  %v3457_v9 = vadd.f32 %v3456_v42, %v8865_v59  ;;  %v10425_v3 = vld [vmem:[#allocation5_spill] sm:$0xff] }
 0x995   : > { %v3401_v28 = vpop.f32.mrf.mxu0 }
 0x996   : > { %v3402_v5 = vadd.f32 %v3401_v28, %v8585_v18  ;;  %10416 = vst [vmem:[#allocation55_spill] sm:$0xff] %v8871_v31  ;;  %v8874_v19 = vadd.f32 %v3400_v29, %v10417_v32  ;;  %v3478_v28 = vadd.f32 %v3477_v60, %v8871_v31 }
 0x997   : > { %v3405_v12 = vpop.f32.mrf.mxu0 }
 0x998   : > { %10418 = vst [vmem:[#allocation52_spill] sm:$0xff] %v8874_v19  ;;  %v3406_v39 = vadd.f32 %v3405_v12, %v8603_v47  ;;  %v8880_v18 = vadd.f32 %v3402_v5, %v10419_v34  ;;  %v3458_v29 = vadd.f32 %v3457_v9, %v8874_v19 }
 0x999   : > { %v3407_v8 = vpop.f32.mrf.mxu0 }
 0x99a   : > { %10420 = vst [vmem:[#allocation64_spill] sm:$0xff] %v8880_v18  ;;  %v8883_v58 = vadd.f32 %v3406_v39, %v10421_v22  ;;  %v3408_v16 = vadd.f32 %v3407_v8, %v8603_v47  ;;  %v3479_v42 = vadd.f32 %v3478_v28, %v8880_v18  ;;  %v10427_v8 = vld [vmem:[#allocation3_spill] sm:$0xff] }
 0x99b   : > { %v3409_v46 = vpop.f32.mrf.mxu0 }
 0x99c   : > { %10422 = vst [vmem:[#allocation54_spill] sm:$0xff] %v8883_v58  ;;  %v8889_v20 = vadd.f32 %v3408_v16, %v10423_v54  ;;  %v3410_v33 = vadd.f32 %v3409_v46, %v8598_v55  ;;  %v3459_v5 = vadd.f32 %v3458_v29, %v8883_v58 }
 0x99d   : > { %v3411_v12 = vpop.f32.mrf.mxu0 }
 0x99e   : > { %10424 = vst [vmem:[#allocation51_spill] sm:$0xff] %v8889_v20  ;;  %v8895_v32 = vadd.f32 %v3410_v33, %v10425_v3  ;;  %v3412_v47 = vadd.f32 %v3411_v12, %v8598_v55  ;;  %v3480_v39 = vadd.f32 %v3479_v42, %v8889_v20 }
 0x9a0   : > { %10426 = vst [vmem:[#allocation59_spill] sm:$0xff] %v8895_v32  ;;  %v3460_v60 = vadd.f32 %v3459_v5, %v8895_v32  ;;  %v8901_v9 = vadd.f32 %v3412_v47, %v10427_v8 }
 0x9a2   : > { %10428 = vst [vmem:[#allocation33_spill] sm:$0xff] %v8901_v9  ;;  %v3461_v34 = vrot.slane %v3460_v60, 4  ;;  %v3481_v22 = vadd.f32 %v3480_v39, %v8901_v9 }
 0x9a4   : > { %v3462_v16 = vadd.f32 %v3461_v34, %v3460_v60  ;;  %v3482_v46 = vrot.slane %v3481_v22, 4 }
 0x9a6   : > { %v3463_v28 = vrot.slane %v3462_v16, 2  ;;  %v3483_v54 = vadd.f32 %v3482_v46, %v3481_v22 }
 0x9a8   : > { %v3464_v29 = vadd.f32 %v3463_v28, %v3462_v16  ;;  %v3484_v57 = vrot.slane %v3483_v54, 2 }
 0x9aa   : > { %v3465_v33 = vrot.slane %v3464_v29, 1  ;;  %v3485_v45 = vadd.f32 %v3484_v57, %v3483_v54 }
 0x9ac   : > { %v3466_v3 = vadd.f32 %v3465_v33, %v3464_v29  ;;  %v3486_v5 = vrot.slane %v3485_v45, 1 }
 0x9ae   : > { %v8904_v55 = vmul.f32 0.0078125, %v3466_v3  ;;  %v3487_v60 = vadd.f32 %v3486_v5, %v3485_v45 }
 0x9b0   : > { %v8908_v12 = vsub.f32 %v8759_v6, %v8904_v55  ;;  %v8912_v42 = vsub.f32 %v8751_v44, %v8904_v55  ;;  %v8916_v47 = vsub.f32 %v8762_v23, %v8904_v55  ;;  %v8924_v8 = vsub.f32 %v8775_v24, %v8904_v55 }
 0x9b1   : > { %v8928_v34 = vsub.f32 %v8786_v56, %v8904_v55  ;;  %v8932_v46 = vmul.f32 0.0078125, %v3487_v60  ;;  %v8936_v28 = vsub.f32 %v8796_v37, %v8904_v55  ;;  %v8950_v3 = vsub.f32 %v8806_v1, %v8904_v55 }
 0x9b2   : > { %10429 = vst [vmem:[#allocation31_spill] sm:$0xff] %v8908_v12  ;;  %10430 = vst [vmem:[#allocation32_spill] sm:$0xff] %v8912_v42  ;;  %v3523_v39 = vmul.f32 %v8908_v12, %v8908_v12  ;;  %v3525_v57 = vmul.f32 %v8912_v42, %v8912_v42  ;;  %v3527_v22 = vmul.f32 %v8916_v47, %v8916_v47 }
 0x9b3   : > { %10431 = vst [vmem:[#allocation28_spill] sm:$0xff] %v8924_v8  ;;  %v3529_v45 = vmul.f32 %v8924_v8, %v8924_v8  ;;  %v8942_v29 = vsub.f32 %v8766_v4, %v8932_v46  ;;  %v8946_v33 = vsub.f32 %v8755_v41, %v8932_v46  ;;  %v3531_v5 = vmul.f32 %v8928_v34, %v8928_v34 }
 0x9b4   : > { %v3555_v16 = vadd.f32 %v3525_v57, %v3523_v39  ;;  %v8956_v57 = vsub.f32 %v8816_v63, %v8904_v55  ;;  %v3533_v60 = vmul.f32 %v8936_v28, %v8936_v28  ;;  %v8998_v23 = vsub.f32 %v8801_v0, %v8932_v46 }
 0x9b5   : > { %10432 = vst [vmem:[#allocation30_spill] sm:$0xff] %v8942_v29  ;;  %10433 = vst [vmem:[#allocation26_spill] sm:$0xff] %v8946_v33  ;;  %v3524_v1 = vmul.f32 %v8942_v29, %v8942_v29  ;;  %v3526_v37 = vmul.f32 %v8946_v33, %v8946_v33  ;;  %v9016_v0 = vsub.f32 %v8865_v59, %v8904_v55 }
 0x9b6   : > { %v3556_v54 = vadd.f32 %v3555_v16, %v3527_v22  ;;  %v8962_v16 = vsub.f32 %v8769_v52, %v8932_v46  ;;  %v3537_v56 = vmul.f32 %v8956_v57, %v8956_v57  ;;  %v9034_v59 = vsub.f32 %v8831_v25, %v8932_v46 }
 0x9b7   : > { %v3521_v25 = vsub.f32 %v8895_v32, %v8904_v55  ;;  %v3516_v32 = vsub.f32 %v8871_v31, %v8932_v46  ;;  %v3522_v31 = vsub.f32 %v8901_v9, %v8932_v46 }
 0x9b8   : > { %v3557_v39 = vadd.f32 %v3556_v54, %v3529_v45  ;;  %v8970_v45 = vsub.f32 %v8826_v14, %v8904_v55  ;;  %v3535_v54 = vmul.f32 %v8950_v3, %v8950_v3  ;;  %v8986_v14 = vsub.f32 %v8791_v35, %v8932_v46 }
 0x9b9   : > { %v3528_v52 = vmul.f32 %v8962_v16, %v8962_v16  ;;  %v9004_v35 = vsub.f32 %v8855_v61, %v8904_v55  ;;  %v9022_v61 = vsub.f32 %v8821_v7, %v8932_v46  ;;  %v9040_v7 = vsub.f32 %v8883_v58, %v8904_v55 }
 0x9ba   : > { %v3558_v22 = vadd.f32 %v3557_v39, %v3531_v5  ;;  %v8976_v5 = vsub.f32 %v8781_v11, %v8932_v46  ;;  %v8980_v39 = vsub.f32 %v8836_v53, %v8904_v55  ;;  %v3539_v53 = vmul.f32 %v8970_v45, %v8970_v45 }
 0x9bb   : > { %v9056_v58 = vsub.f32 %v8851_v36, %v8932_v46  ;;  %v3554_v6 = vmul.f32 %v3522_v31, %v3522_v31 }
 0x9bc   : > { %v3559_v63 = vadd.f32 %v3558_v22, %v3533_v60  ;;  %v3576_v60 = vadd.f32 %v3526_v37, %v3524_v1  ;;  %v8992_v22 = vsub.f32 %v8846_v21, %v8904_v55  ;;  %v3541_v37 = vmul.f32 %v8980_v39, %v8980_v39 }
 0x9bd   : > { %v9010_v21 = vsub.f32 %v8811_v43, %v8932_v46  ;;  %v9028_v43 = vsub.f32 %v8874_v19, %v8904_v55  ;;  %v9046_v19 = vsub.f32 %v8841_v2, %v8932_v46  ;;  %v3551_v2 = vmul.f32 %v9040_v7, %v9040_v7 }
 0x9be   : > { %v3560_v24 = vadd.f32 %v3559_v63, %v3535_v54  ;;  %v3530_v63 = vmul.f32 %v8976_v5, %v8976_v5  ;;  %v3577_v54 = vadd.f32 %v3576_v60, %v3528_v52  ;;  %v3543_v52 = vmul.f32 %v8992_v22, %v8992_v22 }
 0x9bf   : > { %v3542_v55 = vmul.f32 %v9046_v19, %v9046_v19 }
 0x9c0   : > { %v3561_v11 = vadd.f32 %v3560_v24, %v3537_v56  ;;  %v3532_v24 = vmul.f32 %v8986_v14, %v8986_v14  ;;  %v3578_v56 = vadd.f32 %v3577_v54, %v3530_v63  ;;  %v3545_v63 = vmul.f32 %v9004_v35, %v9004_v35 }
 0x9c2   : > { %v3562_v1 = vadd.f32 %v3561_v11, %v3539_v53  ;;  %v3534_v11 = vmul.f32 %v8998_v23, %v8998_v23  ;;  %v3579_v53 = vadd.f32 %v3578_v56, %v3532_v24  ;;  %v3547_v24 = vmul.f32 %v9016_v0, %v9016_v0 }
 0x9c4   : > { %v3563_v60 = vadd.f32 %v3562_v1, %v3541_v37  ;;  %v3536_v37 = vmul.f32 %v9010_v21, %v9010_v21  ;;  %v3580_v1 = vadd.f32 %v3579_v53, %v3534_v11  ;;  %v3549_v11 = vmul.f32 %v9028_v43, %v9028_v43 }
 0x9c6   : > { %v3564_v54 = vadd.f32 %v3563_v60, %v3543_v52  ;;  %v3538_v52 = vmul.f32 %v9022_v61, %v9022_v61  ;;  %v3581_v60 = vadd.f32 %v3580_v1, %v3536_v37  ;;  %v9064_v37 = vsub.f32 %v8861_v38, %v8932_v46 }
 0x9c8   : > { %v3565_v56 = vadd.f32 %v3564_v54, %v3545_v63  ;;  %v3540_v63 = vmul.f32 %v9034_v59, %v9034_v59  ;;  %v3582_v54 = vadd.f32 %v3581_v60, %v3538_v52  ;;  %v3544_v52 = vmul.f32 %v9056_v58, %v9056_v58 }
 0x9ca   : > { %v3566_v53 = vadd.f32 %v3565_v56, %v3547_v24  ;;  %v3583_v1 = vadd.f32 %v3582_v54, %v3540_v63  ;;  %v3553_v24 = vmul.f32 %v3521_v25, %v3521_v25  ;;  %v3520_v63 = vsub.f32 %v8889_v20, %v8932_v46 }
 0x9cc   : > { %v3567_v41 = vadd.f32 %v3566_v53, %v3549_v11  ;;  %v3584_v60 = vadd.f32 %v3583_v1, %v3542_v55  ;;  %v3518_v11 = vsub.f32 %v8880_v18, %v8932_v46  ;;  %v3546_v53 = vmul.f32 %v9064_v37, %v9064_v37  ;;  %v9080_v46 = vpop.permute.xlu1 %3826 }
 0x9ce   : > { %v3568_v56 = vadd.f32 %v3567_v41, %v3551_v2  ;;  %v3585_v38 = vadd.f32 %v3584_v60, %v3544_v52  ;;  %v3548_v41 = vmul.f32 %v3516_v32, %v3516_v32  ;;  %v3550_v4 = vmul.f32 %v3518_v11, %v3518_v11 }
 0x9d0   : > { %v3569_v36 = vadd.f32 %v3568_v56, %v3553_v24  ;;  %v3586_v2 = vadd.f32 %v3585_v38, %v3546_v53  ;;  %v3552_v24 = vmul.f32 %v3520_v63, %v3520_v63  ;;  %v9082_v53 = vpop.permute.xlu0 %3821 }
 0x9d2   : > { %v3570_v44 = vrot.slane %v3569_v36, 4  ;;  %v3587_v55 = vadd.f32 %v3586_v2, %v3548_v41 }
 0x9d4   : > { %v3571_v54 = vadd.f32 %v3570_v44, %v3569_v36  ;;  %v3588_v56 = vadd.f32 %v3587_v55, %v3550_v4  ;;  %v9086_v55 = vpop.permute.xlu0 %3683 }
 0x9d6   : > { %v3572_v1 = vrot.slane %v3571_v54, 2  ;;  %v3589_v42 = vadd.f32 %v3588_v56, %v3552_v24 }
 0x9d8   : > { %v3573_v18 = vadd.f32 %v3572_v1, %v3571_v54  ;;  %v3590_v52 = vadd.f32 %v3589_v42, %v3554_v6  ;;  %v9084_v54 = vpop.permute.xlu1 %3688 }
 0x9da   : > { %v3574_v12 = vrot.slane %v3573_v18, 1  ;;  %v3591_v33 = vrot.slane %v3590_v52, 4 }
 0x9dc   : > { %v3575_v60 = vadd.f32 %v3574_v12, %v3573_v18  ;;  %v3592_v20 = vadd.f32 %v3591_v33, %v3590_v52  ;;  %v9090_v18 = vpop.permute.xlu1 %3816  ;;  %v9092_v12 = vpop.permute.xlu0 %3811 }
 0x9de   : > { %v3597_v29 = vmul.f32 0.0078125, %v3575_v60  ;;  %v3593_v38 = vrot.slane %v3592_v20, 2 }
 0x9e0   : > { %v3599_v8 = vadd.f32 1e-05, %v3597_v29  ;;  %v3594_v44 = vadd.f32 %v3593_v38, %v3592_v20  ;;  %v9101_v33 = vpop.permute.xlu1 %3678  ;;  %v9103_v1 = vpop.permute.xlu0 %3673 }
 0x9e2   : > { %6374 = vrsqrt.f32 %v3599_v8  ;;  %v3595_v36 = vrot.slane %v3594_v44, 1 }
 0x9e4   : > { %v3596_v41 = vadd.f32 %v3595_v36, %v3594_v44 }
 0x9e6   : > { %v3598_v4 = vmul.f32 0.0078125, %v3596_v41 }
 0x9e8   : > { %v3600_v2 = vadd.f32 1e-05, %v3598_v4 }
 0x9ea   : > { %6376 = vrsqrt.f32 %v3600_v2 }
 0x9ef   : > { %v9088_v6 = vpop.eup %6374 }
 0x9f0   : > { %v3633_v20 = vmul.f32 %v9088_v6, %v3521_v25  ;;  %v3631_v42 = vmul.f32 %v9088_v6, %v9040_v7  ;;  %v3627_v8 = vmul.f32 %v9088_v6, %v9016_v0  ;;  %v3629_v29 = vmul.f32 %v9088_v6, %v9028_v43 }
 0x9f1   : > { %v3623_v0 = vmul.f32 %v9088_v6, %v8992_v22  ;;  %v3625_v43 = vmul.f32 %v9088_v6, %v9004_v35 }
 0x9f2   : > { %v3761_v24 = vmul.f32 %v8611_v40, %v3633_v20  ;;  %v3759_v56 = vmul.f32 %v8616_v17, %v3631_v42  ;;  %v3755_v25 = vmul.f32 %v8642_v50, %v3627_v8  ;;  %v3757_v7 = vmul.f32 %v8637_v13, %v3629_v29  ;;  %v9129_v20 = vpop.permute.xlu1 %3806 }
 0x9f3   : > { %v3751_v29 = vmul.f32 %v8668_v48, %v3623_v0 }
 0x9f4   : > { %v3887_v41 = vadd.f32 %v8629_v62, %v3759_v56  ;;  %v3889_v4 = vadd.f32 %v8624_v51, %v3761_v24  ;;  %v3619_v24 = vmul.f32 %v9088_v6, %v8970_v45  ;;  %v3621_v56 = vmul.f32 %v9088_v6, %v8980_v39  ;;  %v10434_v45 = vld [vmem:[#allocation42_spill] sm:$0xff] }
 0x9f7   : > { %v9107_v52 = vpop.eup %6376 }
 0x9f8   : > { %v3634_v60 = vmul.f32 %v9107_v52, %v3522_v31  ;;  %v3632_v38 = vmul.f32 %v9107_v52, %v3520_v63  ;;  %v3628_v44 = vmul.f32 %v9107_v52, %v3516_v32  ;;  %v3630_v36 = vmul.f32 %v9107_v52, %v3518_v11  ;;  %v9131_v11 = vpop.permute.xlu0 %3801 }
 0x9f9   : > { %v3624_v2 = vmul.f32 %v9107_v52, %v9056_v58  ;;  %v3626_v22 = vmul.f32 %v9107_v52, %v9064_v37  ;;  %v3620_v58 = vmul.f32 %v9107_v52, %v9034_v59  ;;  %v3616_v39 = vmul.f32 %v9107_v52, %v9010_v21 }
 0x9fa   : > { %v3760_v35 = vmul.f32 %v8616_v17, %v3632_v38  ;;  %v3762_v31 = vmul.f32 %v8611_v40, %v3634_v60  ;;  %v3756_v63 = vmul.f32 %v8642_v50, %v3628_v44  ;;  %v3758_v32 = vmul.f32 %v8637_v13, %v3630_v36 }
 0x9fb   : > { %v3752_v42 = vmul.f32 %v8668_v48, %v3624_v2  ;;  %v3754_v8 = vmul.f32 %v8663_v26, %v3626_v22  ;;  %v3622_v17 = vmul.f32 %v9107_v52, %v9046_v19  ;;  %v3883_v60 = vadd.f32 %v8655_v10, %v3755_v25 }
 0x9fc   : > { %v3888_v40 = vadd.f32 %v8629_v62, %v3760_v35  ;;  %v3890_v50 = vadd.f32 %v8624_v51, %v3762_v31  ;;  %v3884_v13 = vadd.f32 %v8655_v10, %v3756_v63  ;;  %v3886_v37 = vadd.f32 %v8650_v30, %v3758_v32  ;;  %v3664_v25 = vpop.permute.xlu0 %3663 }
 0x9fd   : > { %v3885_v19 = vadd.f32 %v8650_v30, %v3757_v7  ;;  %v3753_v62 = vmul.f32 %v8663_v26, %v3625_v43  ;;  %v3969_v51 = vpack.c.bf16 %v3889_v4, %v3887_v41  ;;  %v3880_v38 = vadd.f32 %v8681_v15, %v3752_v42  ;;  %v3669_v30 = vpop.permute.xlu1 %3668 }
 0x9fe   : > { %v3970_v59 = vpack.c.bf16 %v3890_v50, %v3888_v40  ;;  %v3748_v44 = vmul.f32 %v8691_v49, %v3620_v58  ;;  %v3750_v48 = vmul.f32 %v8689_v27, %v3622_v17  ;;  %v3968_v0 = vpack.c.bf16 %v3886_v37, %v3884_v13 }
 0x9ff   : > { %v3882_v36 = vadd.f32 %v10434_v45, %v3754_v8  ;;  %v3618_v10 = vmul.f32 %v9107_v52, %v9022_v61  ;;  %v3747_v26 = vmul.f32 %v8691_v49, %v3619_v24  ;;  %v3749_v7 = vmul.f32 %v8689_v27, %v3621_v56 }
 0xa00   : > { %4547 = vmatprep.subr.bf16.mxu1 %v3970_v59  ;;  %v3967_v43 = vpack.c.bf16 %v3885_v19, %v3883_v60  ;;  %v3879_v41 = vadd.f32 %v8681_v15, %v3751_v29  ;;  %v3881_v4 = vadd.f32 %v10434_v45, %v3753_v62  ;;  %v3615_v2 = vmul.f32 %v9088_v6, %v8950_v3  ;;  %v3792_v58 = vpop.permute.xlu0 %3791  ;;  %v10439_v45 = vld [vmem:[#allocation32_spill] sm:$0xff] }
 0xa01   : > { %4548 = vmatpush1.bf16.msra.mxu1 %v3969_v51  ;;  %v3876_v21 = vadd.f32 %v9082_v53, %v3748_v44  ;;  %v3878_v61 = vadd.f32 %v9080_v46, %v3750_v48  ;;  %v3617_v22 = vmul.f32 %v9088_v6, %v8956_v57  ;;  %v3612_v49 = vmul.f32 %v9107_v52, %v8986_v14  ;;  %v3797_v8 = vpop.permute.xlu1 %3796 }
 0xa02   : > { %4549 = vmatprep.subr.bf16.mxu1 %v3968_v0  ;;  %v3966_v27 = vpack.c.bf16 %v3882_v36, %v3880_v38  ;;  %v3744_v35 = vmul.f32 %v9086_v55, %v3616_v39  ;;  %v3746_v15 = vmul.f32 %v9084_v54, %v3618_v10  ;;  %v3614_v31 = vmul.f32 %v9107_v52, %v8998_v23 }
 0xa03   : > { %v3875_v3 = vadd.f32 %v9082_v53, %v3747_v26  ;;  %v3877_v63 = vadd.f32 %v9080_v46, %v3749_v7  ;;  %v3965_v32 = vpack.c.bf16 %v3881_v4, %v3879_v41  ;;  %v3743_v57 = vmul.f32 %v9086_v55, %v3615_v2 }
 0xa04   : > { %v3611_v14 = vmul.f32 %v9088_v6, %v8928_v34  ;;  %v3613_v42 = vmul.f32 %v9088_v6, %v8936_v28  ;;  %v3745_v17 = vmul.f32 %v9084_v54, %v3617_v22  ;;  %v3740_v23 = vmul.f32 %v9103_v1, %v3612_v49 }
 0xa05   : > { %4550 = vmatpush1.bf16.msra.mxu1 %v3967_v43  ;;  %v3608_v53 = vmul.f32 %v9107_v52, %v8962_v16  ;;  %v3610_v46 = vmul.f32 %v9107_v52, %v8976_v5  ;;  %v3964_v40 = vpack.c.bf16 %v3878_v61, %v3876_v21  ;;  %v3872_v55 = vadd.f32 %v9092_v12, %v3744_v35  ;;  %v10435_v5 = vld [vmem:[#allocation28_spill] sm:$0xff]  ;;  %v3659_v38 = vpop.permute.xlu1 %3658 }
 0xa06   : > { %4551 = vmatprep.subr.bf16.mxu1 %v3966_v27  ;;  %v3874_v34 = vadd.f32 %v9090_v18, %v3746_v15  ;;  %v3742_v50 = vmul.f32 %v9101_v33, %v3614_v31  ;;  %v3963_v28 = vpack.c.bf16 %v3877_v63, %v3875_v3  ;;  %v3607_v54 = vmul.f32 %v9088_v6, %v8916_v47  ;;  %v10436_v47 = vld [vmem:[#allocation30_spill] sm:$0xff] }
 0xa07   : > { %v3871_v13 = vadd.f32 %v9092_v12, %v3743_v57  ;;  %v3739_v16 = vmul.f32 %v9103_v1, %v3611_v14  ;;  %v3741_v37 = vmul.f32 %v9101_v33, %v3613_v42  ;;  %v3609_v29 = vmul.f32 %v9088_v6, %v10435_v5  ;;  %v10437_v12 = vld [vmem:[#allocation26_spill] sm:$0xff]  ;;  %v3654_v33 = vpop.permute.xlu0 %3653  ;;  %v5911_v57 = vld [vmem:[%s9975_s8 + $0x8] sm:$0xff]   ;;  %v5912_v14 = vld [vmem:[%s9975_s8 + $0x10] sm:$0xff]  }
 0xa08   : > { %v3873_v24 = vadd.f32 %v9090_v18, %v3745_v17  ;;  %v3868_v56 = vadd.f32 %v9131_v11, %v3740_v23  ;;  %v3736_v59 = vmul.f32 %v3664_v25, %v3608_v53  ;;  %v3738_v60 = vmul.f32 %v3669_v30, %v3610_v46  ;;  %v10438_v18 = vld [vmem:[#allocation31_spill] sm:$0xff]  ;;  %v5910_v63 = vld [vmem:[%s9975_s8] sm:$0xff]   ;;  %v5913_v42 = vld [vmem:[%s9975_s8 + $0x18] sm:$0xff]  }
 0xa09   : > { %4552 = vmatpush1.bf16.msra.mxu1 %v3965_v32  ;;  %v3962_v19 = vpack.c.bf16 %v3874_v34, %v3872_v55  ;;  %v3870_v62 = vadd.f32 %v9129_v20, %v3742_v50  ;;  %v3604_v51 = vmul.f32 %v9107_v52, %v10436_v47  ;;  %v3606_v1 = vmul.f32 %v9107_v52, %v10437_v12  ;;  %v5916_v17 = vld [vmem:[%s9975_s8 + $0x30] sm:$0xff]   ;;  %v5917_v23 = vld [vmem:[%s9975_s8 + $0x38] sm:$0xff]   ;;  %v5918_v53 = vld [vmem:[%s9975_s8 + $0x40] sm:$0xff]  }
 0xa0a   : > { %4553 = vmatprep.subr.bf16.mxu1 %v3964_v40  ;;  %v3735_v44 = vmul.f32 %v3664_v25, %v3607_v54  ;;  %v3737_v48 = vmul.f32 %v3669_v30, %v3609_v29  ;;  %v3603_v0 = vmul.f32 %v9088_v6, %v10438_v18  ;;  %v3605_v36 = vmul.f32 %v9088_v6, %v10439_v45  ;;  %v3787_v30 = vpop.permute.xlu1 %3786  ;;  %v5919_v46 = vld [vmem:[%s9975_s8 + $0x48] sm:$0xff]   ;;  %v5920_v40 = vld [vmem:[%s9975_s8 + $0x50] sm:$0xff]   ;;  %v5921_v55 = vld [vmem:[%s9975_s8 + $0x58] sm:$0xff]  }
 0xa0b   : > { %v3961_v39 = vpack.c.bf16 %v3873_v24, %v3871_v13  ;;  %v3867_v10 = vadd.f32 %v9131_v11, %v3739_v16  ;;  %v3869_v26 = vadd.f32 %v9129_v20, %v3741_v37  ;;  %v3864_v7 = vadd.f32 %v3792_v58, %v3736_v59  ;;  %v3782_v2 = vpop.permute.xlu0 %3781  ;;  %v5922_v34 = vld [vmem:[%s9975_s8 + $0x60] sm:$0xff]   ;;  %v5923_v50 = vld [vmem:[%s9975_s8 + $0x68] sm:$0xff]   ;;  %v5925_v54 = vld [vmem:[%s9975_s8 + $0x78] sm:$0xff]  }
 0xa0c   : > { %v3960_v43 = vpack.c.bf16 %v3870_v62, %v3868_v56  ;;  %v3866_v52 = vadd.f32 %v3797_v8, %v3738_v60  ;;  %v3732_v41 = vmul.f32 %v3654_v33, %v3604_v51  ;;  %v3734_v4 = vmul.f32 %v3659_v38, %v3606_v1  ;;  %v5926_v13 = vld [vmem:[%s9975_s8 + $0x80] sm:$0xff]   ;;  %v5927_v16 = vld [vmem:[%s9975_s8 + $0x88] sm:$0xff]   ;;  %v5928_v37 = vld [vmem:[%s9975_s8 + $0x90] sm:$0xff]  }
 0xa0d   : > { %4554 = vmatpush1.bf16.msra.mxu1 %v3963_v28  ;;  %v3863_v25 = vadd.f32 %v3792_v58, %v3735_v44  ;;  %v3959_v21 = vpack.c.bf16 %v3869_v26, %v3867_v10  ;;  %v3865_v61 = vadd.f32 %v3797_v8, %v3737_v48  ;;  %v3731_v22 = vmul.f32 %v3654_v33, %v3603_v0  ;;  %v5914_v8 = vld [vmem:[%s9975_s8 + $0x20] sm:$0xff]   ;;  %v5915_v58 = vld [vmem:[%s9975_s8 + $0x28] sm:$0xff]   ;;  %v5924_v28 = vld [vmem:[%s9975_s8 + $0x70] sm:$0xff]  }
 0xa0e   : > { %4555 = vmatprep.subr.bf16.mxu1 %v3962_v19  ;;  %v3733_v49 = vmul.f32 %v3659_v38, %v3605_v36  ;;  %v3958_v6 = vpack.c.bf16 %v3866_v52, %v3864_v7  ;;  %v3860_v27 = vadd.f32 %v3782_v2, %v3732_v41  ;;  %v3862_v35 = vadd.f32 %v3787_v30, %v3734_v4  ;;  %v5929_v5 = vld [vmem:[%s9975_s8 + $0x98] sm:$0xff]   ;;  %v9293_v24 = vpop.permute.xlu1 %4112  ;;  %v5930_v56 = vld [vmem:[%s9975_s8 + $0xa0] sm:$0xff]   ;;  %v5931_v62 = vld [vmem:[%s9975_s8 + $0xa8] sm:$0xff]  }
 0xa0f   : > { %v3957_v20 = vpack.c.bf16 %v3865_v61, %v3863_v25  ;;  %v3859_v11 = vadd.f32 %v3782_v2, %v3731_v22  ;;  %v10440_v32 = vmov 0   ;;  %v9290_v29 = vpop.permute.xlu0 %4107  ;;  %v5932_v1 = vld [vmem:[%s9975_s8 + $0xb0] sm:$0xff]   ;;  %v5933_v44 = vld [vmem:[%s9975_s8 + $0xb8] sm:$0xff]   ;;  %v5934_v45 = vld [vmem:[%s9975_s8 + $0xc0] sm:$0xff]  }
 0xa10   : > { %v3861_v15 = vadd.f32 %v3787_v30, %v3733_v49  ;;  %v3956_v31 = vpack.c.bf16 %v3862_v35, %v3860_v27  ;;  %v5935_v41 = vld [vmem:[%s9975_s8 + $0xc8] sm:$0xff]  }
 0xa11   : > { %4556 = vmatpush1.bf16.msra.mxu1 %v3961_v39 }
 0xa12   : > { %4557 = vmatprep.subr.bf16.mxu1 %v3960_v43  ;;  %v3955_v3 = vpack.c.bf16 %v3861_v15, %v3859_v11  ;;  %v9300_v60 = vpop.permute.xlu1 %4102 }
 0xa13   : > { %v9298_v59 = vpop.permute.xlu0 %4097 }
 0xa15   : > { %4558 = vmatpush1.bf16.msra.mxu1 %v3959_v21 }
 0xa16   : > { %4559 = vmatprep.subr.bf16.mxu1 %v3958_v6  ;;  %v9308_v47 = vpop.permute.xlu1 %4092 }
 0xa17   : > { %v9303_v19 = vpop.permute.xlu0 %4087 }
 0xa19   : > { %4560 = vmatpush1.bf16.msra.mxu1 %v3957_v20 }
 0xa1a   : > { %4561 = vmatprep.subr.bf16.mxu1 %v3956_v31  ;;  %v9313_v12 = vpop.permute.xlu1 %4082  ;;  %v5936_v31 = vld [vmem:[%s9975_s8 + $0xd0] sm:$0xff]  }
 0xa1b   : > { %v9311_v51 = vpop.permute.xlu0 %4077 }
 0xa1d   : > { %4562 = vmatpush1.bf16.msra.mxu1 %v3955_v3 }
 0xa1e   : > { %v9321_v33 = vpop.permute.xlu1 %4072 }
 0xa1f   : > { %v9318_v38 = vpop.permute.xlu0 %4067 }
 0xa20   : > { %4580 = vmatmul.mubr.bf16.vlgmr.msra.gmra.mxu1 %v5910_v63 }
 0xa21   : > { %4589 = vmatprep.mubr.bf16.mxu1 %v10440_v32 }
 0xa22   : > { %v9328_v18 = vpop.permute.xlu1 %4062 }
 0xa23   : > { %v9326_v48 = vpop.permute.xlu0 %4057 }
 0xa26   : > { %v4053_v36 = vpop.permute.xlu1 %4052 }
 0xa27   : > { %v4048_v0 = vpop.permute.xlu0 %4047 }
 0xa28   : > { %4590 = vmatmul.mubr.bf16.gmra.mxu1 %v5911_v57 }
 0xa29   : > { %4599 = vmatprep.mubr.bf16.mxu1 %v10440_v32 }
 0xa2a   : > { %v4043_v43 = vpop.permute.xlu1 %4042 }
 0xa2b   : > { %v4038_v10 = vpop.permute.xlu0 %4037 }
 0xa30   : > { %4600 = vmatmul.mubr.bf16.gmra.mxu1 %v5912_v14 }
 0xa31   : > { %4609 = vmatprep.mubr.bf16.mxu1 %v10440_v32 }
 0xa38   : > { %4610 = vmatmul.mubr.bf16.gmra.mxu1 %v5913_v42 }
 0xa39   : > { %4619 = vmatprep.mubr.bf16.mxu1 %v10440_v32 }
 0xa40   : > { %4620 = vmatmul.mubr.bf16.gmra.mxu1 %v5914_v8 }
 0xa41   : > { %4629 = vmatprep.mubr.bf16.mxu1 %v10440_v32 }
 0xa48   : > { %4630 = vmatmul.mubr.bf16.gmra.mxu1 %v5915_v58 }
 0xa49   : > { %4639 = vmatprep.mubr.bf16.mxu1 %v10440_v32 }
 0xa50   : > { %4640 = vmatmul.mubr.bf16.gmra.mxu1 %v5916_v17 }
 0xa51   : > { %4649 = vmatprep.mubr.bf16.mxu1 %v10440_v32 }
 0xa58   : > { %4650 = vmatmul.mubr.bf16.gmra.mxu1 %v5917_v23 }
 0xa59   : > { %4659 = vmatprep.mubr.bf16.mxu1 %v10440_v32 }
 0xa60   : > { %4660 = vmatmul.mubr.bf16.gmra.mxu1 %v5918_v53 }
 0xa61   : > { %4669 = vmatprep.mubr.bf16.mxu1 %v10440_v32 }
 0xa68   : > { %4670 = vmatmul.mubr.bf16.gmra.mxu1 %v5919_v46 }
 0xa69   : > { %4679 = vmatprep.mubr.bf16.mxu1 %v10440_v32 }
 0xa70   : > { %4680 = vmatmul.mubr.bf16.gmra.mxu1 %v5920_v40 }
 0xa71   : > { %4689 = vmatprep.mubr.bf16.mxu1 %v10440_v32 }
 0xa78   : > { %4690 = vmatmul.mubr.bf16.gmra.mxu1 %v5921_v55 }
 0xa79   : > { %4699 = vmatprep.mubr.bf16.mxu1 %v10440_v32 }
 0xa80   : > { %4700 = vmatmul.mubr.bf16.gmra.mxu1 %v5922_v34  ;;  %v5937_v34 = vld [vmem:[%s9975_s8 + $0xd8] sm:$0xff]  }
 0xa81   : > { %4709 = vmatprep.mubr.bf16.mxu1 %v10440_v32 }
 0xa88   : > { %4710 = vmatmul.mubr.bf16.gmra.mxu1 %v5923_v50 }
 0xa89   : > { %4719 = vmatprep.mubr.bf16.mxu1 %v10440_v32 }
 0xa90   : > { %4720 = vmatmul.mubr.bf16.gmra.mxu1 %v5924_v28  ;;  %v9362_v28 = vpop.permute.xlu0 %4187 }
 0xa91   : > { %4729 = vmatprep.mubr.bf16.mxu1 %v10440_v32 }
 0xa98   : > { %4730 = vmatmul.mubr.bf16.gmra.mxu1 %v5925_v54 }
 0xa99   : > { %4739 = vmatprep.mubr.bf16.mxu1 %v10440_v32 }
 0xaa0   : > { %4740 = vmatmul.mubr.bf16.gmra.mxu1 %v5926_v13  ;;  %v9367_v13 = vpop.permute.xlu1 %4192 }
 0xaa1   : > { %4749 = vmatprep.mubr.bf16.mxu1 %v10440_v32 }
 0xaa8   : > { %4750 = vmatmul.mubr.bf16.gmra.mxu1 %v5927_v16 }
 0xaa9   : > { %4759 = vmatprep.mubr.bf16.mxu1 %v10440_v32 }
 0xab0   : > { %4760 = vmatmul.mubr.bf16.gmra.mxu1 %v5928_v37 }
 0xab1   : > { %4769 = vmatprep.mubr.bf16.mxu1 %v10440_v32 }
 0xab8   : > { %4770 = vmatmul.mubr.bf16.gmra.mxu1 %v5929_v5  ;;  %v5938_v5 = vld [vmem:[%s9975_s8 + $0xe0] sm:$0xff]  }
 0xab9   : > { %4779 = vmatprep.mubr.bf16.mxu1 %v10440_v32 }
 0xac0   : > { %4780 = vmatmul.mubr.bf16.gmra.mxu1 %v5930_v56  ;;  %v9376_v56 = vpop.permute.xlu0 %4177 }
 0xac1   : > { %4789 = vmatprep.mubr.bf16.mxu1 %v10440_v32 }
 0xac8   : > { %4790 = vmatmul.mubr.bf16.gmra.mxu1 %v5931_v62 }
 0xac9   : > { %4799 = vmatprep.mubr.bf16.mxu1 %v10440_v32 }
 0xad0   : > { %4800 = vmatmul.mubr.bf16.gmra.mxu1 %v5932_v1  ;;  %v9380_v1 = vpop.permute.xlu1 %4182 }
 0xad1   : > { %4809 = vmatprep.mubr.bf16.mxu1 %v10440_v32 }
 0xad8   : > { %4810 = vmatmul.mubr.bf16.gmra.mxu1 %v5933_v44 }
 0xad9   : > { %4819 = vmatprep.mubr.bf16.mxu1 %v10440_v32 }
 0xae0   : > { %v4581_v39 = vpop.f32.mrf.mxu1  ;;  %4820 = vmatmul.mubr.bf16.gmra.mxu1 %v5934_v45  ;;  %v9387_v45 = vpop.permute.xlu0 %4167 }
 0xae1   : > { %4829 = vmatprep.mubr.bf16.mxu1 %v10440_v32  ;;  %v4582_v7 = vadd.f32 %v4581_v39, %v4038_v10  ;;  %v5939_v39 = vld [vmem:[%s9975_s8 + $0xe8] sm:$0xff]  }
 0xae2   : > { %v4583_v26 = vpop.f32.mrf.mxu1 }
 0xae3   : > { %v4584_v4 = vadd.f32 %v4583_v26, %v4038_v10  ;;  %v4900_v2 = vmax.f32 %v4582_v7, 0.0  ;;  %v9394_v10 = vpop.permute.xlu1 %4172 }
 0xae4   : > { %v4585_v52 = vpop.f32.mrf.mxu1 }
 0xae5   : > { %v4586_v25 = vadd.f32 %v4585_v52, %v4043_v43  ;;  %v4901_v49 = vmax.f32 %v4584_v4, 0.0  ;;  %v9402_v52 = vpop.permute.xlu0 %4157 }
 0xae6   : > { %v4587_v30 = vpop.f32.mrf.mxu1  ;;  %10441 = vst [vmem:[#allocation29_spill] sm:$0xff] %v9402_v52 }
 0xae7   : > { %v4902_v21 = vmax.f32 %v4586_v25, 0.0  ;;  %v4588_v61 = vadd.f32 %v4587_v30, %v4043_v43  ;;  %v5944_v43 = vld [vmem:[%s9977_s10 + $0x4] ss:$16 sps:$4 sm:$0xff]   ;;  %v9404_v4 = vpop.permute.xlu1 %4162 }
 0xae8   : > { %v4591_v22 = vpop.f32.mrf.mxu1  ;;  %4830 = vmatmul.mubr.bf16.gmra.mxu1 %v5935_v41  ;;  %5412 = vmatprep.mubr.bf16.mxu0 %v5944_v43  ;;  %10442 = vst [vmem:[#allocation27_spill] sm:$0xff] %v9404_v4  ;;  %v5940_v30 = vld [vmem:[%s9975_s8 + $0xf0] sm:$0xff]  }
 0xae9   : > { %v9338_v6 = vpack.c.bf16 %v4902_v21, %v4900_v2  ;;  %v4903_v27 = vmax.f32 %v4588_v61, 0.0  ;;  %4839 = vmatprep.mubr.bf16.mxu1 %v10440_v32  ;;  %v4592_v20 = vadd.f32 %v4591_v22, %v4048_v0  ;;  %v9409_v21 = vpop.permute.xlu0 %4147 }
 0xaea   : > { %v4593_v35 = vpop.f32.mrf.mxu1  ;;  %10443 = vst [vmem:[#allocation24_spill] sm:$0xff] %v9409_v21 }
 0xaeb   : > { %v9341_v11 = vpack.c.bf16 %v4903_v27, %v4901_v49  ;;  %v4594_v3 = vadd.f32 %v4593_v35, %v4048_v0  ;;  %v4904_v14 = vmax.f32 %v4592_v20, 0.0  ;;  %v9412_v22 = vpop.permute.xlu1 %4152  ;;  %v5941_v35 = vld [vmem:[%s9975_s8 + $0xf8] sm:$0xff]  }
 0xaec   : > { %v4595_v15 = vpop.f32.mrf.mxu1  ;;  %10444 = vst [vmem:[#allocation22_spill] sm:$0xff] %v9412_v22 }
 0xaed   : > { %v4596_v63 = vadd.f32 %v4595_v15, %v4053_v36  ;;  %v4905_v17 = vmax.f32 %v4594_v3, 0.0  ;;  %v9417_v20 = vpop.permute.xlu0 %4137 }
 0xaee   : > { %v4597_v57 = vpop.f32.mrf.mxu1  ;;  %10445 = vst [vmem:[#allocation25_spill] sm:$0xff] %v9417_v20 }
 0xaef   : > { %v4906_v42 = vmax.f32 %v4596_v63, 0.0  ;;  %v4598_v8 = vadd.f32 %v4597_v57, %v4053_v36 }
 0xaf0   : > { %v9346_v58 = vpop.f32.mrf.mxu1  ;;  %4840 = vmatmul.mubr.bf16.gmra.mxu1 %v5936_v31  ;;  %v9419_v31 = vpop.permute.xlu1 %4142 }
 0xaf1   : > { %v9348_v23 = vpack.c.bf16 %v4906_v42, %v4904_v14  ;;  %v4907_v53 = vmax.f32 %v4598_v8, 0.0  ;;  %4849 = vmatprep.mubr.bf16.mxu1 %v10440_v32  ;;  %10446 = vst [vmem:[#allocation23_spill] sm:$0xff] %v9419_v31  ;;  %v9421_v57 = vpop.permute.xlu0 %4127 }
 0xaf2   : > { %v9351_v46 = vpop.f32.mrf.mxu1 }
 0xaf3   : > { %v9353_v40 = vpack.c.bf16 %v4907_v53, %v4905_v17 }
 0xaf4   : > { %v9355_v55 = vpop.f32.mrf.mxu1  ;;  %v9426_v17 = vpop.permute.xlu1 %4132 }
 0xaf5   : > { %v4118_v31 = vpop.permute.xlu0 %4117 }
 0xaf6   : > { %v9360_v50 = vpop.f32.mrf.mxu1 }
 0xaf8   : > { %v9364_v54 = vpop.f32.mrf.mxu1  ;;  %4850 = vmatmul.mubr.bf16.gmra.mxu1 %v5937_v34 }
 0xaf9   : > { %4859 = vmatprep.mubr.bf16.mxu1 %v10440_v32 }
 0xafa   : > { %v9369_v16 = vpop.f32.mrf.mxu1 }
 0xafc   : > { %v9371_v37 = vpop.f32.mrf.mxu1 }
 0xafe   : > { %v9378_v62 = vpop.f32.mrf.mxu1 }
 0xb00   : > { %v9382_v44 = vpop.f32.mrf.mxu1  ;;  %4860 = vmatmul.mubr.bf16.gmra.mxu1 %v5938_v5 }
 0xb01   : > { %4869 = vmatprep.mubr.bf16.mxu1 %v10440_v32 }
 0xb02   : > { %v9385_v0 = vpop.f32.mrf.mxu1 }
 0xb04   : > { %v9389_v36 = vpop.f32.mrf.mxu1 }
 0xb06   : > { %v4627_v26 = vpop.f32.mrf.mxu1 }
 0xb08   : > { %v9396_v7 = vpop.f32.mrf.mxu1  ;;  %4870 = vmatmul.mubr.bf16.gmra.mxu1 %v5939_v39 }
 0xb09   : > { %4879 = vmatprep.mubr.bf16.mxu1 %v10440_v32 }
 0xb0a   : > { %v4633_v41 = vpop.f32.mrf.mxu1 }
 0xb0c   : > { %v4635_v25 = vpop.f32.mrf.mxu1 }
 0xb0e   : > { %v4637_v2 = vpop.f32.mrf.mxu1 }
 0xb0f   : > { %v4638_v9 = vadd.f32 %v4637_v2, %v9308_v47 }
 0xb10   : > { %v4641_v61 = vpop.f32.mrf.mxu1  ;;  %4880 = vmatmul.mubr.bf16.gmra.mxu1 %v5940_v30 }
 0xb11   : > { %4889 = vmatprep.mubr.bf16.mxu1 %v10440_v32 }
 0xb12   : > { %v4643_v49 = vpop.f32.mrf.mxu1 }
 0xb13   : > { %v4644_v5 = vadd.f32 %v4643_v49, %v9298_v59 }
 0xb14   : > { %v4645_v27 = vpop.f32.mrf.mxu1 }
 0xb15   : > { %v4646_v43 = vadd.f32 %v4645_v27, %v9300_v60  ;;  %v4636_v27 = vadd.f32 %v4635_v25, %v9308_v47 }
 0xb16   : > { %v4647_v15 = vpop.f32.mrf.mxu1 }
 0xb17   : > { %v4648_v32 = vadd.f32 %v4647_v15, %v9300_v60  ;;  %v4628_v60 = vadd.f32 %v4627_v26, %v9313_v12 }
 0xb18   : > { %v4651_v3 = vpop.f32.mrf.mxu1  ;;  %4890 = vmatmul.mubr.bf16.gmra.mxu1 %v5941_v35 }
 0xb19   : > { %v4652_v53 = vadd.f32 %v4651_v3, %v9290_v29  ;;  %v4927_v15 = vmax.f32 %v4648_v32, 0.0  ;;  %v4925_v3 = vmax.f32 %v4644_v5, 0.0 }
 0xb1a   : > { %v4653_v63 = vpop.f32.mrf.mxu1 }
 0xb1b   : > { %v4654_v42 = vadd.f32 %v4653_v63, %v9290_v29  ;;  %v4928_v21 = vmax.f32 %v4652_v53, 0.0  ;;  %v4634_v29 = vadd.f32 %v4633_v41, %v9303_v19  ;;  %v4624_v41 = vadd.f32 %v9385_v0, %v9311_v51 }
 0xb1c   : > { %v4655_v14 = vpop.f32.mrf.mxu1  ;;  %v4922_v53 = vmax.f32 %v4636_v27, 0.0  ;;  %v4612_v27 = vadd.f32 %v9364_v54, %v9318_v38 }
 0xb1d   : > { %v4656_v8 = vadd.f32 %v4655_v14, %v9293_v24  ;;  %v4929_v20 = vmax.f32 %v4654_v42, 0.0  ;;  %v4642_v14 = vadd.f32 %v4641_v61, %v9298_v59  ;;  %v4923_v42 = vmax.f32 %v4638_v9, 0.0 }
 0xb1e   : > { %v4657_v34 = vpop.f32.mrf.mxu1  ;;  %v4618_v59 = vadd.f32 %v9378_v62, %v9321_v33  ;;  %v4632_v61 = vadd.f32 %v9396_v7, %v9303_v19  ;;  %v4921_v47 = vmax.f32 %v4634_v29, 0.0  ;;  %v4622_v7 = vadd.f32 %v9382_v44, %v9311_v51 }
 0xb1f   : > { %v4658_v39 = vadd.f32 %v4657_v34, %v9293_v24  ;;  %v4930_v30 = vmax.f32 %v4656_v8, 0.0  ;;  %v4123_v24 = vpop.permute.xlu1 %4122  ;;  %v4926_v8 = vmax.f32 %v4646_v43, 0.0  ;;  %v5073_v34 = vpack.c.bf16 %v4927_v15, %v4925_v3 }
 0xb20   : > { %v4661_v35 = vpop.f32.mrf.mxu1  ;;  %v4924_v26 = vmax.f32 %v4642_v14, 0.0  ;;  %v5071_v43 = vpack.c.bf16 %v4923_v42, %v4921_v47  ;;  %v4917_v15 = vmax.f32 %v4624_v41, 0.0  ;;  %v4616_v14 = vadd.f32 %v9371_v37, %v9321_v33 }
 0xb21   : > { %v4931_v63 = vmax.f32 %v4658_v39, 0.0  ;;  %v4662_v22 = vadd.f32 %v4661_v35, %v4118_v31  ;;  %v5074_v2 = vpack.c.bf16 %v4930_v30, %v4928_v21  ;;  %v4920_v35 = vmax.f32 %v4632_v61, 0.0 }
 0xb22   : > { %v4663_v52 = vpop.f32.mrf.mxu1  ;;  %v5072_v62 = vpack.c.bf16 %v4926_v8, %v4924_v26  ;;  %v4915_v3 = vmax.f32 %v4618_v59, 0.0  ;;  %v4916_v8 = vmax.f32 %v4622_v7, 0.0  ;;  %v4602_v61 = vadd.f32 %v9346_v58, %v9326_v48 }
 0xb23   : > { %v5075_v49 = vpack.c.bf16 %v4931_v63, %v4929_v20  ;;  %v4664_v39 = vadd.f32 %v4663_v52, %v4118_v31  ;;  %v4932_v25 = vmax.f32 %v4662_v22, 0.0  ;;  %v4626_v52 = vadd.f32 %v9389_v36, %v9313_v12 }
 0xb24   : > { %v4665_v32 = vpop.f32.mrf.mxu1  ;;  %v4919_v31 = vmax.f32 %v4628_v60, 0.0  ;;  %v4608_v63 = vadd.f32 %v9360_v50, %v9328_v18  ;;  %v5070_v51 = vpack.c.bf16 %v4922_v53, %v4920_v35  ;;  %v4604_v60 = vadd.f32 %v9351_v46, %v9326_v48  ;;  %v9485_v53 = vpop.permute.xlu1 %4272 }
 0xb25   : > { %v4666_v4 = vadd.f32 %v4665_v32, %v4123_v24  ;;  %5380 = vmatprep.subr.bf16.mxu0 %v5075_v49  ;;  %v4933_v0 = vmax.f32 %v4664_v39, 0.0  ;;  %v4918_v29 = vmax.f32 %v4626_v52, 0.0  ;;  %v4912_v26 = vmax.f32 %v4612_v27, 0.0 }
 0xb26   : > { %v4667_v20 = vpop.f32.mrf.mxu1  ;;  %5381 = vmatpush1.bf16.msra.mxu0 %v5074_v2  ;;  %v5069_v49 = vpack.c.bf16 %v4919_v31, %v4917_v15  ;;  %v4911_v42 = vmax.f32 %v4608_v63, 0.0  ;;  %v9481_v31 = vpop.permute.xlu0 %4267 }
 0xb27   : > { %v4934_v21 = vmax.f32 %v4666_v4, 0.0  ;;  %v4668_v9 = vadd.f32 %v4667_v20, %v4123_v24  ;;  %5382 = vmatprep.subr.bf16.mxu0 %v5073_v34  ;;  %v4614_v4 = vadd.f32 %v9369_v16, %v9318_v38  ;;  %v4914_v34 = vmax.f32 %v4616_v14, 0.0 }
 0xb28   : > { %v4671_v5 = vpop.f32.mrf.mxu1  ;;  %v5068_v39 = vpack.c.bf16 %v4918_v29, %v4916_v8 }
 0xb29   : > { %v9445_v30 = vpack.c.bf16 %v4934_v21, %v4932_v25  ;;  %v4935_v19 = vmax.f32 %v4668_v9, 0.0  ;;  %v4672_v36 = vadd.f32 %v4671_v5, %v9421_v57  ;;  %v4913_v2 = vmax.f32 %v4614_v4, 0.0 }
 0xb2a   : > { %v4673_v22 = vpop.f32.mrf.mxu1  ;;  %5383 = vmatpush1.bf16.msra.mxu0 %v5072_v62  ;;  %v4908_v9 = vmax.f32 %v4602_v61, 0.0 }
 0xb2b   : > { %v9451_v12 = vpack.c.bf16 %v4935_v19, %v4933_v0  ;;  %5384 = vmatprep.subr.bf16.mxu0 %v5071_v43  ;;  %v4674_v24 = vadd.f32 %v4673_v22, %v9421_v57  ;;  %v4936_v33 = vmax.f32 %v4672_v36, 0.0  ;;  %v4606_v57 = vadd.f32 %v9355_v55, %v9328_v18  ;;  %v9492_v43 = vpop.permute.xlu0 %4257  ;;  %v9498_v19 = vpop.permute.xlu1 %4262 }
 0xb2c   : > { %v4675_v44 = vpop.f32.mrf.mxu1  ;;  %v5067_v54 = vpack.c.bf16 %v4915_v3, %v4913_v2  ;;  %v5066_v55 = vpack.c.bf16 %v4914_v34, %v4912_v26 }
 0xb2d   : > { %v4676_v16 = vadd.f32 %v4675_v44, %v9426_v17  ;;  %v4937_v46 = vmax.f32 %v4674_v24, 0.0  ;;  %v4910_v18 = vmax.f32 %v4606_v57, 0.0 }
 0xb2e   : > { %v4677_v50 = vpop.f32.mrf.mxu1  ;;  %5385 = vmatpush1.bf16.msra.mxu0 %v5070_v51 }
 0xb2f   : > { %v4938_v37 = vmax.f32 %v4676_v16, 0.0  ;;  %v4678_v32 = vadd.f32 %v4677_v50, %v9426_v17  ;;  %5386 = vmatprep.subr.bf16.mxu0 %v5069_v49  ;;  %v4909_v17 = vmax.f32 %v4604_v60, 0.0  ;;  %v5064_v48 = vpack.c.bf16 %v4910_v18, %v4908_v9  ;;  %v9503_v22 = vpop.permute.xlu0 %4247  ;;  %v9507_v4 = vpop.permute.xlu1 %4252 }
 0xb30   : > { %v9467_v59 = vpop.f32.mrf.mxu1 }
 0xb31   : > { %v9469_v41 = vpack.c.bf16 %v4938_v37, %v4936_v33  ;;  %v4939_v38 = vmax.f32 %v4678_v32, 0.0  ;;  %v5065_v21 = vpack.c.bf16 %v4911_v42, %v4909_v17 }
 0xb32   : > { %v9473_v20 = vpop.f32.mrf.mxu1  ;;  %5387 = vmatpush1.bf16.msra.mxu0 %v5068_v39 }
 0xb33   : > { %v9475_v47 = vpack.c.bf16 %v4939_v38, %v4937_v46  ;;  %5388 = vmatprep.subr.bf16.mxu0 %v5067_v54  ;;  %v9509_v63 = vpop.permute.xlu0 %4237  ;;  %v9511_v14 = vpop.permute.xlu1 %4242 }
 0xb34   : > { %v9477_v25 = vpop.f32.mrf.mxu1 }
 0xb36   : > { %v9479_v52 = vpop.f32.mrf.mxu1  ;;  %5389 = vmatpush1.bf16.msra.mxu0 %v5066_v55 }
 0xb37   : > { %5390 = vmatprep.subr.bf16.mxu0 %v5065_v21  ;;  %v9513_v51 = vpop.permute.xlu0 %4227  ;;  %v9515_v3 = vpop.permute.xlu1 %4232 }
 0xb38   : > { %v9483_v58 = vpop.f32.mrf.mxu1 }
 0xb3a   : > { %v9487_v62 = vpop.f32.mrf.mxu1  ;;  %5391 = vmatpush1.bf16.msra.mxu0 %v5064_v48 }
 0xb3b   : > { %5392 = vmatprep.subr.bf16.mxu0 %v9353_v40  ;;  %v9517_v24 = vpop.permute.xlu0 %4217  ;;  %v9519_v60 = vpop.permute.xlu1 %4222 }
 0xb3c   : > { %v9490_v5 = vpop.f32.mrf.mxu1  ;;  %10447 = vst [vmem:[#allocation20_spill] sm:$0xff] %v9517_v24 }
 0xb3e   : > { %v9494_v0 = vpop.f32.mrf.mxu1  ;;  %5393 = vmatpush1.bf16.msra.mxu0 %v9348_v23 }
 0xb3f   : > { %5394 = vmatprep.subr.bf16.mxu0 %v9341_v11  ;;  %v9521_v50 = vpop.permute.xlu0 %4207  ;;  %v9526_v57 = vpop.permute.xlu1 %4212 }
 0xb40   : > { %v9500_v7 = vpop.f32.mrf.mxu1 }
 0xb42   : > { %v4703_v35 = vpop.f32.mrf.mxu1  ;;  %5395 = vmatpush1.bf16.msra.mxu0 %v9338_v6 }
 0xb43   : > { %v4198_v21 = vpop.permute.xlu0 %4197 }
 0xb44   : > { %v9505_v40 = vpop.f32.mrf.mxu1 }
 0xb46   : > { %v4707_v15 = vpop.f32.mrf.mxu1 }
 0xb48   : > { %v4711_v36 = vpop.f32.mrf.mxu1 }
 0xb4a   : > { %v4713_v23 = vpop.f32.mrf.mxu1 }
 0xb4c   : > { %v4715_v11 = vpop.f32.mrf.mxu1 }
 0xb4e   : > { %v4717_v29 = vpop.f32.mrf.mxu1 }
 0xb4f   : > { %v4718_v26 = vadd.f32 %v4717_v29, %v9394_v10 }
 0xb50   : > { %v4721_v44 = vpop.f32.mrf.mxu1 }
 0xb51   : > { %v4722_v9 = vadd.f32 %v4721_v44, %v9376_v56 }
 0xb52   : > { %v4723_v6 = vpop.f32.mrf.mxu1 }
 0xb53   : > { %v4724_v39 = vadd.f32 %v4723_v6, %v9376_v56  ;;  %v10449_v56 = vld [vmem:[#allocation22_spill] sm:$0xff] }
 0xb54   : > { %v4725_v49 = vpop.f32.mrf.mxu1  ;;  %v4698_v44 = vadd.f32 %v9494_v0, %v10449_v56 }
 0xb55   : > { %v4726_v38 = vadd.f32 %v4725_v49, %v9380_v1  ;;  %v4716_v49 = vadd.f32 %v4715_v11, %v9394_v10 }
 0xb56   : > { %v4727_v16 = vpop.f32.mrf.mxu1 }
 0xb57   : > { %v4728_v33 = vadd.f32 %v4727_v16, %v9380_v1 }
 0xb58   : > { %v4731_v27 = vpop.f32.mrf.mxu1 }
 0xb59   : > { %v4732_v42 = vadd.f32 %v4731_v27, %v9362_v28  ;;  %v4959_v17 = vmax.f32 %v4728_v33, 0.0  ;;  %v4957_v27 = vmax.f32 %v4724_v39, 0.0  ;;  %v4712_v39 = vadd.f32 %v4711_v36, %v9387_v45 }
 0xb5a   : > { %v4733_v8 = vpop.f32.mrf.mxu1 }
 0xb5b   : > { %v4734_v37 = vadd.f32 %v4733_v8, %v9362_v28  ;;  %v4960_v48 = vmax.f32 %v4732_v42, 0.0  ;;  %v4714_v28 = vadd.f32 %v4713_v23, %v9387_v45  ;;  %v10450_v23 = vld [vmem:[#allocation29_spill] sm:$0xff] }
 0xb5c   : > { %v4735_v2 = vpop.f32.mrf.mxu1  ;;  %v4704_v42 = vadd.f32 %v4703_v35, %v10450_v23  ;;  %v4702_v36 = vadd.f32 %v9500_v7, %v10450_v23 }
 0xb5d   : > { %v4736_v32 = vadd.f32 %v4735_v2, %v9367_v13  ;;  %v4961_v18 = vmax.f32 %v4734_v37, 0.0  ;;  %v10448_v2 = vld [vmem:[#allocation27_spill] sm:$0xff]  ;;  %v4955_v37 = vmax.f32 %v4718_v26, 0.0 }
 0xb5e   : > { %v4737_v34 = vpop.f32.mrf.mxu1  ;;  %v4708_v1 = vadd.f32 %v4707_v15, %v10448_v2  ;;  %v4953_v15 = vmax.f32 %v4714_v28, 0.0  ;;  %v4948_v23 = vmax.f32 %v4702_v36, 0.0  ;;  %v9579_v36 = vpop.permute.xlu0 %4347 }
 0xb5f   : > { %v4738_v46 = vadd.f32 %v4737_v34, %v9367_v13  ;;  %v4962_v54 = vmax.f32 %v4736_v32, 0.0  ;;  %v4203_v13 = vpop.permute.xlu1 %4202  ;;  %v4958_v32 = vmax.f32 %v4726_v38, 0.0  ;;  %v5089_v34 = vpack.c.bf16 %v4959_v17, %v4957_v27 }
 0xb60   : > { %v4741_v61 = vpop.f32.mrf.mxu1  ;;  %v4951_v26 = vmax.f32 %v4708_v1, 0.0  ;;  %v4954_v17 = vmax.f32 %v4716_v49, 0.0  ;;  %v5087_v0 = vpack.c.bf16 %v4955_v37, %v4953_v15  ;;  %v4949_v27 = vmax.f32 %v4704_v42, 0.0  ;;  %v10453_v37 = vld [vmem:[#allocation25_spill] sm:$0xff] }
 0xb61   : > { %v4963_v55 = vmax.f32 %v4738_v46, 0.0  ;;  %v4742_v8 = vadd.f32 %v4741_v61, %v4198_v21  ;;  %v5090_v29 = vpack.c.bf16 %v4962_v54, %v4960_v48  ;;  %v4956_v61 = vmax.f32 %v4722_v9, 0.0 }
 0xb62   : > { %v4743_v16 = vpop.f32.mrf.mxu1  ;;  %v4706_v54 = vadd.f32 %v9505_v40, %v10448_v2  ;;  %v4952_v9 = vmax.f32 %v4712_v39, 0.0  ;;  %v4696_v2 = vadd.f32 %v9490_v5, %v10449_v56 }
 0xb63   : > { %v5091_v6 = vpack.c.bf16 %v4963_v55, %v4961_v18  ;;  %v4744_v46 = vadd.f32 %v4743_v16, %v4198_v21  ;;  %v4964_v10 = vmax.f32 %v4742_v8, 0.0  ;;  %v5088_v55 = vpack.c.bf16 %v4958_v32, %v4956_v61  ;;  %v10452_v8 = vld [vmem:[#allocation23_spill] sm:$0xff] }
 0xb64   : > { %v4745_v33 = vpop.f32.mrf.mxu1  ;;  %v4950_v1 = vmax.f32 %v4706_v54, 0.0  ;;  %v5086_v7 = vpack.c.bf16 %v4954_v17, %v4952_v9  ;;  %v4947_v32 = vmax.f32 %v4698_v44, 0.0  ;;  %v4946_v61 = vmax.f32 %v4696_v2, 0.0  ;;  %v5942_v2 = vld [vmem:[%s9977_s10] ss:$16 sps:$4 sm:$0xff]  }
 0xb65   : > { %v4746_v24 = vadd.f32 %v4745_v33, %v4203_v13  ;;  %5396 = vmatprep.subr.bf16.mxu0 %v5091_v6  ;;  %v4965_v48 = vmax.f32 %v4744_v46, 0.0 }
 0xb66   : > { %v4747_v18 = vpop.f32.mrf.mxu1  ;;  %5397 = vmatpush2.bf16.msra.mxu0 %v5090_v29  ;;  %v5085_v29 = vpack.c.bf16 %v4951_v26, %v4949_v27  ;;  %v9590_v27 = vpop.permute.xlu0 %4337 }
 0xb67   : > { %v4966_v11 = vmax.f32 %v4746_v24, 0.0  ;;  %v4748_v38 = vadd.f32 %v4747_v18, %v4203_v13  ;;  %5398 = vmatprep.subr.bf16.mxu0 %v5089_v34  ;;  %v10451_v24 = vld [vmem:[#allocation24_spill] sm:$0xff]  ;;  %v4688_v13 = vadd.f32 %v9479_v52, %v10452_v8  ;;  %v4684_v34 = vadd.f32 %v9473_v20, %v10453_v37 }
 0xb68   : > { %v4751_v21 = vpop.f32.mrf.mxu1  ;;  %v4694_v28 = vadd.f32 %v9487_v62, %v10451_v24  ;;  %v4692_v46 = vadd.f32 %v9483_v58, %v10451_v24  ;;  %v5084_v18 = vpack.c.bf16 %v4950_v1, %v4948_v23 }
 0xb69   : > { %v9543_v35 = vpack.c.bf16 %v4966_v11, %v4964_v10  ;;  %v4967_v45 = vmax.f32 %v4748_v38, 0.0  ;;  %v4752_v6 = vadd.f32 %v4751_v21, %v9521_v50  ;;  %v4943_v44 = vmax.f32 %v4688_v13, 0.0 }
 0xb6a   : > { %v4753_v16 = vpop.f32.mrf.mxu1  ;;  %5399 = vmatpush2.bf16.msra.mxu0 %v5088_v55  ;;  %v4945_v42 = vmax.f32 %v4694_v28, 0.0  ;;  %v4682_v38 = vadd.f32 %v9467_v59, %v10453_v37  ;;  %v4944_v54 = vmax.f32 %v4692_v46, 0.0 }
 0xb6b   : > { %v9549_v40 = vpack.c.bf16 %v4967_v45, %v4965_v48  ;;  %5400 = vmatprep.subr.bf16.mxu0 %v5087_v0  ;;  %v4754_v33 = vadd.f32 %v4753_v16, %v9521_v50  ;;  %v4968_v5 = vmax.f32 %v4752_v6, 0.0  ;;  %v4686_v50 = vadd.f32 %v9477_v25, %v10452_v8  ;;  %v9583_v16 = vpop.permute.xlu1 %4352 }
 0xb6c   : > { %v4755_v49 = vpop.f32.mrf.mxu1  ;;  %v5083_v20 = vpack.c.bf16 %v4947_v32, %v4945_v42  ;;  %v5082_v55 = vpack.c.bf16 %v4946_v61, %v4944_v54  ;;  %v4940_v48 = vmax.f32 %v4682_v38, 0.0  ;;  %v5948_v42 = vld [vmem:[%s9977_s10 + $0x40] ss:$16 sps:$4 sm:$0xff]   ;;  %v5956_v38 = vld [vmem:[%s9977_s10 + $0x84] ss:$16 sps:$4 sm:$0xff]  }
 0xb6d   : > { %v4756_v62 = vadd.f32 %v4755_v49, %v9526_v57  ;;  %v4969_v10 = vmax.f32 %v4754_v33, 0.0  ;;  %v4942_v25 = vmax.f32 %v4686_v50, 0.0 }
 0xb6e   : > { %v4757_v52 = vpop.f32.mrf.mxu1  ;;  %5401 = vmatpush2.bf16.msra.mxu0 %v5086_v7  ;;  %v9609_v7 = vpop.permute.xlu0 %4327 }
 0xb6f   : > { %v4970_v56 = vmax.f32 %v4756_v62, 0.0  ;;  %v4758_v39 = vadd.f32 %v4757_v52, %v9526_v57  ;;  %5402 = vmatprep.subr.bf16.mxu0 %v5085_v29  ;;  %v4941_v57 = vmax.f32 %v4684_v34, 0.0  ;;  %v5080_v59 = vpack.c.bf16 %v4942_v25, %v4940_v48  ;;  %v9596_v8 = vpop.permute.xlu1 %4342  ;;  %v5945_v29 = vld [vmem:[%s9977_s10 + $0x20] ss:$16 sps:$4 sm:$0xff]   ;;  %v5950_v62 = vld [vmem:[%s9977_s10 + $0x44] ss:$16 sps:$4 sm:$0xff]  }
 0xb70   : > { %v9565_v15 = vpop.f32.mrf.mxu1 }
 0xb71   : > { %v9567_v58 = vpack.c.bf16 %v4970_v56, %v4968_v5  ;;  %v4971_v11 = vmax.f32 %v4758_v39, 0.0  ;;  %v5081_v0 = vpack.c.bf16 %v4943_v44, %v4941_v57  ;;  %v5953_v39 = vld [vmem:[%s9977_s10 + $0x64] ss:$16 sps:$4 sm:$0xff]  }
 0xb72   : > { %v9571_v26 = vpop.f32.mrf.mxu1  ;;  %5403 = vmatpush2.bf16.msra.mxu0 %v5084_v18 }
 0xb73   : > { %v9573_v17 = vpack.c.bf16 %v4971_v11, %v4969_v10  ;;  %5404 = vmatprep.subr.bf16.mxu0 %v5083_v20  ;;  %v5951_v10 = vld [vmem:[%s9977_s10 + $0x60] ss:$16 sps:$4 sm:$0xff]  }
 0xb74   : > { %v9575_v21 = vpop.f32.mrf.mxu1 }
 0xb76   : > { %v9577_v45 = vpop.f32.mrf.mxu1  ;;  %5405 = vmatpush2.bf16.msra.mxu0 %v5082_v55 }
 0xb77   : > { %5406 = vmatprep.subr.bf16.mxu0 %v5081_v0 }
 0xb78   : > { %v9581_v9 = vpop.f32.mrf.mxu1 }
 0xb7a   : > { %v9585_v24 = vpop.f32.mrf.mxu1  ;;  %5407 = vmatpush2.bf16.msra.mxu0 %v5080_v59 }
 0xb7b   : > { %5408 = vmatprep.subr.bf16.mxu0 %v9475_v47  ;;  %v5947_v47 = vld [vmem:[%s9977_s10 + $0x24] ss:$16 sps:$4 sm:$0xff]  }
 0xb7c   : > { %v9588_v28 = vpop.f32.mrf.mxu1 }
 0xb7e   : > { %v9592_v6 = vpop.f32.mrf.mxu1  ;;  %5409 = vmatpush2.bf16.msra.mxu0 %v9469_v41 }
 0xb7f   : > { %5410 = vmatprep.subr.bf16.mxu0 %v9451_v12  ;;  %v9613_v12 = vpop.permute.xlu1 %4332 }
 0xb80   : > { %v9598_v13 = vpop.f32.mrf.mxu1 }
 0xb82   : > { %v9603_v1 = vpop.f32.mrf.mxu1  ;;  %5411 = vmatpush2.bf16.msra.mxu0 %v9445_v30  ;;  %v9620_v30 = vpop.permute.xlu0 %4317 }
 0xb83   : > { %v9625_v37 = vpop.permute.xlu1 %4322 }
 0xb84   : > { %v9611_v41 = vpop.f32.mrf.mxu1 }
 0xb85   : > { %5413 = vmatmul.mubr.bf16.vlgmr.msra.gmra.mxu0 %v5942_v2 }
 0xb86   : > { %v4787_v49 = vpop.f32.mrf.mxu1  ;;  %5422 = vmatprep.mubr.bf16.mxu0 %v5947_v47  ;;  %v9627_v23 = vpop.permute.xlu0 %4307 }
 0xb87   : > { %10454 = vst [vmem:[#allocation18_spill] sm:$0xff] %v9627_v23  ;;  %v9632_v5 = vpop.permute.xlu1 %4312 }
 0xb88   : > { %v9615_v32 = vpop.f32.mrf.mxu1  ;;  %10455 = vst [vmem:[#allocation21_spill] sm:$0xff] %v9632_v5 }
 0xb8a   : > { %v4793_v33 = vpop.f32.mrf.mxu1  ;;  %v9637_v44 = vpop.permute.xlu0 %4297 }
 0xb8b   : > { %10456 = vst [vmem:[#allocation19_spill] sm:$0xff] %v9637_v44  ;;  %v9639_v18 = vpop.permute.xlu1 %4302 }
 0xb8c   : > { %v4795_v34 = vpop.f32.mrf.mxu1  ;;  %10457 = vst [vmem:[#allocation16_spill] sm:$0xff] %v9639_v18 }
 0xb8d   : > { %5423 = vmatmul.mubr.bf16.gmra.mxu0 %v5945_v29 }
 0xb8e   : > { %v4797_v46 = vpop.f32.mrf.mxu1  ;;  %5432 = vmatprep.mubr.bf16.mxu0 %v5950_v62  ;;  %v9647_v54 = vpop.permute.xlu0 %4287 }
 0xb8f   : > { %v9652_v48 = vpop.permute.xlu1 %4292 }
 0xb90   : > { %v4801_v52 = vpop.f32.mrf.mxu1 }
 0xb92   : > { %v4803_v56 = vpop.f32.mrf.mxu1 }
 0xb93   : > { %v4804_v47 = vadd.f32 %v4803_v56, %v9492_v43 }
 0xb94   : > { %v4805_v50 = vpop.f32.mrf.mxu1 }
 0xb95   : > { %5433 = vmatmul.mubr.bf16.gmra.mxu0 %v5948_v42  ;;  %v4806_v62 = vadd.f32 %v4805_v50, %v9498_v19  ;;  %v4989_v50 = vmax.f32 %v4804_v47, 0.0 }
 0xb96   : > { %v4807_v61 = vpop.f32.mrf.mxu1  ;;  %5442 = vmatprep.mubr.bf16.mxu0 %v5953_v39 }
 0xb97   : > { %v4808_v25 = vadd.f32 %v4807_v61, %v9498_v19  ;;  %v4798_v61 = vadd.f32 %v4797_v46, %v9507_v4  ;;  %v4794_v19 = vadd.f32 %v4793_v33, %v9503_v22  ;;  %v4778_v33 = vadd.f32 %v9592_v6, %v9515_v3 }
 0xb98   : > { %v4811_v20 = vpop.f32.mrf.mxu1 }
 0xb99   : > { %v4812_v59 = vadd.f32 %v4811_v20, %v9481_v31  ;;  %v4802_v20 = vadd.f32 %v4801_v52, %v9492_v43  ;;  %v4987_v43 = vmax.f32 %v4798_v61, 0.0 }
 0xb9a   : > { %v4813_v11 = vpop.f32.mrf.mxu1 }
 0xb9b   : > { %v4814_v55 = vadd.f32 %v4813_v11, %v9481_v31  ;;  %v4991_v11 = vmax.f32 %v4808_v25, 0.0  ;;  %v4278_v31 = vpop.permute.xlu0 %4277  ;;  %v4988_v47 = vmax.f32 %v4802_v20, 0.0 }
 0xb9c   : > { %v4815_v57 = vpop.f32.mrf.mxu1 }
 0xb9d   : > { %v4816_v0 = vadd.f32 %v4815_v57, %v9485_v53  ;;  %5443 = vmatmul.mubr.bf16.gmra.mxu0 %v5951_v10  ;;  %v4993_v44 = vmax.f32 %v4814_v55, 0.0  ;;  %v5954_v10 = vld [vmem:[%s9977_s10 + $0x80] ss:$16 sps:$4 sm:$0xff]   ;;  %v4283_v55 = vpop.permute.xlu1 %4282  ;;  %v5105_v52 = vpack.c.bf16 %v4991_v11, %v4989_v50 }
 0xb9e   : > { %v4817_v2 = vpop.f32.mrf.mxu1  ;;  %5452 = vmatprep.mubr.bf16.mxu0 %v5956_v38  ;;  %v4992_v38 = vmax.f32 %v4812_v59, 0.0 }
 0xb9f   : > { %v4818_v29 = vadd.f32 %v4817_v2, %v9485_v53  ;;  %v4994_v42 = vmax.f32 %v4816_v0, 0.0  ;;  %v5959_v53 = vld [vmem:[%s9977_s10 + $0xa4] ss:$16 sps:$4 sm:$0xff]   ;;  %v4788_v0 = vadd.f32 %v4787_v49, %v9511_v14  ;;  %v4796_v2 = vadd.f32 %v4795_v34, %v9507_v4 }
 0xba0   : > { %v4821_v39 = vpop.f32.mrf.mxu1  ;;  %v4792_v49 = vadd.f32 %v9615_v32, %v9503_v22  ;;  %v4985_v34 = vmax.f32 %v4794_v19, 0.0  ;;  %v5957_v32 = vld [vmem:[%s9977_s10 + $0xa0] ss:$16 sps:$4 sm:$0xff]   ;;  %v4768_v19 = vadd.f32 %v9577_v45, %v9519_v60 }
 0xba1   : > { %v4995_v57 = vmax.f32 %v4818_v29, 0.0  ;;  %v4822_v25 = vadd.f32 %v4821_v39, %v4278_v31  ;;  %v4990_v29 = vmax.f32 %v4806_v62, 0.0  ;;  %v5106_v18 = vpack.c.bf16 %v4994_v42, %v4992_v38 }
 0xba2   : > { %v4823_v56 = vpop.f32.mrf.mxu1  ;;  %v4983_v61 = vmax.f32 %v4788_v0, 0.0  ;;  %v4986_v6 = vmax.f32 %v4796_v2, 0.0  ;;  %v10458_v2 = vld [vmem:[#allocation20_spill] sm:$0xff] }
 0xba3   : > { %v5107_v46 = vpack.c.bf16 %v4995_v57, %v4993_v44  ;;  %v4824_v59 = vadd.f32 %v4823_v56, %v4278_v31  ;;  %v4784_v44 = vadd.f32 %v9603_v1, %v9509_v63  ;;  %v4996_v62 = vmax.f32 %v4822_v25, 0.0 }
 0xba4   : > { %v4825_v23 = vpop.f32.mrf.mxu1  ;;  %v5104_v11 = vpack.c.bf16 %v4990_v29, %v4988_v47  ;;  %v5103_v1 = vpack.c.bf16 %v4987_v43, %v4985_v34  ;;  %v4979_v25 = vmax.f32 %v4778_v33, 0.0  ;;  %v4764_v29 = vadd.f32 %v9571_v26, %v10458_v2 }
 0xba5   : > { %v4826_v5 = vadd.f32 %v4825_v23, %v4283_v55  ;;  %5453 = vmatmul.mubr.bf16.gmra.mxu0 %v5954_v10  ;;  %5493 = vmatprep.subr.bf16.mxu0 %v5107_v46  ;;  %v4786_v23 = vadd.f32 %v9611_v41, %v9511_v14  ;;  %v4997_v10 = vmax.f32 %v4824_v59, 0.0  ;;  %v5962_v14 = vld [vmem:[%s9977_s10 + $0xc4] ss:$16 sps:$4 sm:$0xff]   ;;  %v4774_v41 = vadd.f32 %v9585_v24, %v9513_v51 }
 0xba6   : > { %v4827_v4 = vpop.f32.mrf.mxu1  ;;  %5494 = vmatpush1.bf16.msra.mxu0 %v5106_v18  ;;  %5462 = vmatprep.mubr.bf16.mxu0 %v5959_v53  ;;  %v4984_v18 = vmax.f32 %v4792_v49, 0.0  ;;  %v4981_v38 = vmax.f32 %v4784_v44, 0.0  ;;  %v4772_v43 = vadd.f32 %v9581_v9, %v9513_v51  ;;  %v4975_v44 = vmax.f32 %v4768_v19, 0.0 }
 0xba7   : > { %v4998_v42 = vmax.f32 %v4826_v5, 0.0  ;;  %v4828_v39 = vadd.f32 %v4827_v4, %v4283_v55  ;;  %5495 = vmatprep.subr.bf16.mxu0 %v5105_v52  ;;  %v4782_v5 = vadd.f32 %v9598_v13, %v9509_v63  ;;  %v4776_v63 = vadd.f32 %v9588_v28, %v9515_v3 }
 0xba8   : > { %v4831_v57 = vpop.f32.mrf.mxu1  ;;  %v4982_v13 = vmax.f32 %v4786_v23, 0.0  ;;  %v5102_v50 = vpack.c.bf16 %v4986_v6, %v4984_v18  ;;  %v5101_v55 = vpack.c.bf16 %v4983_v61, %v4981_v38  ;;  %v4977_v3 = vmax.f32 %v4774_v41, 0.0  ;;  %v5968_v18 = vld [vmem:[%s9977_s10 + $0xc] ss:$16 sps:$4 sm:$0xff]  }
 0xba9   : > { %v9677_v31 = vpack.c.bf16 %v4998_v42, %v4996_v62  ;;  %v4999_v22 = vmax.f32 %v4828_v39, 0.0  ;;  %v4832_v53 = vadd.f32 %v4831_v57, %v9647_v54  ;;  %v4980_v45 = vmax.f32 %v4782_v5, 0.0  ;;  %v5960_v62 = vld [vmem:[%s9977_s10 + $0xc0] ss:$16 sps:$4 sm:$0xff]  }
 0xbaa   : > { %v4833_v20 = vpop.f32.mrf.mxu1  ;;  %5496 = vmatpush1.bf16.msra.mxu0 %v5104_v11  ;;  %v4978_v49 = vmax.f32 %v4776_v63, 0.0  ;;  %v5099_v4 = vpack.c.bf16 %v4979_v25, %v4977_v3  ;;  %v4976_v42 = vmax.f32 %v4772_v43, 0.0 }
 0xbab   : > { %v9689_v56 = vpack.c.bf16 %v4999_v22, %v4997_v10  ;;  %5497 = vmatprep.subr.bf16.mxu0 %v5103_v1  ;;  %v4834_v0 = vadd.f32 %v4833_v20, %v9647_v54  ;;  %v5000_v28 = vmax.f32 %v4832_v53, 0.0  ;;  %v4766_v54 = vadd.f32 %v9575_v21, %v9519_v60  ;;  %v5965_v60 = vld [vmem:[%s9977_s10 + $0xe4] ss:$16 sps:$4 sm:$0xff]  }
 0xbac   : > { %v4835_v46 = vpop.f32.mrf.mxu1  ;;  %v5100_v47 = vpack.c.bf16 %v4982_v13, %v4980_v45  ;;  %v4973_v21 = vmax.f32 %v4764_v29, 0.0  ;;  %v5098_v6 = vpack.c.bf16 %v4978_v49, %v4976_v42 }
 0xbad   : > { %v4836_v24 = vadd.f32 %v4835_v46, %v9652_v48  ;;  %5463 = vmatmul.mubr.bf16.gmra.mxu0 %v5957_v32  ;;  %v5001_v51 = vmax.f32 %v4834_v0, 0.0  ;;  %v4974_v61 = vmax.f32 %v4766_v54, 0.0  ;;  %v5963_v32 = vld [vmem:[%s9977_s10 + $0xe0] ss:$16 sps:$4 sm:$0xff]  }
 0xbae   : > { %v4837_v52 = vpop.f32.mrf.mxu1  ;;  %5498 = vmatpush1.bf16.msra.mxu0 %v5102_v50  ;;  %5472 = vmatprep.mubr.bf16.mxu0 %v5962_v14  ;;  %v5097_v57 = vpack.c.bf16 %v4975_v44, %v4973_v21 }
 0xbaf   : > { %v5002_v59 = vmax.f32 %v4836_v24, 0.0  ;;  %v4838_v33 = vadd.f32 %v4837_v52, %v9652_v48  ;;  %5499 = vmatprep.subr.bf16.mxu0 %v5101_v55  ;;  %v4762_v48 = vadd.f32 %v9565_v15, %v10458_v2 }
 0xbb0   : > { %v9705_v26 = vpop.f32.mrf.mxu1 }
 0xbb1   : > { %v9707_v9 = vpack.c.bf16 %v5002_v59, %v5000_v28  ;;  %v5003_v34 = vmax.f32 %v4838_v33, 0.0  ;;  %v4972_v1 = vmax.f32 %v4762_v48, 0.0 }
 0xbb2   : > { %v9714_v39 = vpop.f32.mrf.mxu1  ;;  %5500 = vmatpush1.bf16.msra.mxu0 %v5100_v47 }
 0xbb3   : > { %v9719_v23 = vpack.c.bf16 %v5003_v34, %v5001_v51  ;;  %5501 = vmatprep.subr.bf16.mxu0 %v5099_v4  ;;  %v5096_v10 = vpack.c.bf16 %v4974_v61, %v4972_v1 }
 0xbb4   : > { %v9721_v11 = vpop.f32.mrf.mxu1 }
 0xbb5   : > { %5473 = vmatmul.mubr.bf16.gmra.mxu0 %v5960_v62 }
 0xbb6   : > { %v9723_v15 = vpop.f32.mrf.mxu1  ;;  %5502 = vmatpush1.bf16.msra.mxu0 %v5098_v6  ;;  %5482 = vmatprep.mubr.bf16.mxu0 %v5965_v60 }
 0xbb7   : > { %5503 = vmatprep.subr.bf16.mxu0 %v5097_v57 }
 0xbb8   : > { %v9725_v22 = vpop.f32.mrf.mxu1 }
 0xbba   : > { %v9730_v5 = vpop.f32.mrf.mxu1  ;;  %5504 = vmatpush1.bf16.msra.mxu0 %v5096_v10 }
 0xbbb   : > { %5505 = vmatprep.subr.bf16.mxu0 %v9573_v17 }
 0xbbc   : > { %v9736_v20 = vpop.f32.mrf.mxu1 }
 0xbbd   : > { %5483 = vmatmul.mubr.bf16.gmra.mxu0 %v5963_v32 }
 0xbbe   : > { %v4857_v14 = vpop.f32.mrf.mxu1  ;;  %5506 = vmatpush1.bf16.msra.mxu0 %v9567_v58  ;;  %5525 = vmatprep.mubr.bf16.mxu0 %v5968_v18 }
 0xbbf   : > { %5507 = vmatprep.subr.bf16.mxu0 %v9549_v40 }
 0xbc0   : > { %v4861_v41 = vpop.f32.mrf.mxu1 }
 0xbc2   : > { %v4863_v38 = vpop.f32.mrf.mxu1  ;;  %5508 = vmatpush1.bf16.msra.mxu0 %v9543_v35 }
 0xbc4   : > { %v4865_v53 = vpop.f32.mrf.mxu1 }
 0xbc5   : > { %v4866_v57 = vadd.f32 %v4865_v53, %v9625_v37  ;;  %v10461_v53 = vld [vmem:[#allocation16_spill] sm:$0xff] }
 0xbc6   : > { %v4867_v19 = vpop.f32.mrf.mxu1 }
 0xbc8   : > { %v4871_v63 = vpop.f32.mrf.mxu1 }
 0xbc9   : > { %v4872_v21 = vadd.f32 %v4871_v63, %v9609_v7 }
 0xbca   : > { %v4873_v13 = vpop.f32.mrf.mxu1 }
 0xbcb   : > { %v4874_v51 = vadd.f32 %v4873_v13, %v9609_v7 }
 0xbcc   : > { %v4875_v50 = vpop.f32.mrf.mxu1 }
 0xbcd   : > { %v4876_v62 = vadd.f32 %v4875_v50, %v9613_v12  ;;  %v5017_v6 = vmax.f32 %v4874_v51, 0.0  ;;  %v5016_v50 = vmax.f32 %v4872_v21, 0.0  ;;  %v5987_v51 = vld [vmem:[%s9977_s10 + $0xe8] ss:$16 sps:$4 sm:$0xff]  }
 0xbce   : > { %v4877_v46 = vpop.f32.mrf.mxu1 }
 0xbcf   : > { %v4878_v33 = vadd.f32 %v4877_v46, %v9613_v12  ;;  %v5018_v1 = vmax.f32 %v4876_v62, 0.0  ;;  %v10459_v12 = vld [vmem:[#allocation21_spill] sm:$0xff]  ;;  %v10460_v46 = vld [vmem:[#allocation18_spill] sm:$0xff] }
 0xbd0   : > { %v4881_v17 = vpop.f32.mrf.mxu1  ;;  %v4858_v32 = vadd.f32 %v4857_v14, %v10459_v12  ;;  %v4854_v7 = vadd.f32 %v9730_v5, %v10460_v46 }
 0xbd1   : > { %v4882_v47 = vadd.f32 %v4881_v17, %v9590_v27  ;;  %v5014_v17 = vmax.f32 %v4866_v57, 0.0 }
 0xbd2   : > { %v4883_v25 = vpop.f32.mrf.mxu1  ;;  %v5011_v14 = vmax.f32 %v4858_v32, 0.0 }
 0xbd3   : > { %v4884_v52 = vadd.f32 %v4883_v25, %v9590_v27  ;;  %v5020_v61 = vmax.f32 %v4882_v47, 0.0  ;;  %v4864_v27 = vadd.f32 %v4863_v38, %v9620_v30  ;;  %v4856_v38 = vadd.f32 %v9736_v20, %v10459_v12  ;;  %v5984_v47 = vld [vmem:[%s9977_s10 + $0xc8] ss:$16 sps:$4 sm:$0xff]  }
 0xbd4   : > { %v4885_v55 = vpop.f32.mrf.mxu1  ;;  %v4848_v25 = vadd.f32 %v9723_v15, %v10461_v53  ;;  %v4846_v20 = vadd.f32 %v9721_v11, %v10461_v53  ;;  %v5971_v11 = vld [vmem:[%s9977_s10 + $0x2c] ss:$16 sps:$4 sm:$0xff]  }
 0xbd5   : > { %v4886_v28 = vadd.f32 %v4885_v55, %v9596_v8  ;;  %v5021_v34 = vmax.f32 %v4884_v52, 0.0  ;;  %v5013_v63 = vmax.f32 %v4864_v27, 0.0 }
 0xbd6   : > { %v4887_v0 = vpop.f32.mrf.mxu1 }
 0xbd7   : > { %v4888_v29 = vadd.f32 %v4887_v0, %v9596_v8  ;;  %v5022_v48 = vmax.f32 %v4886_v28, 0.0  ;;  %v5019_v8 = vmax.f32 %v4878_v33, 0.0  ;;  %v10462_v0 = vld [vmem:[#allocation19_spill] sm:$0xff] }
 0xbd8   : > { %v4891_v24 = vpop.f32.mrf.mxu1  ;;  %v4844_v5 = vadd.f32 %v9714_v39, %v10462_v0  ;;  %v4842_v15 = vadd.f32 %v9705_v26, %v10462_v0  ;;  %v5966_v26 = vld [vmem:[%s9977_s10 + $0x8] ss:$16 sps:$4 sm:$0xff]  }
 0xbd9   : > { %v4892_v35 = vadd.f32 %v4891_v24, %v9579_v36  ;;  %v5023_v54 = vmax.f32 %v4888_v29, 0.0  ;;  %v5120_v10 = vpack.c.bf16 %v5022_v48, %v5020_v61  ;;  %v5119_v13 = vpack.c.bf16 %v5019_v8, %v5017_v6  ;;  %v5975_v28 = vld [vmem:[%s9977_s10 + $0x68] ss:$16 sps:$4 sm:$0xff]  }
 0xbda   : > { %v4893_v2 = vpop.f32.mrf.mxu1  ;;  %v5009_v24 = vmax.f32 %v4854_v7, 0.0  ;;  %v5007_v29 = vmax.f32 %v4848_v25, 0.0  ;;  %v5004_v39 = vmax.f32 %v4842_v15, 0.0  ;;  %v5978_v33 = vld [vmem:[%s9977_s10 + $0x88] ss:$16 sps:$4 sm:$0xff]  }
 0xbdb   : > { %v4894_v40 = vadd.f32 %v4893_v2, %v9579_v36  ;;  %v5024_v4 = vmax.f32 %v4892_v35, 0.0  ;;  %v5121_v60 = vpack.c.bf16 %v5023_v54, %v5021_v34  ;;  %v5010_v2 = vmax.f32 %v4856_v38, 0.0  ;;  %v5983_v54 = vld [vmem:[%s9977_s10 + $0xac] ss:$16 sps:$4 sm:$0xff]  }
 0xbdc   : > { %v4895_v58 = vpop.f32.mrf.mxu1  ;;  %v5006_v35 = vmax.f32 %v4846_v20, 0.0 }
 0xbdd   : > { %v4896_v43 = vadd.f32 %v4895_v58, %v9583_v16  ;;  %v5025_v44 = vmax.f32 %v4894_v40, 0.0  ;;  %v5115_v40 = vpack.c.bf16 %v5011_v14, %v5009_v24 }
 0xbde   : > { %v4897_v45 = vpop.f32.mrf.mxu1 }
 0xbdf   : > { %v4898_v3 = vadd.f32 %v4897_v45, %v9583_v16  ;;  %v5026_v59 = vmax.f32 %v4896_v43, 0.0  ;;  %v4868_v16 = vadd.f32 %v4867_v19, %v9625_v37  ;;  %v4862_v19 = vadd.f32 %v4861_v41, %v9620_v30 }
 0xbe0   : > { %v5118_v37 = vpack.c.bf16 %v5018_v1, %v5016_v50  ;;  %v4852_v30 = vadd.f32 %v9725_v22, %v10460_v46  ;;  %v5005_v22 = vmax.f32 %v4844_v5, 0.0 }
 0xbe1   : > { %v5027_v49 = vmax.f32 %v4898_v3, 0.0  ;;  %v5122_v42 = vpack.c.bf16 %v5026_v59, %v5024_v4  ;;  %v5015_v18 = vmax.f32 %v4868_v16, 0.0  ;;  %v5012_v41 = vmax.f32 %v4862_v19, 0.0  ;;  %v5980_v59 = vld [vmem:[%s9977_s10 + $0x8c] ss:$16 sps:$4 sm:$0xff]  }
 0xbe2   : > { %v5008_v43 = vmax.f32 %v4852_v30, 0.0  ;;  %v5113_v52 = vpack.c.bf16 %v5007_v29, %v5005_v22  ;;  %v5112_v3 = vpack.c.bf16 %v5006_v35, %v5004_v39  ;;  %v5989_v4 = vld [vmem:[%s9977_s10 + $0xec] ss:$16 sps:$4 sm:$0xff]   ;;  %v5143_v30 = vpop.permute.xlu0 %5142 }
 0xbe3   : > { %v5123_v36 = vpack.c.bf16 %v5027_v49, %v5025_v44  ;;  %v5117_v55 = vpack.c.bf16 %v5015_v18, %v5013_v63  ;;  %v5116_v58 = vpack.c.bf16 %v5014_v17, %v5012_v41  ;;  %v5981_v44 = vld [vmem:[%s9977_s10 + $0xa8] ss:$16 sps:$4 sm:$0xff]   ;;  %v5986_v49 = vld [vmem:[%s9977_s10 + $0xcc] ss:$16 sps:$4 sm:$0xff]  }
 0xbe4   : > { %v5114_v45 = vpack.c.bf16 %v5010_v2, %v5008_v43  ;;  %v5148_v2 = vpop.permute.xlu1 %5147 }
 0xbe5   : > { %5509 = vmatprep.subr.bf16.mxu0 %v5123_v36 }
 0xbe6   : > { %5510 = vmatpush2.bf16.msra.mxu0 %v5122_v42 }
 0xbe7   : > { %5511 = vmatprep.subr.bf16.mxu0 %v5121_v60 }
 0xbea   : > { %5512 = vmatpush2.bf16.msra.mxu0 %v5120_v10 }
 0xbeb   : > { %5513 = vmatprep.subr.bf16.mxu0 %v5119_v13 }
 0xbee   : > { %5514 = vmatpush2.bf16.msra.mxu0 %v5118_v37 }
 0xbef   : > { %5515 = vmatprep.subr.bf16.mxu0 %v5117_v55 }
 0xbf2   : > { %5516 = vmatpush2.bf16.msra.mxu0 %v5116_v58 }
 0xbf3   : > { %5517 = vmatprep.subr.bf16.mxu0 %v5115_v40  ;;  %v10463_v40 = vld [vmem:[#allocation41_spill] sm:$0xff] }
 0xbf6   : > { %5518 = vmatpush2.bf16.msra.mxu0 %v5114_v45  ;;  %v10464_v45 = vld [vmem:[#allocation36_spill] sm:$0xff] }
 0xbf7   : > { %5519 = vmatprep.subr.bf16.mxu0 %v5113_v52 }
 0xbfa   : > { %5520 = vmatpush2.bf16.msra.mxu0 %v5112_v3  ;;  %v5153_v3 = vpop.permute.xlu0 %5152 }
 0xbfb   : > { %5521 = vmatprep.subr.bf16.mxu0 %v9719_v23  ;;  %v5969_v23 = vld [vmem:[%s9977_s10 + $0x28] ss:$16 sps:$4 sm:$0xff]  }
 0xbfe   : > { %5522 = vmatpush2.bf16.msra.mxu0 %v9707_v9  ;;  %v5977_v9 = vld [vmem:[%s9977_s10 + $0x6c] ss:$16 sps:$4 sm:$0xff]  }
 0xbff   : > { %5523 = vmatprep.subr.bf16.mxu0 %v9689_v56  ;;  %v5974_v56 = vld [vmem:[%s9977_s10 + $0x4c] ss:$16 sps:$4 sm:$0xff]  }
 0xc02   : > { %5524 = vmatpush2.bf16.msra.mxu0 %v9677_v31  ;;  %v5972_v31 = vld [vmem:[%s9977_s10 + $0x48] ss:$16 sps:$4 sm:$0xff]  }
 0xc05   : > { %5526 = vmatmul.mubr.bf16.vlgmr.msra.gmra.mxu0 %v5966_v26 }
 0xc06   : > { %5535 = vmatprep.mubr.bf16.mxu0 %v5971_v11 }
 0xc0d   : > { %5536 = vmatmul.mubr.bf16.gmra.mxu0 %v5969_v23  ;;  %v10465_v23 = vld [vmem:[#allocation45_spill] sm:$0xff] }
 0xc0e   : > { %5545 = vmatprep.mubr.bf16.mxu0 %v5974_v56 }
 0xc15   : > { %5546 = vmatmul.mubr.bf16.gmra.mxu0 %v5972_v31 }
 0xc16   : > { %5555 = vmatprep.mubr.bf16.mxu0 %v5977_v9 }
 0xc1d   : > { %5556 = vmatmul.mubr.bf16.gmra.mxu0 %v5975_v28 }
 0xc1e   : > { %5565 = vmatprep.mubr.bf16.mxu0 %v5980_v59  ;;  %v10466_v59 = vld [vmem:[#allocation39_spill] sm:$0xff] }
 0xc25   : > { %5566 = vmatmul.mubr.bf16.gmra.mxu0 %v5978_v33 }
 0xc26   : > { %5575 = vmatprep.mubr.bf16.mxu0 %v5983_v54 }
 0xc2d   : > { %5576 = vmatmul.mubr.bf16.gmra.mxu0 %v5981_v44  ;;  %v5158_v44 = vpop.permute.xlu1 %5157 }
 0xc2e   : > { %5585 = vmatprep.mubr.bf16.mxu0 %v5986_v49 }
 0xc35   : > { %5586 = vmatmul.mubr.bf16.gmra.mxu0 %v5984_v47 }
 0xc36   : > { %5595 = vmatprep.mubr.bf16.mxu0 %v5989_v4  ;;  %v10467_v4 = vld [vmem:[#allocation65_spill] sm:$0xff] }
 0xc3d   : > { %5596 = vmatmul.mubr.bf16.gmra.mxu0 %v5987_v51 }
 0xc45   : > { %v5414_v34 = vpop.f32.mrf.mxu0 }
 0xc46   : > { %v5415_v0 = vadd.f32 %v5414_v34, %v5143_v30 }
 0xc47   : > { %v5416_v36 = vpop.f32.mrf.mxu0 }
 0xc48   : > { %v5417_v24 = vadd.f32 %v5416_v36, %v5143_v30  ;;  %v5163_v30 = vpop.permute.xlu0 %5162 }
 0xc49   : > { %v5418_v62 = vpop.f32.mrf.mxu0 }
 0xc4a   : > { %v5419_v29 = vadd.f32 %v5418_v62, %v5148_v2 }
 0xc4b   : > { %v5420_v48 = vpop.f32.mrf.mxu0 }
 0xc4c   : > { %v5421_v35 = vadd.f32 %v5420_v48, %v5148_v2  ;;  %v10468_v48 = vld [vmem:[#allocation61_spill] sm:$0xff] }
 0xc4d   : > { %v5424_v42 = vpop.f32.mrf.mxu0 }
 0xc4e   : > { %v5425_v11 = vadd.f32 %v5424_v42, %v5153_v3 }
 0xc4f   : > { %v5426_v16 = vpop.f32.mrf.mxu0 }
 0xc50   : > { %v5427_v28 = vadd.f32 %v5426_v16, %v5153_v3  ;;  %v10472_v3 = vld [vmem:[#allocation43_spill] sm:$0xff] }
 0xc51   : > { %v5428_v8 = vpop.f32.mrf.mxu0 }
 0xc52   : > { %v5429_v47 = vadd.f32 %v5428_v8, %v5158_v44 }
 0xc53   : > { %v5430_v60 = vpop.f32.mrf.mxu0 }
 0xc54   : > { %v5431_v62 = vadd.f32 %v5430_v60, %v5158_v44 }
 0xc55   : > { %v9821_v21 = vpop.f32.mrf.mxu0 }
 0xc57   : > { %v9823_v61 = vpop.f32.mrf.mxu0 }
 0xc59   : > { %v9825_v27 = vpop.f32.mrf.mxu0 }
 0xc5b   : > { %v9827_v6 = vpop.f32.mrf.mxu0 }
 0xc5d   : > { %v9829_v57 = vpop.f32.mrf.mxu0 }
 0xc5f   : > { %v9831_v1 = vpop.f32.mrf.mxu0 }
 0xc61   : > { %v9833_v10 = vpop.f32.mrf.mxu0 }
 0xc63   : > { %v9835_v12 = vpop.f32.mrf.mxu0 }
 0xc65   : > { %v9837_v32 = vpop.f32.mrf.mxu0 }
 0xc67   : > { %v9839_v18 = vpop.f32.mrf.mxu0 }
 0xc69   : > { %v9841_v13 = vpop.f32.mrf.mxu0 }
 0xc6b   : > { %v9843_v19 = vpop.f32.mrf.mxu0 }
 0xc6d   : > { %v9845_v50 = vpop.f32.mrf.mxu0 }
 0xc6f   : > { %v9847_v46 = vpop.f32.mrf.mxu0 }
 0xc71   : > { %v9849_v7 = vpop.f32.mrf.mxu0 }
 0xc73   : > { %v9851_v63 = vpop.f32.mrf.mxu0 }
 0xc75   : > { %v9853_v38 = vpop.f32.mrf.mxu0 }
 0xc77   : > { %v9855_v17 = vpop.f32.mrf.mxu0 }
 0xc79   : > { %v9857_v37 = vpop.f32.mrf.mxu0 }
 0xc7b   : > { %v9859_v53 = vpop.f32.mrf.mxu0 }
 0xc7d   : > { %v9861_v25 = vpop.f32.mrf.mxu0 }
 0xc7f   : > { %v9863_v14 = vpop.f32.mrf.mxu0 }
 0xc81   : > { %v9865_v55 = vpop.f32.mrf.mxu0 }
 0xc83   : > { %v9867_v41 = vpop.f32.mrf.mxu0 }
 0xcc5   : > { %v5527_v5 = vpop.f32.mrf.mxu0 }
 0xcc6   : > { %v5528_v20 = vadd.f32 %v5527_v5, %v5415_v0  ;;  %v5435_v5 = vadd.f32 %v9821_v21, %v5163_v30 }
 0xcc7   : > { %v5529_v58 = vpop.f32.mrf.mxu0 }
 0xcc8   : > { %v5606_v15 = vadd.f32 %v5528_v20, %v10463_v40  ;;  %v5530_v43 = vadd.f32 %v5529_v58, %v5417_v24  ;;  %v10469_v24 = vld [vmem:[#allocation56_spill] sm:$0xff]  ;;  %v5437_v58 = vadd.f32 %v9823_v61, %v5163_v30 }
 0xcc9   : > { %v5531_v22 = vpop.f32.mrf.mxu0 }
 0xcca   : > { %5638 = vst [vmem:[%s9874_s26] sm:$0xff] %v5606_v15  ;;  %v5607_v52 = vadd.f32 %v5530_v43, %v10464_v45  ;;  %v5532_v39 = vadd.f32 %v5531_v22, %v5419_v29  ;;  %v10470_v29 = vld [vmem:[#allocation38_spill] sm:$0xff]  ;;  %v5168_v15 = vpop.permute.xlu1 %5167 }
 0xccb   : > { %v5533_v26 = vpop.f32.mrf.mxu0  ;;  %v5439_v22 = vadd.f32 %v9825_v27, %v5168_v15 }
 0xccc   : > { %5639 = vst [vmem:[%s9874_s26 + $0x8] sm:$0xff] %v5607_v52  ;;  %v5608_v56 = vadd.f32 %v5532_v39, %v10465_v23  ;;  %v5534_v31 = vadd.f32 %v5533_v26, %v5421_v35  ;;  %v10471_v35 = vld [vmem:[#allocation46_spill] sm:$0xff]  ;;  %v5441_v39 = vadd.f32 %v9827_v6, %v5168_v15 }
 0xccd   : > { %v5537_v9 = vpop.f32.mrf.mxu0 }
 0xcce   : > { %5640 = vst [vmem:[%s9874_s26 + $0x10] sm:$0xff] %v5608_v56  ;;  %v5609_v33 = vadd.f32 %v5534_v31, %v10466_v59  ;;  %v5538_v54 = vadd.f32 %v5537_v9, %v5425_v11  ;;  %v5173_v11 = vpop.permute.xlu0 %5172  ;;  %v10473_v31 = vld [vmem:[#allocation47_spill] sm:$0xff]  ;;  %v5178_v44 = vpop.permute.xlu1 %5177 }
 0xccf   : > { %v5539_v49 = vpop.f32.mrf.mxu0  ;;  %v5445_v56 = vadd.f32 %v9829_v57, %v5173_v11  ;;  %v5447_v59 = vadd.f32 %v9831_v1, %v5173_v11 }
 0xcd0   : > { %5641 = vst [vmem:[%s9874_s26 + $0x18] sm:$0xff] %v5609_v33  ;;  %v5610_v51 = vadd.f32 %v5538_v54, %v10467_v4  ;;  %v5540_v34 = vadd.f32 %v5539_v49, %v5427_v28  ;;  %v10474_v33 = vld [vmem:[#allocation48_spill] sm:$0xff] }
 0xcd1   : > { %v5541_v36 = vpop.f32.mrf.mxu0  ;;  %v10475_v4 = vld [vmem:[#allocation40_spill] sm:$0xff] }
 0xcd2   : > { %5642 = vst [vmem:[%s9874_s26 + $0x20] sm:$0xff] %v5610_v51  ;;  %v5611_v42 = vadd.f32 %v5540_v34, %v10468_v48  ;;  %v5542_v16 = vadd.f32 %v5541_v36, %v5429_v47  ;;  %v5449_v47 = vadd.f32 %v9833_v10, %v5178_v44  ;;  %v5451_v36 = vadd.f32 %v9835_v12, %v5178_v44 }
 0xcd3   : > { %v5543_v0 = vpop.f32.mrf.mxu0 }
 0xcd4   : > { %5643 = vst [vmem:[%s9874_s26 + $0x28] sm:$0xff] %v5611_v42  ;;  %v5612_v8 = vadd.f32 %v5542_v16, %v10469_v24  ;;  %v5544_v20 = vadd.f32 %v5543_v0, %v5431_v62  ;;  %v10476_v62 = vld [vmem:[#allocation44_spill] sm:$0xff]  ;;  %v5183_v42 = vpop.permute.xlu0 %5182  ;;  %v10477_v0 = vld [vmem:[#allocation49_spill] sm:$0xff] }
 0xcd5   : > { %v5547_v2 = vpop.f32.mrf.mxu0  ;;  %v5455_v30 = vadd.f32 %v9837_v32, %v5183_v42 }
 0xcd6   : > { %5644 = vst [vmem:[%s9874_s26 + $0x30] sm:$0xff] %v5612_v8  ;;  %v5613_v60 = vadd.f32 %v5544_v20, %v10470_v29  ;;  %v5548_v40 = vadd.f32 %v5547_v2, %v5435_v5  ;;  %v5457_v8 = vadd.f32 %v9839_v18, %v5183_v42  ;;  %v10478_v20 = vld [vmem:[#allocation62_spill] sm:$0xff] }
 0xcd7   : > { %v5549_v43 = vpop.f32.mrf.mxu0 }
 0xcd8   : > { %5645 = vst [vmem:[%s9874_s26 + $0x38] sm:$0xff] %v5613_v60  ;;  %v5614_v21 = vadd.f32 %v5548_v40, %v10471_v35  ;;  %v5550_v45 = vadd.f32 %v5549_v43, %v5437_v58  ;;  %v5188_v58 = vpop.permute.xlu1 %5187  ;;  %v10479_v40 = vld [vmem:[#allocation37_spill] sm:$0xff]  ;;  %v10480_v35 = vld [vmem:[#allocation35_spill] sm:$0xff] }
 0xcd9   : > { %v5551_v52 = vpop.f32.mrf.mxu0  ;;  %v5459_v60 = vadd.f32 %v9841_v13, %v5188_v58 }
 0xcda   : > { %5646 = vst [vmem:[%s9874_s26 + $0x40] sm:$0xff] %v5614_v21  ;;  %v5615_v61 = vadd.f32 %v5550_v45, %v10472_v3  ;;  %v5552_v26 = vadd.f32 %v5551_v52, %v5439_v22  ;;  %v5461_v22 = vadd.f32 %v9843_v19, %v5188_v58  ;;  %v5193_v45 = vpop.permute.xlu0 %5192  ;;  %v10481_v3 = vld [vmem:[#allocation58_spill] sm:$0xff]  ;;  %v10489_v58 = vld [vmem:[#allocation52_spill] sm:$0xff] }
 0xcdb   : > { %v5553_v23 = vpop.f32.mrf.mxu0  ;;  %v5467_v11 = vadd.f32 %v9847_v46, %v5193_v45 }
 0xcdc   : > { %5647 = vst [vmem:[%s9874_s26 + $0x48] sm:$0xff] %v5615_v61  ;;  %v5616_v27 = vadd.f32 %v5552_v26, %v10473_v31  ;;  %v5554_v9 = vadd.f32 %v5553_v23, %v5441_v39  ;;  %v5465_v39 = vadd.f32 %v9845_v50, %v5193_v45  ;;  %v10482_v23 = vld [vmem:[#allocation57_spill] sm:$0xff]  ;;  %v5198_v31 = vpop.permute.xlu1 %5197 }
 0xcdd   : > { %v5557_v28 = vpop.f32.mrf.mxu0 }
 0xcde   : > { %5648 = vst [vmem:[%s9874_s26 + $0x50] sm:$0xff] %v5616_v27  ;;  %v5617_v6 = vadd.f32 %v5554_v9, %v10474_v33  ;;  %v5558_v54 = vadd.f32 %v5557_v28, %v5445_v56  ;;  %v5469_v9 = vadd.f32 %v9849_v7, %v5198_v31  ;;  %v10483_v28 = vld [vmem:[#allocation34_spill] sm:$0xff] }
 0xcdf   : > { %v5559_v49 = vpop.f32.mrf.mxu0 }
 0xce0   : > { %5649 = vst [vmem:[%s9874_s26 + $0x58] sm:$0xff] %v5617_v6  ;;  %v5618_v57 = vadd.f32 %v5558_v54, %v10475_v4  ;;  %v5560_v51 = vadd.f32 %v5559_v49, %v5447_v59  ;;  %v5471_v6 = vadd.f32 %v9851_v63, %v5198_v31  ;;  %v10484_v54 = vld [vmem:[#allocation53_spill] sm:$0xff]  ;;  %v5203_v49 = vpop.permute.xlu0 %5202 }
 0xce1   : > { %v5561_v34 = vpop.f32.mrf.mxu0  ;;  %v5475_v4 = vadd.f32 %v9853_v38, %v5203_v49 }
 0xce2   : > { %5650 = vst [vmem:[%s9874_s26 + $0x60] sm:$0xff] %v5618_v57  ;;  %v5619_v1 = vadd.f32 %v5560_v51, %v10476_v62  ;;  %v5562_v48 = vadd.f32 %v5561_v34, %v5449_v47  ;;  %v10485_v57 = vld [vmem:[#allocation50_spill] sm:$0xff]  ;;  %v10486_v62 = vld [vmem:[#allocation60_spill] sm:$0xff] }
 0xce3   : > { %v5563_v16 = vpop.f32.mrf.mxu0 }
 0xce4   : > { %5651 = vst [vmem:[%s9874_s26 + $0x68] sm:$0xff] %v5619_v1  ;;  %v5620_v10 = vadd.f32 %v5562_v48, %v10477_v0  ;;  %v5564_v5 = vadd.f32 %v5563_v16, %v5451_v36  ;;  %v5477_v36 = vadd.f32 %v9855_v17, %v5203_v49  ;;  %v5208_v48 = vpop.permute.xlu1 %5207 }
 0xce5   : > { %v5567_v24 = vpop.f32.mrf.mxu0  ;;  %v5479_v16 = vadd.f32 %v9857_v37, %v5208_v48 }
 0xce6   : > { %5652 = vst [vmem:[%s9874_s26 + $0x70] sm:$0xff] %v5620_v10  ;;  %v5621_v12 = vadd.f32 %v5564_v5, %v10478_v20  ;;  %v5568_v2 = vadd.f32 %v5567_v24, %v5455_v30  ;;  %v10487_v30 = vld [vmem:[#allocation63_spill] sm:$0xff]  ;;  %v5481_v5 = vadd.f32 %v9859_v53, %v5208_v48  ;;  %v5213_v20 = vpop.permute.xlu0 %5212  ;;  %v10490_v53 = vld [vmem:[#allocation64_spill] sm:$0xff] }
 0xce7   : > { %v5569_v29 = vpop.f32.mrf.mxu0  ;;  %v10488_v24 = vld [vmem:[#allocation55_spill] sm:$0xff] }
 0xce8   : > { %5653 = vst [vmem:[%s9874_s26 + $0x78] sm:$0xff] %v5621_v12  ;;  %v5622_v32 = vadd.f32 %v5568_v2, %v10479_v40  ;;  %v5570_v15 = vadd.f32 %v5569_v29, %v5457_v8  ;;  %v5485_v2 = vadd.f32 %v9861_v25, %v5213_v20  ;;  %v5487_v40 = vadd.f32 %v9863_v14, %v5213_v20  ;;  %v10491_v25 = vld [vmem:[#allocation54_spill] sm:$0xff]  ;;  %v10492_v14 = vld [vmem:[#allocation51_spill] sm:$0xff] }
 0xce9   : > { %v5571_v43 = vpop.f32.mrf.mxu0 }
 0xcea   : > { %5654 = vst [vmem:[%s9874_s26 + $0x80] sm:$0xff] %v5622_v32  ;;  %v5623_v18 = vadd.f32 %v5570_v15, %v10480_v35  ;;  %v5572_v21 = vadd.f32 %v5571_v43, %v5459_v60  ;;  %v5218_v43 = vpop.permute.xlu1 %5217 }
 0xceb   : > { %v5573_v52 = vpop.f32.mrf.mxu0  ;;  %v5489_v35 = vadd.f32 %v9865_v55, %v5218_v43 }
 0xcec   : > { %5655 = vst [vmem:[%s9874_s26 + $0x88] sm:$0xff] %v5623_v18  ;;  %v5624_v13 = vadd.f32 %v5572_v21, %v10481_v3  ;;  %v5574_v61 = vadd.f32 %v5573_v52, %v5461_v22  ;;  %v5491_v52 = vadd.f32 %v9867_v41, %v5218_v43 }
 0xced   : > { %v5577_v26 = vpop.f32.mrf.mxu0 }
 0xcee   : > { %5656 = vst [vmem:[%s9874_s26 + $0x90] sm:$0xff] %v5624_v13  ;;  %v5625_v19 = vadd.f32 %v5574_v61, %v10482_v23  ;;  %v5578_v56 = vadd.f32 %v5577_v26, %v5465_v39  ;;  %v10493_v61 = vld [vmem:[#allocation59_spill] sm:$0xff]  ;;  %v10494_v23 = vld [vmem:[#allocation33_spill] sm:$0xff] }
 0xcef   : > { %v5579_v27 = vpop.f32.mrf.mxu0 }
 0xcf0   : > { %5657 = vst [vmem:[%s9874_s26 + $0x98] sm:$0xff] %v5625_v19  ;;  %v5626_v50 = vadd.f32 %v5578_v56, %v10483_v28  ;;  %v5580_v59 = vadd.f32 %v5579_v27, %v5467_v11 }
 0xcf1   : > { %v5581_v33 = vpop.f32.mrf.mxu0 }
 0xcf2   : > { %5658 = vst [vmem:[%s9874_s26 + $0xa0] sm:$0xff] %v5626_v50  ;;  %v5627_v46 = vadd.f32 %v5580_v59, %v10484_v54  ;;  %v5582_v44 = vadd.f32 %v5581_v33, %v5469_v9 }
 0xcf3   : > { %v5583_v47 = vpop.f32.mrf.mxu0 }
 0xcf4   : > { %5659 = vst [vmem:[%s9874_s26 + $0xa8] sm:$0xff] %v5627_v46  ;;  %v5628_v7 = vadd.f32 %v5582_v44, %v10485_v57  ;;  %v5584_v51 = vadd.f32 %v5583_v47, %v5471_v6 }
 0xcf5   : > { %v5587_v34 = vpop.f32.mrf.mxu0 }
 0xcf6   : > { %5660 = vst [vmem:[%s9874_s26 + $0xb0] sm:$0xff] %v5628_v7  ;;  %v5629_v63 = vadd.f32 %v5584_v51, %v10486_v62  ;;  %v5588_v1 = vadd.f32 %v5587_v34, %v5475_v4 }
 0xcf7   : > { %v5589_v42 = vpop.f32.mrf.mxu0 }
 0xcf8   : > { %5661 = vst [vmem:[%s9874_s26 + $0xb8] sm:$0xff] %v5629_v63  ;;  %v5630_v38 = vadd.f32 %v5588_v1, %v10487_v30  ;;  %v5590_v0 = vadd.f32 %v5589_v42, %v5477_v36 }
 0xcf9   : > { %v5591_v10 = vpop.f32.mrf.mxu0 }
 0xcfa   : > { %5662 = vst [vmem:[%s9874_s26 + $0xc0] sm:$0xff] %v5630_v38  ;;  %v5631_v17 = vadd.f32 %v5590_v0, %v10488_v24  ;;  %v5592_v8 = vadd.f32 %v5591_v10, %v5479_v16 }
 0xcfb   : > { %v5593_v12 = vpop.f32.mrf.mxu0 }
 0xcfc   : > { %5663 = vst [vmem:[%s9874_s26 + $0xc8] sm:$0xff] %v5631_v17  ;;  %v5632_v37 = vadd.f32 %v5592_v8, %v10489_v58  ;;  %v5594_v29 = vadd.f32 %v5593_v12, %v5481_v5 }
 0xcfd   : > { %v5597_v60 = vpop.f32.mrf.mxu0 }
 0xcfe   : > { %5664 = vst [vmem:[%s9874_s26 + $0xd0] sm:$0xff] %v5632_v37  ;;  %v5633_v32 = vadd.f32 %v5594_v29, %v10490_v53  ;;  %v5598_v15 = vadd.f32 %v5597_v60, %v5485_v2 }
 0xcff   : > { %v5599_v22 = vpop.f32.mrf.mxu0 }
 0xd00   : > { %5665 = vst [vmem:[%s9874_s26 + $0xd8] sm:$0xff] %v5633_v32  ;;  %v5634_v18 = vadd.f32 %v5598_v15, %v10491_v25  ;;  %v5600_v21 = vadd.f32 %v5599_v22, %v5487_v40 }
 0xd01   : > { %v5601_v45 = vpop.f32.mrf.mxu0 }
 0xd02   : > { %5666 = vst [vmem:[%s9874_s26 + $0xe0] sm:$0xff] %v5634_v18  ;;  %v5635_v39 = vadd.f32 %v5600_v21, %v10492_v14  ;;  %v5602_v3 = vadd.f32 %v5601_v45, %v5489_v35 }
 0xd03   : > { %v5603_v13 = vpop.f32.mrf.mxu0 }
 0xd04   : > { %5667 = vst [vmem:[%s9874_s26 + $0xe8] sm:$0xff] %v5635_v39  ;;  %v5636_v26 = vadd.f32 %v5602_v3, %v10493_v61  ;;  %v5604_v11 = vadd.f32 %v5603_v13, %v5491_v52 }
 0xd06   : > { %5668 = vst [vmem:[%s9874_s26 + $0xf0] sm:$0xff] %v5636_v26  ;;  %v5637_v19 = vadd.f32 %v5604_v11, %v10494_v23 }
 0xd08   : > { %5669 = vst [vmem:[%s9874_s26 + $0xf8] sm:$0xff] %v5637_v19 }
 0xd09 PF: > { %s22_s21 = sadd.s32 1, %s6384_s21  }
 0xd0a   : > { %p19_p4 = scmp.ge.s32.totalorder %s22_s21, 4  }
 0xd0c   :  { %21 = sbr.rel (!%p19_p4) target bundleno = 1 (0x1), region = 98 }

</bundles_post_ra>
